<compile_context>
chip_gen: v7x
topology: tpu7x:2x2x1
jax: 0.10.0
libtpu: 0.0.40
codegen_flags: <defaults>
</compile_context>

<pallas_src>
import jax
import jax.numpy as jnp
from jax import lax
from jax.experimental import pallas as pl
from jax.experimental.pallas import tpu as pltpu


# ------------------------------- Pallas kernel ---------------------------------
def _make_conv_bn_kernel(th, k2, wo, fused):
    """Kernel computing TH output rows of (stride-1 folded) conv + BN.

    refs: x (TH+k2-1, Ws, Cs), weights (k2*k2, Cs, Cout), BN scale/shift (1, Cout),
    optionally fused 1x1 weights (Cout, Cfin) + its BN scale/shift, output
    (TH, Wo, Cout-or-Cfin).
    """
    def kernel(*refs):
        x_ref = refs[0]
        if fused:
            w_ref, s_ref, b_ref, w2_ref, s2_ref, b2_ref, o_ref = refs[1:]
        else:
            w_ref, s_ref, b_ref, o_ref = refs[1:]

        c_out = w_ref.shape[-1]
        s = s_ref[...]
        b = b_ref[...]
        if fused:
            w2 = w2_ref[...]
            s2 = s2_ref[...]
            b2 = b2_ref[...]

        for r in range(th):                        # static, fully unrolled
            acc = jnp.zeros((wo, c_out), jnp.float32)
            for ah in range(k2):
                row = x_ref[ah + r]                # (Ws, Cs) bf16 row (VMEM load)
                for aw in range(k2):
                    acc = acc + jnp.dot(           # MXU, bf16 in / f32 acc
                        row[aw:aw + wo, :], w_ref[ah * k2 + aw],
                        preferred_element_type=jnp.float32)
            y = acc * s + b                        # folded BatchNorm (f32)
            if fused:                              # fused 1x1 conv_out + its BN
                y = jnp.dot(y.astype(jnp.bfloat16), w2,
                            preferred_element_type=jnp.float32)
                y = y * s2 + b2
            o_ref[r] = y.astype(o_ref.dtype)

    return kernel


# --------------------------- layout helpers (JAX) -------------------------------
def _space_to_depth(x_nhwc, pad):
    """Spatial zero-pad, then fold 2x2 stride phases into channels (bf16)."""
    x = jnp.pad(x_nhwc, ((0, 0), (pad, pad), (pad, pad), (0, 0)))
    n, hp, wp, c = x.shape
    assert hp % 2 == 0 and wp % 2 == 0, "padded spatial dims must be even"
    x = x.reshape(n, hp // 2, 2, wp // 2, 2, c)
    x = jnp.transpose(x, (0, 1, 3, 2, 4, 5))       # (n, i, j, ph, pw, c)
    return x.reshape(n, hp // 2, wp // 2, 4 * c).astype(jnp.bfloat16)


def _fold_weights_s2d(w_oihw, ks):
    """(O, C, ks, ks) conv weight -> (k2*k2, 4C, O) taps over the s2d input.

    Taps: kh = 2*ah + ph, kw = 2*aw + pw; positions past ks are zero-padded.
    Flat channel order ph*2C + pw*C + c matches _space_to_depth.
    """
    o, c = w_oihw.shape[0], w_oihw.shape[1]
    k2 = (ks + 1) // 2
    wp = jnp.zeros((o, c, 2 * k2, 2 * k2), w_oihw.dtype)
    wp = wp.at[:, :, :ks, :ks].set(w_oihw)
    wp = wp.reshape(o, c, k2, 2, k2, 2)            # (o, c, ah, ph, aw, pw)
    wp = jnp.transpose(wp, (2, 4, 3, 5, 1, 0))     # (ah, aw, ph, pw, c, o)
    return wp.reshape(k2 * k2, 4 * c, o).astype(jnp.bfloat16)


def _pick_th(ho, k2):
    """Output rows per grid step: largest power of two dividing ho, capped so the
    fully-unrolled kernel body stays at <= 64 matmul taps."""
    th_max = max(1, 64 // (k2 * k2))
    th = 1
    for cand in (2, 4, 8, 16):
        if cand <= th_max and ho % cand == 0:
            th = cand
    return th


# ------------------------------ one fused layer ---------------------------------
def conv_bn_layer(x_nhwc, p, *, ks, pad, out_dtype, fuse=None):
    """stride-2 conv (no bias) + folded BN; optionally a fused trailing 1x1+BN."""
    n, h, w, _ = x_nhwc.shape
    ho = (h + 2 * pad - ks) // 2 + 1
    wo = (w + 2 * pad - ks) // 2 + 1
    k2 = (ks + 1) // 2

    xs = _space_to_depth(x_nhwc, pad)              # (n, hs, ws, 4C) bf16
    _, hs, ws, cs = xs.shape
    assert hs == ho + k2 - 1 and ws == wo + k2 - 1

    # Pack each row-block's receptive field into its own (non-overlapping) slab so
    # the kernel needs exactly one input DMA per grid step.
    th = _pick_th(ho, k2)
    n_hb = ho // th
    th_in = th + k2 - 1
    idx = jnp.arange(n_hb)[:, None] * th + jnp.arange(th_in)[None, :]
    xs_ext = xs[:, idx]                            # (n, n_hb, th_in, ws, cs)

    wk = _fold_weights_s2d(p["w"], ks)             # (k2*k2, 4C, Cout) bf16
    c_out = wk.shape[-1]
    scale = p["scale"].reshape(1, c_out).astype(jnp.float32)
    shift = p["shift"].reshape(1, c_out).astype(jnp.float32)

    fused = fuse is not None
    c_fin = c_out
    extra_inputs, extra_specs = [], []
    if fused:
        c_fin = fuse["w"].shape[0]
        w2 = jnp.transpose(fuse["w"].reshape(c_fin, c_out), (1, 0)).astype(jnp.bfloat16)
        extra_inputs = [w2,
                        fuse["scale"].reshape(1, c_fin).astype(jnp.float32),
                        fuse["shift"].reshape(1, c_fin).astype(jnp.float32)]
        extra_specs = [pl.BlockSpec((c_out, c_fin), lambda b, t: (0, 0)),
                       pl.BlockSpec((1, c_fin), lambda b, t: (0, 0)),
                       pl.BlockSpec((1, c_fin), lambda b, t: (0, 0))]

    kernel = _make_conv_bn_kernel(th, k2, wo, fused)

    out_itemsize = jnp.dtype(out_dtype).itemsize
    flops = 2 * n * ho * wo * (k2 * k2) * cs * c_out
    if fused:
        flops += 2 * n * ho * wo * c_out * c_fin
    bytes_accessed = (n * n_hb * th_in * ws * cs * 2     # bf16 activation slabs
                      + wk.size * 2                      # resident weights
                      + n * ho * wo * c_fin * out_itemsize)

    return pl.pallas_call(
        kernel,
        out_shape=jax.ShapeDtypeStruct((n, ho, wo, c_fin), out_dtype),
        grid_spec=pltpu.PrefetchScalarGridSpec(
            num_scalar_prefetch=0,
            grid=(n, n_hb),
            in_specs=[
                pl.BlockSpec((None, None, th_in, ws, cs),
                             lambda b, t: (b, t, 0, 0, 0)),
                pl.BlockSpec((k2 * k2, cs, c_out), lambda b, t: (0, 0, 0)),
                pl.BlockSpec((1, c_out), lambda b, t: (0, 0)),
                pl.BlockSpec((1, c_out), lambda b, t: (0, 0)),
            ] + extra_specs,
            out_specs=pl.BlockSpec((None, th, wo, c_fin),
                                   lambda b, t: (b, t, 0, 0)),
        ),
        compiler_params=pltpu.CompilerParams(
            dimension_semantics=("parallel", "parallel")),
        cost_estimate=pl.CostEstimate(flops=flops, transcendentals=0,
                                      bytes_accessed=bytes_accessed),
    )(*([xs_ext, wk, scale, shift] + extra_inputs))


# ----------------------------- parameter creation -------------------------------
def _make_conv_bn_params(key, in_chan, out_chan, ks):
    kw_, kg, kb, km, kv = jax.random.split(key, 5)
    fan_in = in_chan * ks * ks
    # kaiming_normal_(a=1): std = sqrt(2 / ((1 + a^2) * fan_in)) = sqrt(1 / fan_in)
    std = (1.0 / fan_in) ** 0.5
    w = jax.random.normal(kw_, (out_chan, in_chan, ks, ks), jnp.float32) * std
    gamma = 1.0 + 0.1 * jax.random.normal(kg, (out_chan,), jnp.float32)
    beta = 0.1 * jax.random.normal(kb, (out_chan,), jnp.float32)
    mean = 0.1 * jax.random.normal(km, (out_chan,), jnp.float32)
    var = jnp.abs(jax.random.normal(kv, (out_chan,), jnp.float32)) + 0.5
    eps = 1e-5
    scale = gamma / jnp.sqrt(var + eps)            # inference BN folded to affine
    shift = beta - mean * scale
    return dict(w=w, scale=scale, shift=shift)


def make_spatial_path_params(key):
    k1, k2, k3, k4 = jax.random.split(key, 4)
    return {
        "conv1": _make_conv_bn_params(k1, 3, 64, 7),
        "conv2": _make_conv_bn_params(k2, 64, 64, 3),
        "conv3": _make_conv_bn_params(k3, 64, 64, 3),
        "conv_out": _make_conv_bn_params(k4, 64, 128, 1),
    }


# --------------------------------- SpatialPath ----------------------------------
@jax.jit
def spatial_path_forward(x_nchw, params):
    """x: (N, 3, H, W) f32 -> feat: (N, 128, H/8, W/8) f32 (conv->bn, no ReLU)."""
    x = jnp.transpose(x_nchw, (0, 2, 3, 1)).astype(jnp.bfloat16)   # NCHW -> NHWC
    x = conv_bn_layer(x, params["conv1"], ks=7, pad=3, out_dtype=jnp.bfloat16)
    x = conv_bn_layer(x, params["conv2"], ks=3, pad=1, out_dtype=jnp.bfloat16)
    # conv3 with conv_out (1x1) + its BN fused into the kernel epilogue:
    x = conv_bn_layer(x, params["conv3"], ks=3, pad=1, out_dtype=jnp.float32,
                      fuse=params["conv_out"])
    return jnp.transpose(x, (0, 3, 1, 2))                          # NHWC -> NCHW


# ------------------------------- reference check --------------------------------
def _ref_layer(x_nchw, p, stride, pad):
    y = lax.conv_general_dilated(
        x_nchw, p["w"], window_strides=(stride, stride),
        padding=[(pad, pad), (pad, pad)],
        dimension_numbers=("NCHW", "OIHW", "NCHW"))
    return y * p["scale"].reshape(1, -1, 1, 1) + p["shift"].reshape(1, -1, 1, 1)


def spatial_path_reference(x_nchw, params):
    x = _ref_layer(x_nchw, params["conv1"], 2, 3)
    x = _ref_layer(x, params["conv2"], 2, 1)
    x = _ref_layer(x, params["conv3"], 2, 1)
    x = _ref_layer(x, params["conv_out"], 1, 0)
    return x


if __name__ == "__main__":
    key = jax.random.PRNGKey(0)
    kx, kp = jax.random.split(key)
    # Small input consistent with SpatialPath (3 input channels, /8 downsample).
    x = jax.random.normal(kx, (2, 3, 32, 32), jnp.float32)
    params = make_spatial_path_params(kp)

    out = jax.block_until_ready(spatial_path_forward(x, params))
    assert out.shape == (2, 128, 4, 4), out.shape

    ref = jax.block_until_ready(spatial_path_reference(x, params))
    ref_scale = float(jnp.max(jnp.abs(ref))) + 1e-6
    err = float(jnp.max(jnp.abs(out.astype(jnp.float32) - ref)))
    # bf16 activations/weights with f32 accumulation: allow a few % relative error.
    assert err <= 0.05 * ref_scale, f"mismatch vs reference: {err} (scale {ref_scale})"

    print("KERNEL_OK")
</pallas_src>

<mosaic_0001>
module attributes {stable_mosaic.version = 11 : i64} {
  func.func @kernel(%arg0: i32, %arg1: i32, %arg2: memref<1x1x7x19x12xbf16, #tpu.memory_space<vmem>>, %arg3: memref<16x12x64xbf16, #tpu.memory_space<vmem>>, %arg4: memref<1x64xf32, #tpu.memory_space<vmem>>, %arg5: memref<1x64xf32, #tpu.memory_space<vmem>>, %arg6: memref<1x4x16x64xbf16, #tpu.memory_space<vmem>>) attributes {dimension_semantics = [#tpu.dimension_semantics<parallel>, #tpu.dimension_semantics<parallel>], iteration_bounds = array<i64: 2, 4>, scalar_prefetch = 0 : i64, scratch_operands = 0 : i64, tpu.core_type = #tpu.core_type<tc>, window_params = [{transform_indices = @transform_0, window_bounds = array<i64: 1, 1, 7, 19, 12>}, {pipeline_mode = #tpu.pipeline_mode<synchronous>, transform_indices = @transform_1, window_bounds = array<i64: 16, 12, 64>}, {pipeline_mode = #tpu.pipeline_mode<synchronous>, transform_indices = @transform_2, window_bounds = array<i64: 1, 64>}, {pipeline_mode = #tpu.pipeline_mode<synchronous>, transform_indices = @transform_3, window_bounds = array<i64: 1, 64>}, {transform_indices = @transform_4, window_bounds = array<i64: 1, 4, 16, 64>}]} {
    %c0 = arith.constant 0 : index
    %c0_0 = arith.constant 0 : index
    %0 = vector.load %arg4[%c0, %c0_0] : memref<1x64xf32, #tpu.memory_space<vmem>>, vector<1x64xf32>
    %c0_1 = arith.constant 0 : index
    %c0_2 = arith.constant 0 : index
    %1 = vector.load %arg5[%c0_1, %c0_2] : memref<1x64xf32, #tpu.memory_space<vmem>>, vector<1x64xf32>
    %cst = arith.constant 0.000000e+00 : f32
    %2 = vector.broadcast %cst : f32 to vector<16x64xf32>
    %c0_3 = arith.constant 0 : index
    %c0_4 = arith.constant 0 : index
    %c0_5 = arith.constant 0 : index
    %c0_6 = arith.constant 0 : index
    %c0_7 = arith.constant 0 : index
    %3 = vector.load %arg2[%c0_3, %c0_4, %c0_5, %c0_6, %c0_7] : memref<1x1x7x19x12xbf16, #tpu.memory_space<vmem>>, vector<1x1x1x19x12xbf16>
    %4 = vector.shape_cast %3 : vector<1x1x1x19x12xbf16> to vector<19x12xbf16>
    %5 = vector.extract_strided_slice %4 {offsets = [0, 0], sizes = [16, 12], strides = [1, 1]} : vector<19x12xbf16> to vector<16x12xbf16>
    %c0_8 = arith.constant 0 : index
    %c0_9 = arith.constant 0 : index
    %c0_10 = arith.constant 0 : index
    %6 = vector.load %arg3[%c0_8, %c0_9, %c0_10] : memref<16x12x64xbf16, #tpu.memory_space<vmem>>, vector<1x12x64xbf16>
    %7 = vector.shape_cast %6 : vector<1x12x64xbf16> to vector<12x64xbf16>
    %cst_11 = arith.constant dense<0.000000e+00> : vector<16x64xf32>
    %8 = tpu.matmul %5, %7, %cst_11 {dimension_numbers = #tpu.dot_dimension_numbers<[1], [0], [0], [1], [0, 0, 1, 1], [], []>} : vector<16x12xbf16>, vector<12x64xbf16>, vector<16x64xf32> -> vector<16x64xf32>
    %9 = arith.addf %2, %8 : vector<16x64xf32>
    %10 = vector.extract_strided_slice %4 {offsets = [1, 0], sizes = [16, 12], strides = [1, 1]} : vector<19x12xbf16> to vector<16x12xbf16>
    %c1 = arith.constant 1 : index
    %c0_12 = arith.constant 0 : index
    %c0_13 = arith.constant 0 : index
    %11 = vector.load %arg3[%c1, %c0_12, %c0_13] : memref<16x12x64xbf16, #tpu.memory_space<vmem>>, vector<1x12x64xbf16>
    %12 = vector.shape_cast %11 : vector<1x12x64xbf16> to vector<12x64xbf16>
    %cst_14 = arith.constant dense<0.000000e+00> : vector<16x64xf32>
    %13 = tpu.matmul %10, %12, %cst_14 {dimension_numbers = #tpu.dot_dimension_numbers<[1], [0], [0], [1], [0, 0, 1, 1], [], []>} : vector<16x12xbf16>, vector<12x64xbf16>, vector<16x64xf32> -> vector<16x64xf32>
    %14 = arith.addf %9, %13 : vector<16x64xf32>
    %15 = vector.extract_strided_slice %4 {offsets = [2, 0], sizes = [16, 12], strides = [1, 1]} : vector<19x12xbf16> to vector<16x12xbf16>
    %c2 = arith.constant 2 : index
    %c0_15 = arith.constant 0 : index
    %c0_16 = arith.constant 0 : index
    %16 = vector.load %arg3[%c2, %c0_15, %c0_16] : memref<16x12x64xbf16, #tpu.memory_space<vmem>>, vector<1x12x64xbf16>
    %17 = vector.shape_cast %16 : vector<1x12x64xbf16> to vector<12x64xbf16>
    %cst_17 = arith.constant dense<0.000000e+00> : vector<16x64xf32>
    %18 = tpu.matmul %15, %17, %cst_17 {dimension_numbers = #tpu.dot_dimension_numbers<[1], [0], [0], [1], [0, 0, 1, 1], [], []>} : vector<16x12xbf16>, vector<12x64xbf16>, vector<16x64xf32> -> vector<16x64xf32>
    %19 = arith.addf %14, %18 : vector<16x64xf32>
    %20 = vector.extract_strided_slice %4 {offsets = [3, 0], sizes = [16, 12], strides = [1, 1]} : vector<19x12xbf16> to vector<16x12xbf16>
    %c3 = arith.constant 3 : index
    %c0_18 = arith.constant 0 : index
    %c0_19 = arith.constant 0 : index
    %21 = vector.load %arg3[%c3, %c0_18, %c0_19] : memref<16x12x64xbf16, #tpu.memory_space<vmem>>, vector<1x12x64xbf16>
    %22 = vector.shape_cast %21 : vector<1x12x64xbf16> to vector<12x64xbf16>
    %cst_20 = arith.constant dense<0.000000e+00> : vector<16x64xf32>
    %23 = tpu.matmul %20, %22, %cst_20 {dimension_numbers = #tpu.dot_dimension_numbers<[1], [0], [0], [1], [0, 0, 1, 1], [], []>} : vector<16x12xbf16>, vector<12x64xbf16>, vector<16x64xf32> -> vector<16x64xf32>
    %24 = arith.addf %19, %23 : vector<16x64xf32>
    %c0_21 = arith.constant 0 : index
    %c0_22 = arith.constant 0 : index
    %c1_23 = arith.constant 1 : index
    %c0_24 = arith.constant 0 : index
    %c0_25 = arith.constant 0 : index
    %25 = vector.load %arg2[%c0_21, %c0_22, %c1_23, %c0_24, %c0_25] : memref<1x1x7x19x12xbf16, #tpu.memory_space<vmem>>, vector<1x1x1x19x12xbf16>
    %26 = vector.shape_cast %25 : vector<1x1x1x19x12xbf16> to vector<19x12xbf16>
    %27 = vector.extract_strided_slice %26 {offsets = [0, 0], sizes = [16, 12], strides = [1, 1]} : vector<19x12xbf16> to vector<16x12xbf16>
    %c4 = arith.constant 4 : index
    %c0_26 = arith.constant 0 : index
    %c0_27 = arith.constant 0 : index
    %28 = vector.load %arg3[%c4, %c0_26, %c0_27] : memref<16x12x64xbf16, #tpu.memory_space<vmem>>, vector<1x12x64xbf16>
    %29 = vector.shape_cast %28 : vector<1x12x64xbf16> to vector<12x64xbf16>
    %cst_28 = arith.constant dense<0.000000e+00> : vector<16x64xf32>
    %30 = tpu.matmul %27, %29, %cst_28 {dimension_numbers = #tpu.dot_dimension_numbers<[1], [0], [0], [1], [0, 0, 1, 1], [], []>} : vector<16x12xbf16>, vector<12x64xbf16>, vector<16x64xf32> -> vector<16x64xf32>
    %31 = arith.addf %24, %30 : vector<16x64xf32>
    %32 = vector.extract_strided_slice %26 {offsets = [1, 0], sizes = [16, 12], strides = [1, 1]} : vector<19x12xbf16> to vector<16x12xbf16>
    %c5 = arith.constant 5 : index
    %c0_29 = arith.constant 0 : index
    %c0_30 = arith.constant 0 : index
    %33 = vector.load %arg3[%c5, %c0_29, %c0_30] : memref<16x12x64xbf16, #tpu.memory_space<vmem>>, vector<1x12x64xbf16>
    %34 = vector.shape_cast %33 : vector<1x12x64xbf16> to vector<12x64xbf16>
    %cst_31 = arith.constant dense<0.000000e+00> : vector<16x64xf32>
    %35 = tpu.matmul %32, %34, %cst_31 {dimension_numbers = #tpu.dot_dimension_numbers<[1], [0], [0], [1], [0, 0, 1, 1], [], []>} : vector<16x12xbf16>, vector<12x64xbf16>, vector<16x64xf32> -> vector<16x64xf32>
    %36 = arith.addf %31, %35 : vector<16x64xf32>
    %37 = vector.extract_strided_slice %26 {offsets = [2, 0], sizes = [16, 12], strides = [1, 1]} : vector<19x12xbf16> to vector<16x12xbf16>
    %c6 = arith.constant 6 : index
    %c0_32 = arith.constant 0 : index
    %c0_33 = arith.constant 0 : index
    %38 = vector.load %arg3[%c6, %c0_32, %c0_33] : memref<16x12x64xbf16, #tpu.memory_space<vmem>>, vector<1x12x64xbf16>
    %39 = vector.shape_cast %38 : vector<1x12x64xbf16> to vector<12x64xbf16>
    %cst_34 = arith.constant dense<0.000000e+00> : vector<16x64xf32>
    %40 = tpu.matmul %37, %39, %cst_34 {dimension_numbers = #tpu.dot_dimension_numbers<[1], [0], [0], [1], [0, 0, 1, 1], [], []>} : vector<16x12xbf16>, vector<12x64xbf16>, vector<16x64xf32> -> vector<16x64xf32>
    %41 = arith.addf %36, %40 : vector<16x64xf32>
    %42 = vector.extract_strided_slice %26 {offsets = [3, 0], sizes = [16, 12], strides = [1, 1]} : vector<19x12xbf16> to vector<16x12xbf16>
    %c7 = arith.constant 7 : index
    %c0_35 = arith.constant 0 : index
    %c0_36 = arith.constant 0 : index
    %43 = vector.load %arg3[%c7, %c0_35, %c0_36] : memref<16x12x64xbf16, #tpu.memory_space<vmem>>, vector<1x12x64xbf16>
    %44 = vector.shape_cast %43 : vector<1x12x64xbf16> to vector<12x64xbf16>
    %cst_37 = arith.constant dense<0.000000e+00> : vector<16x64xf32>
    %45 = tpu.matmul %42, %44, %cst_37 {dimension_numbers = #tpu.dot_dimension_numbers<[1], [0], [0], [1], [0, 0, 1, 1], [], []>} : vector<16x12xbf16>, vector<12x64xbf16>, vector<16x64xf32> -> vector<16x64xf32>
    %46 = arith.addf %41, %45 : vector<16x64xf32>
    %c0_38 = arith.constant 0 : index
    %c0_39 = arith.constant 0 : index
    %c2_40 = arith.constant 2 : index
    %c0_41 = arith.constant 0 : index
    %c0_42 = arith.constant 0 : index
    %47 = vector.load %arg2[%c0_38, %c0_39, %c2_40, %c0_41, %c0_42] : memref<1x1x7x19x12xbf16, #tpu.memory_space<vmem>>, vector<1x1x1x19x12xbf16>
    %48 = vector.shape_cast %47 : vector<1x1x1x19x12xbf16> to vector<19x12xbf16>
    %49 = vector.extract_strided_slice %48 {offsets = [0, 0], sizes = [16, 12], strides = [1, 1]} : vector<19x12xbf16> to vector<16x12xbf16>
    %c8 = arith.constant 8 : index
    %c0_43 = arith.constant 0 : index
    %c0_44 = arith.constant 0 : index
    %50 = vector.load %arg3[%c8, %c0_43, %c0_44] : memref<16x12x64xbf16, #tpu.memory_space<vmem>>, vector<1x12x64xbf16>
    %51 = vector.shape_cast %50 : vector<1x12x64xbf16> to vector<12x64xbf16>
    %cst_45 = arith.constant dense<0.000000e+00> : vector<16x64xf32>
    %52 = tpu.matmul %49, %51, %cst_45 {dimension_numbers = #tpu.dot_dimension_numbers<[1], [0], [0], [1], [0, 0, 1, 1], [], []>} : vector<16x12xbf16>, vector<12x64xbf16>, vector<16x64xf32> -> vector<16x64xf32>
    %53 = arith.addf %46, %52 : vector<16x64xf32>
    %54 = vector.extract_strided_slice %48 {offsets = [1, 0], sizes = [16, 12], strides = [1, 1]} : vector<19x12xbf16> to vector<16x12xbf16>
    %c9 = arith.constant 9 : index
    %c0_46 = arith.constant 0 : index
    %c0_47 = arith.constant 0 : index
    %55 = vector.load %arg3[%c9, %c0_46, %c0_47] : memref<16x12x64xbf16, #tpu.memory_space<vmem>>, vector<1x12x64xbf16>
    %56 = vector.shape_cast %55 : vector<1x12x64xbf16> to vector<12x64xbf16>
    %cst_48 = arith.constant dense<0.000000e+00> : vector<16x64xf32>
    %57 = tpu.matmul %54, %56, %cst_48 {dimension_numbers = #tpu.dot_dimension_numbers<[1], [0], [0], [1], [0, 0, 1, 1], [], []>} : vector<16x12xbf16>, vector<12x64xbf16>, vector<16x64xf32> -> vector<16x64xf32>
    %58 = arith.addf %53, %57 : vector<16x64xf32>
    %59 = vector.extract_strided_slice %48 {offsets = [2, 0], sizes = [16, 12], strides = [1, 1]} : vector<19x12xbf16> to vector<16x12xbf16>
    %c10 = arith.constant 10 : index
    %c0_49 = arith.constant 0 : index
    %c0_50 = arith.constant 0 : index
    %60 = vector.load %arg3[%c10, %c0_49, %c0_50] : memref<16x12x64xbf16, #tpu.memory_space<vmem>>, vector<1x12x64xbf16>
    %61 = vector.shape_cast %60 : vector<1x12x64xbf16> to vector<12x64xbf16>
    %cst_51 = arith.constant dense<0.000000e+00> : vector<16x64xf32>
    %62 = tpu.matmul %59, %61, %cst_51 {dimension_numbers = #tpu.dot_dimension_numbers<[1], [0], [0], [1], [0, 0, 1, 1], [], []>} : vector<16x12xbf16>, vector<12x64xbf16>, vector<16x64xf32> -> vector<16x64xf32>
    %63 = arith.addf %58, %62 : vector<16x64xf32>
    %64 = vector.extract_strided_slice %48 {offsets = [3, 0], sizes = [16, 12], strides = [1, 1]} : vector<19x12xbf16> to vector<16x12xbf16>
    %c11 = arith.constant 11 : index
    %c0_52 = arith.constant 0 : index
    %c0_53 = arith.constant 0 : index
    %65 = vector.load %arg3[%c11, %c0_52, %c0_53] : memref<16x12x64xbf16, #tpu.memory_space<vmem>>, vector<1x12x64xbf16>
    %66 = vector.shape_cast %65 : vector<1x12x64xbf16> to vector<12x64xbf16>
    %cst_54 = arith.constant dense<0.000000e+00> : vector<16x64xf32>
    %67 = tpu.matmul %64, %66, %cst_54 {dimension_numbers = #tpu.dot_dimension_numbers<[1], [0], [0], [1], [0, 0, 1, 1], [], []>} : vector<16x12xbf16>, vector<12x64xbf16>, vector<16x64xf32> -> vector<16x64xf32>
    %68 = arith.addf %63, %67 : vector<16x64xf32>
    %c0_55 = arith.constant 0 : index
    %c0_56 = arith.constant 0 : index
    %c3_57 = arith.constant 3 : index
    %c0_58 = arith.constant 0 : index
    %c0_59 = arith.constant 0 : index
    %69 = vector.load %arg2[%c0_55, %c0_56, %c3_57, %c0_58, %c0_59] : memref<1x1x7x19x12xbf16, #tpu.memory_space<vmem>>, vector<1x1x1x19x12xbf16>
    %70 = vector.shape_cast %69 : vector<1x1x1x19x12xbf16> to vector<19x12xbf16>
    %71 = vector.extract_strided_slice %70 {offsets = [0, 0], sizes = [16, 12], strides = [1, 1]} : vector<19x12xbf16> to vector<16x12xbf16>
    %c12 = arith.constant 12 : index
    %c0_60 = arith.constant 0 : index
    %c0_61 = arith.constant 0 : index
    %72 = vector.load %arg3[%c12, %c0_60, %c0_61] : memref<16x12x64xbf16, #tpu.memory_space<vmem>>, vector<1x12x64xbf16>
    %73 = vector.shape_cast %72 : vector<1x12x64xbf16> to vector<12x64xbf16>
    %cst_62 = arith.constant dense<0.000000e+00> : vector<16x64xf32>
    %74 = tpu.matmul %71, %73, %cst_62 {dimension_numbers = #tpu.dot_dimension_numbers<[1], [0], [0], [1], [0, 0, 1, 1], [], []>} : vector<16x12xbf16>, vector<12x64xbf16>, vector<16x64xf32> -> vector<16x64xf32>
    %75 = arith.addf %68, %74 : vector<16x64xf32>
    %76 = vector.extract_strided_slice %70 {offsets = [1, 0], sizes = [16, 12], strides = [1, 1]} : vector<19x12xbf16> to vector<16x12xbf16>
    %c13 = arith.constant 13 : index
    %c0_63 = arith.constant 0 : index
    %c0_64 = arith.constant 0 : index
    %77 = vector.load %arg3[%c13, %c0_63, %c0_64] : memref<16x12x64xbf16, #tpu.memory_space<vmem>>, vector<1x12x64xbf16>
    %78 = vector.shape_cast %77 : vector<1x12x64xbf16> to vector<12x64xbf16>
    %cst_65 = arith.constant dense<0.000000e+00> : vector<16x64xf32>
    %79 = tpu.matmul %76, %78, %cst_65 {dimension_numbers = #tpu.dot_dimension_numbers<[1], [0], [0], [1], [0, 0, 1, 1], [], []>} : vector<16x12xbf16>, vector<12x64xbf16>, vector<16x64xf32> -> vector<16x64xf32>
    %80 = arith.addf %75, %79 : vector<16x64xf32>
    %81 = vector.extract_strided_slice %70 {offsets = [2, 0], sizes = [16, 12], strides = [1, 1]} : vector<19x12xbf16> to vector<16x12xbf16>
    %c14 = arith.constant 14 : index
    %c0_66 = arith.constant 0 : index
    %c0_67 = arith.constant 0 : index
    %82 = vector.load %arg3[%c14, %c0_66, %c0_67] : memref<16x12x64xbf16, #tpu.memory_space<vmem>>, vector<1x12x64xbf16>
    %83 = vector.shape_cast %82 : vector<1x12x64xbf16> to vector<12x64xbf16>
    %cst_68 = arith.constant dense<0.000000e+00> : vector<16x64xf32>
    %84 = tpu.matmul %81, %83, %cst_68 {dimension_numbers = #tpu.dot_dimension_numbers<[1], [0], [0], [1], [0, 0, 1, 1], [], []>} : vector<16x12xbf16>, vector<12x64xbf16>, vector<16x64xf32> -> vector<16x64xf32>
    %85 = arith.addf %80, %84 : vector<16x64xf32>
    %86 = vector.extract_strided_slice %70 {offsets = [3, 0], sizes = [16, 12], strides = [1, 1]} : vector<19x12xbf16> to vector<16x12xbf16>
    %c15 = arith.constant 15 : index
    %c0_69 = arith.constant 0 : index
    %c0_70 = arith.constant 0 : index
    %87 = vector.load %arg3[%c15, %c0_69, %c0_70] : memref<16x12x64xbf16, #tpu.memory_space<vmem>>, vector<1x12x64xbf16>
    %88 = vector.shape_cast %87 : vector<1x12x64xbf16> to vector<12x64xbf16>
    %cst_71 = arith.constant dense<0.000000e+00> : vector<16x64xf32>
    %89 = tpu.matmul %86, %88, %cst_71 {dimension_numbers = #tpu.dot_dimension_numbers<[1], [0], [0], [1], [0, 0, 1, 1], [], []>} : vector<16x12xbf16>, vector<12x64xbf16>, vector<16x64xf32> -> vector<16x64xf32>
    %90 = arith.addf %85, %89 : vector<16x64xf32>
    %91 = vector.broadcast %0 : vector<1x64xf32> to vector<16x64xf32>
    %92 = arith.mulf %90, %91 : vector<16x64xf32>
    %93 = vector.broadcast %1 : vector<1x64xf32> to vector<16x64xf32>
    %94 = arith.addf %92, %93 : vector<16x64xf32>
    %95 = arith.truncf %94 : vector<16x64xf32> to vector<16x64xbf16>
    %c0_72 = arith.constant 0 : index
    %c0_73 = arith.constant 0 : index
    %c0_74 = arith.constant 0 : index
    %c0_75 = arith.constant 0 : index
    %96 = vector.load %arg6[%c0_72, %c0_73, %c0_74, %c0_75] : memref<1x4x16x64xbf16, #tpu.memory_space<vmem>>, vector<1x1x16x64xbf16>
    %97 = vector.shape_cast %96 : vector<1x1x16x64xbf16> to vector<16x64xbf16>
    %98 = vector.shape_cast %95 : vector<16x64xbf16> to vector<1x1x16x64xbf16>
    tpu.vector_store %arg6[%c0_72, %c0_73, %c0_74, %c0_75], %98 {strides = array<i32>} : memref<1x4x16x64xbf16, #tpu.memory_space<vmem>>, vector<1x1x16x64xbf16>,
    %cst_76 = arith.constant 0.000000e+00 : f32
    %99 = vector.broadcast %cst_76 : f32 to vector<16x64xf32>
    %c0_77 = arith.constant 0 : index
    %c0_78 = arith.constant 0 : index
    %c1_79 = arith.constant 1 : index
    %c0_80 = arith.constant 0 : index
    %c0_81 = arith.constant 0 : index
    %100 = vector.load %arg2[%c0_77, %c0_78, %c1_79, %c0_80, %c0_81] : memref<1x1x7x19x12xbf16, #tpu.memory_space<vmem>>, vector<1x1x1x19x12xbf16>
    %101 = vector.shape_cast %100 : vector<1x1x1x19x12xbf16> to vector<19x12xbf16>
    %102 = vector.extract_strided_slice %101 {offsets = [0, 0], sizes = [16, 12], strides = [1, 1]} : vector<19x12xbf16> to vector<16x12xbf16>
    %c0_82 = arith.constant 0 : index
    %c0_83 = arith.constant 0 : index
    %c0_84 = arith.constant 0 : index
    %103 = vector.load %arg3[%c0_82, %c0_83, %c0_84] : memref<16x12x64xbf16, #tpu.memory_space<vmem>>, vector<1x12x64xbf16>
    %104 = vector.shape_cast %103 : vector<1x12x64xbf16> to vector<12x64xbf16>
    %cst_85 = arith.constant dense<0.000000e+00> : vector<16x64xf32>
    %105 = tpu.matmul %102, %104, %cst_85 {dimension_numbers = #tpu.dot_dimension_numbers<[1], [0], [0], [1], [0, 0, 1, 1], [], []>} : vector<16x12xbf16>, vector<12x64xbf16>, vector<16x64xf32> -> vector<16x64xf32>
    %106 = arith.addf %99, %105 : vector<16x64xf32>
    %107 = vector.extract_strided_slice %101 {offsets = [1, 0], sizes = [16, 12], strides = [1, 1]} : vector<19x12xbf16> to vector<16x12xbf16>
    %c1_86 = arith.constant 1 : index
    %c0_87 = arith.constant 0 : index
    %c0_88 = arith.constant 0 : index
    %108 = vector.load %arg3[%c1_86, %c0_87, %c0_88] : memref<16x12x64xbf16, #tpu.memory_space<vmem>>, vector<1x12x64xbf16>
    %109 = vector.shape_cast %108 : vector<1x12x64xbf16> to vector<12x64xbf16>
    %cst_89 = arith.constant dense<0.000000e+00> : vector<16x64xf32>
    %110 = tpu.matmul %107, %109, %cst_89 {dimension_numbers = #tpu.dot_dimension_numbers<[1], [0], [0], [1], [0, 0, 1, 1], [], []>} : vector<16x12xbf16>, vector<12x64xbf16>, vector<16x64xf32> -> vector<16x64xf32>
    %111 = arith.addf %106, %110 : vector<16x64xf32>
    %112 = vector.extract_strided_slice %101 {offsets = [2, 0], sizes = [16, 12], strides = [1, 1]} : vector<19x12xbf16> to vector<16x12xbf16>
    %c2_90 = arith.constant 2 : index
    %c0_91 = arith.constant 0 : index
    %c0_92 = arith.constant 0 : index
    %113 = vector.load %arg3[%c2_90, %c0_91, %c0_92] : memref<16x12x64xbf16, #tpu.memory_space<vmem>>, vector<1x12x64xbf16>
    %114 = vector.shape_cast %113 : vector<1x12x64xbf16> to vector<12x64xbf16>
    %cst_93 = arith.constant dense<0.000000e+00> : vector<16x64xf32>
    %115 = tpu.matmul %112, %114, %cst_93 {dimension_numbers = #tpu.dot_dimension_numbers<[1], [0], [0], [1], [0, 0, 1, 1], [], []>} : vector<16x12xbf16>, vector<12x64xbf16>, vector<16x64xf32> -> vector<16x64xf32>
    %116 = arith.addf %111, %115 : vector<16x64xf32>
    %117 = vector.extract_strided_slice %101 {offsets = [3, 0], sizes = [16, 12], strides = [1, 1]} : vector<19x12xbf16> to vector<16x12xbf16>
    %c3_94 = arith.constant 3 : index
    %c0_95 = arith.constant 0 : index
    %c0_96 = arith.constant 0 : index
    %118 = vector.load %arg3[%c3_94, %c0_95, %c0_96] : memref<16x12x64xbf16, #tpu.memory_space<vmem>>, vector<1x12x64xbf16>
    %119 = vector.shape_cast %118 : vector<1x12x64xbf16> to vector<12x64xbf16>
    %cst_97 = arith.constant dense<0.000000e+00> : vector<16x64xf32>
    %120 = tpu.matmul %117, %119, %cst_97 {dimension_numbers = #tpu.dot_dimension_numbers<[1], [0], [0], [1], [0, 0, 1, 1], [], []>} : vector<16x12xbf16>, vector<12x64xbf16>, vector<16x64xf32> -> vector<16x64xf32>
    %121 = arith.addf %116, %120 : vector<16x64xf32>
    %c0_98 = arith.constant 0 : index
    %c0_99 = arith.constant 0 : index
    %c2_100 = arith.constant 2 : index
    %c0_101 = arith.constant 0 : index
    %c0_102 = arith.constant 0 : index
    %122 = vector.load %arg2[%c0_98, %c0_99, %c2_100, %c0_101, %c0_102] : memref<1x1x7x19x12xbf16, #tpu.memory_space<vmem>>, vector<1x1x1x19x12xbf16>
    %123 = vector.shape_cast %122 : vector<1x1x1x19x12xbf16> to vector<19x12xbf16>
    %124 = vector.extract_strided_slice %123 {offsets = [0, 0], sizes = [16, 12], strides = [1, 1]} : vector<19x12xbf16> to vector<16x12xbf16>
    %c4_103 = arith.constant 4 : index
    %c0_104 = arith.constant 0 : index
    %c0_105 = arith.constant 0 : index
    %125 = vector.load %arg3[%c4_103, %c0_104, %c0_105] : memref<16x12x64xbf16, #tpu.memory_space<vmem>>, vector<1x12x64xbf16>
    %126 = vector.shape_cast %125 : vector<1x12x64xbf16> to vector<12x64xbf16>
    %cst_106 = arith.constant dense<0.000000e+00> : vector<16x64xf32>
    %127 = tpu.matmul %124, %126, %cst_106 {dimension_numbers = #tpu.dot_dimension_numbers<[1], [0], [0], [1], [0, 0, 1, 1], [], []>} : vector<16x12xbf16>, vector<12x64xbf16>, vector<16x64xf32> -> vector<16x64xf32>
    %128 = arith.addf %121, %127 : vector<16x64xf32>
    %129 = vector.extract_strided_slice %123 {offsets = [1, 0], sizes = [16, 12], strides = [1, 1]} : vector<19x12xbf16> to vector<16x12xbf16>
    %c5_107 = arith.constant 5 : index
    %c0_108 = arith.constant 0 : index
    %c0_109 = arith.constant 0 : index
    %130 = vector.load %arg3[%c5_107, %c0_108, %c0_109] : memref<16x12x64xbf16, #tpu.memory_space<vmem>>, vector<1x12x64xbf16>
    %131 = vector.shape_cast %130 : vector<1x12x64xbf16> to vector<12x64xbf16>
    %cst_110 = arith.constant dense<0.000000e+00> : vector<16x64xf32>
    %132 = tpu.matmul %129, %131, %cst_110 {dimension_numbers = #tpu.dot_dimension_numbers<[1], [0], [0], [1], [0, 0, 1, 1], [], []>} : vector<16x12xbf16>, vector<12x64xbf16>, vector<16x64xf32> -> vector<16x64xf32>
    %133 = arith.addf %128, %132 : vector<16x64xf32>
    %134 = vector.extract_strided_slice %123 {offsets = [2, 0], sizes = [16, 12], strides = [1, 1]} : vector<19x12xbf16> to vector<16x12xbf16>
    %c6_111 = arith.constant 6 : index
    %c0_112 = arith.constant 0 : index
    %c0_113 = arith.constant 0 : index
    %135 = vector.load %arg3[%c6_111, %c0_112, %c0_113] : memref<16x12x64xbf16, #tpu.memory_space<vmem>>, vector<1x12x64xbf16>
    %136 = vector.shape_cast %135 : vector<1x12x64xbf16> to vector<12x64xbf16>
    %cst_114 = arith.constant dense<0.000000e+00> : vector<16x64xf32>
    %137 = tpu.matmul %134, %136, %cst_114 {dimension_numbers = #tpu.dot_dimension_numbers<[1], [0], [0], [1], [0, 0, 1, 1], [], []>} : vector<16x12xbf16>, vector<12x64xbf16>, vector<16x64xf32> -> vector<16x64xf32>
    %138 = arith.addf %133, %137 : vector<16x64xf32>
    %139 = vector.extract_strided_slice %123 {offsets = [3, 0], sizes = [16, 12], strides = [1, 1]} : vector<19x12xbf16> to vector<16x12xbf16>
    %c7_115 = arith.constant 7 : index
    %c0_116 = arith.constant 0 : index
    %c0_117 = arith.constant 0 : index
    %140 = vector.load %arg3[%c7_115, %c0_116, %c0_117] : memref<16x12x64xbf16, #tpu.memory_space<vmem>>, vector<1x12x64xbf16>
    %141 = vector.shape_cast %140 : vector<1x12x64xbf16> to vector<12x64xbf16>
    %cst_118 = arith.constant dense<0.000000e+00> : vector<16x64xf32>
    %142 = tpu.matmul %139, %141, %cst_118 {dimension_numbers = #tpu.dot_dimension_numbers<[1], [0], [0], [1], [0, 0, 1, 1], [], []>} : vector<16x12xbf16>, vector<12x64xbf16>, vector<16x64xf32> -> vector<16x64xf32>
    %143 = arith.addf %138, %142 : vector<16x64xf32>
    %c0_119 = arith.constant 0 : index
    %c0_120 = arith.constant 0 : index
    %c3_121 = arith.constant 3 : index
    %c0_122 = arith.constant 0 : index
    %c0_123 = arith.constant 0 : index
    %144 = vector.load %arg2[%c0_119, %c0_120, %c3_121, %c0_122, %c0_123] : memref<1x1x7x19x12xbf16, #tpu.memory_space<vmem>>, vector<1x1x1x19x12xbf16>
    %145 = vector.shape_cast %144 : vector<1x1x1x19x12xbf16> to vector<19x12xbf16>
    %146 = vector.extract_strided_slice %145 {offsets = [0, 0], sizes = [16, 12], strides = [1, 1]} : vector<19x12xbf16> to vector<16x12xbf16>
    %c8_124 = arith.constant 8 : index
    %c0_125 = arith.constant 0 : index
    %c0_126 = arith.constant 0 : index
    %147 = vector.load %arg3[%c8_124, %c0_125, %c0_126] : memref<16x12x64xbf16, #tpu.memory_space<vmem>>, vector<1x12x64xbf16>
    %148 = vector.shape_cast %147 : vector<1x12x64xbf16> to vector<12x64xbf16>
    %cst_127 = arith.constant dense<0.000000e+00> : vector<16x64xf32>
    %149 = tpu.matmul %146, %148, %cst_127 {dimension_numbers = #tpu.dot_dimension_numbers<[1], [0], [0], [1], [0, 0, 1, 1], [], []>} : vector<16x12xbf16>, vector<12x64xbf16>, vector<16x64xf32> -> vector<16x64xf32>
    %150 = arith.addf %143, %149 : vector<16x64xf32>
    %151 = vector.extract_strided_slice %145 {offsets = [1, 0], sizes = [16, 12], strides = [1, 1]} : vector<19x12xbf16> to vector<16x12xbf16>
    %c9_128 = arith.constant 9 : index
    %c0_129 = arith.constant 0 : index
    %c0_130 = arith.constant 0 : index
    %152 = vector.load %arg3[%c9_128, %c0_129, %c0_130] : memref<16x12x64xbf16, #tpu.memory_space<vmem>>, vector<1x12x64xbf16>
    %153 = vector.shape_cast %152 : vector<1x12x64xbf16> to vector<12x64xbf16>
    %cst_131 = arith.constant dense<0.000000e+00> : vector<16x64xf32>
    %154 = tpu.matmul %151, %153, %cst_131 {dimension_numbers = #tpu.dot_dimension_numbers<[1], [0], [0], [1], [0, 0, 1, 1], [], []>} : vector<16x12xbf16>, vector<12x64xbf16>, vector<16x64xf32> -> vector<16x64xf32>
    %155 = arith.addf %150, %154 : vector<16x64xf32>
    %156 = vector.extract_strided_slice %145 {offsets = [2, 0], sizes = [16, 12], strides = [1, 1]} : vector<19x12xbf16> to vector<16x12xbf16>
    %c10_132 = arith.constant 10 : index
    %c0_133 = arith.constant 0 : index
    %c0_134 = arith.constant 0 : index
    %157 = vector.load %arg3[%c10_132, %c0_133, %c0_134] : memref<16x12x64xbf16, #tpu.memory_space<vmem>>, vector<1x12x64xbf16>
    %158 = vector.shape_cast %157 : vector<1x12x64xbf16> to vector<12x64xbf16>
    %cst_135 = arith.constant dense<0.000000e+00> : vector<16x64xf32>
    %159 = tpu.matmul %156, %158, %cst_135 {dimension_numbers = #tpu.dot_dimension_numbers<[1], [0], [0], [1], [0, 0, 1, 1], [], []>} : vector<16x12xbf16>, vector<12x64xbf16>, vector<16x64xf32> -> vector<16x64xf32>
    %160 = arith.addf %155, %159 : vector<16x64xf32>
    %161 = vector.extract_strided_slice %145 {offsets = [3, 0], sizes = [16, 12], strides = [1, 1]} : vector<19x12xbf16> to vector<16x12xbf16>
    %c11_136 = arith.constant 11 : index
    %c0_137 = arith.constant 0 : index
    %c0_138 = arith.constant 0 : index
    %162 = vector.load %arg3[%c11_136, %c0_137, %c0_138] : memref<16x12x64xbf16, #tpu.memory_space<vmem>>, vector<1x12x64xbf16>
    %163 = vector.shape_cast %162 : vector<1x12x64xbf16> to vector<12x64xbf16>
    %cst_139 = arith.constant dense<0.000000e+00> : vector<16x64xf32>
    %164 = tpu.matmul %161, %163, %cst_139 {dimension_numbers = #tpu.dot_dimension_numbers<[1], [0], [0], [1], [0, 0, 1, 1], [], []>} : vector<16x12xbf16>, vector<12x64xbf16>, vector<16x64xf32> -> vector<16x64xf32>
    %165 = arith.addf %160, %164 : vector<16x64xf32>
    %c0_140 = arith.constant 0 : index
    %c0_141 = arith.constant 0 : index
    %c4_142 = arith.constant 4 : index
    %c0_143 = arith.constant 0 : index
    %c0_144 = arith.constant 0 : index
    %166 = vector.load %arg2[%c0_140, %c0_141, %c4_142, %c0_143, %c0_144] : memref<1x1x7x19x12xbf16, #tpu.memory_space<vmem>>, vector<1x1x1x19x12xbf16>
    %167 = vector.shape_cast %166 : vector<1x1x1x19x12xbf16> to vector<19x12xbf16>
    %168 = vector.extract_strided_slice %167 {offsets = [0, 0], sizes = [16, 12], strides = [1, 1]} : vector<19x12xbf16> to vector<16x12xbf16>
    %c12_145 = arith.constant 12 : index
    %c0_146 = arith.constant 0 : index
    %c0_147 = arith.constant 0 : index
    %169 = vector.load %arg3[%c12_145, %c0_146, %c0_147] : memref<16x12x64xbf16, #tpu.memory_space<vmem>>, vector<1x12x64xbf16>
    %170 = vector.shape_cast %169 : vector<1x12x64xbf16> to vector<12x64xbf16>
    %cst_148 = arith.constant dense<0.000000e+00> : vector<16x64xf32>
    %171 = tpu.matmul %168, %170, %cst_148 {dimension_numbers = #tpu.dot_dimension_numbers<[1], [0], [0], [1], [0, 0, 1, 1], [], []>} : vector<16x12xbf16>, vector<12x64xbf16>, vector<16x64xf32> -> vector<16x64xf32>
    %172 = arith.addf %165, %171 : vector<16x64xf32>
    %173 = vector.extract_strided_slice %167 {offsets = [1, 0], sizes = [16, 12], strides = [1, 1]} : vector<19x12xbf16> to vector<16x12xbf16>
    %c13_149 = arith.constant 13 : index
    %c0_150 = arith.constant 0 : index
    %c0_151 = arith.constant 0 : index
    %174 = vector.load %arg3[%c13_149, %c0_150, %c0_151] : memref<16x12x64xbf16, #tpu.memory_space<vmem>>, vector<1x12x64xbf16>
    %175 = vector.shape_cast %174 : vector<1x12x64xbf16> to vector<12x64xbf16>
    %cst_152 = arith.constant dense<0.000000e+00> : vector<16x64xf32>
    %176 = tpu.matmul %173, %175, %cst_152 {dimension_numbers = #tpu.dot_dimension_numbers<[1], [0], [0], [1], [0, 0, 1, 1], [], []>} : vector<16x12xbf16>, vector<12x64xbf16>, vector<16x64xf32> -> vector<16x64xf32>
    %177 = arith.addf %172, %176 : vector<16x64xf32>
    %178 = vector.extract_strided_slice %167 {offsets = [2, 0], sizes = [16, 12], strides = [1, 1]} : vector<19x12xbf16> to vector<16x12xbf16>
    %c14_153 = arith.constant 14 : index
    %c0_154 = arith.constant 0 : index
    %c0_155 = arith.constant 0 : index
    %179 = vector.load %arg3[%c14_153, %c0_154, %c0_155] : memref<16x12x64xbf16, #tpu.memory_space<vmem>>, vector<1x12x64xbf16>
    %180 = vector.shape_cast %179 : vector<1x12x64xbf16> to vector<12x64xbf16>
    %cst_156 = arith.constant dense<0.000000e+00> : vector<16x64xf32>
    %181 = tpu.matmul %178, %180, %cst_156 {dimension_numbers = #tpu.dot_dimension_numbers<[1], [0], [0], [1], [0, 0, 1, 1], [], []>} : vector<16x12xbf16>, vector<12x64xbf16>, vector<16x64xf32> -> vector<16x64xf32>
    %182 = arith.addf %177, %181 : vector<16x64xf32>
    %183 = vector.extract_strided_slice %167 {offsets = [3, 0], sizes = [16, 12], strides = [1, 1]} : vector<19x12xbf16> to vector<16x12xbf16>
    %c15_157 = arith.constant 15 : index
    %c0_158 = arith.constant 0 : index
    %c0_159 = arith.constant 0 : index
    %184 = vector.load %arg3[%c15_157, %c0_158, %c0_159] : memref<16x12x64xbf16, #tpu.memory_space<vmem>>, vector<1x12x64xbf16>
    %185 = vector.shape_cast %184 : vector<1x12x64xbf16> to vector<12x64xbf16>
    %cst_160 = arith.constant dense<0.000000e+00> : vector<16x64xf32>
    %186 = tpu.matmul %183, %185, %cst_160 {dimension_numbers = #tpu.dot_dimension_numbers<[1], [0], [0], [1], [0, 0, 1, 1], [], []>} : vector<16x12xbf16>, vector<12x64xbf16>, vector<16x64xf32> -> vector<16x64xf32>
    %187 = arith.addf %182, %186 : vector<16x64xf32>
    %188 = vector.broadcast %0 : vector<1x64xf32> to vector<16x64xf32>
    %189 = arith.mulf %187, %188 : vector<16x64xf32>
    %190 = vector.broadcast %1 : vector<1x64xf32> to vector<16x64xf32>
    %191 = arith.addf %189, %190 : vector<16x64xf32>
    %192 = arith.truncf %191 : vector<16x64xf32> to vector<16x64xbf16>
    %c0_161 = arith.constant 0 : index
    %c1_162 = arith.constant 1 : index
    %c0_163 = arith.constant 0 : index
    %c0_164 = arith.constant 0 : index
    %193 = vector.load %arg6[%c0_161, %c1_162, %c0_163, %c0_164] : memref<1x4x16x64xbf16, #tpu.memory_space<vmem>>, vector<1x1x16x64xbf16>
    %194 = vector.shape_cast %193 : vector<1x1x16x64xbf16> to vector<16x64xbf16>
    %195 = vector.shape_cast %192 : vector<16x64xbf16> to vector<1x1x16x64xbf16>
    tpu.vector_store %arg6[%c0_161, %c1_162, %c0_163, %c0_164], %195 {strides = array<i32>} : memref<1x4x16x64xbf16, #tpu.memory_space<vmem>>, vector<1x1x16x64xbf16>,
    %cst_165 = arith.constant 0.000000e+00 : f32
    %196 = vector.broadcast %cst_165 : f32 to vector<16x64xf32>
    %c0_166 = arith.constant 0 : index
    %c0_167 = arith.constant 0 : index
    %c2_168 = arith.constant 2 : index
    %c0_169 = arith.constant 0 : index
    %c0_170 = arith.constant 0 : index
    %197 = vector.load %arg2[%c0_166, %c0_167, %c2_168, %c0_169, %c0_170] : memref<1x1x7x19x12xbf16, #tpu.memory_space<vmem>>, vector<1x1x1x19x12xbf16>
    %198 = vector.shape_cast %197 : vector<1x1x1x19x12xbf16> to vector<19x12xbf16>
    %199 = vector.extract_strided_slice %198 {offsets = [0, 0], sizes = [16, 12], strides = [1, 1]} : vector<19x12xbf16> to vector<16x12xbf16>
    %c0_171 = arith.constant 0 : index
    %c0_172 = arith.constant 0 : index
    %c0_173 = arith.constant 0 : index
    %200 = vector.load %arg3[%c0_171, %c0_172, %c0_173] : memref<16x12x64xbf16, #tpu.memory_space<vmem>>, vector<1x12x64xbf16>
    %201 = vector.shape_cast %200 : vector<1x12x64xbf16> to vector<12x64xbf16>
    %cst_174 = arith.constant dense<0.000000e+00> : vector<16x64xf32>
    %202 = tpu.matmul %199, %201, %cst_174 {dimension_numbers = #tpu.dot_dimension_numbers<[1], [0], [0], [1], [0, 0, 1, 1], [], []>} : vector<16x12xbf16>, vector<12x64xbf16>, vector<16x64xf32> -> vector<16x64xf32>
    %203 = arith.addf %196, %202 : vector<16x64xf32>
    %204 = vector.extract_strided_slice %198 {offsets = [1, 0], sizes = [16, 12], strides = [1, 1]} : vector<19x12xbf16> to vector<16x12xbf16>
    %c1_175 = arith.constant 1 : index
    %c0_176 = arith.constant 0 : index
    %c0_177 = arith.constant 0 : index
    %205 = vector.load %arg3[%c1_175, %c0_176, %c0_177] : memref<16x12x64xbf16, #tpu.memory_space<vmem>>, vector<1x12x64xbf16>
    %206 = vector.shape_cast %205 : vector<1x12x64xbf16> to vector<12x64xbf16>
    %cst_178 = arith.constant dense<0.000000e+00> : vector<16x64xf32>
    %207 = tpu.matmul %204, %206, %cst_178 {dimension_numbers = #tpu.dot_dimension_numbers<[1], [0], [0], [1], [0, 0, 1, 1], [], []>} : vector<16x12xbf16>, vector<12x64xbf16>, vector<16x64xf32> -> vector<16x64xf32>
    %208 = arith.addf %203, %207 : vector<16x64xf32>
    %209 = vector.extract_strided_slice %198 {offsets = [2, 0], sizes = [16, 12], strides = [1, 1]} : vector<19x12xbf16> to vector<16x12xbf16>
    %c2_179 = arith.constant 2 : index
    %c0_180 = arith.constant 0 : index
    %c0_181 = arith.constant 0 : index
    %210 = vector.load %arg3[%c2_179, %c0_180, %c0_181] : memref<16x12x64xbf16, #tpu.memory_space<vmem>>, vector<1x12x64xbf16>
    %211 = vector.shape_cast %210 : vector<1x12x64xbf16> to vector<12x64xbf16>
    %cst_182 = arith.constant dense<0.000000e+00> : vector<16x64xf32>
    %212 = tpu.matmul %209, %211, %cst_182 {dimension_numbers = #tpu.dot_dimension_numbers<[1], [0], [0], [1], [0, 0, 1, 1], [], []>} : vector<16x12xbf16>, vector<12x64xbf16>, vector<16x64xf32> -> vector<16x64xf32>
    %213 = arith.addf %208, %212 : vector<16x64xf32>
    %214 = vector.extract_strided_slice %198 {offsets = [3, 0], sizes = [16, 12], strides = [1, 1]} : vector<19x12xbf16> to vector<16x12xbf16>
    %c3_183 = arith.constant 3 : index
    %c0_184 = arith.constant 0 : index
    %c0_185 = arith.constant 0 : index
    %215 = vector.load %arg3[%c3_183, %c0_184, %c0_185] : memref<16x12x64xbf16, #tpu.memory_space<vmem>>, vector<1x12x64xbf16>
    %216 = vector.shape_cast %215 : vector<1x12x64xbf16> to vector<12x64xbf16>
    %cst_186 = arith.constant dense<0.000000e+00> : vector<16x64xf32>
    %217 = tpu.matmul %214, %216, %cst_186 {dimension_numbers = #tpu.dot_dimension_numbers<[1], [0], [0], [1], [0, 0, 1, 1], [], []>} : vector<16x12xbf16>, vector<12x64xbf16>, vector<16x64xf32> -> vector<16x64xf32>
    %218 = arith.addf %213, %217 : vector<16x64xf32>
    %c0_187 = arith.constant 0 : index
    %c0_188 = arith.constant 0 : index
    %c3_189 = arith.constant 3 : index
    %c0_190 = arith.constant 0 : index
    %c0_191 = arith.constant 0 : index
    %219 = vector.load %arg2[%c0_187, %c0_188, %c3_189, %c0_190, %c0_191] : memref<1x1x7x19x12xbf16, #tpu.memory_space<vmem>>, vector<1x1x1x19x12xbf16>
    %220 = vector.shape_cast %219 : vector<1x1x1x19x12xbf16> to vector<19x12xbf16>
    %221 = vector.extract_strided_slice %220 {offsets = [0, 0], sizes = [16, 12], strides = [1, 1]} : vector<19x12xbf16> to vector<16x12xbf16>
    %c4_192 = arith.constant 4 : index
    %c0_193 = arith.constant 0 : index
    %c0_194 = arith.constant 0 : index
    %222 = vector.load %arg3[%c4_192, %c0_193, %c0_194] : memref<16x12x64xbf16, #tpu.memory_space<vmem>>, vector<1x12x64xbf16>
    %223 = vector.shape_cast %222 : vector<1x12x64xbf16> to vector<12x64xbf16>
    %cst_195 = arith.constant dense<0.000000e+00> : vector<16x64xf32>
    %224 = tpu.matmul %221, %223, %cst_195 {dimension_numbers = #tpu.dot_dimension_numbers<[1], [0], [0], [1], [0, 0, 1, 1], [], []>} : vector<16x12xbf16>, vector<12x64xbf16>, vector<16x64xf32> -> vector<16x64xf32>
    %225 = arith.addf %218, %224 : vector<16x64xf32>
    %226 = vector.extract_strided_slice %220 {offsets = [1, 0], sizes = [16, 12], strides = [1, 1]} : vector<19x12xbf16> to vector<16x12xbf16>
    %c5_196 = arith.constant 5 : index
    %c0_197 = arith.constant 0 : index
    %c0_198 = arith.constant 0 : index
    %227 = vector.load %arg3[%c5_196, %c0_197, %c0_198] : memref<16x12x64xbf16, #tpu.memory_space<vmem>>, vector<1x12x64xbf16>
    %228 = vector.shape_cast %227 : vector<1x12x64xbf16> to vector<12x64xbf16>
    %cst_199 = arith.constant dense<0.000000e+00> : vector<16x64xf32>
    %229 = tpu.matmul %226, %228, %cst_199 {dimension_numbers = #tpu.dot_dimension_numbers<[1], [0], [0], [1], [0, 0, 1, 1], [], []>} : vector<16x12xbf16>, vector<12x64xbf16>, vector<16x64xf32> -> vector<16x64xf32>
    %230 = arith.addf %225, %229 : vector<16x64xf32>
    %231 = vector.extract_strided_slice %220 {offsets = [2, 0], sizes = [16, 12], strides = [1, 1]} : vector<19x12xbf16> to vector<16x12xbf16>
    %c6_200 = arith.constant 6 : index
    %c0_201 = arith.constant 0 : index
    %c0_202 = arith.constant 0 : index
    %232 = vector.load %arg3[%c6_200, %c0_201, %c0_202] : memref<16x12x64xbf16, #tpu.memory_space<vmem>>, vector<1x12x64xbf16>
    %233 = vector.shape_cast %232 : vector<1x12x64xbf16> to vector<12x64xbf16>
    %cst_203 = arith.constant dense<0.000000e+00> : vector<16x64xf32>
    %234 = tpu.matmul %231, %233, %cst_203 {dimension_numbers = #tpu.dot_dimension_numbers<[1], [0], [0], [1], [0, 0, 1, 1], [], []>} : vector<16x12xbf16>, vector<12x64xbf16>, vector<16x64xf32> -> vector<16x64xf32>
    %235 = arith.addf %230, %234 : vector<16x64xf32>
    %236 = vector.extract_strided_slice %220 {offsets = [3, 0], sizes = [16, 12], strides = [1, 1]} : vector<19x12xbf16> to vector<16x12xbf16>
    %c7_204 = arith.constant 7 : index
    %c0_205 = arith.constant 0 : index
    %c0_206 = arith.constant 0 : index
    %237 = vector.load %arg3[%c7_204, %c0_205, %c0_206] : memref<16x12x64xbf16, #tpu.memory_space<vmem>>, vector<1x12x64xbf16>
    %238 = vector.shape_cast %237 : vector<1x12x64xbf16> to vector<12x64xbf16>
    %cst_207 = arith.constant dense<0.000000e+00> : vector<16x64xf32>
    %239 = tpu.matmul %236, %238, %cst_207 {dimension_numbers = #tpu.dot_dimension_numbers<[1], [0], [0], [1], [0, 0, 1, 1], [], []>} : vector<16x12xbf16>, vector<12x64xbf16>, vector<16x64xf32> -> vector<16x64xf32>
    %240 = arith.addf %235, %239 : vector<16x64xf32>
    %c0_208 = arith.constant 0 : index
    %c0_209 = arith.constant 0 : index
    %c4_210 = arith.constant 4 : index
    %c0_211 = arith.constant 0 : index
    %c0_212 = arith.constant 0 : index
    %241 = vector.load %arg2[%c0_208, %c0_209, %c4_210, %c0_211, %c0_212] : memref<1x1x7x19x12xbf16, #tpu.memory_space<vmem>>, vector<1x1x1x19x12xbf16>
    %242 = vector.shape_cast %241 : vector<1x1x1x19x12xbf16> to vector<19x12xbf16>
    %243 = vector.extract_strided_slice %242 {offsets = [0, 0], sizes = [16, 12], strides = [1, 1]} : vector<19x12xbf16> to vector<16x12xbf16>
    %c8_213 = arith.constant 8 : index
    %c0_214 = arith.constant 0 : index
    %c0_215 = arith.constant 0 : index
    %244 = vector.load %arg3[%c8_213, %c0_214, %c0_215] : memref<16x12x64xbf16, #tpu.memory_space<vmem>>, vector<1x12x64xbf16>
    %245 = vector.shape_cast %244 : vector<1x12x64xbf16> to vector<12x64xbf16>
    %cst_216 = arith.constant dense<0.000000e+00> : vector<16x64xf32>
    %246 = tpu.matmul %243, %245, %cst_216 {dimension_numbers = #tpu.dot_dimension_numbers<[1], [0], [0], [1], [0, 0, 1, 1], [], []>} : vector<16x12xbf16>, vector<12x64xbf16>, vector<16x64xf32> -> vector<16x64xf32>
    %247 = arith.addf %240, %246 : vector<16x64xf32>
    %248 = vector.extract_strided_slice %242 {offsets = [1, 0], sizes = [16, 12], strides = [1, 1]} : vector<19x12xbf16> to vector<16x12xbf16>
    %c9_217 = arith.constant 9 : index
    %c0_218 = arith.constant 0 : index
    %c0_219 = arith.constant 0 : index
    %249 = vector.load %arg3[%c9_217, %c0_218, %c0_219] : memref<16x12x64xbf16, #tpu.memory_space<vmem>>, vector<1x12x64xbf16>
    %250 = vector.shape_cast %249 : vector<1x12x64xbf16> to vector<12x64xbf16>
    %cst_220 = arith.constant dense<0.000000e+00> : vector<16x64xf32>
    %251 = tpu.matmul %248, %250, %cst_220 {dimension_numbers = #tpu.dot_dimension_numbers<[1], [0], [0], [1], [0, 0, 1, 1], [], []>} : vector<16x12xbf16>, vector<12x64xbf16>, vector<16x64xf32> -> vector<16x64xf32>
    %252 = arith.addf %247, %251 : vector<16x64xf32>
    %253 = vector.extract_strided_slice %242 {offsets = [2, 0], sizes = [16, 12], strides = [1, 1]} : vector<19x12xbf16> to vector<16x12xbf16>
    %c10_221 = arith.constant 10 : index
    %c0_222 = arith.constant 0 : index
    %c0_223 = arith.constant 0 : index
    %254 = vector.load %arg3[%c10_221, %c0_222, %c0_223] : memref<16x12x64xbf16, #tpu.memory_space<vmem>>, vector<1x12x64xbf16>
    %255 = vector.shape_cast %254 : vector<1x12x64xbf16> to vector<12x64xbf16>
    %cst_224 = arith.constant dense<0.000000e+00> : vector<16x64xf32>
    %256 = tpu.matmul %253, %255, %cst_224 {dimension_numbers = #tpu.dot_dimension_numbers<[1], [0], [0], [1], [0, 0, 1, 1], [], []>} : vector<16x12xbf16>, vector<12x64xbf16>, vector<16x64xf32> -> vector<16x64xf32>
    %257 = arith.addf %252, %256 : vector<16x64xf32>
    %258 = vector.extract_strided_slice %242 {offsets = [3, 0], sizes = [16, 12], strides = [1, 1]} : vector<19x12xbf16> to vector<16x12xbf16>
    %c11_225 = arith.constant 11 : index
    %c0_226 = arith.constant 0 : index
    %c0_227 = arith.constant 0 : index
    %259 = vector.load %arg3[%c11_225, %c0_226, %c0_227] : memref<16x12x64xbf16, #tpu.memory_space<vmem>>, vector<1x12x64xbf16>
    %260 = vector.shape_cast %259 : vector<1x12x64xbf16> to vector<12x64xbf16>
    %cst_228 = arith.constant dense<0.000000e+00> : vector<16x64xf32>
    %261 = tpu.matmul %258, %260, %cst_228 {dimension_numbers = #tpu.dot_dimension_numbers<[1], [0], [0], [1], [0, 0, 1, 1], [], []>} : vector<16x12xbf16>, vector<12x64xbf16>, vector<16x64xf32> -> vector<16x64xf32>
    %262 = arith.addf %257, %261 : vector<16x64xf32>
    %c0_229 = arith.constant 0 : index
    %c0_230 = arith.constant 0 : index
    %c5_231 = arith.constant 5 : index
    %c0_232 = arith.constant 0 : index
    %c0_233 = arith.constant 0 : index
    %263 = vector.load %arg2[%c0_229, %c0_230, %c5_231, %c0_232, %c0_233] : memref<1x1x7x19x12xbf16, #tpu.memory_space<vmem>>, vector<1x1x1x19x12xbf16>
    %264 = vector.shape_cast %263 : vector<1x1x1x19x12xbf16> to vector<19x12xbf16>
    %265 = vector.extract_strided_slice %264 {offsets = [0, 0], sizes = [16, 12], strides = [1, 1]} : vector<19x12xbf16> to vector<16x12xbf16>
    %c12_234 = arith.constant 12 : index
    %c0_235 = arith.constant 0 : index
    %c0_236 = arith.constant 0 : index
    %266 = vector.load %arg3[%c12_234, %c0_235, %c0_236] : memref<16x12x64xbf16, #tpu.memory_space<vmem>>, vector<1x12x64xbf16>
    %267 = vector.shape_cast %266 : vector<1x12x64xbf16> to vector<12x64xbf16>
    %cst_237 = arith.constant dense<0.000000e+00> : vector<16x64xf32>
    %268 = tpu.matmul %265, %267, %cst_237 {dimension_numbers = #tpu.dot_dimension_numbers<[1], [0], [0], [1], [0, 0, 1, 1], [], []>} : vector<16x12xbf16>, vector<12x64xbf16>, vector<16x64xf32> -> vector<16x64xf32>
    %269 = arith.addf %262, %268 : vector<16x64xf32>
    %270 = vector.extract_strided_slice %264 {offsets = [1, 0], sizes = [16, 12], strides = [1, 1]} : vector<19x12xbf16> to vector<16x12xbf16>
    %c13_238 = arith.constant 13 : index
    %c0_239 = arith.constant 0 : index
    %c0_240 = arith.constant 0 : index
    %271 = vector.load %arg3[%c13_238, %c0_239, %c0_240] : memref<16x12x64xbf16, #tpu.memory_space<vmem>>, vector<1x12x64xbf16>
    %272 = vector.shape_cast %271 : vector<1x12x64xbf16> to vector<12x64xbf16>
    %cst_241 = arith.constant dense<0.000000e+00> : vector<16x64xf32>
    %273 = tpu.matmul %270, %272, %cst_241 {dimension_numbers = #tpu.dot_dimension_numbers<[1], [0], [0], [1], [0, 0, 1, 1], [], []>} : vector<16x12xbf16>, vector<12x64xbf16>, vector<16x64xf32> -> vector<16x64xf32>
    %274 = arith.addf %269, %273 : vector<16x64xf32>
    %275 = vector.extract_strided_slice %264 {offsets = [2, 0], sizes = [16, 12], strides = [1, 1]} : vector<19x12xbf16> to vector<16x12xbf16>
    %c14_242 = arith.constant 14 : index
    %c0_243 = arith.constant 0 : index
    %c0_244 = arith.constant 0 : index
    %276 = vector.load %arg3[%c14_242, %c0_243, %c0_244] : memref<16x12x64xbf16, #tpu.memory_space<vmem>>, vector<1x12x64xbf16>
    %277 = vector.shape_cast %276 : vector<1x12x64xbf16> to vector<12x64xbf16>
    %cst_245 = arith.constant dense<0.000000e+00> : vector<16x64xf32>
    %278 = tpu.matmul %275, %277, %cst_245 {dimension_numbers = #tpu.dot_dimension_numbers<[1], [0], [0], [1], [0, 0, 1, 1], [], []>} : vector<16x12xbf16>, vector<12x64xbf16>, vector<16x64xf32> -> vector<16x64xf32>
    %279 = arith.addf %274, %278 : vector<16x64xf32>
    %280 = vector.extract_strided_slice %264 {offsets = [3, 0], sizes = [16, 12], strides = [1, 1]} : vector<19x12xbf16> to vector<16x12xbf16>
    %c15_246 = arith.constant 15 : index
    %c0_247 = arith.constant 0 : index
    %c0_248 = arith.constant 0 : index
    %281 = vector.load %arg3[%c15_246, %c0_247, %c0_248] : memref<16x12x64xbf16, #tpu.memory_space<vmem>>, vector<1x12x64xbf16>
    %282 = vector.shape_cast %281 : vector<1x12x64xbf16> to vector<12x64xbf16>
    %cst_249 = arith.constant dense<0.000000e+00> : vector<16x64xf32>
    %283 = tpu.matmul %280, %282, %cst_249 {dimension_numbers = #tpu.dot_dimension_numbers<[1], [0], [0], [1], [0, 0, 1, 1], [], []>} : vector<16x12xbf16>, vector<12x64xbf16>, vector<16x64xf32> -> vector<16x64xf32>
    %284 = arith.addf %279, %283 : vector<16x64xf32>
    %285 = vector.broadcast %0 : vector<1x64xf32> to vector<16x64xf32>
    %286 = arith.mulf %284, %285 : vector<16x64xf32>
    %287 = vector.broadcast %1 : vector<1x64xf32> to vector<16x64xf32>
    %288 = arith.addf %286, %287 : vector<16x64xf32>
    %289 = arith.truncf %288 : vector<16x64xf32> to vector<16x64xbf16>
    %c0_250 = arith.constant 0 : index
    %c2_251 = arith.constant 2 : index
    %c0_252 = arith.constant 0 : index
    %c0_253 = arith.constant 0 : index
    %290 = vector.load %arg6[%c0_250, %c2_251, %c0_252, %c0_253] : memref<1x4x16x64xbf16, #tpu.memory_space<vmem>>, vector<1x1x16x64xbf16>
    %291 = vector.shape_cast %290 : vector<1x1x16x64xbf16> to vector<16x64xbf16>
    %292 = vector.shape_cast %289 : vector<16x64xbf16> to vector<1x1x16x64xbf16>
    tpu.vector_store %arg6[%c0_250, %c2_251, %c0_252, %c0_253], %292 {strides = array<i32>} : memref<1x4x16x64xbf16, #tpu.memory_space<vmem>>, vector<1x1x16x64xbf16>,
    %cst_254 = arith.constant 0.000000e+00 : f32
    %293 = vector.broadcast %cst_254 : f32 to vector<16x64xf32>
    %c0_255 = arith.constant 0 : index
    %c0_256 = arith.constant 0 : index
    %c3_257 = arith.constant 3 : index
    %c0_258 = arith.constant 0 : index
    %c0_259 = arith.constant 0 : index
    %294 = vector.load %arg2[%c0_255, %c0_256, %c3_257, %c0_258, %c0_259] : memref<1x1x7x19x12xbf16, #tpu.memory_space<vmem>>, vector<1x1x1x19x12xbf16>
    %295 = vector.shape_cast %294 : vector<1x1x1x19x12xbf16> to vector<19x12xbf16>
    %296 = vector.extract_strided_slice %295 {offsets = [0, 0], sizes = [16, 12], strides = [1, 1]} : vector<19x12xbf16> to vector<16x12xbf16>
    %c0_260 = arith.constant 0 : index
    %c0_261 = arith.constant 0 : index
    %c0_262 = arith.constant 0 : index
    %297 = vector.load %arg3[%c0_260, %c0_261, %c0_262] : memref<16x12x64xbf16, #tpu.memory_space<vmem>>, vector<1x12x64xbf16>
    %298 = vector.shape_cast %297 : vector<1x12x64xbf16> to vector<12x64xbf16>
    %cst_263 = arith.constant dense<0.000000e+00> : vector<16x64xf32>
    %299 = tpu.matmul %296, %298, %cst_263 {dimension_numbers = #tpu.dot_dimension_numbers<[1], [0], [0], [1], [0, 0, 1, 1], [], []>} : vector<16x12xbf16>, vector<12x64xbf16>, vector<16x64xf32> -> vector<16x64xf32>
    %300 = arith.addf %293, %299 : vector<16x64xf32>
    %301 = vector.extract_strided_slice %295 {offsets = [1, 0], sizes = [16, 12], strides = [1, 1]} : vector<19x12xbf16> to vector<16x12xbf16>
    %c1_264 = arith.constant 1 : index
    %c0_265 = arith.constant 0 : index
    %c0_266 = arith.constant 0 : index
    %302 = vector.load %arg3[%c1_264, %c0_265, %c0_266] : memref<16x12x64xbf16, #tpu.memory_space<vmem>>, vector<1x12x64xbf16>
    %303 = vector.shape_cast %302 : vector<1x12x64xbf16> to vector<12x64xbf16>
    %cst_267 = arith.constant dense<0.000000e+00> : vector<16x64xf32>
    %304 = tpu.matmul %301, %303, %cst_267 {dimension_numbers = #tpu.dot_dimension_numbers<[1], [0], [0], [1], [0, 0, 1, 1], [], []>} : vector<16x12xbf16>, vector<12x64xbf16>, vector<16x64xf32> -> vector<16x64xf32>
    %305 = arith.addf %300, %304 : vector<16x64xf32>
    %306 = vector.extract_strided_slice %295 {offsets = [2, 0], sizes = [16, 12], strides = [1, 1]} : vector<19x12xbf16> to vector<16x12xbf16>
    %c2_268 = arith.constant 2 : index
    %c0_269 = arith.constant 0 : index
    %c0_270 = arith.constant 0 : index
    %307 = vector.load %arg3[%c2_268, %c0_269, %c0_270] : memref<16x12x64xbf16, #tpu.memory_space<vmem>>, vector<1x12x64xbf16>
    %308 = vector.shape_cast %307 : vector<1x12x64xbf16> to vector<12x64xbf16>
    %cst_271 = arith.constant dense<0.000000e+00> : vector<16x64xf32>
    %309 = tpu.matmul %306, %308, %cst_271 {dimension_numbers = #tpu.dot_dimension_numbers<[1], [0], [0], [1], [0, 0, 1, 1], [], []>} : vector<16x12xbf16>, vector<12x64xbf16>, vector<16x64xf32> -> vector<16x64xf32>
    %310 = arith.addf %305, %309 : vector<16x64xf32>
    %311 = vector.extract_strided_slice %295 {offsets = [3, 0], sizes = [16, 12], strides = [1, 1]} : vector<19x12xbf16> to vector<16x12xbf16>
    %c3_272 = arith.constant 3 : index
    %c0_273 = arith.constant 0 : index
    %c0_274 = arith.constant 0 : index
    %312 = vector.load %arg3[%c3_272, %c0_273, %c0_274] : memref<16x12x64xbf16, #tpu.memory_space<vmem>>, vector<1x12x64xbf16>
    %313 = vector.shape_cast %312 : vector<1x12x64xbf16> to vector<12x64xbf16>
    %cst_275 = arith.constant dense<0.000000e+00> : vector<16x64xf32>
    %314 = tpu.matmul %311, %313, %cst_275 {dimension_numbers = #tpu.dot_dimension_numbers<[1], [0], [0], [1], [0, 0, 1, 1], [], []>} : vector<16x12xbf16>, vector<12x64xbf16>, vector<16x64xf32> -> vector<16x64xf32>
    %315 = arith.addf %310, %314 : vector<16x64xf32>
    %c0_276 = arith.constant 0 : index
    %c0_277 = arith.constant 0 : index
    %c4_278 = arith.constant 4 : index
    %c0_279 = arith.constant 0 : index
    %c0_280 = arith.constant 0 : index
    %316 = vector.load %arg2[%c0_276, %c0_277, %c4_278, %c0_279, %c0_280] : memref<1x1x7x19x12xbf16, #tpu.memory_space<vmem>>, vector<1x1x1x19x12xbf16>
    %317 = vector.shape_cast %316 : vector<1x1x1x19x12xbf16> to vector<19x12xbf16>
    %318 = vector.extract_strided_slice %317 {offsets = [0, 0], sizes = [16, 12], strides = [1, 1]} : vector<19x12xbf16> to vector<16x12xbf16>
    %c4_281 = arith.constant 4 : index
    %c0_282 = arith.constant 0 : index
    %c0_283 = arith.constant 0 : index
    %319 = vector.load %arg3[%c4_281, %c0_282, %c0_283] : memref<16x12x64xbf16, #tpu.memory_space<vmem>>, vector<1x12x64xbf16>
    %320 = vector.shape_cast %319 : vector<1x12x64xbf16> to vector<12x64xbf16>
    %cst_284 = arith.constant dense<0.000000e+00> : vector<16x64xf32>
    %321 = tpu.matmul %318, %320, %cst_284 {dimension_numbers = #tpu.dot_dimension_numbers<[1], [0], [0], [1], [0, 0, 1, 1], [], []>} : vector<16x12xbf16>, vector<12x64xbf16>, vector<16x64xf32> -> vector<16x64xf32>
    %322 = arith.addf %315, %321 : vector<16x64xf32>
    %323 = vector.extract_strided_slice %317 {offsets = [1, 0], sizes = [16, 12], strides = [1, 1]} : vector<19x12xbf16> to vector<16x12xbf16>
    %c5_285 = arith.constant 5 : index
    %c0_286 = arith.constant 0 : index
    %c0_287 = arith.constant 0 : index
    %324 = vector.load %arg3[%c5_285, %c0_286, %c0_287] : memref<16x12x64xbf16, #tpu.memory_space<vmem>>, vector<1x12x64xbf16>
    %325 = vector.shape_cast %324 : vector<1x12x64xbf16> to vector<12x64xbf16>
    %cst_288 = arith.constant dense<0.000000e+00> : vector<16x64xf32>
    %326 = tpu.matmul %323, %325, %cst_288 {dimension_numbers = #tpu.dot_dimension_numbers<[1], [0], [0], [1], [0, 0, 1, 1], [], []>} : vector<16x12xbf16>, vector<12x64xbf16>, vector<16x64xf32> -> vector<16x64xf32>
    %327 = arith.addf %322, %326 : vector<16x64xf32>
    %328 = vector.extract_strided_slice %317 {offsets = [2, 0], sizes = [16, 12], strides = [1, 1]} : vector<19x12xbf16> to vector<16x12xbf16>
    %c6_289 = arith.constant 6 : index
    %c0_290 = arith.constant 0 : index
    %c0_291 = arith.constant 0 : index
    %329 = vector.load %arg3[%c6_289, %c0_290, %c0_291] : memref<16x12x64xbf16, #tpu.memory_space<vmem>>, vector<1x12x64xbf16>
    %330 = vector.shape_cast %329 : vector<1x12x64xbf16> to vector<12x64xbf16>
    %cst_292 = arith.constant dense<0.000000e+00> : vector<16x64xf32>
    %331 = tpu.matmul %328, %330, %cst_292 {dimension_numbers = #tpu.dot_dimension_numbers<[1], [0], [0], [1], [0, 0, 1, 1], [], []>} : vector<16x12xbf16>, vector<12x64xbf16>, vector<16x64xf32> -> vector<16x64xf32>
    %332 = arith.addf %327, %331 : vector<16x64xf32>
    %333 = vector.extract_strided_slice %317 {offsets = [3, 0], sizes = [16, 12], strides = [1, 1]} : vector<19x12xbf16> to vector<16x12xbf16>
    %c7_293 = arith.constant 7 : index
    %c0_294 = arith.constant 0 : index
    %c0_295 = arith.constant 0 : index
    %334 = vector.load %arg3[%c7_293, %c0_294, %c0_295] : memref<16x12x64xbf16, #tpu.memory_space<vmem>>, vector<1x12x64xbf16>
    %335 = vector.shape_cast %334 : vector<1x12x64xbf16> to vector<12x64xbf16>
    %cst_296 = arith.constant dense<0.000000e+00> : vector<16x64xf32>
    %336 = tpu.matmul %333, %335, %cst_296 {dimension_numbers = #tpu.dot_dimension_numbers<[1], [0], [0], [1], [0, 0, 1, 1], [], []>} : vector<16x12xbf16>, vector<12x64xbf16>, vector<16x64xf32> -> vector<16x64xf32>
    %337 = arith.addf %332, %336 : vector<16x64xf32>
    %c0_297 = arith.constant 0 : index
    %c0_298 = arith.constant 0 : index
    %c5_299 = arith.constant 5 : index
    %c0_300 = arith.constant 0 : index
    %c0_301 = arith.constant 0 : index
    %338 = vector.load %arg2[%c0_297, %c0_298, %c5_299, %c0_300, %c0_301] : memref<1x1x7x19x12xbf16, #tpu.memory_space<vmem>>, vector<1x1x1x19x12xbf16>
    %339 = vector.shape_cast %338 : vector<1x1x1x19x12xbf16> to vector<19x12xbf16>
    %340 = vector.extract_strided_slice %339 {offsets = [0, 0], sizes = [16, 12], strides = [1, 1]} : vector<19x12xbf16> to vector<16x12xbf16>
    %c8_302 = arith.constant 8 : index
    %c0_303 = arith.constant 0 : index
    %c0_304 = arith.constant 0 : index
    %341 = vector.load %arg3[%c8_302, %c0_303, %c0_304] : memref<16x12x64xbf16, #tpu.memory_space<vmem>>, vector<1x12x64xbf16>
    %342 = vector.shape_cast %341 : vector<1x12x64xbf16> to vector<12x64xbf16>
    %cst_305 = arith.constant dense<0.000000e+00> : vector<16x64xf32>
    %343 = tpu.matmul %340, %342, %cst_305 {dimension_numbers = #tpu.dot_dimension_numbers<[1], [0], [0], [1], [0, 0, 1, 1], [], []>} : vector<16x12xbf16>, vector<12x64xbf16>, vector<16x64xf32> -> vector<16x64xf32>
    %344 = arith.addf %337, %343 : vector<16x64xf32>
    %345 = vector.extract_strided_slice %339 {offsets = [1, 0], sizes = [16, 12], strides = [1, 1]} : vector<19x12xbf16> to vector<16x12xbf16>
    %c9_306 = arith.constant 9 : index
    %c0_307 = arith.constant 0 : index
    %c0_308 = arith.constant 0 : index
    %346 = vector.load %arg3[%c9_306, %c0_307, %c0_308] : memref<16x12x64xbf16, #tpu.memory_space<vmem>>, vector<1x12x64xbf16>
    %347 = vector.shape_cast %346 : vector<1x12x64xbf16> to vector<12x64xbf16>
    %cst_309 = arith.constant dense<0.000000e+00> : vector<16x64xf32>
    %348 = tpu.matmul %345, %347, %cst_309 {dimension_numbers = #tpu.dot_dimension_numbers<[1], [0], [0], [1], [0, 0, 1, 1], [], []>} : vector<16x12xbf16>, vector<12x64xbf16>, vector<16x64xf32> -> vector<16x64xf32>
    %349 = arith.addf %344, %348 : vector<16x64xf32>
    %350 = vector.extract_strided_slice %339 {offsets = [2, 0], sizes = [16, 12], strides = [1, 1]} : vector<19x12xbf16> to vector<16x12xbf16>
    %c10_310 = arith.constant 10 : index
    %c0_311 = arith.constant 0 : index
    %c0_312 = arith.constant 0 : index
    %351 = vector.load %arg3[%c10_310, %c0_311, %c0_312] : memref<16x12x64xbf16, #tpu.memory_space<vmem>>, vector<1x12x64xbf16>
    %352 = vector.shape_cast %351 : vector<1x12x64xbf16> to vector<12x64xbf16>
    %cst_313 = arith.constant dense<0.000000e+00> : vector<16x64xf32>
    %353 = tpu.matmul %350, %352, %cst_313 {dimension_numbers = #tpu.dot_dimension_numbers<[1], [0], [0], [1], [0, 0, 1, 1], [], []>} : vector<16x12xbf16>, vector<12x64xbf16>, vector<16x64xf32> -> vector<16x64xf32>
    %354 = arith.addf %349, %353 : vector<16x64xf32>
    %355 = vector.extract_strided_slice %339 {offsets = [3, 0], sizes = [16, 12], strides = [1, 1]} : vector<19x12xbf16> to vector<16x12xbf16>
    %c11_314 = arith.constant 11 : index
    %c0_315 = arith.constant 0 : index
    %c0_316 = arith.constant 0 : index
    %356 = vector.load %arg3[%c11_314, %c0_315, %c0_316] : memref<16x12x64xbf16, #tpu.memory_space<vmem>>, vector<1x12x64xbf16>
    %357 = vector.shape_cast %356 : vector<1x12x64xbf16> to vector<12x64xbf16>
    %cst_317 = arith.constant dense<0.000000e+00> : vector<16x64xf32>
    %358 = tpu.matmul %355, %357, %cst_317 {dimension_numbers = #tpu.dot_dimension_numbers<[1], [0], [0], [1], [0, 0, 1, 1], [], []>} : vector<16x12xbf16>, vector<12x64xbf16>, vector<16x64xf32> -> vector<16x64xf32>
    %359 = arith.addf %354, %358 : vector<16x64xf32>
    %c0_318 = arith.constant 0 : index
    %c0_319 = arith.constant 0 : index
    %c6_320 = arith.constant 6 : index
    %c0_321 = arith.constant 0 : index
    %c0_322 = arith.constant 0 : index
    %360 = vector.load %arg2[%c0_318, %c0_319, %c6_320, %c0_321, %c0_322] : memref<1x1x7x19x12xbf16, #tpu.memory_space<vmem>>, vector<1x1x1x19x12xbf16>
    %361 = vector.shape_cast %360 : vector<1x1x1x19x12xbf16> to vector<19x12xbf16>
    %362 = vector.extract_strided_slice %361 {offsets = [0, 0], sizes = [16, 12], strides = [1, 1]} : vector<19x12xbf16> to vector<16x12xbf16>
    %c12_323 = arith.constant 12 : index
    %c0_324 = arith.constant 0 : index
    %c0_325 = arith.constant 0 : index
    %363 = vector.load %arg3[%c12_323, %c0_324, %c0_325] : memref<16x12x64xbf16, #tpu.memory_space<vmem>>, vector<1x12x64xbf16>
    %364 = vector.shape_cast %363 : vector<1x12x64xbf16> to vector<12x64xbf16>
    %cst_326 = arith.constant dense<0.000000e+00> : vector<16x64xf32>
    %365 = tpu.matmul %362, %364, %cst_326 {dimension_numbers = #tpu.dot_dimension_numbers<[1], [0], [0], [1], [0, 0, 1, 1], [], []>} : vector<16x12xbf16>, vector<12x64xbf16>, vector<16x64xf32> -> vector<16x64xf32>
    %366 = arith.addf %359, %365 : vector<16x64xf32>
    %367 = vector.extract_strided_slice %361 {offsets = [1, 0], sizes = [16, 12], strides = [1, 1]} : vector<19x12xbf16> to vector<16x12xbf16>
    %c13_327 = arith.constant 13 : index
    %c0_328 = arith.constant 0 : index
    %c0_329 = arith.constant 0 : index
    %368 = vector.load %arg3[%c13_327, %c0_328, %c0_329] : memref<16x12x64xbf16, #tpu.memory_space<vmem>>, vector<1x12x64xbf16>
    %369 = vector.shape_cast %368 : vector<1x12x64xbf16> to vector<12x64xbf16>
    %cst_330 = arith.constant dense<0.000000e+00> : vector<16x64xf32>
    %370 = tpu.matmul %367, %369, %cst_330 {dimension_numbers = #tpu.dot_dimension_numbers<[1], [0], [0], [1], [0, 0, 1, 1], [], []>} : vector<16x12xbf16>, vector<12x64xbf16>, vector<16x64xf32> -> vector<16x64xf32>
    %371 = arith.addf %366, %370 : vector<16x64xf32>
    %372 = vector.extract_strided_slice %361 {offsets = [2, 0], sizes = [16, 12], strides = [1, 1]} : vector<19x12xbf16> to vector<16x12xbf16>
    %c14_331 = arith.constant 14 : index
    %c0_332 = arith.constant 0 : index
    %c0_333 = arith.constant 0 : index
    %373 = vector.load %arg3[%c14_331, %c0_332, %c0_333] : memref<16x12x64xbf16, #tpu.memory_space<vmem>>, vector<1x12x64xbf16>
    %374 = vector.shape_cast %373 : vector<1x12x64xbf16> to vector<12x64xbf16>
    %cst_334 = arith.constant dense<0.000000e+00> : vector<16x64xf32>
    %375 = tpu.matmul %372, %374, %cst_334 {dimension_numbers = #tpu.dot_dimension_numbers<[1], [0], [0], [1], [0, 0, 1, 1], [], []>} : vector<16x12xbf16>, vector<12x64xbf16>, vector<16x64xf32> -> vector<16x64xf32>
    %376 = arith.addf %371, %375 : vector<16x64xf32>
    %377 = vector.extract_strided_slice %361 {offsets = [3, 0], sizes = [16, 12], strides = [1, 1]} : vector<19x12xbf16> to vector<16x12xbf16>
    %c15_335 = arith.constant 15 : index
    %c0_336 = arith.constant 0 : index
    %c0_337 = arith.constant 0 : index
    %378 = vector.load %arg3[%c15_335, %c0_336, %c0_337] : memref<16x12x64xbf16, #tpu.memory_space<vmem>>, vector<1x12x64xbf16>
    %379 = vector.shape_cast %378 : vector<1x12x64xbf16> to vector<12x64xbf16>
    %cst_338 = arith.constant dense<0.000000e+00> : vector<16x64xf32>
    %380 = tpu.matmul %377, %379, %cst_338 {dimension_numbers = #tpu.dot_dimension_numbers<[1], [0], [0], [1], [0, 0, 1, 1], [], []>} : vector<16x12xbf16>, vector<12x64xbf16>, vector<16x64xf32> -> vector<16x64xf32>
    %381 = arith.addf %376, %380 : vector<16x64xf32>
    %382 = vector.broadcast %0 : vector<1x64xf32> to vector<16x64xf32>
    %383 = arith.mulf %381, %382 : vector<16x64xf32>
    %384 = vector.broadcast %1 : vector<1x64xf32> to vector<16x64xf32>
    %385 = arith.addf %383, %384 : vector<16x64xf32>
    %386 = arith.truncf %385 : vector<16x64xf32> to vector<16x64xbf16>
    %c0_339 = arith.constant 0 : index
    %c3_340 = arith.constant 3 : index
    %c0_341 = arith.constant 0 : index
    %c0_342 = arith.constant 0 : index
    %387 = vector.load %arg6[%c0_339, %c3_340, %c0_341, %c0_342] : memref<1x4x16x64xbf16, #tpu.memory_space<vmem>>, vector<1x1x16x64xbf16>
    %388 = vector.shape_cast %387 : vector<1x1x16x64xbf16> to vector<16x64xbf16>
    %389 = vector.shape_cast %386 : vector<16x64xbf16> to vector<1x1x16x64xbf16>
    tpu.vector_store %arg6[%c0_339, %c3_340, %c0_341, %c0_342], %389 {strides = array<i32>} : memref<1x4x16x64xbf16, #tpu.memory_space<vmem>>, vector<1x1x16x64xbf16>,
    return
  }
  func.func @transform_0(%arg0: i32, %arg1: i32) -> (i32, i32, i32, i32, i32) {
    %c0_i32 = arith.constant 0 : i32
    %c0_i32_0 = arith.constant 0 : i32
    %c0_i32_1 = arith.constant 0 : i32
    %c0_i32_2 = arith.constant 0 : i32
    return %arg0, %arg1, %c0_i32, %c0_i32_0, %c0_i32_1 : i32, i32, i32, i32, i32
  }
  func.func @transform_1(%arg0: i32, %arg1: i32) -> (i32, i32, i32) {
    %c0_i32 = arith.constant 0 : i32
    %c0_i32_0 = arith.constant 0 : i32
    %c0_i32_1 = arith.constant 0 : i32
    %c0_i32_2 = arith.constant 0 : i32
    return %c0_i32, %c0_i32_0, %c0_i32_1 : i32, i32, i32
  }
  func.func @transform_2(%arg0: i32, %arg1: i32) -> (i32, i32) {
    %c0_i32 = arith.constant 0 : i32
    %c0_i32_0 = arith.constant 0 : i32
    %c0_i32_1 = arith.constant 0 : i32
    return %c0_i32, %c0_i32_0 : i32, i32
  }
  func.func @transform_3(%arg0: i32, %arg1: i32) -> (i32, i32) {
    %c0_i32 = arith.constant 0 : i32
    %c0_i32_0 = arith.constant 0 : i32
    %c0_i32_1 = arith.constant 0 : i32
    return %c0_i32, %c0_i32_0 : i32, i32
  }
  func.func @transform_4(%arg0: i32, %arg1: i32) -> (i32, i32, i32, i32) {
    %c0_i32 = arith.constant 0 : i32
    %c0_i32_0 = arith.constant 0 : i32
    %c0_i32_1 = arith.constant 0 : i32
    return %arg0, %arg1, %c0_i32, %c0_i32_0 : i32, i32, i32, i32
  }
}

module attributes {stable_mosaic.version = 11 : i64} {
  func.func @kernel(%arg0: i32, %arg1: i32, %arg2: memref<1x1x9x9x256xbf16, #tpu.memory_space<vmem>>, %arg3: memref<4x256x64xbf16, #tpu.memory_space<vmem>>, %arg4: memref<1x64xf32, #tpu.memory_space<vmem>>, %arg5: memref<1x64xf32, #tpu.memory_space<vmem>>, %arg6: memref<1x8x8x64xbf16, #tpu.memory_space<vmem>>) attributes {dimension_semantics = [#tpu.dimension_semantics<parallel>, #tpu.dimension_semantics<parallel>], iteration_bounds = array<i64: 2, 1>, scalar_prefetch = 0 : i64, scratch_operands = 0 : i64, tpu.core_type = #tpu.core_type<tc>, window_params = [{transform_indices = @transform_0, window_bounds = array<i64: 1, 1, 9, 9, 256>}, {pipeline_mode = #tpu.pipeline_mode<synchronous>, transform_indices = @transform_1, window_bounds = array<i64: 4, 256, 64>}, {pipeline_mode = #tpu.pipeline_mode<synchronous>, transform_indices = @transform_2, window_bounds = array<i64: 1, 64>}, {pipeline_mode = #tpu.pipeline_mode<synchronous>, transform_indices = @transform_3, window_bounds = array<i64: 1, 64>}, {transform_indices = @transform_4, window_bounds = array<i64: 1, 8, 8, 64>}]} {
    %c0 = arith.constant 0 : index
    %c0_0 = arith.constant 0 : index
    %0 = vector.load %arg4[%c0, %c0_0] : memref<1x64xf32, #tpu.memory_space<vmem>>, vector<1x64xf32>
    %c0_1 = arith.constant 0 : index
    %c0_2 = arith.constant 0 : index
    %1 = vector.load %arg5[%c0_1, %c0_2] : memref<1x64xf32, #tpu.memory_space<vmem>>, vector<1x64xf32>
    %cst = arith.constant 0.000000e+00 : f32
    %2 = vector.broadcast %cst : f32 to vector<8x64xf32>
    %c0_3 = arith.constant 0 : index
    %c0_4 = arith.constant 0 : index
    %c0_5 = arith.constant 0 : index
    %c0_6 = arith.constant 0 : index
    %c0_7 = arith.constant 0 : index
    %3 = vector.load %arg2[%c0_3, %c0_4, %c0_5, %c0_6, %c0_7] : memref<1x1x9x9x256xbf16, #tpu.memory_space<vmem>>, vector<1x1x1x9x256xbf16>
    %4 = vector.shape_cast %3 : vector<1x1x1x9x256xbf16> to vector<9x256xbf16>
    %5 = vector.extract_strided_slice %4 {offsets = [0, 0], sizes = [8, 256], strides = [1, 1]} : vector<9x256xbf16> to vector<8x256xbf16>
    %c0_8 = arith.constant 0 : index
    %c0_9 = arith.constant 0 : index
    %c0_10 = arith.constant 0 : index
    %6 = vector.load %arg3[%c0_8, %c0_9, %c0_10] : memref<4x256x64xbf16, #tpu.memory_space<vmem>>, vector<1x256x64xbf16>
    %7 = vector.shape_cast %6 : vector<1x256x64xbf16> to vector<256x64xbf16>
    %cst_11 = arith.constant dense<0.000000e+00> : vector<8x64xf32>
    %8 = tpu.matmul %5, %7, %cst_11 {dimension_numbers = #tpu.dot_dimension_numbers<[1], [0], [0], [1], [0, 0, 1, 1], [], []>} : vector<8x256xbf16>, vector<256x64xbf16>, vector<8x64xf32> -> vector<8x64xf32>
    %9 = arith.addf %2, %8 : vector<8x64xf32>
    %10 = vector.extract_strided_slice %4 {offsets = [1, 0], sizes = [8, 256], strides = [1, 1]} : vector<9x256xbf16> to vector<8x256xbf16>
    %c1 = arith.constant 1 : index
    %c0_12 = arith.constant 0 : index
    %c0_13 = arith.constant 0 : index
    %11 = vector.load %arg3[%c1, %c0_12, %c0_13] : memref<4x256x64xbf16, #tpu.memory_space<vmem>>, vector<1x256x64xbf16>
    %12 = vector.shape_cast %11 : vector<1x256x64xbf16> to vector<256x64xbf16>
    %cst_14 = arith.constant dense<0.000000e+00> : vector<8x64xf32>
    %13 = tpu.matmul %10, %12, %cst_14 {dimension_numbers = #tpu.dot_dimension_numbers<[1], [0], [0], [1], [0, 0, 1, 1], [], []>} : vector<8x256xbf16>, vector<256x64xbf16>, vector<8x64xf32> -> vector<8x64xf32>
    %14 = arith.addf %9, %13 : vector<8x64xf32>
    %c0_15 = arith.constant 0 : index
    %c0_16 = arith.constant 0 : index
    %c1_17 = arith.constant 1 : index
    %c0_18 = arith.constant 0 : index
    %c0_19 = arith.constant 0 : index
    %15 = vector.load %arg2[%c0_15, %c0_16, %c1_17, %c0_18, %c0_19] : memref<1x1x9x9x256xbf16, #tpu.memory_space<vmem>>, vector<1x1x1x9x256xbf16>
    %16 = vector.shape_cast %15 : vector<1x1x1x9x256xbf16> to vector<9x256xbf16>
    %17 = vector.extract_strided_slice %16 {offsets = [0, 0], sizes = [8, 256], strides = [1, 1]} : vector<9x256xbf16> to vector<8x256xbf16>
    %c2 = arith.constant 2 : index
    %c0_20 = arith.constant 0 : index
    %c0_21 = arith.constant 0 : index
    %18 = vector.load %arg3[%c2, %c0_20, %c0_21] : memref<4x256x64xbf16, #tpu.memory_space<vmem>>, vector<1x256x64xbf16>
    %19 = vector.shape_cast %18 : vector<1x256x64xbf16> to vector<256x64xbf16>
    %cst_22 = arith.constant dense<0.000000e+00> : vector<8x64xf32>
    %20 = tpu.matmul %17, %19, %cst_22 {dimension_numbers = #tpu.dot_dimension_numbers<[1], [0], [0], [1], [0, 0, 1, 1], [], []>} : vector<8x256xbf16>, vector<256x64xbf16>, vector<8x64xf32> -> vector<8x64xf32>
    %21 = arith.addf %14, %20 : vector<8x64xf32>
    %22 = vector.extract_strided_slice %16 {offsets = [1, 0], sizes = [8, 256], strides = [1, 1]} : vector<9x256xbf16> to vector<8x256xbf16>
    %c3 = arith.constant 3 : index
    %c0_23 = arith.constant 0 : index
    %c0_24 = arith.constant 0 : index
    %23 = vector.load %arg3[%c3, %c0_23, %c0_24] : memref<4x256x64xbf16, #tpu.memory_space<vmem>>, vector<1x256x64xbf16>
    %24 = vector.shape_cast %23 : vector<1x256x64xbf16> to vector<256x64xbf16>
    %cst_25 = arith.constant dense<0.000000e+00> : vector<8x64xf32>
    %25 = tpu.matmul %22, %24, %cst_25 {dimension_numbers = #tpu.dot_dimension_numbers<[1], [0], [0], [1], [0, 0, 1, 1], [], []>} : vector<8x256xbf16>, vector<256x64xbf16>, vector<8x64xf32> -> vector<8x64xf32>
    %26 = arith.addf %21, %25 : vector<8x64xf32>
    %27 = vector.broadcast %0 : vector<1x64xf32> to vector<8x64xf32>
    %28 = arith.mulf %26, %27 : vector<8x64xf32>
    %29 = vector.broadcast %1 : vector<1x64xf32> to vector<8x64xf32>
    %30 = arith.addf %28, %29 : vector<8x64xf32>
    %31 = arith.truncf %30 : vector<8x64xf32> to vector<8x64xbf16>
    %c0_26 = arith.constant 0 : index
    %c0_27 = arith.constant 0 : index
    %c0_28 = arith.constant 0 : index
    %c0_29 = arith.constant 0 : index
    %32 = vector.load %arg6[%c0_26, %c0_27, %c0_28, %c0_29] : memref<1x8x8x64xbf16, #tpu.memory_space<vmem>>, vector<1x1x8x64xbf16>
    %33 = vector.shape_cast %32 : vector<1x1x8x64xbf16> to vector<8x64xbf16>
    %34 = vector.shape_cast %31 : vector<8x64xbf16> to vector<1x1x8x64xbf16>
    tpu.vector_store %arg6[%c0_26, %c0_27, %c0_28, %c0_29], %34 {strides = array<i32>} : memref<1x8x8x64xbf16, #tpu.memory_space<vmem>>, vector<1x1x8x64xbf16>,
    %cst_30 = arith.constant 0.000000e+00 : f32
    %35 = vector.broadcast %cst_30 : f32 to vector<8x64xf32>
    %c0_31 = arith.constant 0 : index
    %c0_32 = arith.constant 0 : index
    %c1_33 = arith.constant 1 : index
    %c0_34 = arith.constant 0 : index
    %c0_35 = arith.constant 0 : index
    %36 = vector.load %arg2[%c0_31, %c0_32, %c1_33, %c0_34, %c0_35] : memref<1x1x9x9x256xbf16, #tpu.memory_space<vmem>>, vector<1x1x1x9x256xbf16>
    %37 = vector.shape_cast %36 : vector<1x1x1x9x256xbf16> to vector<9x256xbf16>
    %38 = vector.extract_strided_slice %37 {offsets = [0, 0], sizes = [8, 256], strides = [1, 1]} : vector<9x256xbf16> to vector<8x256xbf16>
    %c0_36 = arith.constant 0 : index
    %c0_37 = arith.constant 0 : index
    %c0_38 = arith.constant 0 : index
    %39 = vector.load %arg3[%c0_36, %c0_37, %c0_38] : memref<4x256x64xbf16, #tpu.memory_space<vmem>>, vector<1x256x64xbf16>
    %40 = vector.shape_cast %39 : vector<1x256x64xbf16> to vector<256x64xbf16>
    %cst_39 = arith.constant dense<0.000000e+00> : vector<8x64xf32>
    %41 = tpu.matmul %38, %40, %cst_39 {dimension_numbers = #tpu.dot_dimension_numbers<[1], [0], [0], [1], [0, 0, 1, 1], [], []>} : vector<8x256xbf16>, vector<256x64xbf16>, vector<8x64xf32> -> vector<8x64xf32>
    %42 = arith.addf %35, %41 : vector<8x64xf32>
    %43 = vector.extract_strided_slice %37 {offsets = [1, 0], sizes = [8, 256], strides = [1, 1]} : vector<9x256xbf16> to vector<8x256xbf16>
    %c1_40 = arith.constant 1 : index
    %c0_41 = arith.constant 0 : index
    %c0_42 = arith.constant 0 : index
    %44 = vector.load %arg3[%c1_40, %c0_41, %c0_42] : memref<4x256x64xbf16, #tpu.memory_space<vmem>>, vector<1x256x64xbf16>
    %45 = vector.shape_cast %44 : vector<1x256x64xbf16> to vector<256x64xbf16>
    %cst_43 = arith.constant dense<0.000000e+00> : vector<8x64xf32>
    %46 = tpu.matmul %43, %45, %cst_43 {dimension_numbers = #tpu.dot_dimension_numbers<[1], [0], [0], [1], [0, 0, 1, 1], [], []>} : vector<8x256xbf16>, vector<256x64xbf16>, vector<8x64xf32> -> vector<8x64xf32>
    %47 = arith.addf %42, %46 : vector<8x64xf32>
    %c0_44 = arith.constant 0 : index
    %c0_45 = arith.constant 0 : index
    %c2_46 = arith.constant 2 : index
    %c0_47 = arith.constant 0 : index
    %c0_48 = arith.constant 0 : index
    %48 = vector.load %arg2[%c0_44, %c0_45, %c2_46, %c0_47, %c0_48] : memref<1x1x9x9x256xbf16, #tpu.memory_space<vmem>>, vector<1x1x1x9x256xbf16>
    %49 = vector.shape_cast %48 : vector<1x1x1x9x256xbf16> to vector<9x256xbf16>
    %50 = vector.extract_strided_slice %49 {offsets = [0, 0], sizes = [8, 256], strides = [1, 1]} : vector<9x256xbf16> to vector<8x256xbf16>
    %c2_49 = arith.constant 2 : index
    %c0_50 = arith.constant 0 : index
    %c0_51 = arith.constant 0 : index
    %51 = vector.load %arg3[%c2_49, %c0_50, %c0_51] : memref<4x256x64xbf16, #tpu.memory_space<vmem>>, vector<1x256x64xbf16>
    %52 = vector.shape_cast %51 : vector<1x256x64xbf16> to vector<256x64xbf16>
    %cst_52 = arith.constant dense<0.000000e+00> : vector<8x64xf32>
    %53 = tpu.matmul %50, %52, %cst_52 {dimension_numbers = #tpu.dot_dimension_numbers<[1], [0], [0], [1], [0, 0, 1, 1], [], []>} : vector<8x256xbf16>, vector<256x64xbf16>, vector<8x64xf32> -> vector<8x64xf32>
    %54 = arith.addf %47, %53 : vector<8x64xf32>
    %55 = vector.extract_strided_slice %49 {offsets = [1, 0], sizes = [8, 256], strides = [1, 1]} : vector<9x256xbf16> to vector<8x256xbf16>
    %c3_53 = arith.constant 3 : index
    %c0_54 = arith.constant 0 : index
    %c0_55 = arith.constant 0 : index
    %56 = vector.load %arg3[%c3_53, %c0_54, %c0_55] : memref<4x256x64xbf16, #tpu.memory_space<vmem>>, vector<1x256x64xbf16>
    %57 = vector.shape_cast %56 : vector<1x256x64xbf16> to vector<256x64xbf16>
    %cst_56 = arith.constant dense<0.000000e+00> : vector<8x64xf32>
    %58 = tpu.matmul %55, %57, %cst_56 {dimension_numbers = #tpu.dot_dimension_numbers<[1], [0], [0], [1], [0, 0, 1, 1], [], []>} : vector<8x256xbf16>, vector<256x64xbf16>, vector<8x64xf32> -> vector<8x64xf32>
    %59 = arith.addf %54, %58 : vector<8x64xf32>
    %60 = vector.broadcast %0 : vector<1x64xf32> to vector<8x64xf32>
    %61 = arith.mulf %59, %60 : vector<8x64xf32>
    %62 = vector.broadcast %1 : vector<1x64xf32> to vector<8x64xf32>
    %63 = arith.addf %61, %62 : vector<8x64xf32>
    %64 = arith.truncf %63 : vector<8x64xf32> to vector<8x64xbf16>
    %c0_57 = arith.constant 0 : index
    %c1_58 = arith.constant 1 : index
    %c0_59 = arith.constant 0 : index
    %c0_60 = arith.constant 0 : index
    %65 = vector.load %arg6[%c0_57, %c1_58, %c0_59, %c0_60] : memref<1x8x8x64xbf16, #tpu.memory_space<vmem>>, vector<1x1x8x64xbf16>
    %66 = vector.shape_cast %65 : vector<1x1x8x64xbf16> to vector<8x64xbf16>
    %67 = vector.shape_cast %64 : vector<8x64xbf16> to vector<1x1x8x64xbf16>
    tpu.vector_store %arg6[%c0_57, %c1_58, %c0_59, %c0_60], %67 {strides = array<i32>} : memref<1x8x8x64xbf16, #tpu.memory_space<vmem>>, vector<1x1x8x64xbf16>,
    %cst_61 = arith.constant 0.000000e+00 : f32
    %68 = vector.broadcast %cst_61 : f32 to vector<8x64xf32>
    %c0_62 = arith.constant 0 : index
    %c0_63 = arith.constant 0 : index
    %c2_64 = arith.constant 2 : index
    %c0_65 = arith.constant 0 : index
    %c0_66 = arith.constant 0 : index
    %69 = vector.load %arg2[%c0_62, %c0_63, %c2_64, %c0_65, %c0_66] : memref<1x1x9x9x256xbf16, #tpu.memory_space<vmem>>, vector<1x1x1x9x256xbf16>
    %70 = vector.shape_cast %69 : vector<1x1x1x9x256xbf16> to vector<9x256xbf16>
    %71 = vector.extract_strided_slice %70 {offsets = [0, 0], sizes = [8, 256], strides = [1, 1]} : vector<9x256xbf16> to vector<8x256xbf16>
    %c0_67 = arith.constant 0 : index
    %c0_68 = arith.constant 0 : index
    %c0_69 = arith.constant 0 : index
    %72 = vector.load %arg3[%c0_67, %c0_68, %c0_69] : memref<4x256x64xbf16, #tpu.memory_space<vmem>>, vector<1x256x64xbf16>
    %73 = vector.shape_cast %72 : vector<1x256x64xbf16> to vector<256x64xbf16>
    %cst_70 = arith.constant dense<0.000000e+00> : vector<8x64xf32>
    %74 = tpu.matmul %71, %73, %cst_70 {dimension_numbers = #tpu.dot_dimension_numbers<[1], [0], [0], [1], [0, 0, 1, 1], [], []>} : vector<8x256xbf16>, vector<256x64xbf16>, vector<8x64xf32> -> vector<8x64xf32>
    %75 = arith.addf %68, %74 : vector<8x64xf32>
    %76 = vector.extract_strided_slice %70 {offsets = [1, 0], sizes = [8, 256], strides = [1, 1]} : vector<9x256xbf16> to vector<8x256xbf16>
    %c1_71 = arith.constant 1 : index
    %c0_72 = arith.constant 0 : index
    %c0_73 = arith.constant 0 : index
    %77 = vector.load %arg3[%c1_71, %c0_72, %c0_73] : memref<4x256x64xbf16, #tpu.memory_space<vmem>>, vector<1x256x64xbf16>
    %78 = vector.shape_cast %77 : vector<1x256x64xbf16> to vector<256x64xbf16>
    %cst_74 = arith.constant dense<0.000000e+00> : vector<8x64xf32>
    %79 = tpu.matmul %76, %78, %cst_74 {dimension_numbers = #tpu.dot_dimension_numbers<[1], [0], [0], [1], [0, 0, 1, 1], [], []>} : vector<8x256xbf16>, vector<256x64xbf16>, vector<8x64xf32> -> vector<8x64xf32>
    %80 = arith.addf %75, %79 : vector<8x64xf32>
    %c0_75 = arith.constant 0 : index
    %c0_76 = arith.constant 0 : index
    %c3_77 = arith.constant 3 : index
    %c0_78 = arith.constant 0 : index
    %c0_79 = arith.constant 0 : index
    %81 = vector.load %arg2[%c0_75, %c0_76, %c3_77, %c0_78, %c0_79] : memref<1x1x9x9x256xbf16, #tpu.memory_space<vmem>>, vector<1x1x1x9x256xbf16>
    %82 = vector.shape_cast %81 : vector<1x1x1x9x256xbf16> to vector<9x256xbf16>
    %83 = vector.extract_strided_slice %82 {offsets = [0, 0], sizes = [8, 256], strides = [1, 1]} : vector<9x256xbf16> to vector<8x256xbf16>
    %c2_80 = arith.constant 2 : index
    %c0_81 = arith.constant 0 : index
    %c0_82 = arith.constant 0 : index
    %84 = vector.load %arg3[%c2_80, %c0_81, %c0_82] : memref<4x256x64xbf16, #tpu.memory_space<vmem>>, vector<1x256x64xbf16>
    %85 = vector.shape_cast %84 : vector<1x256x64xbf16> to vector<256x64xbf16>
    %cst_83 = arith.constant dense<0.000000e+00> : vector<8x64xf32>
    %86 = tpu.matmul %83, %85, %cst_83 {dimension_numbers = #tpu.dot_dimension_numbers<[1], [0], [0], [1], [0, 0, 1, 1], [], []>} : vector<8x256xbf16>, vector<256x64xbf16>, vector<8x64xf32> -> vector<8x64xf32>
    %87 = arith.addf %80, %86 : vector<8x64xf32>
    %88 = vector.extract_strided_slice %82 {offsets = [1, 0], sizes = [8, 256], strides = [1, 1]} : vector<9x256xbf16> to vector<8x256xbf16>
    %c3_84 = arith.constant 3 : index
    %c0_85 = arith.constant 0 : index
    %c0_86 = arith.constant 0 : index
    %89 = vector.load %arg3[%c3_84, %c0_85, %c0_86] : memref<4x256x64xbf16, #tpu.memory_space<vmem>>, vector<1x256x64xbf16>
    %90 = vector.shape_cast %89 : vector<1x256x64xbf16> to vector<256x64xbf16>
    %cst_87 = arith.constant dense<0.000000e+00> : vector<8x64xf32>
    %91 = tpu.matmul %88, %90, %cst_87 {dimension_numbers = #tpu.dot_dimension_numbers<[1], [0], [0], [1], [0, 0, 1, 1], [], []>} : vector<8x256xbf16>, vector<256x64xbf16>, vector<8x64xf32> -> vector<8x64xf32>
    %92 = arith.addf %87, %91 : vector<8x64xf32>
    %93 = vector.broadcast %0 : vector<1x64xf32> to vector<8x64xf32>
    %94 = arith.mulf %92, %93 : vector<8x64xf32>
    %95 = vector.broadcast %1 : vector<1x64xf32> to vector<8x64xf32>
    %96 = arith.addf %94, %95 : vector<8x64xf32>
    %97 = arith.truncf %96 : vector<8x64xf32> to vector<8x64xbf16>
    %c0_88 = arith.constant 0 : index
    %c2_89 = arith.constant 2 : index
    %c0_90 = arith.constant 0 : index
    %c0_91 = arith.constant 0 : index
    %98 = vector.load %arg6[%c0_88, %c2_89, %c0_90, %c0_91] : memref<1x8x8x64xbf16, #tpu.memory_space<vmem>>, vector<1x1x8x64xbf16>
    %99 = vector.shape_cast %98 : vector<1x1x8x64xbf16> to vector<8x64xbf16>
    %100 = vector.shape_cast %97 : vector<8x64xbf16> to vector<1x1x8x64xbf16>
    tpu.vector_store %arg6[%c0_88, %c2_89, %c0_90, %c0_91], %100 {strides = array<i32>} : memref<1x8x8x64xbf16, #tpu.memory_space<vmem>>, vector<1x1x8x64xbf16>,
    %cst_92 = arith.constant 0.000000e+00 : f32
    %101 = vector.broadcast %cst_92 : f32 to vector<8x64xf32>
    %c0_93 = arith.constant 0 : index
    %c0_94 = arith.constant 0 : index
    %c3_95 = arith.constant 3 : index
    %c0_96 = arith.constant 0 : index
    %c0_97 = arith.constant 0 : index
    %102 = vector.load %arg2[%c0_93, %c0_94, %c3_95, %c0_96, %c0_97] : memref<1x1x9x9x256xbf16, #tpu.memory_space<vmem>>, vector<1x1x1x9x256xbf16>
    %103 = vector.shape_cast %102 : vector<1x1x1x9x256xbf16> to vector<9x256xbf16>
    %104 = vector.extract_strided_slice %103 {offsets = [0, 0], sizes = [8, 256], strides = [1, 1]} : vector<9x256xbf16> to vector<8x256xbf16>
    %c0_98 = arith.constant 0 : index
    %c0_99 = arith.constant 0 : index
    %c0_100 = arith.constant 0 : index
    %105 = vector.load %arg3[%c0_98, %c0_99, %c0_100] : memref<4x256x64xbf16, #tpu.memory_space<vmem>>, vector<1x256x64xbf16>
    %106 = vector.shape_cast %105 : vector<1x256x64xbf16> to vector<256x64xbf16>
    %cst_101 = arith.constant dense<0.000000e+00> : vector<8x64xf32>
    %107 = tpu.matmul %104, %106, %cst_101 {dimension_numbers = #tpu.dot_dimension_numbers<[1], [0], [0], [1], [0, 0, 1, 1], [], []>} : vector<8x256xbf16>, vector<256x64xbf16>, vector<8x64xf32> -> vector<8x64xf32>
    %108 = arith.addf %101, %107 : vector<8x64xf32>
    %109 = vector.extract_strided_slice %103 {offsets = [1, 0], sizes = [8, 256], strides = [1, 1]} : vector<9x256xbf16> to vector<8x256xbf16>
    %c1_102 = arith.constant 1 : index
    %c0_103 = arith.constant 0 : index
    %c0_104 = arith.constant 0 : index
    %110 = vector.load %arg3[%c1_102, %c0_103, %c0_104] : memref<4x256x64xbf16, #tpu.memory_space<vmem>>, vector<1x256x64xbf16>
    %111 = vector.shape_cast %110 : vector<1x256x64xbf16> to vector<256x64xbf16>
    %cst_105 = arith.constant dense<0.000000e+00> : vector<8x64xf32>
    %112 = tpu.matmul %109, %111, %cst_105 {dimension_numbers = #tpu.dot_dimension_numbers<[1], [0], [0], [1], [0, 0, 1, 1], [], []>} : vector<8x256xbf16>, vector<256x64xbf16>, vector<8x64xf32> -> vector<8x64xf32>
    %113 = arith.addf %108, %112 : vector<8x64xf32>
    %c0_106 = arith.constant 0 : index
    %c0_107 = arith.constant 0 : index
    %c4 = arith.constant 4 : index
    %c0_108 = arith.constant 0 : index
    %c0_109 = arith.constant 0 : index
    %114 = vector.load %arg2[%c0_106, %c0_107, %c4, %c0_108, %c0_109] : memref<1x1x9x9x256xbf16, #tpu.memory_space<vmem>>, vector<1x1x1x9x256xbf16>
    %115 = vector.shape_cast %114 : vector<1x1x1x9x256xbf16> to vector<9x256xbf16>
    %116 = vector.extract_strided_slice %115 {offsets = [0, 0], sizes = [8, 256], strides = [1, 1]} : vector<9x256xbf16> to vector<8x256xbf16>
    %c2_110 = arith.constant 2 : index
    %c0_111 = arith.constant 0 : index
    %c0_112 = arith.constant 0 : index
    %117 = vector.load %arg3[%c2_110, %c0_111, %c0_112] : memref<4x256x64xbf16, #tpu.memory_space<vmem>>, vector<1x256x64xbf16>
    %118 = vector.shape_cast %117 : vector<1x256x64xbf16> to vector<256x64xbf16>
    %cst_113 = arith.constant dense<0.000000e+00> : vector<8x64xf32>
    %119 = tpu.matmul %116, %118, %cst_113 {dimension_numbers = #tpu.dot_dimension_numbers<[1], [0], [0], [1], [0, 0, 1, 1], [], []>} : vector<8x256xbf16>, vector<256x64xbf16>, vector<8x64xf32> -> vector<8x64xf32>
    %120 = arith.addf %113, %119 : vector<8x64xf32>
    %121 = vector.extract_strided_slice %115 {offsets = [1, 0], sizes = [8, 256], strides = [1, 1]} : vector<9x256xbf16> to vector<8x256xbf16>
    %c3_114 = arith.constant 3 : index
    %c0_115 = arith.constant 0 : index
    %c0_116 = arith.constant 0 : index
    %122 = vector.load %arg3[%c3_114, %c0_115, %c0_116] : memref<4x256x64xbf16, #tpu.memory_space<vmem>>, vector<1x256x64xbf16>
    %123 = vector.shape_cast %122 : vector<1x256x64xbf16> to vector<256x64xbf16>
    %cst_117 = arith.constant dense<0.000000e+00> : vector<8x64xf32>
    %124 = tpu.matmul %121, %123, %cst_117 {dimension_numbers = #tpu.dot_dimension_numbers<[1], [0], [0], [1], [0, 0, 1, 1], [], []>} : vector<8x256xbf16>, vector<256x64xbf16>, vector<8x64xf32> -> vector<8x64xf32>
    %125 = arith.addf %120, %124 : vector<8x64xf32>
    %126 = vector.broadcast %0 : vector<1x64xf32> to vector<8x64xf32>
    %127 = arith.mulf %125, %126 : vector<8x64xf32>
    %128 = vector.broadcast %1 : vector<1x64xf32> to vector<8x64xf32>
    %129 = arith.addf %127, %128 : vector<8x64xf32>
    %130 = arith.truncf %129 : vector<8x64xf32> to vector<8x64xbf16>
    %c0_118 = arith.constant 0 : index
    %c3_119 = arith.constant 3 : index
    %c0_120 = arith.constant 0 : index
    %c0_121 = arith.constant 0 : index
    %131 = vector.load %arg6[%c0_118, %c3_119, %c0_120, %c0_121] : memref<1x8x8x64xbf16, #tpu.memory_space<vmem>>, vector<1x1x8x64xbf16>
    %132 = vector.shape_cast %131 : vector<1x1x8x64xbf16> to vector<8x64xbf16>
    %133 = vector.shape_cast %130 : vector<8x64xbf16> to vector<1x1x8x64xbf16>
    tpu.vector_store %arg6[%c0_118, %c3_119, %c0_120, %c0_121], %133 {strides = array<i32>} : memref<1x8x8x64xbf16, #tpu.memory_space<vmem>>, vector<1x1x8x64xbf16>,
    %cst_122 = arith.constant 0.000000e+00 : f32
    %134 = vector.broadcast %cst_122 : f32 to vector<8x64xf32>
    %c0_123 = arith.constant 0 : index
    %c0_124 = arith.constant 0 : index
    %c4_125 = arith.constant 4 : index
    %c0_126 = arith.constant 0 : index
    %c0_127 = arith.constant 0 : index
    %135 = vector.load %arg2[%c0_123, %c0_124, %c4_125, %c0_126, %c0_127] : memref<1x1x9x9x256xbf16, #tpu.memory_space<vmem>>, vector<1x1x1x9x256xbf16>
    %136 = vector.shape_cast %135 : vector<1x1x1x9x256xbf16> to vector<9x256xbf16>
    %137 = vector.extract_strided_slice %136 {offsets = [0, 0], sizes = [8, 256], strides = [1, 1]} : vector<9x256xbf16> to vector<8x256xbf16>
    %c0_128 = arith.constant 0 : index
    %c0_129 = arith.constant 0 : index
    %c0_130 = arith.constant 0 : index
    %138 = vector.load %arg3[%c0_128, %c0_129, %c0_130] : memref<4x256x64xbf16, #tpu.memory_space<vmem>>, vector<1x256x64xbf16>
    %139 = vector.shape_cast %138 : vector<1x256x64xbf16> to vector<256x64xbf16>
    %cst_131 = arith.constant dense<0.000000e+00> : vector<8x64xf32>
    %140 = tpu.matmul %137, %139, %cst_131 {dimension_numbers = #tpu.dot_dimension_numbers<[1], [0], [0], [1], [0, 0, 1, 1], [], []>} : vector<8x256xbf16>, vector<256x64xbf16>, vector<8x64xf32> -> vector<8x64xf32>
    %141 = arith.addf %134, %140 : vector<8x64xf32>
    %142 = vector.extract_strided_slice %136 {offsets = [1, 0], sizes = [8, 256], strides = [1, 1]} : vector<9x256xbf16> to vector<8x256xbf16>
    %c1_132 = arith.constant 1 : index
    %c0_133 = arith.constant 0 : index
    %c0_134 = arith.constant 0 : index
    %143 = vector.load %arg3[%c1_132, %c0_133, %c0_134] : memref<4x256x64xbf16, #tpu.memory_space<vmem>>, vector<1x256x64xbf16>
    %144 = vector.shape_cast %143 : vector<1x256x64xbf16> to vector<256x64xbf16>
    %cst_135 = arith.constant dense<0.000000e+00> : vector<8x64xf32>
    %145 = tpu.matmul %142, %144, %cst_135 {dimension_numbers = #tpu.dot_dimension_numbers<[1], [0], [0], [1], [0, 0, 1, 1], [], []>} : vector<8x256xbf16>, vector<256x64xbf16>, vector<8x64xf32> -> vector<8x64xf32>
    %146 = arith.addf %141, %145 : vector<8x64xf32>
    %c0_136 = arith.constant 0 : index
    %c0_137 = arith.constant 0 : index
    %c5 = arith.constant 5 : index
    %c0_138 = arith.constant 0 : index
    %c0_139 = arith.constant 0 : index
    %147 = vector.load %arg2[%c0_136, %c0_137, %c5, %c0_138, %c0_139] : memref<1x1x9x9x256xbf16, #tpu.memory_space<vmem>>, vector<1x1x1x9x256xbf16>
    %148 = vector.shape_cast %147 : vector<1x1x1x9x256xbf16> to vector<9x256xbf16>
    %149 = vector.extract_strided_slice %148 {offsets = [0, 0], sizes = [8, 256], strides = [1, 1]} : vector<9x256xbf16> to vector<8x256xbf16>
    %c2_140 = arith.constant 2 : index
    %c0_141 = arith.constant 0 : index
    %c0_142 = arith.constant 0 : index
    %150 = vector.load %arg3[%c2_140, %c0_141, %c0_142] : memref<4x256x64xbf16, #tpu.memory_space<vmem>>, vector<1x256x64xbf16>
    %151 = vector.shape_cast %150 : vector<1x256x64xbf16> to vector<256x64xbf16>
    %cst_143 = arith.constant dense<0.000000e+00> : vector<8x64xf32>
    %152 = tpu.matmul %149, %151, %cst_143 {dimension_numbers = #tpu.dot_dimension_numbers<[1], [0], [0], [1], [0, 0, 1, 1], [], []>} : vector<8x256xbf16>, vector<256x64xbf16>, vector<8x64xf32> -> vector<8x64xf32>
    %153 = arith.addf %146, %152 : vector<8x64xf32>
    %154 = vector.extract_strided_slice %148 {offsets = [1, 0], sizes = [8, 256], strides = [1, 1]} : vector<9x256xbf16> to vector<8x256xbf16>
    %c3_144 = arith.constant 3 : index
    %c0_145 = arith.constant 0 : index
    %c0_146 = arith.constant 0 : index
    %155 = vector.load %arg3[%c3_144, %c0_145, %c0_146] : memref<4x256x64xbf16, #tpu.memory_space<vmem>>, vector<1x256x64xbf16>
    %156 = vector.shape_cast %155 : vector<1x256x64xbf16> to vector<256x64xbf16>
    %cst_147 = arith.constant dense<0.000000e+00> : vector<8x64xf32>
    %157 = tpu.matmul %154, %156, %cst_147 {dimension_numbers = #tpu.dot_dimension_numbers<[1], [0], [0], [1], [0, 0, 1, 1], [], []>} : vector<8x256xbf16>, vector<256x64xbf16>, vector<8x64xf32> -> vector<8x64xf32>
    %158 = arith.addf %153, %157 : vector<8x64xf32>
    %159 = vector.broadcast %0 : vector<1x64xf32> to vector<8x64xf32>
    %160 = arith.mulf %158, %159 : vector<8x64xf32>
    %161 = vector.broadcast %1 : vector<1x64xf32> to vector<8x64xf32>
    %162 = arith.addf %160, %161 : vector<8x64xf32>
    %163 = arith.truncf %162 : vector<8x64xf32> to vector<8x64xbf16>
    %c0_148 = arith.constant 0 : index
    %c4_149 = arith.constant 4 : index
    %c0_150 = arith.constant 0 : index
    %c0_151 = arith.constant 0 : index
    %164 = vector.load %arg6[%c0_148, %c4_149, %c0_150, %c0_151] : memref<1x8x8x64xbf16, #tpu.memory_space<vmem>>, vector<1x1x8x64xbf16>
    %165 = vector.shape_cast %164 : vector<1x1x8x64xbf16> to vector<8x64xbf16>
    %166 = vector.shape_cast %163 : vector<8x64xbf16> to vector<1x1x8x64xbf16>
    tpu.vector_store %arg6[%c0_148, %c4_149, %c0_150, %c0_151], %166 {strides = array<i32>} : memref<1x8x8x64xbf16, #tpu.memory_space<vmem>>, vector<1x1x8x64xbf16>,
    %cst_152 = arith.constant 0.000000e+00 : f32
    %167 = vector.broadcast %cst_152 : f32 to vector<8x64xf32>
    %c0_153 = arith.constant 0 : index
    %c0_154 = arith.constant 0 : index
    %c5_155 = arith.constant 5 : index
    %c0_156 = arith.constant 0 : index
    %c0_157 = arith.constant 0 : index
    %168 = vector.load %arg2[%c0_153, %c0_154, %c5_155, %c0_156, %c0_157] : memref<1x1x9x9x256xbf16, #tpu.memory_space<vmem>>, vector<1x1x1x9x256xbf16>
    %169 = vector.shape_cast %168 : vector<1x1x1x9x256xbf16> to vector<9x256xbf16>
    %170 = vector.extract_strided_slice %169 {offsets = [0, 0], sizes = [8, 256], strides = [1, 1]} : vector<9x256xbf16> to vector<8x256xbf16>
    %c0_158 = arith.constant 0 : index
    %c0_159 = arith.constant 0 : index
    %c0_160 = arith.constant 0 : index
    %171 = vector.load %arg3[%c0_158, %c0_159, %c0_160] : memref<4x256x64xbf16, #tpu.memory_space<vmem>>, vector<1x256x64xbf16>
    %172 = vector.shape_cast %171 : vector<1x256x64xbf16> to vector<256x64xbf16>
    %cst_161 = arith.constant dense<0.000000e+00> : vector<8x64xf32>
    %173 = tpu.matmul %170, %172, %cst_161 {dimension_numbers = #tpu.dot_dimension_numbers<[1], [0], [0], [1], [0, 0, 1, 1], [], []>} : vector<8x256xbf16>, vector<256x64xbf16>, vector<8x64xf32> -> vector<8x64xf32>
    %174 = arith.addf %167, %173 : vector<8x64xf32>
    %175 = vector.extract_strided_slice %169 {offsets = [1, 0], sizes = [8, 256], strides = [1, 1]} : vector<9x256xbf16> to vector<8x256xbf16>
    %c1_162 = arith.constant 1 : index
    %c0_163 = arith.constant 0 : index
    %c0_164 = arith.constant 0 : index
    %176 = vector.load %arg3[%c1_162, %c0_163, %c0_164] : memref<4x256x64xbf16, #tpu.memory_space<vmem>>, vector<1x256x64xbf16>
    %177 = vector.shape_cast %176 : vector<1x256x64xbf16> to vector<256x64xbf16>
    %cst_165 = arith.constant dense<0.000000e+00> : vector<8x64xf32>
    %178 = tpu.matmul %175, %177, %cst_165 {dimension_numbers = #tpu.dot_dimension_numbers<[1], [0], [0], [1], [0, 0, 1, 1], [], []>} : vector<8x256xbf16>, vector<256x64xbf16>, vector<8x64xf32> -> vector<8x64xf32>
    %179 = arith.addf %174, %178 : vector<8x64xf32>
    %c0_166 = arith.constant 0 : index
    %c0_167 = arith.constant 0 : index
    %c6 = arith.constant 6 : index
    %c0_168 = arith.constant 0 : index
    %c0_169 = arith.constant 0 : index
    %180 = vector.load %arg2[%c0_166, %c0_167, %c6, %c0_168, %c0_169] : memref<1x1x9x9x256xbf16, #tpu.memory_space<vmem>>, vector<1x1x1x9x256xbf16>
    %181 = vector.shape_cast %180 : vector<1x1x1x9x256xbf16> to vector<9x256xbf16>
    %182 = vector.extract_strided_slice %181 {offsets = [0, 0], sizes = [8, 256], strides = [1, 1]} : vector<9x256xbf16> to vector<8x256xbf16>
    %c2_170 = arith.constant 2 : index
    %c0_171 = arith.constant 0 : index
    %c0_172 = arith.constant 0 : index
    %183 = vector.load %arg3[%c2_170, %c0_171, %c0_172] : memref<4x256x64xbf16, #tpu.memory_space<vmem>>, vector<1x256x64xbf16>
    %184 = vector.shape_cast %183 : vector<1x256x64xbf16> to vector<256x64xbf16>
    %cst_173 = arith.constant dense<0.000000e+00> : vector<8x64xf32>
    %185 = tpu.matmul %182, %184, %cst_173 {dimension_numbers = #tpu.dot_dimension_numbers<[1], [0], [0], [1], [0, 0, 1, 1], [], []>} : vector<8x256xbf16>, vector<256x64xbf16>, vector<8x64xf32> -> vector<8x64xf32>
    %186 = arith.addf %179, %185 : vector<8x64xf32>
    %187 = vector.extract_strided_slice %181 {offsets = [1, 0], sizes = [8, 256], strides = [1, 1]} : vector<9x256xbf16> to vector<8x256xbf16>
    %c3_174 = arith.constant 3 : index
    %c0_175 = arith.constant 0 : index
    %c0_176 = arith.constant 0 : index
    %188 = vector.load %arg3[%c3_174, %c0_175, %c0_176] : memref<4x256x64xbf16, #tpu.memory_space<vmem>>, vector<1x256x64xbf16>
    %189 = vector.shape_cast %188 : vector<1x256x64xbf16> to vector<256x64xbf16>
    %cst_177 = arith.constant dense<0.000000e+00> : vector<8x64xf32>
    %190 = tpu.matmul %187, %189, %cst_177 {dimension_numbers = #tpu.dot_dimension_numbers<[1], [0], [0], [1], [0, 0, 1, 1], [], []>} : vector<8x256xbf16>, vector<256x64xbf16>, vector<8x64xf32> -> vector<8x64xf32>
    %191 = arith.addf %186, %190 : vector<8x64xf32>
    %192 = vector.broadcast %0 : vector<1x64xf32> to vector<8x64xf32>
    %193 = arith.mulf %191, %192 : vector<8x64xf32>
    %194 = vector.broadcast %1 : vector<1x64xf32> to vector<8x64xf32>
    %195 = arith.addf %193, %194 : vector<8x64xf32>
    %196 = arith.truncf %195 : vector<8x64xf32> to vector<8x64xbf16>
    %c0_178 = arith.constant 0 : index
    %c5_179 = arith.constant 5 : index
    %c0_180 = arith.constant 0 : index
    %c0_181 = arith.constant 0 : index
    %197 = vector.load %arg6[%c0_178, %c5_179, %c0_180, %c0_181] : memref<1x8x8x64xbf16, #tpu.memory_space<vmem>>, vector<1x1x8x64xbf16>
    %198 = vector.shape_cast %197 : vector<1x1x8x64xbf16> to vector<8x64xbf16>
    %199 = vector.shape_cast %196 : vector<8x64xbf16> to vector<1x1x8x64xbf16>
    tpu.vector_store %arg6[%c0_178, %c5_179, %c0_180, %c0_181], %199 {strides = array<i32>} : memref<1x8x8x64xbf16, #tpu.memory_space<vmem>>, vector<1x1x8x64xbf16>,
    %cst_182 = arith.constant 0.000000e+00 : f32
    %200 = vector.broadcast %cst_182 : f32 to vector<8x64xf32>
    %c0_183 = arith.constant 0 : index
    %c0_184 = arith.constant 0 : index
    %c6_185 = arith.constant 6 : index
    %c0_186 = arith.constant 0 : index
    %c0_187 = arith.constant 0 : index
    %201 = vector.load %arg2[%c0_183, %c0_184, %c6_185, %c0_186, %c0_187] : memref<1x1x9x9x256xbf16, #tpu.memory_space<vmem>>, vector<1x1x1x9x256xbf16>
    %202 = vector.shape_cast %201 : vector<1x1x1x9x256xbf16> to vector<9x256xbf16>
    %203 = vector.extract_strided_slice %202 {offsets = [0, 0], sizes = [8, 256], strides = [1, 1]} : vector<9x256xbf16> to vector<8x256xbf16>
    %c0_188 = arith.constant 0 : index
    %c0_189 = arith.constant 0 : index
    %c0_190 = arith.constant 0 : index
    %204 = vector.load %arg3[%c0_188, %c0_189, %c0_190] : memref<4x256x64xbf16, #tpu.memory_space<vmem>>, vector<1x256x64xbf16>
    %205 = vector.shape_cast %204 : vector<1x256x64xbf16> to vector<256x64xbf16>
    %cst_191 = arith.constant dense<0.000000e+00> : vector<8x64xf32>
    %206 = tpu.matmul %203, %205, %cst_191 {dimension_numbers = #tpu.dot_dimension_numbers<[1], [0], [0], [1], [0, 0, 1, 1], [], []>} : vector<8x256xbf16>, vector<256x64xbf16>, vector<8x64xf32> -> vector<8x64xf32>
    %207 = arith.addf %200, %206 : vector<8x64xf32>
    %208 = vector.extract_strided_slice %202 {offsets = [1, 0], sizes = [8, 256], strides = [1, 1]} : vector<9x256xbf16> to vector<8x256xbf16>
    %c1_192 = arith.constant 1 : index
    %c0_193 = arith.constant 0 : index
    %c0_194 = arith.constant 0 : index
    %209 = vector.load %arg3[%c1_192, %c0_193, %c0_194] : memref<4x256x64xbf16, #tpu.memory_space<vmem>>, vector<1x256x64xbf16>
    %210 = vector.shape_cast %209 : vector<1x256x64xbf16> to vector<256x64xbf16>
    %cst_195 = arith.constant dense<0.000000e+00> : vector<8x64xf32>
    %211 = tpu.matmul %208, %210, %cst_195 {dimension_numbers = #tpu.dot_dimension_numbers<[1], [0], [0], [1], [0, 0, 1, 1], [], []>} : vector<8x256xbf16>, vector<256x64xbf16>, vector<8x64xf32> -> vector<8x64xf32>
    %212 = arith.addf %207, %211 : vector<8x64xf32>
    %c0_196 = arith.constant 0 : index
    %c0_197 = arith.constant 0 : index
    %c7 = arith.constant 7 : index
    %c0_198 = arith.constant 0 : index
    %c0_199 = arith.constant 0 : index
    %213 = vector.load %arg2[%c0_196, %c0_197, %c7, %c0_198, %c0_199] : memref<1x1x9x9x256xbf16, #tpu.memory_space<vmem>>, vector<1x1x1x9x256xbf16>
    %214 = vector.shape_cast %213 : vector<1x1x1x9x256xbf16> to vector<9x256xbf16>
    %215 = vector.extract_strided_slice %214 {offsets = [0, 0], sizes = [8, 256], strides = [1, 1]} : vector<9x256xbf16> to vector<8x256xbf16>
    %c2_200 = arith.constant 2 : index
    %c0_201 = arith.constant 0 : index
    %c0_202 = arith.constant 0 : index
    %216 = vector.load %arg3[%c2_200, %c0_201, %c0_202] : memref<4x256x64xbf16, #tpu.memory_space<vmem>>, vector<1x256x64xbf16>
    %217 = vector.shape_cast %216 : vector<1x256x64xbf16> to vector<256x64xbf16>
    %cst_203 = arith.constant dense<0.000000e+00> : vector<8x64xf32>
    %218 = tpu.matmul %215, %217, %cst_203 {dimension_numbers = #tpu.dot_dimension_numbers<[1], [0], [0], [1], [0, 0, 1, 1], [], []>} : vector<8x256xbf16>, vector<256x64xbf16>, vector<8x64xf32> -> vector<8x64xf32>
    %219 = arith.addf %212, %218 : vector<8x64xf32>
    %220 = vector.extract_strided_slice %214 {offsets = [1, 0], sizes = [8, 256], strides = [1, 1]} : vector<9x256xbf16> to vector<8x256xbf16>
    %c3_204 = arith.constant 3 : index
    %c0_205 = arith.constant 0 : index
    %c0_206 = arith.constant 0 : index
    %221 = vector.load %arg3[%c3_204, %c0_205, %c0_206] : memref<4x256x64xbf16, #tpu.memory_space<vmem>>, vector<1x256x64xbf16>
    %222 = vector.shape_cast %221 : vector<1x256x64xbf16> to vector<256x64xbf16>
    %cst_207 = arith.constant dense<0.000000e+00> : vector<8x64xf32>
    %223 = tpu.matmul %220, %222, %cst_207 {dimension_numbers = #tpu.dot_dimension_numbers<[1], [0], [0], [1], [0, 0, 1, 1], [], []>} : vector<8x256xbf16>, vector<256x64xbf16>, vector<8x64xf32> -> vector<8x64xf32>
    %224 = arith.addf %219, %223 : vector<8x64xf32>
    %225 = vector.broadcast %0 : vector<1x64xf32> to vector<8x64xf32>
    %226 = arith.mulf %224, %225 : vector<8x64xf32>
    %227 = vector.broadcast %1 : vector<1x64xf32> to vector<8x64xf32>
    %228 = arith.addf %226, %227 : vector<8x64xf32>
    %229 = arith.truncf %228 : vector<8x64xf32> to vector<8x64xbf16>
    %c0_208 = arith.constant 0 : index
    %c6_209 = arith.constant 6 : index
    %c0_210 = arith.constant 0 : index
    %c0_211 = arith.constant 0 : index
    %230 = vector.load %arg6[%c0_208, %c6_209, %c0_210, %c0_211] : memref<1x8x8x64xbf16, #tpu.memory_space<vmem>>, vector<1x1x8x64xbf16>
    %231 = vector.shape_cast %230 : vector<1x1x8x64xbf16> to vector<8x64xbf16>
    %232 = vector.shape_cast %229 : vector<8x64xbf16> to vector<1x1x8x64xbf16>
    tpu.vector_store %arg6[%c0_208, %c6_209, %c0_210, %c0_211], %232 {strides = array<i32>} : memref<1x8x8x64xbf16, #tpu.memory_space<vmem>>, vector<1x1x8x64xbf16>,
    %cst_212 = arith.constant 0.000000e+00 : f32
    %233 = vector.broadcast %cst_212 : f32 to vector<8x64xf32>
    %c0_213 = arith.constant 0 : index
    %c0_214 = arith.constant 0 : index
    %c7_215 = arith.constant 7 : index
    %c0_216 = arith.constant 0 : index
    %c0_217 = arith.constant 0 : index
    %234 = vector.load %arg2[%c0_213, %c0_214, %c7_215, %c0_216, %c0_217] : memref<1x1x9x9x256xbf16, #tpu.memory_space<vmem>>, vector<1x1x1x9x256xbf16>
    %235 = vector.shape_cast %234 : vector<1x1x1x9x256xbf16> to vector<9x256xbf16>
    %236 = vector.extract_strided_slice %235 {offsets = [0, 0], sizes = [8, 256], strides = [1, 1]} : vector<9x256xbf16> to vector<8x256xbf16>
    %c0_218 = arith.constant 0 : index
    %c0_219 = arith.constant 0 : index
    %c0_220 = arith.constant 0 : index
    %237 = vector.load %arg3[%c0_218, %c0_219, %c0_220] : memref<4x256x64xbf16, #tpu.memory_space<vmem>>, vector<1x256x64xbf16>
    %238 = vector.shape_cast %237 : vector<1x256x64xbf16> to vector<256x64xbf16>
    %cst_221 = arith.constant dense<0.000000e+00> : vector<8x64xf32>
    %239 = tpu.matmul %236, %238, %cst_221 {dimension_numbers = #tpu.dot_dimension_numbers<[1], [0], [0], [1], [0, 0, 1, 1], [], []>} : vector<8x256xbf16>, vector<256x64xbf16>, vector<8x64xf32> -> vector<8x64xf32>
    %240 = arith.addf %233, %239 : vector<8x64xf32>
    %241 = vector.extract_strided_slice %235 {offsets = [1, 0], sizes = [8, 256], strides = [1, 1]} : vector<9x256xbf16> to vector<8x256xbf16>
    %c1_222 = arith.constant 1 : index
    %c0_223 = arith.constant 0 : index
    %c0_224 = arith.constant 0 : index
    %242 = vector.load %arg3[%c1_222, %c0_223, %c0_224] : memref<4x256x64xbf16, #tpu.memory_space<vmem>>, vector<1x256x64xbf16>
    %243 = vector.shape_cast %242 : vector<1x256x64xbf16> to vector<256x64xbf16>
    %cst_225 = arith.constant dense<0.000000e+00> : vector<8x64xf32>
    %244 = tpu.matmul %241, %243, %cst_225 {dimension_numbers = #tpu.dot_dimension_numbers<[1], [0], [0], [1], [0, 0, 1, 1], [], []>} : vector<8x256xbf16>, vector<256x64xbf16>, vector<8x64xf32> -> vector<8x64xf32>
    %245 = arith.addf %240, %244 : vector<8x64xf32>
    %c0_226 = arith.constant 0 : index
    %c0_227 = arith.constant 0 : index
    %c8 = arith.constant 8 : index
    %c0_228 = arith.constant 0 : index
    %c0_229 = arith.constant 0 : index
    %246 = vector.load %arg2[%c0_226, %c0_227, %c8, %c0_228, %c0_229] : memref<1x1x9x9x256xbf16, #tpu.memory_space<vmem>>, vector<1x1x1x9x256xbf16>
    %247 = vector.shape_cast %246 : vector<1x1x1x9x256xbf16> to vector<9x256xbf16>
    %248 = vector.extract_strided_slice %247 {offsets = [0, 0], sizes = [8, 256], strides = [1, 1]} : vector<9x256xbf16> to vector<8x256xbf16>
    %c2_230 = arith.constant 2 : index
    %c0_231 = arith.constant 0 : index
    %c0_232 = arith.constant 0 : index
    %249 = vector.load %arg3[%c2_230, %c0_231, %c0_232] : memref<4x256x64xbf16, #tpu.memory_space<vmem>>, vector<1x256x64xbf16>
    %250 = vector.shape_cast %249 : vector<1x256x64xbf16> to vector<256x64xbf16>
    %cst_233 = arith.constant dense<0.000000e+00> : vector<8x64xf32>
    %251 = tpu.matmul %248, %250, %cst_233 {dimension_numbers = #tpu.dot_dimension_numbers<[1], [0], [0], [1], [0, 0, 1, 1], [], []>} : vector<8x256xbf16>, vector<256x64xbf16>, vector<8x64xf32> -> vector<8x64xf32>
    %252 = arith.addf %245, %251 : vector<8x64xf32>
    %253 = vector.extract_strided_slice %247 {offsets = [1, 0], sizes = [8, 256], strides = [1, 1]} : vector<9x256xbf16> to vector<8x256xbf16>
    %c3_234 = arith.constant 3 : index
    %c0_235 = arith.constant 0 : index
    %c0_236 = arith.constant 0 : index
    %254 = vector.load %arg3[%c3_234, %c0_235, %c0_236] : memref<4x256x64xbf16, #tpu.memory_space<vmem>>, vector<1x256x64xbf16>
    %255 = vector.shape_cast %254 : vector<1x256x64xbf16> to vector<256x64xbf16>
    %cst_237 = arith.constant dense<0.000000e+00> : vector<8x64xf32>
    %256 = tpu.matmul %253, %255, %cst_237 {dimension_numbers = #tpu.dot_dimension_numbers<[1], [0], [0], [1], [0, 0, 1, 1], [], []>} : vector<8x256xbf16>, vector<256x64xbf16>, vector<8x64xf32> -> vector<8x64xf32>
    %257 = arith.addf %252, %256 : vector<8x64xf32>
    %258 = vector.broadcast %0 : vector<1x64xf32> to vector<8x64xf32>
    %259 = arith.mulf %257, %258 : vector<8x64xf32>
    %260 = vector.broadcast %1 : vector<1x64xf32> to vector<8x64xf32>
    %261 = arith.addf %259, %260 : vector<8x64xf32>
    %262 = arith.truncf %261 : vector<8x64xf32> to vector<8x64xbf16>
    %c0_238 = arith.constant 0 : index
    %c7_239 = arith.constant 7 : index
    %c0_240 = arith.constant 0 : index
    %c0_241 = arith.constant 0 : index
    %263 = vector.load %arg6[%c0_238, %c7_239, %c0_240, %c0_241] : memref<1x8x8x64xbf16, #tpu.memory_space<vmem>>, vector<1x1x8x64xbf16>
    %264 = vector.shape_cast %263 : vector<1x1x8x64xbf16> to vector<8x64xbf16>
    %265 = vector.shape_cast %262 : vector<8x64xbf16> to vector<1x1x8x64xbf16>
    tpu.vector_store %arg6[%c0_238, %c7_239, %c0_240, %c0_241], %265 {strides = array<i32>} : memref<1x8x8x64xbf16, #tpu.memory_space<vmem>>, vector<1x1x8x64xbf16>,
    return
  }
  func.func @transform_0(%arg0: i32, %arg1: i32) -> (i32, i32, i32, i32, i32) {
    %c0_i32 = arith.constant 0 : i32
    %c0_i32_0 = arith.constant 0 : i32
    %c0_i32_1 = arith.constant 0 : i32
    %c0_i32_2 = arith.constant 0 : i32
    return %arg0, %arg1, %c0_i32, %c0_i32_0, %c0_i32_1 : i32, i32, i32, i32, i32
  }
  func.func @transform_1(%arg0: i32, %arg1: i32) -> (i32, i32, i32) {
    %c0_i32 = arith.constant 0 : i32
    %c0_i32_0 = arith.constant 0 : i32
    %c0_i32_1 = arith.constant 0 : i32
    %c0_i32_2 = arith.constant 0 : i32
    return %c0_i32, %c0_i32_0, %c0_i32_1 : i32, i32, i32
  }
  func.func @transform_2(%arg0: i32, %arg1: i32) -> (i32, i32) {
    %c0_i32 = arith.constant 0 : i32
    %c0_i32_0 = arith.constant 0 : i32
    %c0_i32_1 = arith.constant 0 : i32
    return %c0_i32, %c0_i32_0 : i32, i32
  }
  func.func @transform_3(%arg0: i32, %arg1: i32) -> (i32, i32) {
    %c0_i32 = arith.constant 0 : i32
    %c0_i32_0 = arith.constant 0 : i32
    %c0_i32_1 = arith.constant 0 : i32
    return %c0_i32, %c0_i32_0 : i32, i32
  }
  func.func @transform_4(%arg0: i32, %arg1: i32) -> (i32, i32, i32, i32) {
    %c0_i32 = arith.constant 0 : i32
    %c0_i32_0 = arith.constant 0 : i32
    %c0_i32_1 = arith.constant 0 : i32
    return %arg0, %arg1, %c0_i32, %c0_i32_0 : i32, i32, i32, i32
  }
}

module attributes {stable_mosaic.version = 11 : i64} {
  func.func @kernel(%arg0: i32, %arg1: i32, %arg2: memref<1x1x5x5x256xbf16, #tpu.memory_space<vmem>>, %arg3: memref<4x256x64xbf16, #tpu.memory_space<vmem>>, %arg4: memref<1x64xf32, #tpu.memory_space<vmem>>, %arg5: memref<1x64xf32, #tpu.memory_space<vmem>>, %arg6: memref<64x128xbf16, #tpu.memory_space<vmem>>, %arg7: memref<1x128xf32, #tpu.memory_space<vmem>>, %arg8: memref<1x128xf32, #tpu.memory_space<vmem>>, %arg9: memref<1x4x4x128xf32, #tpu.memory_space<vmem>>) attributes {dimension_semantics = [#tpu.dimension_semantics<parallel>, #tpu.dimension_semantics<parallel>], iteration_bounds = array<i64: 2, 1>, scalar_prefetch = 0 : i64, scratch_operands = 0 : i64, tpu.core_type = #tpu.core_type<tc>, window_params = [{transform_indices = @transform_0, window_bounds = array<i64: 1, 1, 5, 5, 256>}, {pipeline_mode = #tpu.pipeline_mode<synchronous>, transform_indices = @transform_1, window_bounds = array<i64: 4, 256, 64>}, {pipeline_mode = #tpu.pipeline_mode<synchronous>, transform_indices = @transform_2, window_bounds = array<i64: 1, 64>}, {pipeline_mode = #tpu.pipeline_mode<synchronous>, transform_indices = @transform_3, window_bounds = array<i64: 1, 64>}, {pipeline_mode = #tpu.pipeline_mode<synchronous>, transform_indices = @transform_4, window_bounds = array<i64: 64, 128>}, {pipeline_mode = #tpu.pipeline_mode<synchronous>, transform_indices = @transform_5, window_bounds = array<i64: 1, 128>}, {pipeline_mode = #tpu.pipeline_mode<synchronous>, transform_indices = @transform_6, window_bounds = array<i64: 1, 128>}, {transform_indices = @transform_7, window_bounds = array<i64: 1, 4, 4, 128>}]} {
    %c0 = arith.constant 0 : index
    %c0_0 = arith.constant 0 : index
    %0 = vector.load %arg4[%c0, %c0_0] : memref<1x64xf32, #tpu.memory_space<vmem>>, vector<1x64xf32>
    %c0_1 = arith.constant 0 : index
    %c0_2 = arith.constant 0 : index
    %1 = vector.load %arg5[%c0_1, %c0_2] : memref<1x64xf32, #tpu.memory_space<vmem>>, vector<1x64xf32>
    %c0_3 = arith.constant 0 : index
    %c0_4 = arith.constant 0 : index
    %2 = vector.load %arg6[%c0_3, %c0_4] : memref<64x128xbf16, #tpu.memory_space<vmem>>, vector<64x128xbf16>
    %c0_5 = arith.constant 0 : index
    %c0_6 = arith.constant 0 : index
    %3 = vector.load %arg7[%c0_5, %c0_6] : memref<1x128xf32, #tpu.memory_space<vmem>>, vector<1x128xf32>
    %c0_7 = arith.constant 0 : index
    %c0_8 = arith.constant 0 : index
    %4 = vector.load %arg8[%c0_7, %c0_8] : memref<1x128xf32, #tpu.memory_space<vmem>>, vector<1x128xf32>
    %cst = arith.constant 0.000000e+00 : f32
    %5 = vector.broadcast %cst : f32 to vector<4x64xf32>
    %c0_9 = arith.constant 0 : index
    %c0_10 = arith.constant 0 : index
    %c0_11 = arith.constant 0 : index
    %c0_12 = arith.constant 0 : index
    %c0_13 = arith.constant 0 : index
    %6 = vector.load %arg2[%c0_9, %c0_10, %c0_11, %c0_12, %c0_13] : memref<1x1x5x5x256xbf16, #tpu.memory_space<vmem>>, vector<1x1x1x5x256xbf16>
    %7 = vector.shape_cast %6 : vector<1x1x1x5x256xbf16> to vector<5x256xbf16>
    %8 = vector.extract_strided_slice %7 {offsets = [0, 0], sizes = [4, 256], strides = [1, 1]} : vector<5x256xbf16> to vector<4x256xbf16>
    %c0_14 = arith.constant 0 : index
    %c0_15 = arith.constant 0 : index
    %c0_16 = arith.constant 0 : index
    %9 = vector.load %arg3[%c0_14, %c0_15, %c0_16] : memref<4x256x64xbf16, #tpu.memory_space<vmem>>, vector<1x256x64xbf16>
    %10 = vector.shape_cast %9 : vector<1x256x64xbf16> to vector<256x64xbf16>
    %cst_17 = arith.constant dense<0.000000e+00> : vector<4x64xf32>
    %11 = tpu.matmul %8, %10, %cst_17 {dimension_numbers = #tpu.dot_dimension_numbers<[1], [0], [0], [1], [0, 0, 1, 1], [], []>} : vector<4x256xbf16>, vector<256x64xbf16>, vector<4x64xf32> -> vector<4x64xf32>
    %12 = arith.addf %5, %11 : vector<4x64xf32>
    %13 = vector.extract_strided_slice %7 {offsets = [1, 0], sizes = [4, 256], strides = [1, 1]} : vector<5x256xbf16> to vector<4x256xbf16>
    %c1 = arith.constant 1 : index
    %c0_18 = arith.constant 0 : index
    %c0_19 = arith.constant 0 : index
    %14 = vector.load %arg3[%c1, %c0_18, %c0_19] : memref<4x256x64xbf16, #tpu.memory_space<vmem>>, vector<1x256x64xbf16>
    %15 = vector.shape_cast %14 : vector<1x256x64xbf16> to vector<256x64xbf16>
    %cst_20 = arith.constant dense<0.000000e+00> : vector<4x64xf32>
    %16 = tpu.matmul %13, %15, %cst_20 {dimension_numbers = #tpu.dot_dimension_numbers<[1], [0], [0], [1], [0, 0, 1, 1], [], []>} : vector<4x256xbf16>, vector<256x64xbf16>, vector<4x64xf32> -> vector<4x64xf32>
    %17 = arith.addf %12, %16 : vector<4x64xf32>
    %c0_21 = arith.constant 0 : index
    %c0_22 = arith.constant 0 : index
    %c1_23 = arith.constant 1 : index
    %c0_24 = arith.constant 0 : index
    %c0_25 = arith.constant 0 : index
    %18 = vector.load %arg2[%c0_21, %c0_22, %c1_23, %c0_24, %c0_25] : memref<1x1x5x5x256xbf16, #tpu.memory_space<vmem>>, vector<1x1x1x5x256xbf16>
    %19 = vector.shape_cast %18 : vector<1x1x1x5x256xbf16> to vector<5x256xbf16>
    %20 = vector.extract_strided_slice %19 {offsets = [0, 0], sizes = [4, 256], strides = [1, 1]} : vector<5x256xbf16> to vector<4x256xbf16>
    %c2 = arith.constant 2 : index
    %c0_26 = arith.constant 0 : index
    %c0_27 = arith.constant 0 : index
    %21 = vector.load %arg3[%c2, %c0_26, %c0_27] : memref<4x256x64xbf16, #tpu.memory_space<vmem>>, vector<1x256x64xbf16>
    %22 = vector.shape_cast %21 : vector<1x256x64xbf16> to vector<256x64xbf16>
    %cst_28 = arith.constant dense<0.000000e+00> : vector<4x64xf32>
    %23 = tpu.matmul %20, %22, %cst_28 {dimension_numbers = #tpu.dot_dimension_numbers<[1], [0], [0], [1], [0, 0, 1, 1], [], []>} : vector<4x256xbf16>, vector<256x64xbf16>, vector<4x64xf32> -> vector<4x64xf32>
    %24 = arith.addf %17, %23 : vector<4x64xf32>
    %25 = vector.extract_strided_slice %19 {offsets = [1, 0], sizes = [4, 256], strides = [1, 1]} : vector<5x256xbf16> to vector<4x256xbf16>
    %c3 = arith.constant 3 : index
    %c0_29 = arith.constant 0 : index
    %c0_30 = arith.constant 0 : index
    %26 = vector.load %arg3[%c3, %c0_29, %c0_30] : memref<4x256x64xbf16, #tpu.memory_space<vmem>>, vector<1x256x64xbf16>
    %27 = vector.shape_cast %26 : vector<1x256x64xbf16> to vector<256x64xbf16>
    %cst_31 = arith.constant dense<0.000000e+00> : vector<4x64xf32>
    %28 = tpu.matmul %25, %27, %cst_31 {dimension_numbers = #tpu.dot_dimension_numbers<[1], [0], [0], [1], [0, 0, 1, 1], [], []>} : vector<4x256xbf16>, vector<256x64xbf16>, vector<4x64xf32> -> vector<4x64xf32>
    %29 = arith.addf %24, %28 : vector<4x64xf32>
    %30 = vector.broadcast %0 : vector<1x64xf32> to vector<4x64xf32>
    %31 = arith.mulf %29, %30 : vector<4x64xf32>
    %32 = vector.broadcast %1 : vector<1x64xf32> to vector<4x64xf32>
    %33 = arith.addf %31, %32 : vector<4x64xf32>
    %34 = arith.truncf %33 : vector<4x64xf32> to vector<4x64xbf16>
    %cst_32 = arith.constant dense<0.000000e+00> : vector<4x128xf32>
    %35 = tpu.matmul %34, %2, %cst_32 {dimension_numbers = #tpu.dot_dimension_numbers<[1], [0], [0], [1], [0, 0, 1, 1], [], []>} : vector<4x64xbf16>, vector<64x128xbf16>, vector<4x128xf32> -> vector<4x128xf32>
    %36 = vector.broadcast %3 : vector<1x128xf32> to vector<4x128xf32>
    %37 = arith.mulf %35, %36 : vector<4x128xf32>
    %38 = vector.broadcast %4 : vector<1x128xf32> to vector<4x128xf32>
    %39 = arith.addf %37, %38 : vector<4x128xf32>
    %c0_33 = arith.constant 0 : index
    %c0_34 = arith.constant 0 : index
    %c0_35 = arith.constant 0 : index
    %c0_36 = arith.constant 0 : index
    %40 = vector.load %arg9[%c0_33, %c0_34, %c0_35, %c0_36] : memref<1x4x4x128xf32, #tpu.memory_space<vmem>>, vector<1x1x4x128xf32>
    %41 = vector.shape_cast %40 : vector<1x1x4x128xf32> to vector<4x128xf32>
    %42 = vector.shape_cast %39 : vector<4x128xf32> to vector<1x1x4x128xf32>
    tpu.vector_store %arg9[%c0_33, %c0_34, %c0_35, %c0_36], %42 {strides = array<i32>} : memref<1x4x4x128xf32, #tpu.memory_space<vmem>>, vector<1x1x4x128xf32>,
    %cst_37 = arith.constant 0.000000e+00 : f32
    %43 = vector.broadcast %cst_37 : f32 to vector<4x64xf32>
    %c0_38 = arith.constant 0 : index
    %c0_39 = arith.constant 0 : index
    %c1_40 = arith.constant 1 : index
    %c0_41 = arith.constant 0 : index
    %c0_42 = arith.constant 0 : index
    %44 = vector.load %arg2[%c0_38, %c0_39, %c1_40, %c0_41, %c0_42] : memref<1x1x5x5x256xbf16, #tpu.memory_space<vmem>>, vector<1x1x1x5x256xbf16>
    %45 = vector.shape_cast %44 : vector<1x1x1x5x256xbf16> to vector<5x256xbf16>
    %46 = vector.extract_strided_slice %45 {offsets = [0, 0], sizes = [4, 256], strides = [1, 1]} : vector<5x256xbf16> to vector<4x256xbf16>
    %c0_43 = arith.constant 0 : index
    %c0_44 = arith.constant 0 : index
    %c0_45 = arith.constant 0 : index
    %47 = vector.load %arg3[%c0_43, %c0_44, %c0_45] : memref<4x256x64xbf16, #tpu.memory_space<vmem>>, vector<1x256x64xbf16>
    %48 = vector.shape_cast %47 : vector<1x256x64xbf16> to vector<256x64xbf16>
    %cst_46 = arith.constant dense<0.000000e+00> : vector<4x64xf32>
    %49 = tpu.matmul %46, %48, %cst_46 {dimension_numbers = #tpu.dot_dimension_numbers<[1], [0], [0], [1], [0, 0, 1, 1], [], []>} : vector<4x256xbf16>, vector<256x64xbf16>, vector<4x64xf32> -> vector<4x64xf32>
    %50 = arith.addf %43, %49 : vector<4x64xf32>
    %51 = vector.extract_strided_slice %45 {offsets = [1, 0], sizes = [4, 256], strides = [1, 1]} : vector<5x256xbf16> to vector<4x256xbf16>
    %c1_47 = arith.constant 1 : index
    %c0_48 = arith.constant 0 : index
    %c0_49 = arith.constant 0 : index
    %52 = vector.load %arg3[%c1_47, %c0_48, %c0_49] : memref<4x256x64xbf16, #tpu.memory_space<vmem>>, vector<1x256x64xbf16>
    %53 = vector.shape_cast %52 : vector<1x256x64xbf16> to vector<256x64xbf16>
    %cst_50 = arith.constant dense<0.000000e+00> : vector<4x64xf32>
    %54 = tpu.matmul %51, %53, %cst_50 {dimension_numbers = #tpu.dot_dimension_numbers<[1], [0], [0], [1], [0, 0, 1, 1], [], []>} : vector<4x256xbf16>, vector<256x64xbf16>, vector<4x64xf32> -> vector<4x64xf32>
    %55 = arith.addf %50, %54 : vector<4x64xf32>
    %c0_51 = arith.constant 0 : index
    %c0_52 = arith.constant 0 : index
    %c2_53 = arith.constant 2 : index
    %c0_54 = arith.constant 0 : index
    %c0_55 = arith.constant 0 : index
    %56 = vector.load %arg2[%c0_51, %c0_52, %c2_53, %c0_54, %c0_55] : memref<1x1x5x5x256xbf16, #tpu.memory_space<vmem>>, vector<1x1x1x5x256xbf16>
    %57 = vector.shape_cast %56 : vector<1x1x1x5x256xbf16> to vector<5x256xbf16>
    %58 = vector.extract_strided_slice %57 {offsets = [0, 0], sizes = [4, 256], strides = [1, 1]} : vector<5x256xbf16> to vector<4x256xbf16>
    %c2_56 = arith.constant 2 : index
    %c0_57 = arith.constant 0 : index
    %c0_58 = arith.constant 0 : index
    %59 = vector.load %arg3[%c2_56, %c0_57, %c0_58] : memref<4x256x64xbf16, #tpu.memory_space<vmem>>, vector<1x256x64xbf16>
    %60 = vector.shape_cast %59 : vector<1x256x64xbf16> to vector<256x64xbf16>
    %cst_59 = arith.constant dense<0.000000e+00> : vector<4x64xf32>
    %61 = tpu.matmul %58, %60, %cst_59 {dimension_numbers = #tpu.dot_dimension_numbers<[1], [0], [0], [1], [0, 0, 1, 1], [], []>} : vector<4x256xbf16>, vector<256x64xbf16>, vector<4x64xf32> -> vector<4x64xf32>
    %62 = arith.addf %55, %61 : vector<4x64xf32>
    %63 = vector.extract_strided_slice %57 {offsets = [1, 0], sizes = [4, 256], strides = [1, 1]} : vector<5x256xbf16> to vector<4x256xbf16>
    %c3_60 = arith.constant 3 : index
    %c0_61 = arith.constant 0 : index
    %c0_62 = arith.constant 0 : index
    %64 = vector.load %arg3[%c3_60, %c0_61, %c0_62] : memref<4x256x64xbf16, #tpu.memory_space<vmem>>, vector<1x256x64xbf16>
    %65 = vector.shape_cast %64 : vector<1x256x64xbf16> to vector<256x64xbf16>
    %cst_63 = arith.constant dense<0.000000e+00> : vector<4x64xf32>
    %66 = tpu.matmul %63, %65, %cst_63 {dimension_numbers = #tpu.dot_dimension_numbers<[1], [0], [0], [1], [0, 0, 1, 1], [], []>} : vector<4x256xbf16>, vector<256x64xbf16>, vector<4x64xf32> -> vector<4x64xf32>
    %67 = arith.addf %62, %66 : vector<4x64xf32>
    %68 = vector.broadcast %0 : vector<1x64xf32> to vector<4x64xf32>
    %69 = arith.mulf %67, %68 : vector<4x64xf32>
    %70 = vector.broadcast %1 : vector<1x64xf32> to vector<4x64xf32>
    %71 = arith.addf %69, %70 : vector<4x64xf32>
    %72 = arith.truncf %71 : vector<4x64xf32> to vector<4x64xbf16>
    %cst_64 = arith.constant dense<0.000000e+00> : vector<4x128xf32>
    %73 = tpu.matmul %72, %2, %cst_64 {dimension_numbers = #tpu.dot_dimension_numbers<[1], [0], [0], [1], [0, 0, 1, 1], [], []>} : vector<4x64xbf16>, vector<64x128xbf16>, vector<4x128xf32> -> vector<4x128xf32>
    %74 = vector.broadcast %3 : vector<1x128xf32> to vector<4x128xf32>
    %75 = arith.mulf %73, %74 : vector<4x128xf32>
    %76 = vector.broadcast %4 : vector<1x128xf32> to vector<4x128xf32>
    %77 = arith.addf %75, %76 : vector<4x128xf32>
    %c0_65 = arith.constant 0 : index
    %c1_66 = arith.constant 1 : index
    %c0_67 = arith.constant 0 : index
    %c0_68 = arith.constant 0 : index
    %78 = vector.load %arg9[%c0_65, %c1_66, %c0_67, %c0_68] : memref<1x4x4x128xf32, #tpu.memory_space<vmem>>, vector<1x1x4x128xf32>
    %79 = vector.shape_cast %78 : vector<1x1x4x128xf32> to vector<4x128xf32>
    %80 = vector.shape_cast %77 : vector<4x128xf32> to vector<1x1x4x128xf32>
    tpu.vector_store %arg9[%c0_65, %c1_66, %c0_67, %c0_68], %80 {strides = array<i32>} : memref<1x4x4x128xf32, #tpu.memory_space<vmem>>, vector<1x1x4x128xf32>,
    %cst_69 = arith.constant 0.000000e+00 : f32
    %81 = vector.broadcast %cst_69 : f32 to vector<4x64xf32>
    %c0_70 = arith.constant 0 : index
    %c0_71 = arith.constant 0 : index
    %c2_72 = arith.constant 2 : index
    %c0_73 = arith.constant 0 : index
    %c0_74 = arith.constant 0 : index
    %82 = vector.load %arg2[%c0_70, %c0_71, %c2_72, %c0_73, %c0_74] : memref<1x1x5x5x256xbf16, #tpu.memory_space<vmem>>, vector<1x1x1x5x256xbf16>
    %83 = vector.shape_cast %82 : vector<1x1x1x5x256xbf16> to vector<5x256xbf16>
    %84 = vector.extract_strided_slice %83 {offsets = [0, 0], sizes = [4, 256], strides = [1, 1]} : vector<5x256xbf16> to vector<4x256xbf16>
    %c0_75 = arith.constant 0 : index
    %c0_76 = arith.constant 0 : index
    %c0_77 = arith.constant 0 : index
    %85 = vector.load %arg3[%c0_75, %c0_76, %c0_77] : memref<4x256x64xbf16, #tpu.memory_space<vmem>>, vector<1x256x64xbf16>
    %86 = vector.shape_cast %85 : vector<1x256x64xbf16> to vector<256x64xbf16>
    %cst_78 = arith.constant dense<0.000000e+00> : vector<4x64xf32>
    %87 = tpu.matmul %84, %86, %cst_78 {dimension_numbers = #tpu.dot_dimension_numbers<[1], [0], [0], [1], [0, 0, 1, 1], [], []>} : vector<4x256xbf16>, vector<256x64xbf16>, vector<4x64xf32> -> vector<4x64xf32>
    %88 = arith.addf %81, %87 : vector<4x64xf32>
    %89 = vector.extract_strided_slice %83 {offsets = [1, 0], sizes = [4, 256], strides = [1, 1]} : vector<5x256xbf16> to vector<4x256xbf16>
    %c1_79 = arith.constant 1 : index
    %c0_80 = arith.constant 0 : index
    %c0_81 = arith.constant 0 : index
    %90 = vector.load %arg3[%c1_79, %c0_80, %c0_81] : memref<4x256x64xbf16, #tpu.memory_space<vmem>>, vector<1x256x64xbf16>
    %91 = vector.shape_cast %90 : vector<1x256x64xbf16> to vector<256x64xbf16>
    %cst_82 = arith.constant dense<0.000000e+00> : vector<4x64xf32>
    %92 = tpu.matmul %89, %91, %cst_82 {dimension_numbers = #tpu.dot_dimension_numbers<[1], [0], [0], [1], [0, 0, 1, 1], [], []>} : vector<4x256xbf16>, vector<256x64xbf16>, vector<4x64xf32> -> vector<4x64xf32>
    %93 = arith.addf %88, %92 : vector<4x64xf32>
    %c0_83 = arith.constant 0 : index
    %c0_84 = arith.constant 0 : index
    %c3_85 = arith.constant 3 : index
    %c0_86 = arith.constant 0 : index
    %c0_87 = arith.constant 0 : index
    %94 = vector.load %arg2[%c0_83, %c0_84, %c3_85, %c0_86, %c0_87] : memref<1x1x5x5x256xbf16, #tpu.memory_space<vmem>>, vector<1x1x1x5x256xbf16>
    %95 = vector.shape_cast %94 : vector<1x1x1x5x256xbf16> to vector<5x256xbf16>
    %96 = vector.extract_strided_slice %95 {offsets = [0, 0], sizes = [4, 256], strides = [1, 1]} : vector<5x256xbf16> to vector<4x256xbf16>
    %c2_88 = arith.constant 2 : index
    %c0_89 = arith.constant 0 : index
    %c0_90 = arith.constant 0 : index
    %97 = vector.load %arg3[%c2_88, %c0_89, %c0_90] : memref<4x256x64xbf16, #tpu.memory_space<vmem>>, vector<1x256x64xbf16>
    %98 = vector.shape_cast %97 : vector<1x256x64xbf16> to vector<256x64xbf16>
    %cst_91 = arith.constant dense<0.000000e+00> : vector<4x64xf32>
    %99 = tpu.matmul %96, %98, %cst_91 {dimension_numbers = #tpu.dot_dimension_numbers<[1], [0], [0], [1], [0, 0, 1, 1], [], []>} : vector<4x256xbf16>, vector<256x64xbf16>, vector<4x64xf32> -> vector<4x64xf32>
    %100 = arith.addf %93, %99 : vector<4x64xf32>
    %101 = vector.extract_strided_slice %95 {offsets = [1, 0], sizes = [4, 256], strides = [1, 1]} : vector<5x256xbf16> to vector<4x256xbf16>
    %c3_92 = arith.constant 3 : index
    %c0_93 = arith.constant 0 : index
    %c0_94 = arith.constant 0 : index
    %102 = vector.load %arg3[%c3_92, %c0_93, %c0_94] : memref<4x256x64xbf16, #tpu.memory_space<vmem>>, vector<1x256x64xbf16>
    %103 = vector.shape_cast %102 : vector<1x256x64xbf16> to vector<256x64xbf16>
    %cst_95 = arith.constant dense<0.000000e+00> : vector<4x64xf32>
    %104 = tpu.matmul %101, %103, %cst_95 {dimension_numbers = #tpu.dot_dimension_numbers<[1], [0], [0], [1], [0, 0, 1, 1], [], []>} : vector<4x256xbf16>, vector<256x64xbf16>, vector<4x64xf32> -> vector<4x64xf32>
    %105 = arith.addf %100, %104 : vector<4x64xf32>
    %106 = vector.broadcast %0 : vector<1x64xf32> to vector<4x64xf32>
    %107 = arith.mulf %105, %106 : vector<4x64xf32>
    %108 = vector.broadcast %1 : vector<1x64xf32> to vector<4x64xf32>
    %109 = arith.addf %107, %108 : vector<4x64xf32>
    %110 = arith.truncf %109 : vector<4x64xf32> to vector<4x64xbf16>
    %cst_96 = arith.constant dense<0.000000e+00> : vector<4x128xf32>
    %111 = tpu.matmul %110, %2, %cst_96 {dimension_numbers = #tpu.dot_dimension_numbers<[1], [0], [0], [1], [0, 0, 1, 1], [], []>} : vector<4x64xbf16>, vector<64x128xbf16>, vector<4x128xf32> -> vector<4x128xf32>
    %112 = vector.broadcast %3 : vector<1x128xf32> to vector<4x128xf32>
    %113 = arith.mulf %111, %112 : vector<4x128xf32>
    %114 = vector.broadcast %4 : vector<1x128xf32> to vector<4x128xf32>
    %115 = arith.addf %113, %114 : vector<4x128xf32>
    %c0_97 = arith.constant 0 : index
    %c2_98 = arith.constant 2 : index
    %c0_99 = arith.constant 0 : index
    %c0_100 = arith.constant 0 : index
    %116 = vector.load %arg9[%c0_97, %c2_98, %c0_99, %c0_100] : memref<1x4x4x128xf32, #tpu.memory_space<vmem>>, vector<1x1x4x128xf32>
    %117 = vector.shape_cast %116 : vector<1x1x4x128xf32> to vector<4x128xf32>
    %118 = vector.shape_cast %115 : vector<4x128xf32> to vector<1x1x4x128xf32>
    tpu.vector_store %arg9[%c0_97, %c2_98, %c0_99, %c0_100], %118 {strides = array<i32>} : memref<1x4x4x128xf32, #tpu.memory_space<vmem>>, vector<1x1x4x128xf32>,
    %cst_101 = arith.constant 0.000000e+00 : f32
    %119 = vector.broadcast %cst_101 : f32 to vector<4x64xf32>
    %c0_102 = arith.constant 0 : index
    %c0_103 = arith.constant 0 : index
    %c3_104 = arith.constant 3 : index
    %c0_105 = arith.constant 0 : index
    %c0_106 = arith.constant 0 : index
    %120 = vector.load %arg2[%c0_102, %c0_103, %c3_104, %c0_105, %c0_106] : memref<1x1x5x5x256xbf16, #tpu.memory_space<vmem>>, vector<1x1x1x5x256xbf16>
    %121 = vector.shape_cast %120 : vector<1x1x1x5x256xbf16> to vector<5x256xbf16>
    %122 = vector.extract_strided_slice %121 {offsets = [0, 0], sizes = [4, 256], strides = [1, 1]} : vector<5x256xbf16> to vector<4x256xbf16>
    %c0_107 = arith.constant 0 : index
    %c0_108 = arith.constant 0 : index
    %c0_109 = arith.constant 0 : index
    %123 = vector.load %arg3[%c0_107, %c0_108, %c0_109] : memref<4x256x64xbf16, #tpu.memory_space<vmem>>, vector<1x256x64xbf16>
    %124 = vector.shape_cast %123 : vector<1x256x64xbf16> to vector<256x64xbf16>
    %cst_110 = arith.constant dense<0.000000e+00> : vector<4x64xf32>
    %125 = tpu.matmul %122, %124, %cst_110 {dimension_numbers = #tpu.dot_dimension_numbers<[1], [0], [0], [1], [0, 0, 1, 1], [], []>} : vector<4x256xbf16>, vector<256x64xbf16>, vector<4x64xf32> -> vector<4x64xf32>
    %126 = arith.addf %119, %125 : vector<4x64xf32>
    %127 = vector.extract_strided_slice %121 {offsets = [1, 0], sizes = [4, 256], strides = [1, 1]} : vector<5x256xbf16> to vector<4x256xbf16>
    %c1_111 = arith.constant 1 : index
    %c0_112 = arith.constant 0 : index
    %c0_113 = arith.constant 0 : index
    %128 = vector.load %arg3[%c1_111, %c0_112, %c0_113] : memref<4x256x64xbf16, #tpu.memory_space<vmem>>, vector<1x256x64xbf16>
    %129 = vector.shape_cast %128 : vector<1x256x64xbf16> to vector<256x64xbf16>
    %cst_114 = arith.constant dense<0.000000e+00> : vector<4x64xf32>
    %130 = tpu.matmul %127, %129, %cst_114 {dimension_numbers = #tpu.dot_dimension_numbers<[1], [0], [0], [1], [0, 0, 1, 1], [], []>} : vector<4x256xbf16>, vector<256x64xbf16>, vector<4x64xf32> -> vector<4x64xf32>
    %131 = arith.addf %126, %130 : vector<4x64xf32>
    %c0_115 = arith.constant 0 : index
    %c0_116 = arith.constant 0 : index
    %c4 = arith.constant 4 : index
    %c0_117 = arith.constant 0 : index
    %c0_118 = arith.constant 0 : index
    %132 = vector.load %arg2[%c0_115, %c0_116, %c4, %c0_117, %c0_118] : memref<1x1x5x5x256xbf16, #tpu.memory_space<vmem>>, vector<1x1x1x5x256xbf16>
    %133 = vector.shape_cast %132 : vector<1x1x1x5x256xbf16> to vector<5x256xbf16>
    %134 = vector.extract_strided_slice %133 {offsets = [0, 0], sizes = [4, 256], strides = [1, 1]} : vector<5x256xbf16> to vector<4x256xbf16>
    %c2_119 = arith.constant 2 : index
    %c0_120 = arith.constant 0 : index
    %c0_121 = arith.constant 0 : index
    %135 = vector.load %arg3[%c2_119, %c0_120, %c0_121] : memref<4x256x64xbf16, #tpu.memory_space<vmem>>, vector<1x256x64xbf16>
    %136 = vector.shape_cast %135 : vector<1x256x64xbf16> to vector<256x64xbf16>
    %cst_122 = arith.constant dense<0.000000e+00> : vector<4x64xf32>
    %137 = tpu.matmul %134, %136, %cst_122 {dimension_numbers = #tpu.dot_dimension_numbers<[1], [0], [0], [1], [0, 0, 1, 1], [], []>} : vector<4x256xbf16>, vector<256x64xbf16>, vector<4x64xf32> -> vector<4x64xf32>
    %138 = arith.addf %131, %137 : vector<4x64xf32>
    %139 = vector.extract_strided_slice %133 {offsets = [1, 0], sizes = [4, 256], strides = [1, 1]} : vector<5x256xbf16> to vector<4x256xbf16>
    %c3_123 = arith.constant 3 : index
    %c0_124 = arith.constant 0 : index
    %c0_125 = arith.constant 0 : index
    %140 = vector.load %arg3[%c3_123, %c0_124, %c0_125] : memref<4x256x64xbf16, #tpu.memory_space<vmem>>, vector<1x256x64xbf16>
    %141 = vector.shape_cast %140 : vector<1x256x64xbf16> to vector<256x64xbf16>
    %cst_126 = arith.constant dense<0.000000e+00> : vector<4x64xf32>
    %142 = tpu.matmul %139, %141, %cst_126 {dimension_numbers = #tpu.dot_dimension_numbers<[1], [0], [0], [1], [0, 0, 1, 1], [], []>} : vector<4x256xbf16>, vector<256x64xbf16>, vector<4x64xf32> -> vector<4x64xf32>
    %143 = arith.addf %138, %142 : vector<4x64xf32>
    %144 = vector.broadcast %0 : vector<1x64xf32> to vector<4x64xf32>
    %145 = arith.mulf %143, %144 : vector<4x64xf32>
    %146 = vector.broadcast %1 : vector<1x64xf32> to vector<4x64xf32>
    %147 = arith.addf %145, %146 : vector<4x64xf32>
    %148 = arith.truncf %147 : vector<4x64xf32> to vector<4x64xbf16>
    %cst_127 = arith.constant dense<0.000000e+00> : vector<4x128xf32>
    %149 = tpu.matmul %148, %2, %cst_127 {dimension_numbers = #tpu.dot_dimension_numbers<[1], [0], [0], [1], [0, 0, 1, 1], [], []>} : vector<4x64xbf16>, vector<64x128xbf16>, vector<4x128xf32> -> vector<4x128xf32>
    %150 = vector.broadcast %3 : vector<1x128xf32> to vector<4x128xf32>
    %151 = arith.mulf %149, %150 : vector<4x128xf32>
    %152 = vector.broadcast %4 : vector<1x128xf32> to vector<4x128xf32>
    %153 = arith.addf %151, %152 : vector<4x128xf32>
    %c0_128 = arith.constant 0 : index
    %c3_129 = arith.constant 3 : index
    %c0_130 = arith.constant 0 : index
    %c0_131 = arith.constant 0 : index
    %154 = vector.load %arg9[%c0_128, %c3_129, %c0_130, %c0_131] : memref<1x4x4x128xf32, #tpu.memory_space<vmem>>, vector<1x1x4x128xf32>
    %155 = vector.shape_cast %154 : vector<1x1x4x128xf32> to vector<4x128xf32>
    %156 = vector.shape_cast %153 : vector<4x128xf32> to vector<1x1x4x128xf32>
    tpu.vector_store %arg9[%c0_128, %c3_129, %c0_130, %c0_131], %156 {strides = array<i32>} : memref<1x4x4x128xf32, #tpu.memory_space<vmem>>, vector<1x1x4x128xf32>,
    return
  }
  func.func @transform_0(%arg0: i32, %arg1: i32) -> (i32, i32, i32, i32, i32) {
    %c0_i32 = arith.constant 0 : i32
    %c0_i32_0 = arith.constant 0 : i32
    %c0_i32_1 = arith.constant 0 : i32
    %c0_i32_2 = arith.constant 0 : i32
    return %arg0, %arg1, %c0_i32, %c0_i32_0, %c0_i32_1 : i32, i32, i32, i32, i32
  }
  func.func @transform_1(%arg0: i32, %arg1: i32) -> (i32, i32, i32) {
    %c0_i32 = arith.constant 0 : i32
    %c0_i32_0 = arith.constant 0 : i32
    %c0_i32_1 = arith.constant 0 : i32
    %c0_i32_2 = arith.constant 0 : i32
    return %c0_i32, %c0_i32_0, %c0_i32_1 : i32, i32, i32
  }
  func.func @transform_2(%arg0: i32, %arg1: i32) -> (i32, i32) {
    %c0_i32 = arith.constant 0 : i32
    %c0_i32_0 = arith.constant 0 : i32
    %c0_i32_1 = arith.constant 0 : i32
    return %c0_i32, %c0_i32_0 : i32, i32
  }
  func.func @transform_3(%arg0: i32, %arg1: i32) -> (i32, i32) {
    %c0_i32 = arith.constant 0 : i32
    %c0_i32_0 = arith.constant 0 : i32
    %c0_i32_1 = arith.constant 0 : i32
    return %c0_i32, %c0_i32_0 : i32, i32
  }
  func.func @transform_4(%arg0: i32, %arg1: i32) -> (i32, i32) {
    %c0_i32 = arith.constant 0 : i32
    %c0_i32_0 = arith.constant 0 : i32
    %c0_i32_1 = arith.constant 0 : i32
    return %c0_i32, %c0_i32_0 : i32, i32
  }
  func.func @transform_5(%arg0: i32, %arg1: i32) -> (i32, i32) {
    %c0_i32 = arith.constant 0 : i32
    %c0_i32_0 = arith.constant 0 : i32
    %c0_i32_1 = arith.constant 0 : i32
    return %c0_i32, %c0_i32_0 : i32, i32
  }
  func.func @transform_6(%arg0: i32, %arg1: i32) -> (i32, i32) {
    %c0_i32 = arith.constant 0 : i32
    %c0_i32_0 = arith.constant 0 : i32
    %c0_i32_1 = arith.constant 0 : i32
    return %c0_i32, %c0_i32_0 : i32, i32
  }
  func.func @transform_7(%arg0: i32, %arg1: i32) -> (i32, i32, i32, i32) {
    %c0_i32 = arith.constant 0 : i32
    %c0_i32_0 = arith.constant 0 : i32
    %c0_i32_1 = arith.constant 0 : i32
    return %arg0, %arg1, %c0_i32, %c0_i32_0 : i32, i32, i32, i32
  }
}

</mosaic_0001>

<bundles_post_ra>
// kernel: spatial_path_forward.3
= control target key start
LH: loop header
LB: loop body
LE: loop exit
PB: predicated region body
PF: predicated region fallthrough
CT: control target
= control target key end

     0   :  { %s5869_s15 = smov 0   ;;  %s5871_s16 = smov 0   ;;  %s6596_s0 = inlined_call_operand.vmem [shape: bf16[2,4,7,19,12], index: 0, kind: input, shape index: {}]   ;;  %s6597_s1 = inlined_call_operand.vmem [shape: bf16[16,12,64], index: 1, kind: input, shape index: {}]   ;;  %s6598_s2 = inlined_call_operand.vmem [shape: f32[1,64], index: 2, kind: input, shape index: {}]   ;;  %s6599_s3 = inlined_call_operand.vmem [shape: f32[1,64], index: 3, kind: input, shape index: {}]   ;;  %s6600_s4 = inlined_call_operand.vmem [shape: bf16[2,16,16,64], index: 4, kind: output, shape index: {}]  }
   0x1   :  { %s5873_s17 = smov 0   ;;  %s5875_s18 = smov 0  }
   0x2   :  { %s5877_s19 = smov 0  }
   0x3 LB: > { %s23_s20 = sadd.s32 1, %s5832_s17  ;;  %s26_s21 = sadd.s32 1, %s5836_s18  ;;  %s5840_s19 = sphi %s5877_s19, %s14_s19   ;;  %s5836_s18 = sphi %s5875_s18, %s6604_s18   ;;  %s5832_s17 = sphi %s5873_s17, %s6603_s17   ;;  %s5828_s16 = sphi %s5871_s16, %s6602_s16   ;;  %s5824_s15 = sphi %s5869_s15, %s6601_s15  }
   0x4   : > { %p24_p0 = scmp.ge.s32.totalorder %s23_s20, 4  ;;  %p4553_p1 = scmp.ge.s32.totalorder %s5840_s19, 1 }
   0x5   : > { %p182_p2 = scmp.lt.s32.totalorder %s5840_s19, 9 }
   0x6   : > { %s6606_s20 = smov (%p24_p0, %s23_s20), 0  ;;  %s6608_s21 = smov (!%p24_p0, %s26_s21), %s5836_s18 }
   0x7   : > { %p183_p3 = pnand %p4553_p1, %p182_p2  ;;  %p28_p4 = scmp.ge.s32.totalorder %s6608_s21, 2 }
   0x8   : > { %vm278_vm0 = vcmask (!%p183_p3), 1045504   ;;  %v5842_v0 = vmov (!%p183_p3), 0.0   ;;  %v5706_v1 = vld [vmem:[%s6597_s1 + $0x8] sm:$0x3f] (!%p183_p3)   ;;  %p217_p5 = scmp.lt.s32.totalorder (!%p183_p3), %s5828_s16, 1  ;;  %p219_p6 = scmp.lt.s32.totalorder (!%p183_p3), %s5824_s15, 3 }
   0x9   : > { %s6610_s21 = smov (%p28_p4, %s6608_s21), 0  ;;  %186 = sbr.rel (%p183_p3) target bundleno = 622 (0x26e), region = 36 }
   0xa   : > { %5038 = vmatprep.subr.bf16.mxu0 (!%p183_p3), %v5842_v0  ;;  %5134 = vmatprep.subr.bf16.mxu1 (!%p183_p3), %v5842_v0  ;;  %v5707_v2 = vld [vmem:[%s6597_s1 + $0x8] sm:$0x3f] (!%p183_p3)   ;;  %v280_v3 = vsel (!%p183_p3), %vm278_vm0, %v5706_v1, 0  ;;  %vm5843_vm1 = vmmov (!%p183_p3), 0   ;;  %v5710_v12 = vld [vmem:[%s6597_s1] sm:$0x3f] (!%p183_p3)  }
   0xb   : > { %5040 = vmatprep.mubr.msk.bf16.mxu0 (!%p183_p3), %vm5843_vm1, %v5842_v0  ;;  %5136 = vmatprep.mubr.msk.bf16.mxu1 (!%p183_p3), %vm5843_vm1, %v5842_v0  ;;  %v1354_v4 = vsel (!%p183_p3), %vm278_vm0, %v5707_v2, 0  ;;  %v5713_v17 = vld [vmem:[%s6597_s1] sm:$0x3f] (!%p183_p3)   ;;  %vm256_vm2 = vsmask.f32 (!%p183_p3), 7424  ;;  %vm274_vm3 = vcmask (!%p183_p3), 97280  }
   0xc   : > { %5039 = vmatpush3.bf16.msra.mxu0 (!%p183_p3), %v280_v3  ;;  %5135 = vmatpush3.bf16.msra.mxu1 (!%p183_p3), %v1354_v4  ;;  %v331_v21 = vsel (!%p183_p3), %vm278_vm0, %v5710_v12, 0  ;;  %v1405_v25 = vsel (!%p183_p3), %vm278_vm0, %v5713_v17, 0  ;;  %v5714_v27 = vld [vmem:[%s6597_s1 + $0x10] sm:$0x3f] (!%p183_p3)   ;;  %vm377_vm4 = vcmask (!%p183_p3), 1046528   ;;  %vm1315_vm6 = vcmask (!%p183_p3), 519168  }
   0xd   : > { %5044 = vmatprep.subr.bf16.mxu0 (!%p183_p3), %v5842_v0  ;;  %5140 = vmatprep.subr.bf16.mxu1 (!%p183_p3), %v5842_v0  ;;  %v5715_v28 = vld [vmem:[%s6597_s1 + $0x10] sm:$0x3f] (!%p183_p3)   ;;  %v390_v29 = vsel (!%p183_p3), %vm278_vm0, %v5714_v27, 0  ;;  %v5716_v33 = vld [vmem:[%s6597_s1 + $0x18] sm:$0x3f] (!%p183_p3)  }
   0xe   : > { %v1462_v30 = vsel (!%p183_p3), %vm278_vm0, %v5715_v28, 0  ;;  %v5717_v36 = vld [vmem:[%s6597_s1 + $0x18] sm:$0x3f] (!%p183_p3)   ;;  %v457_v39 = vsel (!%p183_p3), %vm278_vm0, %v5716_v33, 0  ;;  %vm438_vm5 = vsmask.f32 (!%p183_p3), 6400 }
   0xf   : > { %v1527_v42 = vsel (!%p183_p3), %vm278_vm0, %v5717_v36, 0  ;;  %v5718_v53 = vld [vmem:[%s6597_s1 + $0x20] sm:$0x3f] (!%p183_p3)   ;;  %v5721_v61 = vld [vmem:[%s6597_s1 + $0x28] sm:$0x3f] (!%p183_p3)  }
  0x10   : > { %s6612_s16 = smov (!%p217_p5, %s5828_s16), 1  ;;  %v5719_v56 = vld [vmem:[%s6597_s1 + $0x20] sm:$0x3f]   ;;  %v523_v58 = vsel %vm278_vm0, %v5718_v53, 0  ;;  %v5723_v63 = vld [vmem:[%s6597_s1 + $0x28] sm:$0x3f]  }
  0x11   : > { %s220_s26 = scalar_select %p219_p6, %s5824_s15, 3  ;;  %v1591_v60 = vsel %vm278_vm0, %v5719_v56, 0  ;;  %v594_v1 = vsel %vm278_vm0, %v5721_v61, 0  ;;  %v5735_v56 = vld [vmem:[%s6597_s1 + $0x48] sm:$0x3f]  }
  0x12   : > { %s5663_s27 = smul.u32 84, %s6612_s16  ;;  %s4557_s6 = sshll.u32 %s6612_s16, 5 }
  0x13   : > { %s5662_s28 = smul.u32 21, %s220_s26 }
  0x15   : > { %s223_s29 = sadd.s32 %s5663_s27, %s5662_s28 }
  0x16   : > { %s4554_s30 = sshll.u32 %s223_s29, 2 }
  0x17   : > { %s5925_s7 = scalar_lea.vmem %s6596_s0, %s4554_s30  ;;  %s4555_s30 = sshll.u32 %s5824_s15, 2 }
  0x18   : > { %v5708_v5 = vld [vmem:[%s5925_s7] sm:$0xff]   ;;  %v5709_v6 = vld [vmem:[%s5925_s7 + $0x8] ss:$0 sps:$4 sm:$0x33]   ;;  %v5930_v7 = vld [vmem:[%s5925_s7 + $0xc] sm:$0xff]   ;;  %p229_p7 = scmp.lt.s32.totalorder %s4555_s30, 15 }
  0x19   : > { %v258_v8 = vshrl.u32 %v5708_v5, 16  ;;  %v260_v9 = vshll.u32 %v5708_v5, 16  ;;  %v265_v10 = vshll.u32 %v5709_v6, 16  ;;  %v5933_v11 = vld [vmem:[%s5925_s7 + $0x14] ss:$0 sps:$4 sm:$0x33]  }
  0x1a   : > { %v1334_v13 = vshrl.u32 %v5930_v7, 16  ;;  %v1336_v14 = vshll.u32 %v5930_v7, 16  ;;  %v1341_v19 = vshll.u32 %v5933_v11, 16  ;;  %v378_v31 = vrot.slane %v5708_v5, 1  ;;  %v5720_v62 = vld [vmem:[%s5925_s7 + $0xc] sm:$0xff]   ;;  %v5722_v2 = vld [vmem:[%s5925_s7 + $0x18] sm:$0xff]  }
  0x1b   : > { %v262_v15 = vrot.slane %v260_v9, 1  ;;  %v267_v16 = vrot.slane %v265_v10, 1  ;;  %v379_v32 = vrot.slane %v5709_v6, 1  ;;  %v1450_v34 = vrot.slane %v5930_v7, 1  ;;  %s6614_s30 = smov (!%p229_p7, %s4555_s30), 15 }
  0x1c   : > { %v1338_v18 = vrot.slane %v1336_v14, 1  ;;  %v1343_v23 = vrot.slane %v1341_v19, 1  ;;  %v1451_v35 = vrot.slane %v5933_v11, 1  ;;  %v442_v38 = vshrl.u32 %v5709_v6, 16  ;;  %s4556_s5 = sshll.u32 %s6614_s30, 1 }
  0x1d   : > { %v263_v20 = vor.u32 %v262_v15, %v258_v8  ;;  %v380_v37 = vsel %vm377_vm4, %v378_v31, %v379_v32  ;;  %v1512_v41 = vshrl.u32 %v5933_v11, 16  ;;  %v439_v43 = vrot.slane %v258_v8, 1  ;;  %v5724_v3 = vld [vmem:[%s5925_s7 + $0x14] ss:$0 sps:$4 sm:$0x33]   ;;  %s233_s8 = sadd.s32 %s4557_s6, %s4556_s5 }
  0x1e   : > { %v1339_v22 = vor.u32 %v1338_v18, %v1334_v13  ;;  %v1452_v40 = vsel %vm377_vm4, %v1450_v34, %v1451_v35  ;;  %v445_v44 = vrot.slane %v265_v10, 2  ;;  %v440_v45 = vrot.slane %v260_v9, 2  ;;  %v5738_v61 = vld [vmem:[%s5925_s7 + $0x2c] ss:$0 sps:$4 sm:$0x33]   ;;  %s4558_s13 = sshll.u32 %s233_s8, 2 }
  0x1f   : > { %v268_v24 = vsel %vm256_vm2, %v263_v20, %v267_v16  ;;  %v444_v46 = vrot.slane %v442_v38, 1  ;;  %v1509_v47 = vrot.slane %v1334_v13, 1  ;;  %v1515_v48 = vrot.slane %v1341_v19, 2  ;;  %v5725_v16 = vld [vmem:[%s6597_s1 + $0x30] sm:$0x3f]   ;;  %s6563_s14 = scalar_lea.vmem %s6600_s4, %s4558_s13 }
  0x20   : > { %5041 = vmatmul.mubr.msk.bf16.vlgmr.msra.gmra.mrb[0].mxu0 %vm274_vm3, %v268_v24  ;;  %v1344_v26 = vsel %vm256_vm2, %v1339_v22, %v1343_v23  ;;  %v1510_v49 = vrot.slane %v1336_v14, 2  ;;  %v1514_v50 = vrot.slane %v1512_v41, 1  ;;  %v441_v51 = vor.u32 %v440_v45, %v439_v43  ;;  %v5727_v19 = vld [vmem:[%s6597_s1 + $0x30] sm:$0x3f]   ;;  %v5731_v45 = vld [vmem:[%s6597_s1 + $0x40] sm:$0x3f]  }
  0x21   : > { %5045 = vmatpush3.bf16.msra.mxu0 %v331_v21  ;;  %5137 = vmatmul.mubr.msk.bf16.vlgmr.msra.gmra.mrb[0].mxu1 %vm274_vm3, %v1344_v26  ;;  %v446_v52 = vor.u32 %v445_v44, %v444_v46  ;;  %v576_v4 = vshll.u32 %v5720_v62, 16  ;;  %v1643_v6 = vshll.u32 %v5722_v2, 16  ;;  %v574_v8 = vshrl.u32 %v5720_v62, 16  ;;  %v5728_v21 = vld [vmem:[%s6597_s1 + $0x38] sm:$0x3f]  }
  0x22   : > { %5141 = vmatpush3.bf16.msra.mxu1 %v1405_v25  ;;  %5046 = vmatprep.mubr.msk.bf16.mxu0 %vm5843_vm1, %v5842_v0  ;;  %v1511_v54 = vor.u32 %v1510_v49, %v1509_v47  ;;  %v1516_v55 = vor.u32 %v1515_v48, %v1514_v50  ;;  %v581_v10 = vshll.u32 %v5724_v3, 16  ;;  %v1641_v11 = vshrl.u32 %v5722_v2, 16  ;;  %v5729_v25 = vld [vmem:[%s6597_s1 + $0x38] sm:$0x3f]   ;;  %v5730_v44 = vld [vmem:[%s6597_s1 + $0x40] sm:$0x3f]  }
  0x23   : > { %5050 = vmatprep.subr.bf16.mxu0 %v5842_v0  ;;  %5142 = vmatprep.mubr.msk.bf16.mxu1 %vm5843_vm1, %v5842_v0  ;;  %v447_v57 = vsel %vm438_vm5, %v441_v51, %v446_v52  ;;  %v578_v9 = vrot.slane %v576_v4, 1  ;;  %v1645_v12 = vrot.slane %v1643_v6, 1  ;;  %v654_v22 = vsel %vm278_vm0, %v5725_v16, 0 }
  0x24   : > { %5146 = vmatprep.subr.bf16.mxu1 %v5842_v0  ;;  %v1517_v59 = vsel %vm438_vm5, %v1511_v54, %v1516_v55  ;;  %v583_v15 = vrot.slane %v581_v10, 1  ;;  %v1720_v24 = vsel %vm278_vm0, %v5727_v19, 0  ;;  %v642_v26 = vrot.slane %v5720_v62, 1  ;;  %v5733_v54 = vld [vmem:[%s6597_s1 + $0x48] sm:$0x3f]   ;;  %v5732_v55 = vld [vmem:[%s5925_s7 + $0x18] sm:$0xff]  }
  0x25   : > { %v579_v14 = vor.u32 %v578_v9, %v574_v8  ;;  %v1646_v17 = vor.u32 %v1645_v12, %v1641_v11  ;;  %v643_v27 = vrot.slane %v5724_v3, 1  ;;  %v1708_v28 = vrot.slane %v5722_v2, 1  ;;  %v5737_v9 = vld [vmem:[%s6597_s1 + $0x50] sm:$0x3f]   ;;  %v5740_v19 = vld [vmem:[%s6597_s1 + $0x58] sm:$0x3f]  }
  0x26   : > { %v702_v31 = vrot.slane %v574_v8, 1  ;;  %v703_v32 = vrot.slane %v576_v4, 2  ;;  %v705_v33 = vshrl.u32 %v5724_v3, 16  ;;  %v1785_v34 = vsel %vm278_vm0, %v5729_v25, 0  ;;  %v5739_v12 = vld [vmem:[%s6597_s1 + $0x50] sm:$0x3f]  }
  0x27   : > { %v584_v20 = vsel %vm256_vm2, %v579_v14, %v583_v15  ;;  %v644_v36 = vsel %vm377_vm4, %v642_v26, %v643_v27  ;;  %v708_v38 = vrot.slane %v581_v10, 2  ;;  %v1768_v41 = vrot.slane %v1643_v6, 2 }
  0x28   : > { %v704_v46 = vor.u32 %v703_v32, %v702_v31  ;;  %v786_v51 = vsel %vm278_vm0, %v5730_v44, 0  ;;  %v1849_v53 = vsel %vm278_vm0, %v5731_v45, 0  ;;  %v1906_v6 = vshll.u32 %v5738_v61, 16 }
  0x29   : > { %v917_v14 = vsel %vm278_vm0, %v5737_v9, 0  ;;  %v1978_v16 = vsel %vm278_vm0, %v5739_v12, 0  ;;  %v983_v25 = vsel %vm278_vm0, %v5740_v19, 0  ;;  %v2028_v27 = vshrl.u32 %v5738_v61, 16  ;;  %v5752_v12 = vld [vmem:[%s6597_s1 + $0x78] sm:$0x3f]  }
  0x2a   : > { %v1246_v19 = vsel %vm278_vm0, %v5752_v12, 0 }
  0x2c   : > { %5047 = vmatmul.mubr.msk.bf16.vlgmr.msra.gmra.mrb[0].mxu0 %vm274_vm3, %v5708_v5  ;;  %v5726_v5 = vld [vmem:[%s5925_s7 + $0x20] ss:$0 sps:$4 sm:$0x33]  }
  0x2d   : > { %5051 = vmatpush3.bf16.msra.mxu0 %v390_v29  ;;  %5143 = vmatmul.mubr.msk.bf16.vlgmr.msra.gmra.mrb[0].mxu1 %vm274_vm3, %v5930_v7  ;;  %v1661_v7 = vsel %vm278_vm0, %v5723_v63, 0  ;;  %v1648_v13 = vshll.u32 %v5726_v5, 16  ;;  %v1709_v29 = vrot.slane %v5726_v5, 1  ;;  %v1770_v35 = vshrl.u32 %v5726_v5, 16 }
  0x2e   : > { %5147 = vmatpush3.bf16.msra.mxu1 %v1462_v30  ;;  %5052 = vmatprep.mubr.msk.bf16.mxu0 %vm5843_vm1, %v5842_v0  ;;  %v720_v30 = vsel %vm278_vm0, %v5728_v21, 0  ;;  %v1919_v63 = vsel %vm278_vm0, %v5735_v56, 0  ;;  %v1967_v21 = vrot.slane %v5738_v61, 1 }
  0x2f   : > { %5056 = vmatprep.subr.bf16.mxu0 %v5842_v0  ;;  %5148 = vmatprep.mubr.msk.bf16.mxu1 %vm5843_vm1, %v5842_v0  ;;  %v1650_v18 = vrot.slane %v1648_v13, 1  ;;  %v1773_v43 = vrot.slane %v1648_v13, 2 }
  0x30   : > { %5152 = vmatprep.subr.bf16.mxu1 %v5842_v0 }
  0x31   : > { %v1651_v23 = vsel %vm256_vm2, %v1646_v17, %v1650_v18  ;;  %v905_v17 = vrot.slane %v5732_v55, 1 }
  0x38   : > { %5053 = vmatmul.mubr.msk.bf16.vlgmr.msra.gmra.mrb[0].mxu0 %vm274_vm3, %v380_v37  ;;  %v1710_v37 = vsel %vm377_vm4, %v1708_v28, %v1709_v29 }
  0x39   : > { %5057 = vmatpush3.bf16.msra.mxu0 %v457_v39  ;;  %5149 = vmatmul.mubr.msk.bf16.vlgmr.msra.gmra.mrb[0].mxu1 %vm274_vm3, %v1452_v40  ;;  %v1767_v39 = vrot.slane %v1641_v11, 1  ;;  %v707_v40 = vrot.slane %v705_v33, 1  ;;  %v1908_v11 = vrot.slane %v1906_v6, 1 }
  0x3a   : > { %5153 = vmatpush3.bf16.msra.mxu1 %v1527_v42  ;;  %5058 = vmatprep.mubr.msk.bf16.mxu0 %vm5843_vm1, %v5842_v0  ;;  %v1772_v42 = vrot.slane %v1770_v35, 1  ;;  %v2030_v35 = vrot.slane %v2028_v27, 1 }
  0x3b   : > { %5062 = vmatprep.subr.bf16.mxu0 %v5842_v0  ;;  %5154 = vmatprep.mubr.msk.bf16.mxu1 %vm5843_vm1, %v5842_v0  ;;  %v709_v47 = vor.u32 %v708_v38, %v707_v40  ;;  %v1769_v48 = vor.u32 %v1768_v41, %v1767_v39  ;;  %v5742_v39 = vld [vmem:[%s6597_s1 + $0x60] sm:$0x3f]  }
  0x3c   : > { %5158 = vmatprep.subr.bf16.mxu1 %v5842_v0  ;;  %v1774_v49 = vor.u32 %v1773_v43, %v1772_v42  ;;  %v5743_v42 = vld [vmem:[%s6597_s1 + $0x60] sm:$0x3f]   ;;  %v1049_v44 = vsel %vm278_vm0, %v5742_v39, 0  ;;  %v6230_v39 = vld [vmem:[%s5925_s7 + $0x2c] ss:$0 sps:$4 sm:$0x33]  }
  0x3d   : > { %v710_v50 = vsel %vm438_vm5, %v704_v46, %v709_v47  ;;  %v2108_v46 = vsel %vm278_vm0, %v5743_v42, 0  ;;  %v5745_v47 = vld [vmem:[%s6597_s1 + $0x68] sm:$0x3f]  }
  0x3e   : > { %v1775_v52 = vsel %vm438_vm5, %v1769_v48, %v1774_v49  ;;  %v5744_v48 = vld [vmem:[%s5925_s7 + $0x24] sm:$0xff]  }
  0x3f   : > { %v5747_v49 = vld [vmem:[%s6597_s1 + $0x68] sm:$0x3f]  }
  0x40   : > { %v2178_v56 = vsel %vm278_vm0, %v5747_v49, 0 }
  0x44   : > { %5059 = vmatmul.mubr.msk.bf16.vlgmr.msra.gmra.mrb[0].mxu0 %vm274_vm3, %v447_v57  ;;  %v5734_v57 = vld [vmem:[%s5925_s7 + $0x24] sm:$0xff]  }
  0x45   : > { %5063 = vmatpush3.bf16.msra.mxu0 %v523_v58  ;;  %5155 = vmatmul.mubr.msk.bf16.vlgmr.msra.gmra.mrb[0].mxu1 %vm274_vm3, %v1517_v59  ;;  %v5736_v58 = vld [vmem:[%s5925_s7 + $0x20] ss:$0 sps:$4 sm:$0x33]   ;;  %v839_v59 = vshll.u32 %v5732_v55, 16  ;;  %v1899_v4 = vshrl.u32 %v5734_v57, 16 }
  0x46   : > { %5159 = vmatpush3.bf16.msra.mxu1 %v1591_v60  ;;  %5064 = vmatprep.mubr.msk.bf16.mxu0 %vm5843_vm1, %v5842_v0  ;;  %v857_v60 = vsel %vm278_vm0, %v5733_v54, 0  ;;  %v844_v3 = vshll.u32 %v5736_v58, 16  ;;  %v906_v18 = vrot.slane %v5736_v58, 1  ;;  %v5750_v54 = vld [vmem:[%s5925_s7 + $0x38] ss:$0 sps:$4 sm:$0x33]  }
  0x47   : > { %5068 = vmatprep.subr.bf16.mxu0 %v5842_v0  ;;  %5160 = vmatprep.mubr.msk.bf16.mxu1 %vm5843_vm1, %v5842_v0  ;;  %v2025_v33 = vrot.slane %v1899_v4, 1 }
  0x48   : > { %5164 = vmatprep.subr.bf16.mxu1 %v5842_v0  ;;  %v846_v8 = vrot.slane %v844_v3, 1  ;;  %v971_v32 = vrot.slane %v844_v3, 2 }
  0x50   : > { %5065 = vmatmul.mubr.msk.bf16.vlgmr.msra.gmra.mrb[0].mxu0 %vm274_vm3, %v5720_v62  ;;  %v1901_v62 = vshll.u32 %v5734_v57, 16 }
  0x51   : > { %5069 = vmatpush3.bf16.msra.mxu0 %v594_v1  ;;  %5161 = vmatmul.mubr.msk.bf16.vlgmr.msra.gmra.mrb[0].mxu1 %vm274_vm3, %v5722_v2  ;;  %v837_v1 = vshrl.u32 %v5732_v55, 16  ;;  %v841_v2 = vrot.slane %v839_v59, 1 }
  0x52   : > { %5165 = vmatpush3.bf16.msra.mxu1 %v1661_v7  ;;  %5070 = vmatprep.mubr.msk.bf16.mxu0 %vm5843_vm1, %v5842_v0  ;;  %v1903_v5 = vrot.slane %v1901_v62, 1 }
  0x53   : > { %5074 = vmatprep.subr.bf16.mxu0 %v5842_v0  ;;  %5166 = vmatprep.mubr.msk.bf16.mxu1 %vm5843_vm1, %v5842_v0  ;;  %v842_v7 = vor.u32 %v841_v2, %v837_v1  ;;  %v965_v29 = vrot.slane %v837_v1, 1  ;;  %v5749_v2 = vld [vmem:[%s6597_s1 + $0x70] sm:$0x3f]  }
  0x54   : > { %5170 = vmatprep.subr.bf16.mxu1 %v5842_v0  ;;  %v1904_v10 = vor.u32 %v1903_v5, %v1899_v4  ;;  %v5751_v5 = vld [vmem:[%s6597_s1 + $0x70] sm:$0x3f]  }
  0x55   : > { %v847_v13 = vsel %vm256_vm2, %v842_v7, %v846_v8  ;;  %v1180_v7 = vsel %vm278_vm0, %v5749_v2, 0  ;;  %v2237_v9 = vsel %vm278_vm0, %v5751_v5, 0  ;;  %v5764_v5 = vld [vmem:[%s6597_s1 + $0x18] sm:$0x3f]  }
  0x56   : > { %v1909_v15 = vsel %vm256_vm2, %v1904_v10, %v1908_v11  ;;  %v1168_v10 = vrot.slane %v5744_v48, 1 }
  0x5c   : > { %5071 = vmatmul.mubr.msk.bf16.vlgmr.msra.gmra.mrb[0].mxu0 %vm274_vm3, %v584_v20  ;;  %v1966_v20 = vrot.slane %v5734_v57, 1 }
  0x5d   : > { %5075 = vmatpush3.bf16.msra.mxu0 %v654_v22  ;;  %5167 = vmatmul.mubr.msk.bf16.vlgmr.msra.gmra.mrb[0].mxu1 %vm274_vm3, %v1651_v23  ;;  %v5741_v22 = vld [vmem:[%s6597_s1 + $0x58] sm:$0x3f]   ;;  %v907_v23 = vsel %vm377_vm4, %v905_v17, %v906_v18  ;;  %v2287_v18 = vshrl.u32 %v5750_v54, 16 }
  0x5e   : > { %5171 = vmatpush3.bf16.msra.mxu1 %v1720_v24  ;;  %5076 = vmatprep.mubr.msk.bf16.mxu0 %vm5843_vm1, %v5842_v0  ;;  %v968_v24 = vshrl.u32 %v5736_v58, 16  ;;  %v1968_v26 = vsel %vm377_vm4, %v1966_v20, %v1967_v21  ;;  %v2043_v28 = vsel %vm278_vm0, %v5741_v22, 0 }
  0x5f   : > { %5080 = vmatprep.subr.bf16.mxu0 %v5842_v0  ;;  %5172 = vmatprep.mubr.msk.bf16.mxu1 %vm5843_vm1, %v5842_v0 }
  0x60   : > { %5176 = vmatprep.subr.bf16.mxu1 %v5842_v0  ;;  %v970_v31 = vrot.slane %v968_v24, 1 }
  0x62   : > { %v972_v38 = vor.u32 %v971_v32, %v970_v31  ;;  %v6216_v31 = vld [vmem:[%s5925_s7 + $0x24] sm:$0xff]  }
  0x68   : > { %5077 = vmatmul.mubr.msk.bf16.vlgmr.msra.gmra.mrb[0].mxu0 %vm274_vm3, %v644_v36  ;;  %v2031_v36 = vrot.slane %v1906_v6, 2 }
  0x69   : > { %5081 = vmatpush3.bf16.msra.mxu0 %v720_v30  ;;  %5173 = vmatmul.mubr.msk.bf16.vlgmr.msra.gmra.mrb[0].mxu1 %vm274_vm3, %v1710_v37  ;;  %v966_v30 = vrot.slane %v839_v59, 2 }
  0x6a   : > { %5177 = vmatpush3.bf16.msra.mxu1 %v1785_v34  ;;  %5082 = vmatprep.mubr.msk.bf16.mxu0 %vm5843_vm1, %v5842_v0  ;;  %v2026_v34 = vrot.slane %v1901_v62, 2  ;;  %v2032_v41 = vor.u32 %v2031_v36, %v2030_v35  ;;  %v2165_v62 = vshll.u32 %v5750_v54, 16  ;;  %v6223_v36 = vld [vmem:[%s5925_s7 + $0x20] ss:$0 sps:$4 sm:$0x33]  }
  0x6b   : > { %5086 = vmatprep.subr.bf16.mxu0 %v5842_v0  ;;  %5178 = vmatprep.mubr.msk.bf16.mxu1 %vm5843_vm1, %v5842_v0  ;;  %v967_v37 = vor.u32 %v966_v30, %v965_v29  ;;  %v6211_v30 = vld [vmem:[%s5925_s7 + $0x18] sm:$0xff]  }
  0x6c   : > { %5182 = vmatprep.subr.bf16.mxu1 %v5842_v0  ;;  %v2027_v40 = vor.u32 %v2026_v34, %v2025_v33  ;;  %v2167_v4 = vrot.slane %v2165_v62, 1  ;;  %v2290_v29 = vrot.slane %v2165_v62, 2  ;;  %v5762_v62 = vld [vmem:[%s6597_s1 + $0x10] sm:$0x3f]  }
  0x6d   : > { %v973_v43 = vsel %vm438_vm5, %v967_v37, %v972_v38  ;;  %v2380_v37 = vshll.u32 %v6211_v30, 16  ;;  %v5754_v38 = vld [vmem:[%s6597_s1 + $0x8] sm:$0x3f]  }
  0x6e   : > { %v2033_v45 = vsel %vm438_vm5, %v2027_v40, %v2032_v41  ;;  %v3424_v40 = vshll.u32 %v6216_v31, 16  ;;  %v5755_v41 = vld [vmem:[%s6597_s1 + $0x8] sm:$0x3f]  }
  0x70   : > { %v3426_v49 = vrot.slane %v3424_v40, 1 }
  0x74   : > { %5083 = vmatmul.mubr.msk.bf16.vlgmr.msra.gmra.mrb[0].mxu0 %vm274_vm3, %v710_v50  ;;  %v5746_v50 = vld [vmem:[%s5925_s7 + $0x30] sm:$0xff]  }
  0x75   : > { %5087 = vmatpush3.bf16.msra.mxu0 %v786_v51  ;;  %5179 = vmatmul.mubr.msk.bf16.vlgmr.msra.gmra.mrb[0].mxu1 %vm274_vm3, %v1775_v52  ;;  %v5748_v51 = vld [vmem:[%s5925_s7 + $0x2c] ss:$0 sps:$4 sm:$0x33]   ;;  %v1102_v52 = vshll.u32 %v5744_v48, 16 }
  0x76   : > { %5183 = vmatpush3.bf16.msra.mxu1 %v1849_v53  ;;  %5088 = vmatprep.mubr.msk.bf16.mxu0 %vm5843_vm1, %v5842_v0  ;;  %v1120_v53 = vsel %vm278_vm0, %v5745_v47, 0  ;;  %v1107_v59 = vshll.u32 %v5748_v51, 16  ;;  %v1169_v11 = vrot.slane %v5748_v51, 1  ;;  %v2398_v47 = vsel %vm278_vm0, %v5754_v38, 0 }
  0x77   : > { %5092 = vmatprep.subr.bf16.mxu0 %v5842_v0  ;;  %5184 = vmatprep.mubr.msk.bf16.mxu1 %vm5843_vm1, %v5842_v0  ;;  %v1104_v58 = vrot.slane %v1102_v52, 1 }
  0x78   : > { %5188 = vmatprep.subr.bf16.mxu1 %v5842_v0  ;;  %v1109_v1 = vrot.slane %v1107_v59, 1  ;;  %v1170_v17 = vsel %vm377_vm4, %v1168_v10, %v1169_v11  ;;  %v2556_v10 = vshrl.u32 %v6223_v36, 16  ;;  %v2571_v11 = vsel %vm278_vm0, %v5764_v5, 0 }
  0x80   : > { %5089 = vmatmul.mubr.msk.bf16.vlgmr.msra.gmra.mrb[0].mxu0 %vm274_vm3, %v5732_v55  ;;  %v2160_v55 = vshll.u32 %v5746_v50, 16 }
  0x81   : > { %5093 = vmatpush3.bf16.msra.mxu0 %v857_v60  ;;  %5185 = vmatmul.mubr.msk.bf16.vlgmr.msra.gmra.mrb[0].mxu1 %vm274_vm3, %v5734_v57  ;;  %v1100_v57 = vshrl.u32 %v5744_v48, 16  ;;  %v2158_v60 = vshrl.u32 %v5746_v50, 16 }
  0x82   : > { %5189 = vmatpush3.bf16.msra.mxu1 %v1919_v63  ;;  %5094 = vmatprep.mubr.msk.bf16.mxu0 %vm5843_vm1, %v5842_v0  ;;  %v2162_v61 = vrot.slane %v2160_v55, 1  ;;  %v2285_v27 = vrot.slane %v2160_v55, 2 }
  0x83   : > { %5098 = vmatprep.subr.bf16.mxu0 %v5842_v0  ;;  %5190 = vmatprep.mubr.msk.bf16.mxu1 %vm5843_vm1, %v5842_v0  ;;  %v1105_v63 = vor.u32 %v1104_v58, %v1100_v57  ;;  %v1228_v22 = vrot.slane %v1100_v57, 1  ;;  %v5761_v57 = vld [vmem:[%s6597_s1] sm:$0x3f]  }
  0x84   : > { %5194 = vmatprep.subr.bf16.mxu1 %v5842_v0  ;;  %v2163_v3 = vor.u32 %v2162_v61, %v2158_v60  ;;  %v3493_v61 = vsel %vm278_vm0, %v5761_v57, 0 }
  0x85   : > { %v1110_v6 = vsel %vm256_vm2, %v1105_v63, %v1109_v1  ;;  %v5763_v63 = vld [vmem:[%s6597_s1 + $0x10] sm:$0x3f]   ;;  %v2506_v1 = vsel %vm278_vm0, %v5762_v62, 0 }
  0x86   : > { %v2168_v8 = vsel %vm256_vm2, %v2163_v3, %v2167_v4  ;;  %v3550_v2 = vsel %vm278_vm0, %v5763_v63, 0  ;;  %v2494_v3 = vrot.slane %v6211_v30, 1  ;;  %v2495_v4 = vrot.slane %v6223_v36, 1 }
  0x8c   : > { %5095 = vmatmul.mubr.msk.bf16.vlgmr.msra.gmra.mrb[0].mxu0 %vm274_vm3, %v847_v13  ;;  %v2225_v13 = vrot.slane %v5746_v50, 1 }
  0x8d   : > { %5099 = vmatpush3.bf16.msra.mxu0 %v917_v14  ;;  %5191 = vmatmul.mubr.msk.bf16.vlgmr.msra.gmra.mrb[0].mxu1 %vm274_vm3, %v1909_v15  ;;  %v2226_v14 = vrot.slane %v5750_v54, 1  ;;  %v5753_v15 = vld [vmem:[%s6597_s1 + $0x78] sm:$0x3f]   ;;  %v5758_v54 = vld [vmem:[%s6597_s1] sm:$0x3f]  }
  0x8e   : > { %5195 = vmatpush3.bf16.msra.mxu1 %v1978_v16  ;;  %5100 = vmatprep.mubr.msk.bf16.mxu0 %vm5843_vm1, %v5842_v0  ;;  %v1231_v16 = vshrl.u32 %v5748_v51, 16  ;;  %v2302_v21 = vsel %vm278_vm0, %v5753_v15, 0  ;;  %v3442_v51 = vsel %vm278_vm0, %v5755_v41, 0 }
  0x8f   : > { %5104 = vmatprep.subr.bf16.mxu0 %v5842_v0  ;;  %5196 = vmatprep.mubr.msk.bf16.mxu1 %vm5843_vm1, %v5842_v0  ;;  %v2227_v20 = vsel %vm377_vm4, %v2225_v13, %v2226_v14  ;;  %v3600_v13 = vshrl.u32 %v6230_v39, 16 }
  0x90   : > { %5200 = vmatprep.subr.bf16.mxu1 %v5842_v0  ;;  %v1233_v24 = vrot.slane %v1231_v16, 1  ;;  %v2554_v16 = vrot.slane %v2380_v37, 2 }
  0x98   : > { %5101 = vmatmul.mubr.msk.bf16.vlgmr.msra.gmra.mrb[0].mxu0 %vm274_vm3, %v907_v23  ;;  %v1229_v23 = vrot.slane %v1102_v52, 2 }
  0x99   : > { %5105 = vmatpush3.bf16.msra.mxu0 %v983_v25  ;;  %5197 = vmatmul.mubr.msk.bf16.vlgmr.msra.gmra.mrb[0].mxu1 %vm274_vm3, %v1968_v26  ;;  %v1234_v25 = vrot.slane %v1107_v59, 2  ;;  %v2284_v26 = vrot.slane %v2158_v60, 1  ;;  %v2449_v59 = vsel %vm278_vm0, %v5758_v54, 0  ;;  %v5775_v54 = vld [vmem:[%s6597_s1 + $0x30] sm:$0x3f]  }
  0x9a   : > { %5201 = vmatpush3.bf16.msra.mxu1 %v2043_v28  ;;  %5106 = vmatprep.mubr.msk.bf16.mxu0 %vm5843_vm1, %v5842_v0  ;;  %v2289_v28 = vrot.slane %v2287_v18, 1  ;;  %v1230_v32 = vor.u32 %v1229_v23, %v1228_v22 }
  0x9b   : > { %5110 = vmatprep.subr.bf16.mxu0 %v5842_v0  ;;  %5202 = vmatprep.mubr.msk.bf16.mxu1 %vm5843_vm1, %v5842_v0  ;;  %v1235_v33 = vor.u32 %v1234_v25, %v1233_v24  ;;  %v2286_v34 = vor.u32 %v2285_v27, %v2284_v26  ;;  %v5766_v25 = vld [vmem:[%s6597_s1 + $0x20] sm:$0x3f]  }
  0x9c   : > { %5206 = vmatprep.subr.bf16.mxu1 %v5842_v0  ;;  %v2291_v35 = vor.u32 %v2290_v29, %v2289_v28  ;;  %v5767_v28 = vld [vmem:[%s6597_s1 + $0x20] sm:$0x3f]  }
  0x9d   : > { %v1236_v42 = vsel %vm438_vm5, %v1230_v32, %v1235_v33  ;;  %v3679_v32 = vsel %vm278_vm0, %v5767_v28, 0  ;;  %v5769_v33 = vld [vmem:[%s6597_s1 + $0x28] sm:$0x3f]  }
  0x9e   : > { %v5783_v28 = vld [vmem:[%s6597_s1 + $0x48] sm:$0x3f]  }
  0xa4   : > { %5107 = vmatmul.mubr.msk.bf16.vlgmr.msra.gmra.mrb[0].mxu0 %vm274_vm3, %v973_v43  ;;  %v2292_v43 = vsel %vm438_vm5, %v2286_v34, %v2291_v35  ;;  %v5768_v34 = vld [vmem:[%s5925_s7 + $0x24] sm:$0xff]  }
  0xa5   : > { %5111 = vmatpush3.bf16.msra.mxu0 %v1049_v44  ;;  %5203 = vmatmul.mubr.msk.bf16.vlgmr.msra.gmra.mrb[0].mxu1 %vm274_vm3, %v2033_v45  ;;  %v2378_v44 = vshrl.u32 %v6211_v30, 16  ;;  %v2382_v45 = vrot.slane %v2380_v37, 1  ;;  %v5771_v35 = vld [vmem:[%s6597_s1 + $0x28] sm:$0x3f]   ;;  %v2687_v38 = vshll.u32 %v5768_v34, 16 }
  0xa6   : > { %5207 = vmatpush3.bf16.msra.mxu1 %v2108_v46  ;;  %5112 = vmatprep.mubr.msk.bf16.mxu0 %vm5843_vm1, %v5842_v0  ;;  %v2385_v46 = vshll.u32 %v6223_v36, 16  ;;  %v5770_v36 = vld [vmem:[%s5925_s7 + $0x30] sm:$0xff]   ;;  %v5772_v37 = vld [vmem:[%s5925_s7 + $0x2c] ss:$0 sps:$4 sm:$0x33]  }
  0xa7   : > { %5116 = vmatprep.subr.bf16.mxu0 %v5842_v0  ;;  %5208 = vmatprep.mubr.msk.bf16.mxu1 %vm5843_vm1, %v5842_v0  ;;  %v2383_v52 = vor.u32 %v2382_v45, %v2378_v44  ;;  %v2553_v15 = vrot.slane %v2378_v44, 1  ;;  %v3731_v41 = vshll.u32 %v5770_v36, 16  ;;  %v2689_v44 = vrot.slane %v2687_v38, 1 }
  0xa8   : > { %5212 = vmatprep.subr.bf16.mxu1 %v5842_v0  ;;  %v2559_v18 = vrot.slane %v2385_v46, 2  ;;  %v2692_v45 = vshll.u32 %v5772_v37, 16  ;;  %v3796_v62 = vrot.slane %v5770_v36, 1 }
  0xa9   : > { %v2555_v23 = vor.u32 %v2554_v16, %v2553_v15 }
  0xb0   : > { %5113 = vmatmul.mubr.msk.bf16.vlgmr.msra.gmra.mrb[0].mxu0 %vm274_vm3, %v5744_v48  ;;  %v3422_v48 = vshrl.u32 %v6216_v31, 16 }
  0xb1   : > { %5117 = vmatpush3.bf16.msra.mxu0 %v1120_v53  ;;  %5209 = vmatmul.mubr.msk.bf16.vlgmr.msra.gmra.mrb[0].mxu1 %vm274_vm3, %v5746_v50  ;;  %v3429_v50 = vshll.u32 %v6230_v39, 16  ;;  %v2387_v53 = vrot.slane %v2385_v46, 1  ;;  %v3729_v46 = vshrl.u32 %v5770_v36, 16 }
  0xb2   : > { %5213 = vmatpush3.bf16.msra.mxu1 %v2178_v56  ;;  %5118 = vmatprep.mubr.msk.bf16.mxu0 %vm5843_vm1, %v5842_v0  ;;  %v3427_v55 = vor.u32 %v3426_v49, %v3422_v48 }
  0xb3   : > { %5122 = vmatprep.subr.bf16.mxu0 %v5842_v0  ;;  %5214 = vmatprep.mubr.msk.bf16.mxu1 %vm5843_vm1, %v5842_v0  ;;  %v3431_v56 = vrot.slane %v3429_v50, 1  ;;  %v2388_v58 = vsel %vm256_vm2, %v2383_v52, %v2387_v53  ;;  %v3603_v22 = vrot.slane %v3429_v50, 2  ;;  %v2694_v50 = vrot.slane %v2692_v45, 1 }
  0xb4   : > { %5218 = vmatprep.subr.bf16.mxu1 %v5842_v0 }
  0xb5   : > { %v3432_v60 = vsel %vm256_vm2, %v3427_v55, %v3431_v56 }
  0xbc   : > { %5119 = vmatmul.mubr.msk.bf16.vlgmr.msra.gmra.mrb[0].mxu0 %vm274_vm3, %v1110_v6  ;;  %v3538_v6 = vrot.slane %v6216_v31, 1 }
  0xbd   : > { %5123 = vmatpush3.bf16.msra.mxu0 %v1180_v7  ;;  %5215 = vmatmul.mubr.msk.bf16.vlgmr.msra.gmra.mrb[0].mxu1 %vm274_vm3, %v2168_v8  ;;  %v3539_v7 = vrot.slane %v6230_v39, 1  ;;  %v5765_v8 = vld [vmem:[%s6597_s1 + $0x18] sm:$0x3f]   ;;  %v2705_v39 = vsel %vm278_vm0, %v5769_v33, 0 }
  0xbe   : > { %5219 = vmatpush3.bf16.msra.mxu1 %v2237_v9  ;;  %5124 = vmatprep.mubr.msk.bf16.mxu0 %vm5843_vm1, %v5842_v0  ;;  %v2496_v9 = vsel %vm377_vm4, %v2494_v3, %v2495_v4  ;;  %v3615_v14 = vsel %vm278_vm0, %v5765_v8, 0  ;;  %v2814_v3 = vshrl.u32 %v5772_v37, 16  ;;  %v5786_v33 = vld [vmem:[%s5925_s7 + $0x44] ss:$0 sps:$4 sm:$0x33]  }
  0xbf   : > { %5128 = vmatprep.subr.bf16.mxu0 %v5842_v0  ;;  %5220 = vmatprep.mubr.msk.bf16.mxu1 %vm5843_vm1, %v5842_v0  ;;  %v3540_v12 = vsel %vm377_vm4, %v3538_v6, %v3539_v7 }
  0xc0   : > { %5224 = vmatprep.subr.bf16.mxu1 %v5842_v0 }
  0xc8   : > { %5125 = vmatmul.mubr.msk.bf16.vlgmr.msra.gmra.mrb[0].mxu0 %vm274_vm3, %v1170_v17  ;;  %v2558_v17 = vrot.slane %v2556_v10, 1  ;;  %v2816_v10 = vrot.slane %v2814_v3, 1 }
  0xc9   : > { %5129 = vmatpush3.bf16.msra.mxu0 %v1246_v19  ;;  %5221 = vmatmul.mubr.msk.bf16.vlgmr.msra.gmra.mrb[0].mxu1 %vm274_vm3, %v2227_v20  ;;  %v3597_v19 = vrot.slane %v3422_v48, 1  ;;  %v3598_v20 = vrot.slane %v3424_v40, 2  ;;  %v5774_v40 = vld [vmem:[%s5925_s7 + $0x38] ss:$0 sps:$4 sm:$0x33]  }
  0xca   : > { %5225 = vmatpush3.bf16.msra.mxu1 %v2302_v21  ;;  %5130 = vmatprep.mubr.msk.bf16.mxu0 %vm5843_vm1, %v5842_v0  ;;  %v3602_v21 = vrot.slane %v3600_v13, 1  ;;  %v2560_v24 = vor.u32 %v2559_v18, %v2558_v17  ;;  %v3736_v48 = vshll.u32 %v5774_v40, 16  ;;  %v3797_v63 = vrot.slane %v5774_v40, 1  ;;  %v5778_v18 = vld [vmem:[%s6597_s1 + $0x40] sm:$0x3f]  }
  0xcb   : > { %5226 = vmatprep.mubr.msk.bf16.mxu1 %vm5843_vm1, %v5842_v0  ;;  %5230 = vmatprep.subr.bf16.mxu0 %v5842_v0  ;;  %v3599_v26 = vor.u32 %v3598_v20, %v3597_v19  ;;  %v3858_v6 = vshrl.u32 %v5774_v40, 16  ;;  %v3856_v13 = vrot.slane %v3731_v41, 2 }
  0xcc   : > { %5326 = vmatprep.subr.bf16.mxu1 %v5842_v0  ;;  %v3604_v27 = vor.u32 %v3603_v22, %v3602_v21  ;;  %v2561_v29 = vsel %vm438_vm5, %v2555_v23, %v2560_v24  ;;  %v3738_v53 = vrot.slane %v3736_v48, 1  ;;  %v3798_v5 = vsel %vm377_vm4, %v3796_v62, %v3797_v63  ;;  %v5779_v21 = vld [vmem:[%s6597_s1 + $0x40] sm:$0x3f]  }
  0xcd   : > { %v3861_v15 = vrot.slane %v3736_v48, 2  ;;  %v2893_v23 = vsel %vm278_vm0, %v5778_v18, 0  ;;  %v4116_v62 = vshrl.u32 %v5786_v33, 16 }
  0xd4   : > { %5131 = vmatmul.mubr.msk.bf16.vlgmr.msra.gmra.mrb[0].mxu0 %vm274_vm3, %v1236_v42  ;;  %v3749_v42 = vsel %vm278_vm0, %v5771_v35, 0  ;;  %v4007_v35 = vsel %vm278_vm0, %v5783_v28, 0 }
  0xd5   : > { %5227 = vmatmul.mubr.msk.bf16.vlgmr.msra.gmra.mrb[0].mxu1 %vm274_vm3, %v2292_v43  ;;  %5231 = vmatpush3.bf16.msra.mxu0 %v2398_v47  ;;  %v2685_v43 = vshrl.u32 %v5768_v34, 16  ;;  %v3733_v47 = vrot.slane %v3731_v41, 1  ;;  %v3994_v41 = vshll.u32 %v5786_v33, 16 }
  0xd6   : > { %5327 = vmatpush3.bf16.msra.mxu1 %v3442_v51  ;;  %5232 = vmatprep.mubr.msk.bf16.mxu0 %vm5843_vm1, %v5842_v0  ;;  %v5773_v51 = vld [vmem:[%s6597_s1 + $0x30] sm:$0x3f]  }
  0xd7   : > { %5236 = vmatprep.subr.bf16.mxu0 %v5842_v0  ;;  %5328 = vmatprep.mubr.msk.bf16.mxu1 %vm5843_vm1, %v5842_v0  ;;  %v2690_v49 = vor.u32 %v2689_v44, %v2685_v43  ;;  %v3734_v52 = vor.u32 %v3733_v47, %v3729_v46  ;;  %v2764_v56 = vsel %vm278_vm0, %v5773_v51, 0  ;;  %v2811_v8 = vrot.slane %v2685_v43, 1  ;;  %v5785_v44 = vld [vmem:[%s6597_s1 + $0x50] sm:$0x3f]  }
  0xd8   : > { %5332 = vmatprep.subr.bf16.mxu1 %v5842_v0  ;;  %v5787_v47 = vld [vmem:[%s6597_s1 + $0x50] sm:$0x3f]  }
  0xd9   : > { %v2695_v55 = vsel %vm256_vm2, %v2690_v49, %v2694_v50  ;;  %v3739_v57 = vsel %vm256_vm2, %v3734_v52, %v3738_v53  ;;  %v3022_v49 = vsel %vm278_vm0, %v5785_v44, 0  ;;  %v4066_v51 = vsel %vm278_vm0, %v5787_v47, 0  ;;  %v5800_v47 = vld [vmem:[%s6597_s1 + $0x78] sm:$0x3f]  }
  0xdc   : > { %5233 = vmatmul.mubr.msk.bf16.vlgmr.msra.gmra.mrb[4].mxu0 %vm274_vm3, %v2388_v58  ;;  %v3808_v58 = vsel %vm278_vm0, %v5775_v54, 0  ;;  %v5788_v54 = vld [vmem:[%s6597_s1 + $0x58] sm:$0x3f]  }
  0xdd   : > { %5237 = vmatpush3.bf16.msra.mxu0 %v2449_v59  ;;  %5329 = vmatmul.mubr.msk.bf16.vlgmr.msra.gmra.mrb[4].mxu1 %vm274_vm3, %v3432_v60  ;;  %v2752_v59 = vrot.slane %v5768_v34, 1  ;;  %v2753_v60 = vrot.slane %v5772_v37, 1 }
  0xde   : > { %5333 = vmatpush3.bf16.msra.mxu1 %v3493_v61  ;;  %5238 = vmatprep.mubr.msk.bf16.mxu0 %vm5843_vm1, %v5842_v0  ;;  %v5776_v61 = vld [vmem:[%s6597_s1 + $0x38] sm:$0x3f]  }
  0xdf   : > { %5242 = vmatprep.subr.bf16.mxu0 %v5842_v0  ;;  %5334 = vmatprep.mubr.msk.bf16.mxu1 %vm5843_vm1, %v5842_v0  ;;  %v2829_v4 = vsel %vm278_vm0, %v5776_v61, 0 }
  0xe0   : > { %5338 = vmatprep.subr.bf16.mxu1 %v5842_v0 }
  0xe8   : > { %5239 = vmatmul.mubr.msk.bf16.vlgmr.msra.gmra.mrb[4].mxu0 %vm274_vm3, %v6211_v30  ;;  %v2635_v30 = vsel %vm278_vm0, %v5766_v25, 0  ;;  %v3937_v25 = vsel %vm278_vm0, %v5779_v21, 0  ;;  %v5795_v21 = vld [vmem:[%s6597_s1 + $0x68] sm:$0x3f]  }
  0xe9   : > { %5243 = vmatpush3.bf16.msra.mxu0 %v2506_v1  ;;  %5335 = vmatmul.mubr.msk.bf16.vlgmr.msra.gmra.mrb[4].mxu1 %vm274_vm3, %v6216_v31  ;;  %v3605_v31 = vsel %vm438_vm5, %v3599_v26, %v3604_v27  ;;  %v5777_v1 = vld [vmem:[%s6597_s1 + $0x38] sm:$0x3f]   ;;  %v5781_v26 = vld [vmem:[%s6597_s1 + $0x48] sm:$0x3f]   ;;  %v5780_v27 = vld [vmem:[%s5925_s7 + $0x30] sm:$0xff]   ;;  %v4266_v28 = vsel %vm278_vm0, %v5795_v21, 0 }
  0xea   : > { %5339 = vmatpush3.bf16.msra.mxu1 %v3550_v2  ;;  %5244 = vmatprep.mubr.msk.bf16.mxu0 %vm5843_vm1, %v5842_v0  ;;  %v2754_v2 = vsel %vm377_vm4, %v2752_v59, %v2753_v60  ;;  %v3873_v7 = vsel %vm278_vm0, %v5777_v1, 0  ;;  %v3010_v52 = vrot.slane %v5780_v27, 1  ;;  %v3087_v60 = vsel %vm278_vm0, %v5788_v54, 0 }
  0xeb   : > { %5248 = vmatprep.subr.bf16.mxu0 %v5842_v0  ;;  %5340 = vmatprep.mubr.msk.bf16.mxu1 %vm5843_vm1, %v5842_v0 }
  0xec   : > { %5344 = vmatprep.subr.bf16.mxu1 %v5842_v0 }
  0xf4   : > { %5245 = vmatmul.mubr.msk.bf16.vlgmr.msra.gmra.mrb[4].mxu0 %vm274_vm3, %v2496_v9  ;;  %v2812_v9 = vrot.slane %v2687_v38, 2 }
  0xf5   : > { %5249 = vmatpush3.bf16.msra.mxu0 %v2571_v11  ;;  %5341 = vmatmul.mubr.msk.bf16.vlgmr.msra.gmra.mrb[4].mxu1 %vm274_vm3, %v3540_v12  ;;  %v2817_v11 = vrot.slane %v2692_v45, 2  ;;  %v3855_v12 = vrot.slane %v3729_v46, 1  ;;  %v3996_v46 = vrot.slane %v3994_v41, 1 }
  0xf6   : > { %5345 = vmatpush3.bf16.msra.mxu1 %v3615_v14  ;;  %5250 = vmatprep.mubr.msk.bf16.mxu0 %vm5843_vm1, %v5842_v0  ;;  %v3860_v14 = vrot.slane %v3858_v6, 1  ;;  %v2813_v16 = vor.u32 %v2812_v9, %v2811_v8  ;;  %v4119_v8 = vrot.slane %v3994_v41, 2 }
  0xf7   : > { %5254 = vmatprep.subr.bf16.mxu0 %v5842_v0  ;;  %5346 = vmatprep.mubr.msk.bf16.mxu1 %vm5843_vm1, %v5842_v0  ;;  %v2818_v17 = vor.u32 %v2817_v11, %v2816_v10  ;;  %v3857_v19 = vor.u32 %v3856_v13, %v3855_v12  ;;  %v5790_v11 = vld [vmem:[%s6597_s1 + $0x60] sm:$0x3f]  }
  0xf8   : > { %5350 = vmatprep.subr.bf16.mxu1 %v5842_v0  ;;  %v3862_v20 = vor.u32 %v3861_v15, %v3860_v14  ;;  %v5791_v14 = vld [vmem:[%s6597_s1 + $0x60] sm:$0x3f]  }
  0xf9   : > { %v2819_v22 = vsel %vm438_vm5, %v2813_v16, %v2818_v17  ;;  %v3152_v16 = vsel %vm278_vm0, %v5790_v11, 0  ;;  %v4196_v18 = vsel %vm278_vm0, %v5791_v14, 0 }
  0xfa   : > { %v3863_v24 = vsel %vm438_vm5, %v3857_v19, %v3862_v20  ;;  %v5793_v19 = vld [vmem:[%s6597_s1 + $0x68] sm:$0x3f]   ;;  %v5792_v20 = vld [vmem:[%s5925_s7 + $0x3c] sm:$0xff]  }
 0x100   : > { %5251 = vmatmul.mubr.msk.bf16.vlgmr.msra.gmra.mrb[4].mxu0 %vm274_vm3, %v2561_v29  ;;  %v5782_v29 = vld [vmem:[%s5925_s7 + $0x3c] sm:$0xff]  }
 0x101   : > { %5255 = vmatpush3.bf16.msra.mxu0 %v2635_v30  ;;  %5347 = vmatmul.mubr.msk.bf16.vlgmr.msra.gmra.mrb[4].mxu1 %vm274_vm3, %v3605_v31  ;;  %v5784_v30 = vld [vmem:[%s5925_s7 + $0x38] ss:$0 sps:$4 sm:$0x33]   ;;  %v2945_v31 = vshll.u32 %v5780_v27, 16 }
 0x102   : > { %5351 = vmatpush3.bf16.msra.mxu1 %v3679_v32  ;;  %5256 = vmatprep.mubr.msk.bf16.mxu0 %vm5843_vm1, %v5842_v0  ;;  %v2963_v32 = vsel %vm278_vm0, %v5781_v26, 0  ;;  %v2950_v38 = vshll.u32 %v5784_v30, 16  ;;  %v3011_v53 = vrot.slane %v5784_v30, 1  ;;  %v3072_v59 = vshrl.u32 %v5784_v30, 16 }
 0x103   : > { %5260 = vmatprep.subr.bf16.mxu0 %v5842_v0  ;;  %5352 = vmatprep.mubr.msk.bf16.mxu1 %vm5843_vm1, %v5842_v0  ;;  %v2947_v37 = vrot.slane %v2945_v31, 1  ;;  %v5798_v26 = vld [vmem:[%s5925_s7 + $0x50] ss:$0 sps:$4 sm:$0x33]  }
 0x104   : > { %5356 = vmatprep.subr.bf16.mxu1 %v5842_v0  ;;  %v2952_v43 = vrot.slane %v2950_v38, 1  ;;  %v3074_v3 = vrot.slane %v3072_v59, 1 }
 0x10c   : > { %5257 = vmatmul.mubr.msk.bf16.vlgmr.msra.gmra.mrb[4].mxu0 %vm274_vm3, %v5768_v34  ;;  %v3989_v34 = vshll.u32 %v5782_v29, 16 }
 0x10d   : > { %5261 = vmatpush3.bf16.msra.mxu0 %v2705_v39  ;;  %5353 = vmatmul.mubr.msk.bf16.vlgmr.msra.gmra.mrb[4].mxu1 %vm274_vm3, %v5770_v36  ;;  %v2943_v36 = vshrl.u32 %v5780_v27, 16  ;;  %v3987_v39 = vshrl.u32 %v5782_v29, 16 }
 0x10e   : > { %5357 = vmatpush3.bf16.msra.mxu1 %v3749_v42  ;;  %5262 = vmatprep.mubr.msk.bf16.mxu0 %vm5843_vm1, %v5842_v0  ;;  %v3991_v40 = vrot.slane %v3989_v34, 1  ;;  %v4114_v6 = vrot.slane %v3989_v34, 2  ;;  %v4253_v34 = vshll.u32 %v5798_v26, 16 }
 0x10f   : > { %5266 = vmatprep.subr.bf16.mxu0 %v5842_v0  ;;  %5358 = vmatprep.mubr.msk.bf16.mxu1 %vm5843_vm1, %v5842_v0  ;;  %v2948_v42 = vor.u32 %v2947_v37, %v2943_v36  ;;  %v3069_v1 = vrot.slane %v2943_v36, 1  ;;  %v5797_v37 = vld [vmem:[%s6597_s1 + $0x70] sm:$0x3f]  }
 0x110   : > { %5362 = vmatprep.subr.bf16.mxu1 %v5842_v0  ;;  %v3992_v45 = vor.u32 %v3991_v40, %v3987_v39  ;;  %v5799_v40 = vld [vmem:[%s6597_s1 + $0x70] sm:$0x3f]  }
 0x111   : > { %v2953_v48 = vsel %vm256_vm2, %v2948_v42, %v2952_v43  ;;  %v3281_v42 = vsel %vm278_vm0, %v5797_v37, 0  ;;  %v4325_v44 = vsel %vm278_vm0, %v5799_v40, 0 }
 0x112   : > { %v3997_v50 = vsel %vm256_vm2, %v3992_v45, %v3996_v46  ;;  %v3269_v45 = vrot.slane %v5792_v20, 1 }
 0x118   : > { %5263 = vmatmul.mubr.msk.bf16.vlgmr.msra.gmra.mrb[4].mxu0 %vm274_vm3, %v2695_v55  ;;  %v4054_v55 = vrot.slane %v5782_v29, 1 }
 0x119   : > { %5267 = vmatpush3.bf16.msra.mxu0 %v2764_v56  ;;  %5359 = vmatmul.mubr.msk.bf16.vlgmr.msra.gmra.mrb[4].mxu1 %vm274_vm3, %v3739_v57  ;;  %v4055_v56 = vrot.slane %v5786_v33, 1  ;;  %v5789_v57 = vld [vmem:[%s6597_s1 + $0x58] sm:$0x3f]  }
 0x11a   : > { %5363 = vmatpush3.bf16.msra.mxu1 %v3808_v58  ;;  %5268 = vmatprep.mubr.msk.bf16.mxu0 %vm5843_vm1, %v5842_v0  ;;  %v3012_v58 = vsel %vm377_vm4, %v3010_v52, %v3011_v53  ;;  %v4131_v63 = vsel %vm278_vm0, %v5789_v57, 0  ;;  %v3346_v53 = vsel %vm278_vm0, %v5800_v47, 0 }
 0x11b   : > { %5272 = vmatprep.subr.bf16.mxu0 %v5842_v0  ;;  %5364 = vmatprep.mubr.msk.bf16.mxu1 %vm5843_vm1, %v5842_v0  ;;  %v4056_v61 = vsel %vm377_vm4, %v4054_v55, %v4055_v56  ;;  %v4375_v55 = vshrl.u32 %v5798_v26, 16 }
 0x11c   : > { %5368 = vmatprep.subr.bf16.mxu1 %v5842_v0 }
 0x124   : > { %5269 = vmatmul.mubr.msk.bf16.vlgmr.msra.gmra.mrb[4].mxu0 %vm274_vm3, %v2754_v2  ;;  %v3070_v2 = vrot.slane %v2945_v31, 2 }
 0x125   : > { %5273 = vmatpush3.bf16.msra.mxu0 %v2829_v4  ;;  %5365 = vmatmul.mubr.msk.bf16.vlgmr.msra.gmra.mrb[4].mxu1 %vm274_vm3, %v3798_v5  ;;  %v3075_v4 = vrot.slane %v2950_v38, 2  ;;  %v4113_v5 = vrot.slane %v3987_v39, 1  ;;  %v4255_v39 = vrot.slane %v4253_v34, 1 }
 0x126   : > { %5369 = vmatpush3.bf16.msra.mxu1 %v3873_v7  ;;  %5274 = vmatprep.mubr.msk.bf16.mxu0 %vm5843_vm1, %v5842_v0  ;;  %v4118_v7 = vrot.slane %v4116_v62, 1  ;;  %v3071_v9 = vor.u32 %v3070_v2, %v3069_v1  ;;  %v4378_v1 = vrot.slane %v4253_v34, 2 }
 0x127   : > { %5278 = vmatprep.subr.bf16.mxu0 %v5842_v0  ;;  %5370 = vmatprep.mubr.msk.bf16.mxu1 %vm5843_vm1, %v5842_v0  ;;  %v3076_v10 = vor.u32 %v3075_v4, %v3074_v3  ;;  %v4115_v12 = vor.u32 %v4114_v6, %v4113_v5 }
 0x128   : > { %5374 = vmatprep.subr.bf16.mxu1 %v5842_v0  ;;  %v4120_v13 = vor.u32 %v4119_v8, %v4118_v7  ;;  %v4639_v8 = vld [vmem:[%s6599_s3] ss:$0 sm:$0xff] }
 0x129   : > { %v3077_v15 = vsel %vm438_vm5, %v3071_v9, %v3076_v10 }
 0x12a   : > { %v4121_v17 = vsel %vm438_vm5, %v4115_v12, %v4120_v13 }
 0x130   : > { %5275 = vmatmul.mubr.msk.bf16.vlgmr.msra.gmra.mrb[4].mxu0 %vm274_vm3, %v2819_v22  ;;  %v5794_v22 = vld [vmem:[%s5925_s7 + $0x48] sm:$0xff]  }
 0x131   : > { %5279 = vmatpush3.bf16.msra.mxu0 %v2893_v23  ;;  %5371 = vmatmul.mubr.msk.bf16.vlgmr.msra.gmra.mrb[4].mxu1 %vm274_vm3, %v3863_v24  ;;  %v5796_v23 = vld [vmem:[%s5925_s7 + $0x44] ss:$0 sps:$4 sm:$0x33]   ;;  %v3204_v24 = vshll.u32 %v5792_v20, 16 }
 0x132   : > { %5375 = vmatpush3.bf16.msra.mxu1 %v3937_v25  ;;  %5280 = vmatprep.mubr.msk.bf16.mxu0 %vm5843_vm1, %v5842_v0  ;;  %v3222_v25 = vsel %vm278_vm0, %v5793_v19, 0  ;;  %v3209_v31 = vshll.u32 %v5796_v23, 16  ;;  %v3270_v46 = vrot.slane %v5796_v23, 1  ;;  %v3331_v52 = vshrl.u32 %v5796_v23, 16 }
 0x133   : > { %5284 = vmatprep.subr.bf16.mxu0 %v5842_v0  ;;  %5376 = vmatprep.mubr.msk.bf16.mxu1 %vm5843_vm1, %v5842_v0  ;;  %v3206_v30 = vrot.slane %v3204_v24, 1 }
 0x134   : > { %5380 = vmatprep.subr.bf16.mxu1 %v5842_v0  ;;  %v3211_v36 = vrot.slane %v3209_v31, 1  ;;  %v3333_v59 = vrot.slane %v3331_v52, 1 }
 0x13c   : > { %5281 = vmatmul.mubr.msk.bf16.vlgmr.msra.gmra.mrb[4].mxu0 %vm274_vm3, %v5780_v27  ;;  %v4248_v27 = vshll.u32 %v5794_v22, 16 }
 0x13d   : > { %5285 = vmatpush3.bf16.msra.mxu0 %v2963_v32  ;;  %5377 = vmatmul.mubr.msk.bf16.vlgmr.msra.gmra.mrb[4].mxu1 %vm274_vm3, %v5782_v29  ;;  %v3202_v29 = vshrl.u32 %v5792_v20, 16  ;;  %v4246_v32 = vshrl.u32 %v5794_v22, 16 }
 0x13e   : > { %5381 = vmatpush3.bf16.msra.mxu1 %v4007_v35  ;;  %5286 = vmatprep.mubr.msk.bf16.mxu0 %vm5843_vm1, %v5842_v0  ;;  %v4250_v33 = vrot.slane %v4248_v27, 1  ;;  %v4373_v62 = vrot.slane %v4248_v27, 2 }
 0x13f   : > { %5290 = vmatprep.subr.bf16.mxu0 %v5842_v0  ;;  %5382 = vmatprep.mubr.msk.bf16.mxu1 %vm5843_vm1, %v5842_v0  ;;  %v3207_v35 = vor.u32 %v3206_v30, %v3202_v29  ;;  %v3328_v57 = vrot.slane %v3202_v29, 1 }
 0x140   : > { %5386 = vmatprep.subr.bf16.mxu1 %v5842_v0  ;;  %v4251_v38 = vor.u32 %v4250_v33, %v4246_v32 }
 0x141   : > { %v3212_v41 = vsel %vm256_vm2, %v3207_v35, %v3211_v36 }
 0x142   : > { %v4256_v43 = vsel %vm256_vm2, %v4251_v38, %v4255_v39 }
 0x148   : > { %5287 = vmatmul.mubr.msk.bf16.vlgmr.msra.gmra.mrb[4].mxu0 %vm274_vm3, %v2953_v48  ;;  %v4313_v48 = vrot.slane %v5794_v22, 1 }
 0x149   : > { %5291 = vmatpush3.bf16.msra.mxu0 %v3022_v49  ;;  %5383 = vmatmul.mubr.msk.bf16.vlgmr.msra.gmra.mrb[4].mxu1 %vm274_vm3, %v3997_v50  ;;  %v4314_v49 = vrot.slane %v5798_v26, 1  ;;  %v5801_v50 = vld [vmem:[%s6597_s1 + $0x78] sm:$0x3f]  }
 0x14a   : > { %5387 = vmatpush3.bf16.msra.mxu1 %v4066_v51  ;;  %5292 = vmatprep.mubr.msk.bf16.mxu0 %vm5843_vm1, %v5842_v0  ;;  %v3271_v51 = vsel %vm377_vm4, %v3269_v45, %v3270_v46  ;;  %v4390_v56 = vsel %vm278_vm0, %v5801_v50, 0 }
 0x14b   : > { %5296 = vmatprep.subr.bf16.mxu0 %v5842_v0  ;;  %5388 = vmatprep.mubr.msk.bf16.mxu1 %vm5843_vm1, %v5842_v0  ;;  %v4315_v54 = vsel %vm377_vm4, %v4313_v48, %v4314_v49 }
 0x14c   : > { %5392 = vmatprep.subr.bf16.mxu1 %v5842_v0 }
 0x154   : > { %5293 = vmatmul.mubr.msk.bf16.vlgmr.msra.gmra.mrb[4].mxu0 %vm274_vm3, %v3012_v58  ;;  %v3329_v58 = vrot.slane %v3204_v24, 2 }
 0x155   : > { %5297 = vmatpush3.bf16.msra.mxu0 %v3087_v60  ;;  %5389 = vmatmul.mubr.msk.bf16.vlgmr.msra.gmra.mrb[4].mxu1 %vm274_vm3, %v4056_v61  ;;  %v3334_v60 = vrot.slane %v3209_v31, 2  ;;  %v4372_v61 = vrot.slane %v4246_v32, 1 }
 0x156   : > { %5393 = vmatpush3.bf16.msra.mxu1 %v4131_v63  ;;  %5298 = vmatprep.mubr.msk.bf16.mxu0 %vm5843_vm1, %v5842_v0  ;;  %v4377_v63 = vrot.slane %v4375_v55, 1  ;;  %v3330_v2 = vor.u32 %v3329_v58, %v3328_v57 }
 0x157   : > { %5302 = vmatprep.subr.bf16.mxu0 %v5842_v0  ;;  %5394 = vmatprep.mubr.msk.bf16.mxu1 %vm5843_vm1, %v5842_v0  ;;  %v3335_v3 = vor.u32 %v3334_v60, %v3333_v59  ;;  %v4374_v4 = vor.u32 %v4373_v62, %v4372_v61 }
 0x158   : > { %5398 = vmatprep.subr.bf16.mxu1 %v5842_v0  ;;  %v4379_v5 = vor.u32 %v4378_v1, %v4377_v63 }
 0x159   : > { %v3336_v6 = vsel %vm438_vm5, %v3330_v2, %v3335_v3 }
 0x15a   : > { %v4380_v7 = vsel %vm438_vm5, %v4374_v4, %v4379_v5 }
 0x160   : > { %5299 = vmatmul.mubr.msk.bf16.vlgmr.msra.gmra.mrb[4].mxu0 %vm274_vm3, %v3077_v15 }
 0x161   : > { %5303 = vmatpush3.bf16.msra.mxu0 %v3152_v16  ;;  %5395 = vmatmul.mubr.msk.bf16.vlgmr.msra.gmra.mrb[4].mxu1 %vm274_vm3, %v4121_v17 }
 0x162   : > { %5399 = vmatpush3.bf16.msra.mxu1 %v4196_v18  ;;  %5304 = vmatprep.mubr.msk.bf16.mxu0 %vm5843_vm1, %v5842_v0 }
 0x163   : > { %5308 = vmatprep.subr.bf16.mxu0 %v5842_v0  ;;  %5400 = vmatprep.mubr.msk.bf16.mxu1 %vm5843_vm1, %v5842_v0 }
 0x164   : > { %5404 = vmatprep.subr.bf16.mxu1 %v5842_v0 }
 0x16c   : > { %5305 = vmatmul.mubr.msk.bf16.vlgmr.msra.gmra.mrb[4].mxu0 %vm274_vm3, %v5792_v20 }
 0x16d   : > { %5309 = vmatpush3.bf16.msra.mxu0 %v3222_v25  ;;  %5401 = vmatmul.mubr.msk.bf16.vlgmr.msra.gmra.mrb[4].mxu1 %vm274_vm3, %v5794_v22 }
 0x16e   : > { %5405 = vmatpush3.bf16.msra.mxu1 %v4266_v28  ;;  %5310 = vmatprep.mubr.msk.bf16.mxu0 %vm5843_vm1, %v5842_v0 }
 0x16f   : > { %5314 = vmatprep.subr.bf16.mxu0 %v5842_v0  ;;  %5406 = vmatprep.mubr.msk.bf16.mxu1 %vm5843_vm1, %v5842_v0 }
 0x170   : > { %5410 = vmatprep.subr.bf16.mxu1 %v5842_v0 }
 0x178   : > { %5311 = vmatmul.mubr.msk.bf16.vlgmr.msra.gmra.mrb[4].mxu0 %vm274_vm3, %v3212_v41 }
 0x179   : > { %5315 = vmatpush3.bf16.msra.mxu0 %v3281_v42  ;;  %5407 = vmatmul.mubr.msk.bf16.vlgmr.msra.gmra.mrb[4].mxu1 %vm274_vm3, %v4256_v43 }
 0x17a   : > { %5411 = vmatpush3.bf16.msra.mxu1 %v4325_v44  ;;  %5316 = vmatprep.mubr.msk.bf16.mxu0 %vm5843_vm1, %v5842_v0 }
 0x17b   : > { %5320 = vmatprep.subr.bf16.mxu0 %v5842_v0  ;;  %5412 = vmatprep.mubr.msk.bf16.mxu1 %vm5843_vm1, %v5842_v0 }
 0x17c   : > { %5416 = vmatprep.subr.bf16.mxu1 %v5842_v0 }
 0x184   : > { %5317 = vmatmul.mubr.msk.bf16.vlgmr.msra.gmra.mrb[4].mxu0 %vm274_vm3, %v3271_v51 }
 0x185   : > { %5321 = vmatpush3.bf16.msra.mxu0 %v3346_v53  ;;  %5413 = vmatmul.mubr.msk.bf16.vlgmr.msra.gmra.mrb[4].mxu1 %vm274_vm3, %v4315_v54 }
 0x186   : > { %5417 = vmatpush3.bf16.msra.mxu1 %v4390_v56  ;;  %5322 = vmatprep.mubr.msk.bf16.mxu0 %vm5843_vm1, %v5842_v0 }
 0x187   : > { %5418 = vmatprep.mubr.msk.bf16.mxu1 %vm5843_vm1, %v5842_v0  ;;  %v4638_v0 = vld [vmem:[%s6598_s2] ss:$0 sm:$0xff] }
 0x190   : > { %5323 = vmatmul.mubr.msk.bf16.vlgmr.msra.gmra.mrb[4].mxu0 %vm274_vm3, %v3336_v6 }
 0x191   : > { %5419 = vmatmul.mubr.msk.bf16.vlgmr.msra.gmra.mrb[4].mxu1 %vm274_vm3, %v4380_v7 }
 0x1a7   : > { %v1282_v9 = vpop.f32.mrb[0].mxu0 }
 0x1a8   : > { %v1297_v10 = vmul.f32 %v4638_v0, %v1282_v9  ;;  %v2338_v11 = vpop.f32.mrb[0].mxu1  ;;  %v5132_v12 = vpop.f32.mrb[1].mxu0 }
 0x1a9   : > { %v2347_v13 = vmul.f32 %v4638_v0, %v2338_v11  ;;  %v5228_v14 = vpop.f32.mrb[1].mxu1  ;;  %v1285_v15 = vpop.f32.mrb[2].mxu0 }
 0x1aa   : > { %v1305_v16 = vadd.f32 %v4639_v8, %v1297_v10  ;;  %v1298_v17 = vmul.f32 %v4638_v0, %v1285_v15  ;;  %v2341_v18 = vpop.f32.mrb[2].mxu1  ;;  %v5133_v19 = vpop.f32.mrb[3].mxu0 }
 0x1ab   : > { %v2349_v20 = vadd.f32 %v4639_v8, %v2347_v13  ;;  %v2348_v21 = vmul.f32 %v4638_v0, %v2341_v18  ;;  %v5229_v22 = vpop.f32.mrb[3].mxu1 }
 0x1ac   : > { %v4902_v23 = vpack.c.bf16 %v1305_v16, %v1305_v16  ;;  %v1306_v24 = vadd.f32 %v4639_v8, %v1298_v17 }
 0x1ad   : > { %v4904_v25 = vpack.c.bf16 %v2349_v20, %v2349_v20  ;;  %v2350_v26 = vadd.f32 %v4639_v8, %v2348_v21 }
 0x1ae   : > { %1316 = vst.msk [vmem:[%s6563_s14] sm:$0xf] %vm1315_vm6, %v4902_v23  ;;  %v4903_v27 = vpack.c.bf16 %v1306_v24, %v1306_v24 }
 0x1af   : > { %4726 = vst.msk [vmem:[%s6563_s14 + $0x8] sm:$0xf] %vm1315_vm6, %v4904_v25  ;;  %v4905_v28 = vpack.c.bf16 %v2350_v26, %v2350_v26 }
 0x1b0   : > { %1317 = vst.msk [vmem:[%s6563_s14 + $0x4] sm:$0xf] %vm1315_vm6, %v4903_v27 }
 0x1b1   : > { %4727 = vst.msk [vmem:[%s6563_s14 + $0xc] sm:$0xf] %vm1315_vm6, %v4905_v28 }
 0x263   : > { %v3382_v29 = vpop.f32.mrb[4].mxu0 }
 0x264   : > { %v3391_v30 = vmul.f32 %v4638_v0, %v3382_v29  ;;  %v4426_v31 = vpop.f32.mrb[4].mxu1  ;;  %v5324_v32 = vpop.f32.mrb[5].mxu0 }
 0x265   : > { %v4435_v33 = vmul.f32 %v4638_v0, %v4426_v31  ;;  %v5420_v34 = vpop.f32.mrb[5].mxu1  ;;  %v3385_v35 = vpop.f32.mrb[6].mxu0 }
 0x266   : > { %v3393_v36 = vadd.f32 %v4639_v8, %v3391_v30  ;;  %v3392_v37 = vmul.f32 %v4638_v0, %v3385_v35  ;;  %v4429_v38 = vpop.f32.mrb[6].mxu1  ;;  %v5325_v39 = vpop.f32.mrb[7].mxu0 }
 0x267   : > { %v4437_v40 = vadd.f32 %v4639_v8, %v4435_v33  ;;  %v4436_v41 = vmul.f32 %v4638_v0, %v4429_v38  ;;  %v5421_v42 = vpop.f32.mrb[7].mxu1 }
 0x268   : > { %v4906_v43 = vpack.c.bf16 %v3393_v36, %v3393_v36  ;;  %v3394_v44 = vadd.f32 %v4639_v8, %v3392_v37 }
 0x269   : > { %v4908_v45 = vpack.c.bf16 %v4437_v40, %v4437_v40  ;;  %v4438_v46 = vadd.f32 %v4639_v8, %v4436_v41 }
 0x26a   : > { %4812 = vst.msk [vmem:[%s6563_s14 + $0x10] sm:$0xf] %vm1315_vm6, %v4906_v43  ;;  %v4907_v47 = vpack.c.bf16 %v3394_v44, %v3394_v44 }
 0x26b   : > { %4898 = vst.msk [vmem:[%s6563_s14 + $0x18] sm:$0xf] %vm1315_vm6, %v4908_v45  ;;  %v4909_v48 = vpack.c.bf16 %v4438_v46, %v4438_v46 }
 0x26c   : > { %4813 = vst.msk [vmem:[%s6563_s14 + $0x14] sm:$0xf] %vm1315_vm6, %v4907_v47 }
 0x26d   : > { %4899 = vst.msk [vmem:[%s6563_s14 + $0x1c] sm:$0xf] %vm1315_vm6, %v4909_v48 }
 0x26e PF: > { %s14_s19 = sadd.s32 1, %s5840_s19   ;;  %s6601_s15 = smov %s5832_s17 }
 0x26f   : > { %p11_p8 = scmp.ge.s32.totalorder %s14_s19, 10   ;;  %s6602_s16 = smov %s5836_s18 }
 0x270   : > { %s6603_s17 = smov %s6606_s20  ;;  %s6604_s18 = smov %s6610_s21 }
 0x271   :  { %13 = sbr.rel (!%p11_p8) target bundleno = 3 (0x3), region = 90 }

// kernel: spatial_path_forward.5
= control target key start
LH: loop header
LB: loop body
LE: loop exit
PB: predicated region body
PF: predicated region fallthrough
CT: control target
= control target key end

     0   :  { %12 = vsyncpa [#allocation3], 0  ;;  %s6226_s0 = inlined_call_operand.vmem [shape: bf16[2,1,5,5,256], index: 0, kind: input, shape index: {}]   ;;  %s6227_s1 = inlined_call_operand.vmem [shape: bf16[4,256,64], index: 1, kind: input, shape index: {}]   ;;  %s6228_s2 = inlined_call_operand.vmem [shape: f32[1,64], index: 2, kind: input, shape index: {}]   ;;  %s6229_s3 = inlined_call_operand.vmem [shape: f32[1,64], index: 3, kind: input, shape index: {}]   ;;  %s6230_s4 = inlined_call_operand.vmem [shape: bf16[64,128], index: 4, kind: input, shape index: {}]   ;;  %s6231_s5 = inlined_call_operand.vmem [shape: f32[1,128], index: 5, kind: input, shape index: {}]   ;;  %s6232_s6 = inlined_call_operand.vmem [shape: f32[1,128], index: 6, kind: input, shape index: {}]   ;;  %s6233_s7 = inlined_call_operand.hbm [shape: f32[2,4,4,128], index: 7, kind: output, shape index: {}]  }
   0x1   :  { %14 = vsyncpa [#allocation3 + $0x1], 0  ;;  %s5138_s24 = smov 0   ;;  %s5140_s25 = smov 0  }
   0x2   :  { %s5142_s26 = smov 0   ;;  %s5144_s27 = smov 0  }
   0x3   :  { %s5146_s28 = smov 0   ;;  %s5148_s29 = smov 0  }
   0x4 LB: > { %s3560_s30 = sadd.s32 4294967295, %s5091_s29   ;;  %s3561_s8 = sadd.s32 4294967294, %s5091_s29   ;;  %s5091_s29 = sphi %s5148_s29, %s20_s29   ;;  %s5087_s28 = sphi %s5146_s28, %s6240_s28   ;;  %s5083_s27 = sphi %s5144_s27, %s6239_s27   ;;  %s5079_s26 = sphi %s5142_s26, %s6238_s26   ;;  %s5075_s25 = sphi %s5140_s25, %s6237_s25   ;;  %s5071_s24 = sphi %s5138_s24, %s6236_s24  }
   0x5   : > { %s32_s9 = sadd.s32 1, %s5087_s28  ;;  %s195_s10 = sadd.s32 1, %s5079_s26 }
   0x6   : > { %p34_p0 = scmp.ge.s32.totalorder %s32_s9, 2  ;;  %p205_p1 = scmp.ne.s32.totalorder %s5079_s26, %s5075_s25 }
   0x7   : > { %p206_p2 = scmp.eq.s32.totalorder %s3560_s30, 1  ;;  %p211_p3 = scmp.ne.s32.totalorder %s5075_s25, %s5071_s24 }
   0x8   : > { %s6242_s9 = smov (%p34_p0, %s32_s9), 0  ;;  %p212_p5 = scmp.eq.s32.totalorder %s3561_s8, 1 }
   0x9   : > { %p5178_p4 = por %p206_p2, %p205_p1  ;;  %s190_s12 = ssub.s32 %s5087_s28, %s6242_s9 }
   0xa   : > { %p3564_p6 = scmp.ge.s32.totalorder %s5091_s29, 1  ;;  %p193_p7 = scmp.eq.s32.totalorder %s190_s12, 0 }
   0xb   : > { %p5185_p8 = por %p212_p5, %p211_p3  ;;  %p260_p9 = scmp.lt.s32.totalorder %s5091_s29, 3 }
   0xc   : > { %s5191_s14 = scalar_select %p193_p7, %s5079_s26, %s195_s10  }
   0xd   : > { %p261_p10 = pnand %p3564_p6, %p260_p9 }
   0xe   : > { %v4731_v0 = vld [vmem:[%s6227_s1 + $0xc0] sm:$0xff] (!%p261_p10)   ;;  %v4735_v4 = vld [vmem:[%s6227_s1 + $0xc8] sm:$0xff] (!%p261_p10)   ;;  %v4739_v8 = vld [vmem:[%s6227_s1 + $0xd0] sm:$0xff] (!%p261_p10)   ;;  %p296_p11 = scmp.lt.s32.totalorder (!%p261_p10), %s5083_s27, 1  ;;  %vm5094_vm0 = vmmov (!%p261_p10), 0   ;;  %vm1084_vm1 = vcmask (!%p261_p10), 523264  }
   0xf   : > { %264 = sbr.rel (%p261_p10) target bundleno = 1397 (0x575), region = 48  ;;  %v4732_v1 = vld [vmem:[%s6227_s1 + $0x40] sm:$0xff] (!%p261_p10)   ;;  %4251 = vmatprep.subr.bf16.mxu0 (!%p261_p10), %v4731_v0  ;;  %v4736_v5 = vld [vmem:[%s6227_s1 + $0x48] sm:$0xff] (!%p261_p10)   ;;  %v4740_v9 = vld [vmem:[%s6227_s1 + $0x50] sm:$0xff] (!%p261_p10)   ;;  %s4250_s15 = sshll.u32 (!%p261_p10), %s5083_s27, 8 }
  0x10   : > { %v4733_v2 = vld [vmem:[%s6227_s1 + $0x80] sm:$0xff] (!%p261_p10)   ;;  %4273 = vmatprep.subr.bf16.mxu1 (!%p261_p10), %v4732_v1  ;;  %v4737_v6 = vld [vmem:[%s6227_s1 + $0x88] sm:$0xff] (!%p261_p10)   ;;  %v4741_v10 = vld [vmem:[%s6227_s1 + $0x90] sm:$0xff] (!%p261_p10)   ;;  %s6174_s19 = scalar_lea.hbm (!%p261_p10), %s6233_s7, %s4250_s15  ;;  %s5095_s22 = smov (!%p261_p10), [#allocation2]  }
  0x11   : > { %v4734_v3 = vld [vmem:[%s6227_s1] sm:$0xff] (!%p261_p10)   ;;  %4252 = vmatpush3.bf16.msra.mxu0 (!%p261_p10), %v4733_v2  ;;  %v4738_v7 = vld [vmem:[%s6227_s1 + $0x8] sm:$0xff] (!%p261_p10)   ;;  %v4742_v11 = vld [vmem:[%s6227_s1 + $0x10] sm:$0xff] (!%p261_p10)  }
  0x12   : > { %4274 = vmatpush3.bf16.msra.mxu1 (!%p261_p10), %v4734_v3  ;;  %4253 = vmatprep.subr.bf16.mxu0 (!%p261_p10), %v4735_v4  ;;  %v4743_v12 = vld [vmem:[%s6227_s1 + $0xd8] sm:$0xff] (!%p261_p10)   ;;  %v4747_v16 = vld [vmem:[%s6227_s1 + $0xe0] sm:$0xff] (!%p261_p10)   ;;  %v4751_v20 = vld [vmem:[%s6227_s1 + $0xe8] sm:$0xff] (!%p261_p10)  }
  0x13   : > { %4275 = vmatprep.subr.bf16.mxu1 (!%p261_p10), %v4736_v5  ;;  %v4744_v13 = vld [vmem:[%s6227_s1 + $0x58] sm:$0xff] (!%p261_p10)   ;;  %v4748_v17 = vld [vmem:[%s6227_s1 + $0x60] sm:$0xff] (!%p261_p10)   ;;  %v4752_v21 = vld [vmem:[%s6227_s1 + $0x68] sm:$0xff] (!%p261_p10)  }
  0x14   : > { %v4745_v14 = vld [vmem:[%s6227_s1 + $0x98] sm:$0xff] (!%p261_p10)   ;;  %v4749_v18 = vld [vmem:[%s6227_s1 + $0xa0] sm:$0xff] (!%p261_p10)   ;;  %v4753_v22 = vld [vmem:[%s6227_s1 + $0xa8] sm:$0xff] (!%p261_p10)  }
  0x15   : > { %4254 = vmatpush3.bf16.msra.mxu0 (!%p261_p10), %v4737_v6  ;;  %v4746_v15 = vld [vmem:[%s6227_s1 + $0x18] sm:$0xff] (!%p261_p10)   ;;  %v4750_v19 = vld [vmem:[%s6227_s1 + $0x20] sm:$0xff] (!%p261_p10)   ;;  %v4754_v23 = vld [vmem:[%s6227_s1 + $0x28] sm:$0xff] (!%p261_p10)  }
  0x16   : > { %4276 = vmatpush3.bf16.msra.mxu1 %v4738_v7  ;;  %4255 = vmatprep.subr.bf16.mxu0 %v4739_v8  ;;  %s297_s20 = scalar_select %p296_p11, %s5083_s27, 1  ;;  %v4755_v24 = vld [vmem:[%s6227_s1 + $0xf0] sm:$0xff]   ;;  %v4759_v28 = vld [vmem:[%s6227_s1 + $0xf8] sm:$0xff]   ;;  %v4765_v35 = vld [vmem:[%s6227_s1 + $0x140] sm:$0xff]  }
  0x17   : > { %4277 = vmatprep.subr.bf16.mxu1 %v4740_v9  ;;  %v4756_v25 = vld [vmem:[%s6227_s1 + $0x70] sm:$0xff]   ;;  %v4760_v29 = vld [vmem:[%s6227_s1 + $0x78] sm:$0xff]   ;;  %v4766_v36 = vld [vmem:[%s6227_s1 + $0x1c0] sm:$0xff]  }
  0x18   : > { %s4671_s16 = smul.u32 40, %s297_s20  ;;  %v4757_v26 = vld [vmem:[%s6227_s1 + $0xb0] sm:$0xff]   ;;  %v4761_v30 = vld [vmem:[%s6227_s1 + $0xb8] sm:$0xff]   ;;  %v4768_v41 = vld [vmem:[%s6227_s1 + $0x180] sm:$0xff]   ;;  %s293_s20 = sand.u32 1, %s5075_s25  }
  0x19   : > { %4256 = vmatpush3.bf16.msra.mxu0 %v4741_v10  ;;  %v4758_v27 = vld [vmem:[%s6227_s1 + $0x30] sm:$0xff]   ;;  %v4762_v31 = vld [vmem:[%s6227_s1 + $0x38] sm:$0xff]   ;;  %v4767_v44 = vld [vmem:[%s6227_s1 + $0x100] sm:$0xff]   ;;  %s3565_s17 = sshll.u32 %s293_s20, 4  ;;  %s6180_s27 = scalar_lea.sflag [#allocation3], %s293_s20 }
  0x1a   : > { %4278 = vmatpush3.bf16.msra.mxu1 %v4742_v11  ;;  %4257 = vmatprep.subr.bf16.mxu0 %v4743_v12  ;;  %s5288_s12 = scalar_lea.vmem %s6226_s0, %s4671_s16  ;;  %v4770_v45 = vld [vmem:[%s6227_s1 + $0x1c8] sm:$0xff]   ;;  %v4774_v51 = vld [vmem:[%s6227_s1 + $0x1d0] sm:$0xff]   ;;  %v4778_v55 = vld [vmem:[%s6227_s1 + $0x1d8] sm:$0xff]   ;;  %s5805_s21 = scalar_lea.vmem [#allocation2], %s3565_s17 }
  0x1b   : > { %4279 = vmatprep.subr.bf16.mxu1 %v4744_v13  ;;  %v319_v32 = vld [vmem:[%s5288_s12] sm:$0x77]  ;;  %v4769_v48 = vld [vmem:[%s6227_s1 + $0x148] sm:$0xff]   ;;  %v4773_v52 = vld [vmem:[%s6227_s1 + $0x150] sm:$0xff]   ;;  %s3478_s10 = sshll.u32 %s5805_s21, 4  ;;  %s5017_s16 = sshll.u32 %s5095_s22, 4  ;;  %s6169_s10 = int_to_ptr.vmem [resolvable:$true] %s3478_s10  ;;  %s5018_s16 = int_to_ptr.vmem [resolvable:$false] %s5017_s16 }
  0x1c   : > { %v3599_v33 = vcombine.low %v319_v32, %v319_v32  ;;  %v3600_v34 = vcombine.high %v319_v32, %v319_v32  ;;  %v4772_v49 = vld [vmem:[%s6227_s1 + $0x188] sm:$0xff]   ;;  %v4776_v53 = vld [vmem:[%s6227_s1 + $0x190] sm:$0xff]   ;;  %v4777_v56 = vld [vmem:[%s6227_s1 + $0x158] sm:$0xff]   ;;  %s5019_s23 = scalar_lea.vmem %s5018_s16, 512  ;;  %p5020_p1 = scmp.lt.s32.totalorder %s6169_s10, %s5018_s16 }
  0x1d   : > { %4258 = vmatpush3.bf16.msra.mxu0 %v4745_v14  ;;  %v4771_v50 = vld [vmem:[%s6227_s1 + $0x108] sm:$0xff]   ;;  %v4775_v54 = vld [vmem:[%s6227_s1 + $0x110] sm:$0xff]   ;;  %v4780_v57 = vld [vmem:[%s6227_s1 + $0x198] sm:$0xff]  }
  0x1e   : > { %4280 = vmatpush3.bf16.msra.mxu1 %v4746_v15  ;;  %4259 = vmatprep.subr.bf16.mxu0 %v4747_v16  ;;  %v398_v37 = vshrl.u32 %v3600_v34, 16  ;;  %v400_v38 = vshll.u32 %v3600_v34, 16  ;;  %v391_v39 = vshrl.u32 %v3599_v33, 16  ;;  %v393_v40 = vshll.u32 %v3599_v33, 16  ;;  %v4779_v58 = vld [vmem:[%s6227_s1 + $0x118] sm:$0xff]   ;;  %v4782_v59 = vld [vmem:[%s6227_s1 + $0x1e0] sm:$0xff]  }
  0x1f   : > { %4281 = vmatprep.subr.bf16.mxu1 %v4748_v17  ;;  %672 = vmatprep.mubr.bf16.mxu1 %v3600_v34  ;;  %v4781_v60 = vld [vmem:[%s6227_s1 + $0x160] sm:$0xff]   ;;  %v4786_v63 = vld [vmem:[%s6227_s1 + $0x1e8] sm:$0xff]   ;;  %v4790_v3 = vld [vmem:[%s6227_s1 + $0x1f0] sm:$0xff]  }
  0x20   : > { %v402_v42 = vrot.slane %v400_v38, 1  ;;  %v395_v43 = vrot.slane %v393_v40, 1  ;;  %v4784_v61 = vld [vmem:[%s6227_s1 + $0x1a0] sm:$0xff]   ;;  %v4785_v0 = vld [vmem:[%s6227_s1 + $0x168] sm:$0xff]   ;;  %v4789_v4 = vld [vmem:[%s6227_s1 + $0x170] sm:$0xff]  }
  0x21   : > { %4260 = vmatpush3.bf16.msra.mxu0 %v4749_v18  ;;  %v4783_v62 = vld [vmem:[%s6227_s1 + $0x120] sm:$0xff]   ;;  %v4788_v1 = vld [vmem:[%s6227_s1 + $0x1a8] sm:$0xff]   ;;  %v4792_v5 = vld [vmem:[%s6227_s1 + $0x1b0] sm:$0xff]  }
  0x22   : > { %4282 = vmatpush3.bf16.msra.mxu1 %v4750_v19  ;;  %4261 = vmatprep.subr.bf16.mxu0 %v4751_v20  ;;  %v403_v46 = vor.u32 %v402_v42, %v398_v37  ;;  %v396_v47 = vor.u32 %v395_v43, %v391_v39  ;;  %v4787_v2 = vld [vmem:[%s6227_s1 + $0x128] sm:$0xff]   ;;  %v4791_v6 = vld [vmem:[%s6227_s1 + $0x130] sm:$0xff]   ;;  %v4794_v7 = vld [vmem:[%s6227_s1 + $0x1f8] sm:$0xff]  }
  0x23   : > { %4283 = vmatprep.subr.bf16.mxu1 %v4752_v21  ;;  %v4793_v8 = vld [vmem:[%s6227_s1 + $0x178] sm:$0xff]   ;;  %v3633_v10 = vld [vmem:[%s5288_s12 + $0x8] sm:$0x77]  ;;  %v4808_v32 = vld [vmem:[%s6227_s1 + $0xe0] sm:$0xff]  }
  0x24   : > { %534 = vmatprep.mubr.bf16.mxu0 %v403_v46  ;;  %v4796_v9 = vld [vmem:[%s6227_s1 + $0x1b8] sm:$0xff]   ;;  %v3666_v12 = vcombine.low %v3633_v10, %v3633_v10  ;;  %v3667_v13 = vcombine.high %v3633_v10, %v3633_v10  ;;  %v5435_v34 = vld [vmem:[%s6230_s4 + $0x8] sm:$0xff]   ;;  %v5448_v37 = vld [vmem:[%s6230_s4 + $0x10] sm:$0xff]  }
  0x25   : > { %4262 = vmatpush3.bf16.msra.mxu0 %v4753_v22  ;;  %v4795_v11 = vld [vmem:[%s6227_s1 + $0x138] sm:$0xff]   ;;  %v4799_v22 = vld [vmem:[%s6227_s1 + $0xc0] sm:$0xff]   ;;  %v4814_v38 = vld [vmem:[%s6227_s1 + $0xf0] sm:$0xff]  }
  0x26   : > { %4284 = vmatpush3.bf16.msra.mxu1 %v4754_v23  ;;  %4263 = vmatprep.subr.bf16.mxu0 %v4755_v24  ;;  %v900_v14 = vshrl.u32 %v3667_v13, 16  ;;  %v902_v15 = vshll.u32 %v3667_v13, 16  ;;  %v893_v16 = vshrl.u32 %v3666_v12, 16  ;;  %v895_v17 = vshll.u32 %v3666_v12, 16  ;;  %v4800_v23 = vld [vmem:[%s6227_s1 + $0x80] sm:$0xff]   ;;  %v4801_v24 = vld [vmem:[%s6227_s1 + $0xc8] sm:$0xff]  }
  0x27   : > { %4285 = vmatprep.subr.bf16.mxu1 %v4756_v25  ;;  %v5093_v25 = vmov 0.0   ;;  %v4815_v39 = vld [vmem:[%s6227_s1 + $0xb0] sm:$0xff]   ;;  %v3741_v40 = vld [vmem:[%s5288_s12 + $0x8] sm:$0x77]  ;;  %v4817_v43 = vld [vmem:[%s6227_s1 + $0xf8] sm:$0xff]  }
  0x28   : > { %v904_v18 = vrot.slane %v902_v15, 1  ;;  %v897_v19 = vrot.slane %v895_v17, 1  ;;  %v5464_v42 = vcombine.high %v3741_v40, %v3741_v40 }
  0x29   : > { %4264 = vmatpush3.bf16.msra.mxu0 %v4757_v26  ;;  %v4802_v26 = vld [vmem:[%s6227_s1 + $0x88] sm:$0xff]  }
  0x2a   : > { %4286 = vmatpush3.bf16.msra.mxu1 %v4758_v27  ;;  %4265 = vmatprep.subr.bf16.mxu0 %v4759_v28  ;;  %v905_v20 = vor.u32 %v904_v18, %v900_v14  ;;  %v898_v21 = vor.u32 %v897_v19, %v893_v16  ;;  %v5410_v27 = vld [vmem:[%s6230_s4] sm:$0xff]   ;;  %v4803_v28 = vld [vmem:[%s6227_s1 + $0xd0] sm:$0xff]   ;;  %v1223_v46 = vshll.u32 %v5464_v42, 16 }
  0x2b   : > { %4287 = vmatprep.subr.bf16.mxu1 %v4760_v29  ;;  %v4804_v29 = vld [vmem:[%s6227_s1 + $0x90] sm:$0xff]  }
  0x2d   : > { %4266 = vmatpush3.bf16.msra.mxu0 %v4761_v30  ;;  %v4805_v30 = vld [vmem:[%s6227_s1 + $0xd8] sm:$0xff]  }
  0x2e   : > { %4288 = vmatpush3.bf16.msra.mxu1 %v4762_v31  ;;  %4295 = vmatprep.subr.bf16.mxu0 %v4765_v35  ;;  %v4806_v31 = vld [vmem:[%s6227_s1 + $0x98] sm:$0xff]   ;;  %v4811_v35 = vld [vmem:[%s6227_s1 + $0xe8] sm:$0xff]  }
  0x2f   : > { %4317 = vmatprep.subr.bf16.mxu1 %v4766_v36  ;;  %v4812_v36 = vld [vmem:[%s6227_s1 + $0xa8] sm:$0xff]  }
  0x30   : > { %535 = vmatmul.mubr.bf16.vlgmr.msra.gmra.mrb[0].mxu0 %v396_v47  ;;  %v4819_v47 = vld [vmem:[%s6227_s1 + $0x40] sm:$0xff]  }
  0x31   : > { %673 = vmatmul.mubr.bf16.vlgmr.msra.gmra.mrb[0].mxu1 %v3599_v33  ;;  %4296 = vmatpush3.bf16.msra.mxu0 %v4767_v44  ;;  %v4809_v33 = vld [vmem:[%s6227_s1 + $0xa0] sm:$0xff]   ;;  %v5469_v44 = vcombine.low %v3741_v40, %v3741_v40 }
  0x32   : > { %4318 = vmatpush3.bf16.msra.mxu1 %v4768_v41  ;;  %4297 = vmatprep.subr.bf16.mxu0 %v4769_v48  ;;  %v5462_v41 = vld [vmem:[%s6230_s4 + $0x18] sm:$0xff]  }
  0x33   : > { %4319 = vmatprep.subr.bf16.mxu1 %v4770_v45  ;;  %850 = vmatprep.mubr.bf16.mxu0 %v3667_v13  ;;  %v4818_v45 = vld [vmem:[%s6227_s1 + $0xb8] sm:$0xff]   ;;  %v1216_v48 = vshll.u32 %v5469_v44, 16 }
  0x34   : > { %1036 = vmatprep.mubr.bf16.mxu1 %v905_v20 }
  0x35   : > { %4298 = vmatpush3.bf16.msra.mxu0 %v4771_v50  ;;  %v1225_v50 = vrot.slane %v1223_v46, 1  ;;  %v4825_v46 = vld [vmem:[%s6227_s1 + $0x48] sm:$0xff]  }
  0x36   : > { %4320 = vmatpush3.bf16.msra.mxu1 %v4772_v49  ;;  %4299 = vmatprep.subr.bf16.mxu0 %v4773_v52  ;;  %v1221_v49 = vshrl.u32 %v5464_v42, 16  ;;  %v1218_v52 = vrot.slane %v1216_v48, 1  ;;  %v4829_v48 = vld [vmem:[%s6227_s1 + $0x50] sm:$0xff]  }
  0x37   : > { %4321 = vmatprep.subr.bf16.mxu1 %v4774_v51  ;;  %v1214_v51 = vshrl.u32 %v5469_v44, 16 }
  0x39   : > { %4300 = vmatpush3.bf16.msra.mxu0 %v4775_v54  ;;  %v4823_v54 = vld [vmem:[%s6227_s1 + $0x140] sm:$0xff]  }
  0x3a   : > { %4322 = vmatpush3.bf16.msra.mxu1 %v4776_v53  ;;  %4301 = vmatprep.subr.bf16.mxu0 %v4777_v56  ;;  %v1226_v53 = vor.u32 %v1225_v50, %v1221_v49  ;;  %v4824_v56 = vld [vmem:[%s6227_s1 + $0x100] sm:$0xff]   ;;  %v4830_v49 = vld [vmem:[%s6227_s1 + $0x10] sm:$0xff]   ;;  %v4833_v50 = vld [vmem:[%s6227_s1 + $0x58] sm:$0xff]  }
  0x3b   : > { %4323 = vmatprep.subr.bf16.mxu1 %v4778_v55  ;;  %v1219_v55 = vor.u32 %v1218_v52, %v1214_v51  ;;  %v4837_v51 = vld [vmem:[%s6227_s1 + $0x60] sm:$0xff]  }
  0x3c   : > { %v4838_v52 = vld [vmem:[%s6227_s1 + $0x20] sm:$0xff]  }
  0x3d   : > { %4302 = vmatpush3.bf16.msra.mxu0 %v4779_v58  ;;  %v4828_v58 = vld [vmem:[%s6227_s1 + $0x108] sm:$0xff]  }
  0x3e   : > { %4324 = vmatpush3.bf16.msra.mxu1 %v4780_v57  ;;  %4303 = vmatprep.subr.bf16.mxu0 %v4781_v60  ;;  %v4827_v57 = vld [vmem:[%s6227_s1 + $0x148] sm:$0xff]   ;;  %v4832_v60 = vld [vmem:[%s6227_s1 + $0x110] sm:$0xff]  }
  0x3f   : > { %4325 = vmatprep.subr.bf16.mxu1 %v4782_v59  ;;  %v4831_v59 = vld [vmem:[%s6227_s1 + $0x150] sm:$0xff]  }
  0x41   : > { %4304 = vmatpush3.bf16.msra.mxu0 %v4783_v62  ;;  %v4836_v62 = vld [vmem:[%s6227_s1 + $0x118] sm:$0xff]  }
  0x42   : > { %4326 = vmatpush3.bf16.msra.mxu1 %v4784_v61  ;;  %4305 = vmatprep.subr.bf16.mxu0 %v4785_v0  ;;  %v4835_v61 = vld [vmem:[%s6227_s1 + $0x158] sm:$0xff]   ;;  %v4840_v0 = vld [vmem:[%s6227_s1 + $0x120] sm:$0xff]  }
  0x43   : > { %4327 = vmatprep.subr.bf16.mxu1 %v4786_v63  ;;  %v4839_v63 = vld [vmem:[%s6227_s1 + $0x160] sm:$0xff]  }
  0x45   : > { %4306 = vmatpush3.bf16.msra.mxu0 %v4787_v2  ;;  %v4844_v2 = vld [vmem:[%s6227_s1 + $0x128] sm:$0xff]  }
  0x46   : > { %4328 = vmatpush3.bf16.msra.mxu1 %v4788_v1  ;;  %4307 = vmatprep.subr.bf16.mxu0 %v4789_v4  ;;  %v4843_v1 = vld [vmem:[%s6227_s1 + $0x168] sm:$0xff]   ;;  %v4848_v4 = vld [vmem:[%s6227_s1 + $0x130] sm:$0xff]  }
  0x47   : > { %4329 = vmatprep.subr.bf16.mxu1 %v4790_v3  ;;  %v4847_v3 = vld [vmem:[%s6227_s1 + $0x170] sm:$0xff]  }
  0x49   : > { %4308 = vmatpush3.bf16.msra.mxu0 %v4791_v6  ;;  %v4852_v6 = vld [vmem:[%s6227_s1 + $0x138] sm:$0xff]  }
  0x4a   : > { %4330 = vmatpush3.bf16.msra.mxu1 %v4792_v5  ;;  %4309 = vmatprep.subr.bf16.mxu0 %v4793_v8  ;;  %v4851_v5 = vld [vmem:[%s6227_s1 + $0x178] sm:$0xff]  }
  0x4b   : > { %4331 = vmatprep.subr.bf16.mxu1 %v4794_v7  ;;  %v3808_v7 = vld [vmem:[%s5288_s12 + $0x10] sm:$0x77] }
  0x4c   : > { %v5533_v8 = vcombine.high %v3808_v7, %v3808_v7 }
  0x4d   : > { %4310 = vmatpush3.bf16.msra.mxu0 %v4795_v11 }
  0x4e   : > { %4332 = vmatpush3.bf16.msra.mxu1 %v4796_v9  ;;  %4623 = vmatprep.subr.bf16.mxu0 %v5093_v25  ;;  %v5535_v9 = vcombine.low %v3808_v7, %v3808_v7  ;;  %v4864_v7 = vld [vmem:[%s6227_s1 + $0x1a0] sm:$0xff]  }
  0x4f   : > { %4344 = vmatprep.subr.bf16.mxu1 %v4799_v22 }
  0x50   : > { %851 = vmatmul.mubr.bf16.vlgmr.msra.gmra.mrb[4].mxu0 %v3666_v12 }
  0x51   : > { %1037 = vmatmul.mubr.bf16.vlgmr.msra.gmra.mrb[4].mxu1 %v898_v21  ;;  %4624 = vmatpush3.bf16.msra.mxu0 %v5410_v27 }
  0x52   : > { %4345 = vmatpush3.bf16.msra.mxu1 %v4800_v23  ;;  %4625 = vmatprep.subr.bf16.mxu0 %v5093_v25 }
  0x53   : > { %4346 = vmatprep.subr.bf16.mxu1 %v4801_v24  ;;  %4631 = vmatprep.mubr.msk.bf16.mxu0 %vm5094_vm0, %v5093_v25 }
  0x54   : > { %1357 = vmatprep.mubr.bf16.mxu1 %v1226_v53  ;;  %v4841_v53 = vld [vmem:[%s6227_s1 + $0x68] sm:$0xff]  }
  0x55   : > { %4626 = vmatpush3.bf16.msra.mxu0 %v5435_v34 }
  0x56   : > { %4347 = vmatpush3.bf16.msra.mxu1 %v4802_v26  ;;  %4627 = vmatprep.subr.bf16.mxu0 %v5093_v25 }
  0x57   : > { %4348 = vmatprep.subr.bf16.mxu1 %v4803_v28 }
  0x59   : > { %4628 = vmatpush3.bf16.msra.mxu0 %v5448_v37 }
  0x5a   : > { %4349 = vmatpush3.bf16.msra.mxu1 %v4804_v29  ;;  %4629 = vmatprep.subr.bf16.mxu0 %v5093_v25 }
  0x5b   : > { %4350 = vmatprep.subr.bf16.mxu1 %v4805_v30 }
  0x5d   : > { %4630 = vmatpush3.bf16.msra.mxu0 %v5462_v41 }
  0x5e   : > { %4351 = vmatpush3.bf16.msra.mxu1 %v4806_v31  ;;  %4366 = vmatprep.subr.bf16.mxu0 %v4819_v47  ;;  %v4826_v47 = vld [vmem:[%s6227_s1 + $0x8] sm:$0xff]  }
  0x5f   : > { %4352 = vmatprep.subr.bf16.mxu1 %v4808_v32 }
  0x62   : > { %4353 = vmatpush3.bf16.msra.mxu1 %v4809_v33 }
  0x63   : > { %4354 = vmatprep.subr.bf16.mxu1 %v4811_v35  ;;  %v5552_v35 = vld [vmem:[%s6228_s2] ss:$0 sm:$0xff] }
  0x66   : > { %4355 = vmatpush3.bf16.msra.mxu1 %v4812_v36 }
  0x67   : > { %4356 = vmatprep.subr.bf16.mxu1 %v4814_v38  ;;  %v5557_v38 = vld [vmem:[%s6229_s3] ss:$0 sm:$0xff] }
  0x6a   : > { %4357 = vmatpush3.bf16.msra.mxu1 %v4815_v39 }
  0x6b   : > { %4358 = vmatprep.subr.bf16.mxu1 %v4817_v43  ;;  %v4820_v43 = vld [vmem:[%s6227_s1] sm:$0xff]  }
  0x6e   : > { %4359 = vmatpush3.bf16.msra.mxu1 %v4818_v45 }
  0x6f   : > { %4388 = vmatprep.subr.bf16.mxu1 %v4823_v54  ;;  %v4842_v54 = vld [vmem:[%s6227_s1 + $0x28] sm:$0xff]  }
  0x71   : > { %1358 = vmatmul.mubr.bf16.vlgmr.msra.gmra.mrb[8].mxu1 %v1219_v55  ;;  %v4845_v55 = vld [vmem:[%s6227_s1 + $0x70] sm:$0xff]  }
  0x72   : > { %4389 = vmatpush3.bf16.msra.mxu1 %v4824_v56  ;;  %1672 = vmatprep.mubr.bf16.mxu1 %v5533_v8  ;;  %v4846_v56 = vld [vmem:[%s6227_s1 + $0x30] sm:$0xff]  }
  0x73   : > { %4390 = vmatprep.subr.bf16.mxu1 %v4827_v57  ;;  %v1723_v57 = vshll.u32 %v5533_v8, 16 }
  0x76   : > { %4391 = vmatpush3.bf16.msra.mxu1 %v4828_v58  ;;  %v4849_v58 = vld [vmem:[%s6227_s1 + $0x78] sm:$0xff]  }
  0x77   : > { %4392 = vmatprep.subr.bf16.mxu1 %v4831_v59  ;;  %v4850_v59 = vld [vmem:[%s6227_s1 + $0x38] sm:$0xff]  }
  0x7a   : > { %4393 = vmatpush3.bf16.msra.mxu1 %v4832_v60  ;;  %v1721_v60 = vshrl.u32 %v5533_v8, 16  ;;  %v4865_v8 = vld [vmem:[%s6227_s1 + $0x1e8] sm:$0xff]  }
  0x7b   : > { %4394 = vmatprep.subr.bf16.mxu1 %v4835_v61  ;;  %v1725_v61 = vrot.slane %v1723_v57, 1 }
  0x7e   : > { %4395 = vmatpush3.bf16.msra.mxu1 %v4836_v62  ;;  %v4853_v62 = vld [vmem:[%s6227_s1 + $0x1c0] sm:$0xff]  }
  0x7f   : > { %4396 = vmatprep.subr.bf16.mxu1 %v4839_v63  ;;  %v4856_v63 = vld [vmem:[%s6227_s1 + $0x180] sm:$0xff]  }
  0x82   : > { %4397 = vmatpush3.bf16.msra.mxu1 %v4840_v0  ;;  %v1726_v0 = vor.u32 %v1725_v61, %v1721_v60 }
  0x83   : > { %4398 = vmatprep.subr.bf16.mxu1 %v4843_v1  ;;  %v4857_v1 = vld [vmem:[%s6227_s1 + $0x1c8] sm:$0xff]  }
  0x86   : > { %4399 = vmatpush3.bf16.msra.mxu1 %v4844_v2  ;;  %v4858_v2 = vld [vmem:[%s6227_s1 + $0x188] sm:$0xff]  }
  0x87   : > { %4400 = vmatprep.subr.bf16.mxu1 %v4847_v3  ;;  %v4859_v3 = vld [vmem:[%s6227_s1 + $0x1d0] sm:$0xff]  }
  0x8a   : > { %4401 = vmatpush3.bf16.msra.mxu1 %v4848_v4  ;;  %v4860_v4 = vld [vmem:[%s6227_s1 + $0x190] sm:$0xff]  }
  0x8b   : > { %4402 = vmatprep.subr.bf16.mxu1 %v4851_v5  ;;  %v4862_v5 = vld [vmem:[%s6227_s1 + $0x198] sm:$0xff]  }
  0x8e   : > { %4403 = vmatpush3.bf16.msra.mxu1 %v4852_v6  ;;  %v4863_v6 = vld [vmem:[%s6227_s1 + $0x1e0] sm:$0xff]  }
  0x8f   : > { %4635 = vmatprep.subr.bf16.mxu1 %v5093_v25 }
  0x91   : > { %1673 = vmatmul.mubr.bf16.vlgmr.msra.gmra.mrb[12].mxu1 %v5535_v9 }
  0x92   : > { %4636 = vmatpush3.bf16.msra.mxu1 %v5410_v27  ;;  %4643 = vmatprep.mubr.msk.bf16.mxu1 %vm5094_vm0, %v5093_v25 }
  0x93   : > { %4637 = vmatprep.subr.bf16.mxu1 %v5093_v25 }
  0x96   : > { %4638 = vmatpush3.bf16.msra.mxu1 %v5435_v34 }
  0x97   : > { %4639 = vmatprep.subr.bf16.mxu1 %v5093_v25 }
  0x9a   : > { %4640 = vmatpush3.bf16.msra.mxu1 %v5448_v37 }
  0x9b   : > { %4641 = vmatprep.subr.bf16.mxu1 %v5093_v25 }
  0x9e   : > { %4642 = vmatpush3.bf16.msra.mxu1 %v5462_v41 }
 0x103   : > { %v4267_v15 = vpop.f32.mrb[0].mxu0 }
 0x104   : > { %v4289_v10 = vpop.f32.mrb[0].mxu1  ;;  %v4268_v16 = vpop.f32.mrb[1].mxu0 }
 0x105   : > { %v4290_v11 = vpop.f32.mrb[1].mxu1  ;;  %v4269_v17 = vadd.f32 %v4268_v16, %v4267_v15  ;;  %v4270_v18 = vpop.f32.mrb[2].mxu0  ;;  %v1714_v15 = vshrl.u32 %v5535_v9, 16 }
 0x106   : > { %v4291_v12 = vadd.f32 %v4290_v11, %v4289_v10  ;;  %v4292_v13 = vpop.f32.mrb[2].mxu1  ;;  %v4271_v19 = vpop.f32.mrb[3].mxu0  ;;  %v4866_v10 = vld [vmem:[%s6227_s1 + $0x1a8] sm:$0xff]   ;;  %v4867_v11 = vld [vmem:[%s6227_s1 + $0x1f0] sm:$0xff]  }
 0x107   : > { %v4293_v14 = vpop.f32.mrb[3].mxu1  ;;  %v4868_v13 = vld [vmem:[%s6227_s1 + $0x1b0] sm:$0xff]  }
 0x108   : > { %v675_v20 = vadd.f32 %v4291_v12, %v4269_v17  ;;  %v1716_v12 = vshll.u32 %v5535_v9, 16  ;;  %v4869_v14 = vld [vmem:[%s6227_s1 + $0x1f8] sm:$0xff]  }
 0x109   : > { %v4870_v17 = vld [vmem:[%s6227_s1 + $0x1b8] sm:$0xff]  }
 0x10a   : > { %v1718_v16 = vrot.slane %v1716_v12, 1  ;;  %v4915_v12 = vld [vmem:[%s6227_s1 + $0x170] sm:$0xff]  }
 0x10c   : > { %v1719_v18 = vor.u32 %v1718_v16, %v1714_v15  ;;  %v4920_v15 = vld [vmem:[%s6227_s1 + $0x138] sm:$0xff]  }
 0x10d   : > { %v3976_v16 = vld [vmem:[%s5288_s12 + $0x18] sm:$0x77] }
 0x123   : > { %v4311_v21 = vpop.f32.mrb[4].mxu0 }
 0x124   : > { %v4333_v22 = vpop.f32.mrb[4].mxu1  ;;  %v4312_v23 = vpop.f32.mrb[5].mxu0 }
 0x125   : > { %v4334_v24 = vpop.f32.mrb[5].mxu1  ;;  %v4313_v26 = vadd.f32 %v4312_v23, %v4311_v21  ;;  %v4314_v29 = vpop.f32.mrb[6].mxu0 }
 0x126   : > { %v4335_v28 = vadd.f32 %v4334_v24, %v4333_v22  ;;  %v4336_v30 = vpop.f32.mrb[6].mxu1  ;;  %v4315_v31 = vpop.f32.mrb[7].mxu0  ;;  %v4871_v29 = vld [vmem:[%s6227_s1 + $0xc0] sm:$0xff]  }
 0x127   : > { %v4337_v32 = vpop.f32.mrb[7].mxu1  ;;  %v858_v33 = vadd.f32 %v4313_v26, %v675_v20  ;;  %v4872_v30 = vld [vmem:[%s6227_s1 + $0x80] sm:$0xff]   ;;  %v4873_v31 = vld [vmem:[%s6227_s1 + $0xc8] sm:$0xff]  }
 0x129   : > { %v1044_v36 = vadd.f32 %v4335_v28, %v858_v33  ;;  %v4874_v33 = vld [vmem:[%s6227_s1 + $0x88] sm:$0xff]  }
 0x12b   : > { %v1051_v39 = vmul.f32 %v5552_v35, %v1044_v36  ;;  %v4875_v36 = vld [vmem:[%s6227_s1 + $0xd0] sm:$0xff]  }
 0x12d   : > { %v1058_v40 = vadd.f32 %v5557_v38, %v1051_v39  ;;  %v4876_v39 = vld [vmem:[%s6227_s1 + $0x90] sm:$0xff]  }
 0x12f   : > { %v1059_v45 = vpack.c.bf16 %v1058_v40, %v1058_v40  ;;  %v4877_v40 = vld [vmem:[%s6227_s1 + $0xd8] sm:$0xff]  }
 0x131   : > { %4632 = vmatmul.mubr.msk.bf16.vlgmr.msra.gmra.mrb[8].mxu0 %vm1084_vm1, %v1059_v45  ;;  %v4879_v45 = vld [vmem:[%s6227_s1 + $0xe0] sm:$0xff]  }
 0x132   : > { %4367 = vmatpush3.bf16.msra.mxu0 %v4820_v43  ;;  %1495 = vmatprep.mubr.bf16.mxu0 %v5464_v42  ;;  %v4834_v42 = vld [vmem:[%s6227_s1 + $0x18] sm:$0xff]  }
 0x133   : > { %4368 = vmatprep.subr.bf16.mxu0 %v4825_v46  ;;  %v4878_v43 = vld [vmem:[%s6227_s1 + $0x98] sm:$0xff]   ;;  %v4880_v46 = vld [vmem:[%s6227_s1 + $0xa0] sm:$0xff]  }
 0x136   : > { %4369 = vmatpush3.bf16.msra.mxu0 %v4826_v47  ;;  %v4881_v47 = vld [vmem:[%s6227_s1 + $0xe8] sm:$0xff]  }
 0x137   : > { %4370 = vmatprep.subr.bf16.mxu0 %v4829_v48  ;;  %v4882_v48 = vld [vmem:[%s6227_s1 + $0xa8] sm:$0xff]  }
 0x13a   : > { %4371 = vmatpush3.bf16.msra.mxu0 %v4830_v49  ;;  %v4883_v49 = vld [vmem:[%s6227_s1 + $0xf0] sm:$0xff]  }
 0x13b   : > { %4372 = vmatprep.subr.bf16.mxu0 %v4833_v50  ;;  %v4884_v50 = vld [vmem:[%s6227_s1 + $0xb0] sm:$0xff]  }
 0x13e   : > { %4373 = vmatpush3.bf16.msra.mxu0 %v4834_v42  ;;  %v3909_v42 = vld [vmem:[%s5288_s12 + $0x10] sm:$0x77] }
 0x13f   : > { %4374 = vmatprep.subr.bf16.mxu0 %v4837_v51  ;;  %v5708_v51 = vcombine.high %v3909_v42, %v3909_v42 }
 0x142   : > { %4375 = vmatpush3.bf16.msra.mxu0 %v4838_v52  ;;  %v4885_v52 = vld [vmem:[%s6227_s1 + $0xf8] sm:$0xff]  }
 0x143   : > { %4376 = vmatprep.subr.bf16.mxu0 %v4841_v53  ;;  %v5713_v53 = vcombine.low %v3909_v42, %v3909_v42  ;;  %v4898_v42 = vld [vmem:[%s6227_s1 + $0x10] sm:$0xff]  }
 0x144   : > { %v4360_v19 = vpop.f32.mrb[8].mxu1 }
 0x145   : > { %v4361_v20 = vpop.f32.mrb[9].mxu1  ;;  %v1989_v57 = vshll.u32 %v5713_v53, 16  ;;  %v1987_v60 = vshrl.u32 %v5713_v53, 16 }
 0x146   : > { %4377 = vmatpush3.bf16.msra.mxu0 %v4842_v54  ;;  %v5661_v21 = vadd.f32 %v4361_v20, %v4360_v19  ;;  %v4363_v22 = vpop.f32.mrb[10].mxu1  ;;  %v4886_v54 = vld [vmem:[%s6227_s1 + $0xb8] sm:$0xff]  }
 0x147   : > { %4378 = vmatprep.subr.bf16.mxu0 %v4845_v55  ;;  %v4364_v23 = vpop.f32.mrb[11].mxu1  ;;  %v1996_v55 = vshll.u32 %v5708_v51, 16  ;;  %v1991_v61 = vrot.slane %v1989_v57, 1  ;;  %v4910_v57 = vld [vmem:[%s6227_s1 + $0x28] sm:$0xff]  }
 0x14a   : > { %4379 = vmatpush3.bf16.msra.mxu0 %v4846_v56  ;;  %v4887_v56 = vld [vmem:[%s6227_s1 + $0x40] sm:$0xff]  }
 0x14b   : > { %4380 = vmatprep.subr.bf16.mxu0 %v4849_v58  ;;  %v1994_v58 = vshrl.u32 %v5708_v51, 16  ;;  %4459 = vmatprep.subr.bf16.mxu1 %v4887_v56  ;;  %v4909_v56 = vld [vmem:[%s6227_s1 + $0x68] sm:$0xff]  }
 0x14e   : > { %4381 = vmatpush3.bf16.msra.mxu0 %v4850_v59  ;;  %v1998_v59 = vrot.slane %v1996_v55, 1  ;;  %v4906_v55 = vld [vmem:[%s6227_s1 + $0x20] sm:$0xff]  }
 0x14f   : > { %4410 = vmatprep.subr.bf16.mxu0 %v4853_v62 }
 0x150   : > { %v1999_v62 = vor.u32 %v1998_v59, %v1994_v58  ;;  %v4913_v58 = vld [vmem:[%s6227_s1 + $0x70] sm:$0xff]  }
 0x151   : > { %1496 = vmatmul.mubr.bf16.vlgmr.msra.gmra.mrb[12].mxu0 %v5469_v44  ;;  %v4861_v44 = vld [vmem:[%s6227_s1 + $0x1d8] sm:$0xff]   ;;  %v4914_v59 = vld [vmem:[%s6227_s1 + $0x30] sm:$0xff]  }
 0x152   : > { %4411 = vmatpush3.bf16.msra.mxu0 %v4856_v63  ;;  %1857 = vmatprep.mubr.bf16.mxu0 %v1726_v0  ;;  %v4891_v63 = vld [vmem:[%s6227_s1 + $0x140] sm:$0xff]   ;;  %v1992_v0 = vor.u32 %v1991_v61, %v1987_v60  ;;  %v4917_v61 = vld [vmem:[%s6227_s1 + $0x78] sm:$0xff]  }
 0x153   : > { %4412 = vmatprep.subr.bf16.mxu0 %v4857_v1  ;;  %v4892_v1 = vld [vmem:[%s6227_s1 + $0x100] sm:$0xff]  }
 0x156   : > { %4413 = vmatpush3.bf16.msra.mxu0 %v4858_v2  ;;  %v4895_v2 = vld [vmem:[%s6227_s1 + $0x148] sm:$0xff]  }
 0x157   : > { %4414 = vmatprep.subr.bf16.mxu0 %v4859_v3  ;;  %v4896_v3 = vld [vmem:[%s6227_s1 + $0x108] sm:$0xff]  }
 0x15a   : > { %4415 = vmatpush3.bf16.msra.mxu0 %v4860_v4  ;;  %v4899_v4 = vld [vmem:[%s6227_s1 + $0x150] sm:$0xff]  }
 0x15b   : > { %4416 = vmatprep.subr.bf16.mxu0 %v4861_v44  ;;  %v4900_v44 = vld [vmem:[%s6227_s1 + $0x110] sm:$0xff]  }
 0x15e   : > { %4417 = vmatpush3.bf16.msra.mxu0 %v4862_v5  ;;  %v4903_v5 = vld [vmem:[%s6227_s1 + $0x158] sm:$0xff]  }
 0x15f   : > { %4418 = vmatprep.subr.bf16.mxu0 %v4863_v6  ;;  %v4904_v6 = vld [vmem:[%s6227_s1 + $0x118] sm:$0xff]  }
 0x162   : > { %4419 = vmatpush3.bf16.msra.mxu0 %v4864_v7  ;;  %v4907_v7 = vld [vmem:[%s6227_s1 + $0x160] sm:$0xff]  }
 0x163   : > { %4420 = vmatprep.subr.bf16.mxu0 %v4865_v8  ;;  %v4908_v8 = vld [vmem:[%s6227_s1 + $0x120] sm:$0xff]  }
 0x164   : > { %v4404_v24 = vpop.f32.mrb[12].mxu1 }
 0x165   : > { %v4405_v26 = vpop.f32.mrb[13].mxu1 }
 0x166   : > { %4421 = vmatpush3.bf16.msra.mxu0 %v4866_v10  ;;  %v5663_v28 = vadd.f32 %v4405_v26, %v4404_v24  ;;  %v4407_v9 = vpop.f32.mrb[14].mxu1  ;;  %v4911_v10 = vld [vmem:[%s6227_s1 + $0x168] sm:$0xff]  }
 0x167   : > { %4422 = vmatprep.subr.bf16.mxu0 %v4867_v11  ;;  %v4408_v32 = vpop.f32.mrb[15].mxu1  ;;  %v4912_v11 = vld [vmem:[%s6227_s1 + $0x128] sm:$0xff]  }
 0x16a   : > { %4423 = vmatpush3.bf16.msra.mxu0 %v4868_v13  ;;  %v4916_v13 = vld [vmem:[%s6227_s1 + $0x130] sm:$0xff]  }
 0x16b   : > { %4424 = vmatprep.subr.bf16.mxu0 %v4869_v14  ;;  %v4919_v14 = vld [vmem:[%s6227_s1 + $0x178] sm:$0xff]  }
 0x16e   : > { %4425 = vmatpush3.bf16.msra.mxu0 %v4870_v17  ;;  %v5774_v17 = vcombine.high %v3976_v16, %v3976_v16 }
 0x16f   : > { %4437 = vmatprep.subr.bf16.mxu0 %v4871_v29 }
 0x170   : > { %v2496_v60 = vshll.u32 %v5774_v17, 16 }
 0x171   : > { %1858 = vmatmul.mubr.bf16.vlgmr.msra.gmra.mrb[16].mxu0 %v1719_v18  ;;  %v5776_v18 = vcombine.low %v3976_v16, %v3976_v16  ;;  %v4937_v16 = vld [vmem:[%s6227_s1 + $0x1f8] sm:$0xff]  }
 0x172   : > { %4438 = vmatpush3.bf16.msra.mxu0 %v4872_v30  ;;  %2130 = vmatprep.mubr.bf16.mxu0 %v1999_v62  ;;  %v4918_v62 = vld [vmem:[%s6227_s1 + $0x38] sm:$0xff]  }
 0x173   : > { %4439 = vmatprep.subr.bf16.mxu0 %v4873_v31 }
 0x176   : > { %4440 = vmatpush3.bf16.msra.mxu0 %v4874_v33 }
 0x177   : > { %4441 = vmatprep.subr.bf16.mxu0 %v4875_v36 }
 0x17a   : > { %4442 = vmatpush3.bf16.msra.mxu0 %v4876_v39 }
 0x17b   : > { %4443 = vmatprep.subr.bf16.mxu0 %v4877_v40 }
 0x17e   : > { %4444 = vmatpush3.bf16.msra.mxu0 %v4878_v43 }
 0x17f   : > { %4445 = vmatprep.subr.bf16.mxu0 %v4879_v45 }
 0x182   : > { %4446 = vmatpush3.bf16.msra.mxu0 %v4880_v46 }
 0x183   : > { %4447 = vmatprep.subr.bf16.mxu0 %v4881_v47 }
 0x186   : > { %4448 = vmatpush3.bf16.msra.mxu0 %v4882_v48  ;;  %v4888_v48 = vld [vmem:[%s6227_s1] sm:$0xff]  }
 0x187   : > { %4449 = vmatprep.subr.bf16.mxu0 %v4883_v49 }
 0x18a   : > { %4450 = vmatpush3.bf16.msra.mxu0 %v4884_v50  ;;  %v4897_v50 = vld [vmem:[%s6227_s1 + $0x50] sm:$0xff]  }
 0x18b   : > { %4451 = vmatprep.subr.bf16.mxu0 %v4885_v52  ;;  %v4901_v52 = vld [vmem:[%s6227_s1 + $0x58] sm:$0xff]  }
 0x18e   : > { %4452 = vmatpush3.bf16.msra.mxu0 %v4886_v54  ;;  %v4905_v54 = vld [vmem:[%s6227_s1 + $0x60] sm:$0xff]  }
 0x18f   : > { %4481 = vmatprep.subr.bf16.mxu0 %v4891_v63  ;;  %v2494_v63 = vshrl.u32 %v5774_v17, 16 }
 0x191   : > { %2131 = vmatmul.mubr.bf16.vlgmr.msra.gmra.mrb[20].mxu0 %v1992_v0  ;;  %v2498_v0 = vrot.slane %v2496_v60, 1 }
 0x192   : > { %4482 = vmatpush3.bf16.msra.mxu0 %v4892_v1  ;;  %2445 = vmatprep.mubr.bf16.mxu0 %v5774_v17  ;;  %v4921_v1 = vld [vmem:[%s6227_s1 + $0x1c0] sm:$0xff]   ;;  %v2487_v17 = vshrl.u32 %v5776_v18, 16 }
 0x193   : > { %4483 = vmatprep.subr.bf16.mxu0 %v4895_v2  ;;  %v4924_v2 = vld [vmem:[%s6227_s1 + $0x180] sm:$0xff]  }
 0x196   : > { %4484 = vmatpush3.bf16.msra.mxu0 %v4896_v3  ;;  %v2499_v3 = vor.u32 %v2498_v0, %v2494_v63  ;;  %v4959_v0 = vld [vmem:[%s6227_s1 + $0x140] sm:$0xff]  }
 0x197   : > { %4485 = vmatprep.subr.bf16.mxu0 %v4899_v4  ;;  %v4925_v4 = vld [vmem:[%s6227_s1 + $0x1c8] sm:$0xff]  }
 0x19a   : > { %4486 = vmatpush3.bf16.msra.mxu0 %v4900_v44  ;;  %v4926_v44 = vld [vmem:[%s6227_s1 + $0x188] sm:$0xff]  }
 0x19b   : > { %4487 = vmatprep.subr.bf16.mxu0 %v4903_v5  ;;  %v4927_v5 = vld [vmem:[%s6227_s1 + $0x1d0] sm:$0xff]  }
 0x19e   : > { %4488 = vmatpush3.bf16.msra.mxu0 %v4904_v6  ;;  %v4928_v6 = vld [vmem:[%s6227_s1 + $0x190] sm:$0xff]  }
 0x19f   : > { %4489 = vmatprep.subr.bf16.mxu0 %v4907_v7  ;;  %v4930_v7 = vld [vmem:[%s6227_s1 + $0x198] sm:$0xff]  }
 0x1a2   : > { %4490 = vmatpush3.bf16.msra.mxu0 %v4908_v8  ;;  %v4931_v8 = vld [vmem:[%s6227_s1 + $0x1e0] sm:$0xff]  }
 0x1a3   : > { %4491 = vmatprep.subr.bf16.mxu0 %v4911_v10  ;;  %v4932_v10 = vld [vmem:[%s6227_s1 + $0x1a0] sm:$0xff]  }
 0x1a6   : > { %4492 = vmatpush3.bf16.msra.mxu0 %v4912_v11  ;;  %v4933_v11 = vld [vmem:[%s6227_s1 + $0x1e8] sm:$0xff]  }
 0x1a7   : > { %4493 = vmatprep.subr.bf16.mxu0 %v4915_v12  ;;  %v4934_v12 = vld [vmem:[%s6227_s1 + $0x1a8] sm:$0xff]  }
 0x1aa   : > { %4494 = vmatpush3.bf16.msra.mxu0 %v4916_v13  ;;  %v4935_v13 = vld [vmem:[%s6227_s1 + $0x1f0] sm:$0xff]  }
 0x1ab   : > { %4495 = vmatprep.subr.bf16.mxu0 %v4919_v14  ;;  %v2489_v14 = vshll.u32 %v5776_v18, 16 }
 0x1ae   : > { %4496 = vmatpush3.bf16.msra.mxu0 %v4920_v15  ;;  %v4936_v15 = vld [vmem:[%s6227_s1 + $0x1b0] sm:$0xff]  }
 0x1af   : > { %4647 = vmatprep.subr.bf16.mxu0 %v5093_v25 }
 0x1b1   : > { %2446 = vmatmul.mubr.bf16.vlgmr.msra.gmra.mrb[24].mxu0 %v5776_v18 }
 0x1b2   : > { %4648 = vmatpush3.bf16.msra.mxu0 %v5410_v27  ;;  %4655 = vmatprep.mubr.msk.bf16.mxu0 %vm5094_vm0, %v5093_v25  ;;  %v5794_v27 = vld [vmem:[%s6231_s5] ss:$0 sm:$0xff] }
 0x1b3   : > { %4649 = vmatprep.subr.bf16.mxu0 %v5093_v25 }
 0x1b6   : > { %4650 = vmatpush3.bf16.msra.mxu0 %v5435_v34  ;;  %v5801_v34 = vld [vmem:[%s6232_s6] ss:$0 sm:$0xff] }
 0x1b7   : > { %4651 = vmatprep.subr.bf16.mxu0 %v5093_v25 }
 0x1ba   : > { %4652 = vmatpush3.bf16.msra.mxu0 %v5448_v37 }
 0x1bb   : > { %4653 = vmatprep.subr.bf16.mxu0 %v5093_v25 }
 0x1be   : > { %4654 = vmatpush3.bf16.msra.mxu0 %v5462_v41 }
 0x204   : > { %v1122_v19 = vpop.f32.mrb[8].mxu0 }
 0x205   : > { %v1134_v37 = vmul.f32 %v5794_v27, %v1122_v19  ;;  %v4633_v20 = vpop.f32.mrb[9].mxu0  ;;  %v2491_v19 = vrot.slane %v2489_v14, 1  ;;  %v4987_v14 = vld [vmem:[%s6227_s1 + $0x178] sm:$0xff]  }
 0x206   : > { %v1125_v22 = vpop.f32.mrb[10].mxu0 }
 0x207   : > { %v1141_v23 = vadd.f32 %v5801_v34, %v1134_v37  ;;  %v4634_v41 = vpop.f32.mrb[11].mxu0  ;;  %v4938_v37 = vld [vmem:[%s6227_s1 + $0x1b8] sm:$0xff]   ;;  %v2492_v20 = vor.u32 %v2491_v19, %v2487_v17 }
 0x209   : > { %1142 = vst [vmem:[%s5805_s21] sm:$0xf] %v1141_v23 }
 0x224   : > { %v4382_v24 = vpop.f32.mrb[12].mxu0 }
 0x225   : > { %v4383_v26 = vpop.f32.mrb[13].mxu0 }
 0x226   : > { %v4384_v9 = vadd.f32 %v4383_v26, %v4382_v24  ;;  %v4385_v29 = vpop.f32.mrb[14].mxu0 }
 0x227   : > { %v4386_v30 = vpop.f32.mrb[15].mxu0 }
 0x228   : > { %v1498_v31 = vadd.f32 %v4384_v9, %v5661_v21  ;;  %v4893_v21 = vld [vmem:[%s6227_s1 + $0x48] sm:$0xff]  }
 0x22a   : > { %v1680_v32 = vadd.f32 %v5663_v28, %v1498_v31  ;;  %v4894_v28 = vld [vmem:[%s6227_s1 + $0x8] sm:$0xff]   ;;  %v4939_v31 = vld [vmem:[%s6227_s1 + $0xc0] sm:$0xff]  }
 0x244   : > { %v4426_v33 = vpop.f32.mrb[16].mxu0 }
 0x245   : > { %v4427_v36 = vpop.f32.mrb[17].mxu0 }
 0x246   : > { %v4428_v39 = vadd.f32 %v4427_v36, %v4426_v33  ;;  %v4429_v40 = vpop.f32.mrb[18].mxu0  ;;  %v4941_v33 = vld [vmem:[%s6227_s1 + $0xc8] sm:$0xff]  }
 0x247   : > { %v4430_v43 = vpop.f32.mrb[19].mxu0  ;;  %v4943_v40 = vld [vmem:[%s6227_s1 + $0xd0] sm:$0xff]  }
 0x248   : > { %v1865_v45 = vadd.f32 %v4428_v39, %v1680_v32  ;;  %v4940_v32 = vld [vmem:[%s6227_s1 + $0x80] sm:$0xff]   ;;  %v4942_v39 = vld [vmem:[%s6227_s1 + $0x88] sm:$0xff]   ;;  %v4944_v43 = vld [vmem:[%s6227_s1 + $0x90] sm:$0xff]  }
 0x24a   : > { %v1866_v46 = vmul.f32 %v5552_v35, %v1865_v45  ;;  %v4945_v45 = vld [vmem:[%s6227_s1 + $0xd8] sm:$0xff]  }
 0x24c   : > { %v1867_v47 = vadd.f32 %v5557_v38, %v1866_v46  ;;  %v4946_v46 = vld [vmem:[%s6227_s1 + $0x98] sm:$0xff]  }
 0x24e   : > { %v1868_v49 = vpack.c.bf16 %v1867_v47, %v1867_v47  ;;  %v4947_v47 = vld [vmem:[%s6227_s1 + $0xe0] sm:$0xff]  }
 0x250   : > { %4644 = vmatmul.mubr.msk.bf16.vlgmr.msra.gmra.mrb[16].mxu1 %vm1084_vm1, %v1868_v49  ;;  %v4949_v49 = vld [vmem:[%s6227_s1 + $0xe8] sm:$0xff]  }
 0x251   : > { %4460 = vmatpush3.bf16.msra.mxu1 %v4888_v48  ;;  %2268 = vmatprep.mubr.bf16.mxu1 %v5708_v51  ;;  %v4902_v51 = vld [vmem:[%s6227_s1 + $0x18] sm:$0xff]   ;;  %v4948_v48 = vld [vmem:[%s6227_s1 + $0xa0] sm:$0xff]  }
 0x252   : > { %4461 = vmatprep.subr.bf16.mxu1 %v4893_v21  ;;  %v4950_v21 = vld [vmem:[%s6227_s1 + $0xa8] sm:$0xff]  }
 0x255   : > { %4462 = vmatpush3.bf16.msra.mxu1 %v4894_v28  ;;  %v4951_v28 = vld [vmem:[%s6227_s1 + $0xf0] sm:$0xff]  }
 0x256   : > { %4463 = vmatprep.subr.bf16.mxu1 %v4897_v50  ;;  %v4952_v50 = vld [vmem:[%s6227_s1 + $0xb0] sm:$0xff]  }
 0x259   : > { %4464 = vmatpush3.bf16.msra.mxu1 %v4898_v42  ;;  %v4077_v42 = vld [vmem:[%s5288_s12 + $0x18] sm:$0x77] }
 0x25a   : > { %4465 = vmatprep.subr.bf16.mxu1 %v4901_v52  ;;  %v5959_v52 = vcombine.high %v4077_v42, %v4077_v42 }
 0x25d   : > { %4466 = vmatpush3.bf16.msra.mxu1 %v4902_v51  ;;  %v4953_v51 = vld [vmem:[%s6227_s1 + $0xf8] sm:$0xff]  }
 0x25e   : > { %4467 = vmatprep.subr.bf16.mxu1 %v4905_v54  ;;  %v5964_v54 = vcombine.low %v4077_v42, %v4077_v42  ;;  %v4956_v42 = vld [vmem:[%s6227_s1] sm:$0xff]  }
 0x261   : > { %4468 = vmatpush3.bf16.msra.mxu1 %v4906_v55  ;;  %v4954_v55 = vld [vmem:[%s6227_s1 + $0xb8] sm:$0xff]  }
 0x262   : > { %4469 = vmatprep.subr.bf16.mxu1 %v4909_v56  ;;  %v2769_v56 = vshll.u32 %v5959_v52, 16 }
 0x264   : > { %v4453_v22 = vpop.f32.mrb[20].mxu0  ;;  %v2771_v60 = vrot.slane %v2769_v56, 1  ;;  %v4973_v56 = vld [vmem:[%s6227_s1 + $0x60] sm:$0xff]  }
 0x265   : > { %4470 = vmatpush3.bf16.msra.mxu1 %v4910_v57  ;;  %v4454_v23 = vpop.f32.mrb[21].mxu0  ;;  %v4955_v57 = vld [vmem:[%s6227_s1 + $0x40] sm:$0xff]  }
 0x266   : > { %4471 = vmatprep.subr.bf16.mxu1 %v4913_v58  ;;  %v5912_v41 = vadd.f32 %v4454_v23, %v4453_v22  ;;  %v4456_v24 = vpop.f32.mrb[22].mxu0  ;;  %v2762_v58 = vshll.u32 %v5964_v54, 16  ;;  %4552 = vmatprep.subr.bf16.mxu0 %v4955_v57  ;;  %v5009_v22 = vld [vmem:[%s6230_s4 + $0x10] sm:$0xff]   ;;  %v5010_v23 = vld [vmem:[%s6230_s4 + $0x18] sm:$0xff]   ;;  %v4974_v57 = vld [vmem:[%s6227_s1 + $0x20] sm:$0xff]  }
 0x267   : > { %v4457_v26 = vpop.f32.mrb[23].mxu0 }
 0x269   : > { %4472 = vmatpush3.bf16.msra.mxu1 %v4914_v59  ;;  %v2767_v59 = vshrl.u32 %v5959_v52, 16 }
 0x26a   : > { %4473 = vmatprep.subr.bf16.mxu1 %v4917_v61  ;;  %v2760_v61 = vshrl.u32 %v5964_v54, 16 }
 0x26b   : > { %v2772_v63 = vor.u32 %v2771_v60, %v2767_v59  ;;  %v4978_v59 = vld [vmem:[%s6227_s1 + $0x28] sm:$0xff]   ;;  %v4981_v60 = vld [vmem:[%s6227_s1 + $0x70] sm:$0xff]  }
 0x26d   : > { %4474 = vmatpush3.bf16.msra.mxu1 %v4918_v62  ;;  %v2764_v62 = vrot.slane %v2762_v58, 1  ;;  %v4977_v58 = vld [vmem:[%s6227_s1 + $0x68] sm:$0xff]  }
 0x26e   : > { %4503 = vmatprep.subr.bf16.mxu1 %v4921_v1 }
 0x26f   : > { %v2765_v1 = vor.u32 %v2764_v62, %v2760_v61  ;;  %v4982_v61 = vld [vmem:[%s6227_s1 + $0x30] sm:$0xff]  }
 0x270   : > { %2269 = vmatmul.mubr.bf16.vlgmr.msra.gmra.mrb[20].mxu1 %v5713_v53  ;;  %v4929_v53 = vld [vmem:[%s6227_s1 + $0x1d8] sm:$0xff]  }
 0x271   : > { %4504 = vmatpush3.bf16.msra.mxu1 %v4924_v2  ;;  %2630 = vmatprep.mubr.bf16.mxu1 %v2499_v3  ;;  %v4960_v2 = vld [vmem:[%s6227_s1 + $0x100] sm:$0xff]   ;;  %v4963_v3 = vld [vmem:[%s6227_s1 + $0x148] sm:$0xff]  }
 0x272   : > { %4505 = vmatprep.subr.bf16.mxu1 %v4925_v4  ;;  %v4964_v4 = vld [vmem:[%s6227_s1 + $0x108] sm:$0xff]  }
 0x275   : > { %4506 = vmatpush3.bf16.msra.mxu1 %v4926_v44  ;;  %v4967_v44 = vld [vmem:[%s6227_s1 + $0x150] sm:$0xff]  }
 0x276   : > { %4507 = vmatprep.subr.bf16.mxu1 %v4927_v5  ;;  %v4968_v5 = vld [vmem:[%s6227_s1 + $0x110] sm:$0xff]  }
 0x279   : > { %4508 = vmatpush3.bf16.msra.mxu1 %v4928_v6  ;;  %v4971_v6 = vld [vmem:[%s6227_s1 + $0x158] sm:$0xff]  }
 0x27a   : > { %4509 = vmatprep.subr.bf16.mxu1 %v4929_v53  ;;  %v4972_v53 = vld [vmem:[%s6227_s1 + $0x118] sm:$0xff]  }
 0x27d   : > { %4510 = vmatpush3.bf16.msra.mxu1 %v4930_v7  ;;  %v4975_v7 = vld [vmem:[%s6227_s1 + $0x160] sm:$0xff]  }
 0x27e   : > { %4511 = vmatprep.subr.bf16.mxu1 %v4931_v8  ;;  %v4976_v8 = vld [vmem:[%s6227_s1 + $0x120] sm:$0xff]  }
 0x281   : > { %4512 = vmatpush3.bf16.msra.mxu1 %v4932_v10  ;;  %v4979_v10 = vld [vmem:[%s6227_s1 + $0x168] sm:$0xff]  }
 0x282   : > { %4513 = vmatprep.subr.bf16.mxu1 %v4933_v11  ;;  %v4980_v11 = vld [vmem:[%s6227_s1 + $0x128] sm:$0xff]  }
 0x284   : > { %v4497_v9 = vpop.f32.mrb[24].mxu0 }
 0x285   : > { %4514 = vmatpush3.bf16.msra.mxu1 %v4934_v12  ;;  %v4498_v29 = vpop.f32.mrb[25].mxu0  ;;  %v4983_v12 = vld [vmem:[%s6227_s1 + $0x170] sm:$0xff]  }
 0x286   : > { %4515 = vmatprep.subr.bf16.mxu1 %v4935_v13  ;;  %v5914_v30 = vadd.f32 %v4498_v29, %v4497_v9  ;;  %v4500_v18 = vpop.f32.mrb[26].mxu0  ;;  %v4984_v13 = vld [vmem:[%s6227_s1 + $0x130] sm:$0xff]  }
 0x287   : > { %v4501_v36 = vpop.f32.mrb[27].mxu0 }
 0x289   : > { %4516 = vmatpush3.bf16.msra.mxu1 %v4936_v15  ;;  %v4988_v15 = vld [vmem:[%s6227_s1 + $0x138] sm:$0xff]  }
 0x28a   : > { %4517 = vmatprep.subr.bf16.mxu1 %v4937_v16  ;;  %v4144_v16 = vld [vmem:[%s5288_s12 + $0x20] sm:$0x77]  ;;  %s5013_s12 = scalar_lea.vmem %s6169_s10, 256 }
 0x28b   : > { %v6025_v17 = vcombine.high %v4144_v16, %v4144_v16  ;;  %v6027_v19 = vcombine.low %v4144_v16, %v4144_v16  ;;  %v5004_v16 = vld [vmem:[%s6227_s1 + $0x1b0] sm:$0xff]   ;;  %p5014_p12 = scmp.ne.s32.totalorder %s6169_s10, %s5013_s12  ;;  %p5021_p2 = scmp.lt.s32.totalorder %s5019_s23, %s5013_s12 }
 0x28d   : > { %4518 = vmatpush3.bf16.msra.mxu1 %v4938_v37  ;;  %v5007_v37 = vld [vmem:[%s6230_s4] sm:$0xff]   ;;  %v3269_v62 = vshll.u32 %v6025_v17, 16  ;;  %p5015_p13 = pnand %p5014_p12, %p5178_p4  ;;  %p5022_p3 = por %p5021_p2, %p5020_p1 }
 0x28e   : > { %4530 = vmatprep.subr.bf16.mxu1 %v4939_v31 }
 0x28f   : > { %p5016_p0 = pneg %p5015_p13 }
 0x290   : > { %2631 = vmatmul.mubr.bf16.vlgmr.msra.gmra.mrb[24].mxu1 %v2492_v20  ;;  %v5008_v20 = vld [vmem:[%s6230_s4 + $0x8] sm:$0xff]  }
 0x291   : > { %4531 = vmatpush3.bf16.msra.mxu1 %v4940_v32  ;;  %2903 = vmatprep.mubr.bf16.mxu1 %v2772_v63  ;;  %v4985_v63 = vld [vmem:[%s6227_s1 + $0x78] sm:$0xff]   ;;  %p5023_p5 = pnand %p5022_p3, %p5016_p0 }
 0x292   : > { %4532 = vmatprep.subr.bf16.mxu1 %v4941_v33 }
 0x295   : > { %4533 = vmatpush3.bf16.msra.mxu1 %v4942_v39 }
 0x296   : > { %4534 = vmatprep.subr.bf16.mxu1 %v4943_v40 }
 0x299   : > { %4535 = vmatpush3.bf16.msra.mxu1 %v4944_v43 }
 0x29a   : > { %4536 = vmatprep.subr.bf16.mxu1 %v4945_v45 }
 0x29d   : > { %4537 = vmatpush3.bf16.msra.mxu1 %v4946_v46 }
 0x29e   : > { %4538 = vmatprep.subr.bf16.mxu1 %v4947_v47 }
 0x2a1   : > { %4539 = vmatpush3.bf16.msra.mxu1 %v4948_v48 }
 0x2a2   : > { %4540 = vmatprep.subr.bf16.mxu1 %v4949_v49 }
 0x2a5   : > { %4541 = vmatpush3.bf16.msra.mxu1 %v4950_v21 }
 0x2a6   : > { %4542 = vmatprep.subr.bf16.mxu1 %v4951_v28 }
 0x2a9   : > { %4543 = vmatpush3.bf16.msra.mxu1 %v4952_v50 }
 0x2aa   : > { %4544 = vmatprep.subr.bf16.mxu1 %v4953_v51 }
 0x2ad   : > { %4545 = vmatpush3.bf16.msra.mxu1 %v4954_v55  ;;  %v4969_v55 = vld [vmem:[%s6227_s1 + $0x58] sm:$0xff]  }
 0x2ae   : > { %4574 = vmatprep.subr.bf16.mxu1 %v4959_v0  ;;  %v4986_v0 = vld [vmem:[%s6227_s1 + $0x38] sm:$0xff]  }
 0x2b0   : > { %2904 = vmatmul.mubr.bf16.vlgmr.msra.gmra.mrb[28].mxu1 %v2765_v1  ;;  %v3267_v1 = vshrl.u32 %v6025_v17, 16 }
 0x2b1   : > { %4575 = vmatpush3.bf16.msra.mxu1 %v4960_v2  ;;  %3218 = vmatprep.mubr.bf16.mxu1 %v6025_v17  ;;  %v3271_v2 = vrot.slane %v3269_v62, 1  ;;  %v5005_v17 = vld [vmem:[%s6227_s1 + $0x1f8] sm:$0xff]  }
 0x2b2   : > { %4576 = vmatprep.subr.bf16.mxu1 %v4963_v3  ;;  %v4989_v3 = vld [vmem:[%s6227_s1 + $0x1c0] sm:$0xff]  }
 0x2b5   : > { %4577 = vmatpush3.bf16.msra.mxu1 %v4964_v4  ;;  %v4992_v4 = vld [vmem:[%s6227_s1 + $0x180] sm:$0xff]  }
 0x2b6   : > { %4578 = vmatprep.subr.bf16.mxu1 %v4967_v44  ;;  %v3272_v44 = vor.u32 %v3271_v2, %v3267_v1 }
 0x2b9   : > { %4579 = vmatpush3.bf16.msra.mxu1 %v4968_v5  ;;  %v4993_v5 = vld [vmem:[%s6227_s1 + $0x1c8] sm:$0xff]  }
 0x2ba   : > { %4580 = vmatprep.subr.bf16.mxu1 %v4971_v6  ;;  %v4994_v6 = vld [vmem:[%s6227_s1 + $0x188] sm:$0xff]  }
 0x2bd   : > { %4581 = vmatpush3.bf16.msra.mxu1 %v4972_v53  ;;  %v4995_v53 = vld [vmem:[%s6227_s1 + $0x1d0] sm:$0xff]  }
 0x2be   : > { %4582 = vmatprep.subr.bf16.mxu1 %v4975_v7  ;;  %v4996_v7 = vld [vmem:[%s6227_s1 + $0x190] sm:$0xff]  }
 0x2c1   : > { %4583 = vmatpush3.bf16.msra.mxu1 %v4976_v8  ;;  %v4998_v8 = vld [vmem:[%s6227_s1 + $0x198] sm:$0xff]  }
 0x2c2   : > { %4584 = vmatprep.subr.bf16.mxu1 %v4979_v10  ;;  %v4999_v10 = vld [vmem:[%s6227_s1 + $0x1e0] sm:$0xff]  }
 0x2c5   : > { %4585 = vmatpush3.bf16.msra.mxu1 %v4980_v11  ;;  %v5000_v11 = vld [vmem:[%s6227_s1 + $0x1a0] sm:$0xff]  }
 0x2c6   : > { %4586 = vmatprep.subr.bf16.mxu1 %v4983_v12  ;;  %v5001_v12 = vld [vmem:[%s6227_s1 + $0x1e8] sm:$0xff]  }
 0x2c9   : > { %4587 = vmatpush3.bf16.msra.mxu1 %v4984_v13  ;;  %v5002_v13 = vld [vmem:[%s6227_s1 + $0x1a8] sm:$0xff]  }
 0x2ca   : > { %4588 = vmatprep.subr.bf16.mxu1 %v4987_v14  ;;  %v5003_v14 = vld [vmem:[%s6227_s1 + $0x1f0] sm:$0xff]  }
 0x2cd   : > { %4589 = vmatpush3.bf16.msra.mxu1 %v4988_v15  ;;  %v3262_v15 = vshll.u32 %v6027_v19, 16 }
 0x2ce   : > { %4659 = vmatprep.subr.bf16.mxu1 %v5093_v25 }
 0x2d0   : > { %3219 = vmatmul.mubr.bf16.vlgmr.msra.gmra.mrb[32].mxu1 %v6027_v19 }
 0x2d1   : > { %4660 = vmatpush3.bf16.msra.mxu1 %v5007_v37  ;;  %4667 = vmatprep.mubr.msk.bf16.mxu1 %vm5094_vm0, %v5093_v25  ;;  %v3260_v37 = vshrl.u32 %v6027_v19, 16 }
 0x2d2   : > { %4661 = vmatprep.subr.bf16.mxu1 %v5093_v25 }
 0x2d5   : > { %4662 = vmatpush3.bf16.msra.mxu1 %v5008_v20  ;;  %v3264_v20 = vrot.slane %v3262_v15, 1 }
 0x2d6   : > { %4663 = vmatprep.subr.bf16.mxu1 %v5093_v25 }
 0x2d9   : > { %4664 = vmatpush3.bf16.msra.mxu1 %v5009_v22  ;;  %v5006_v22 = vld [vmem:[%s6227_s1 + $0x1b8] sm:$0xff]  }
 0x2da   : > { %4665 = vmatprep.subr.bf16.mxu1 %v5093_v25 }
 0x2dd   : > { %4666 = vmatpush3.bf16.msra.mxu1 %v5010_v23  ;;  %v3265_v23 = vor.u32 %v3264_v20, %v3260_v37 }
 0x323   : > { %v1906_v24 = vpop.f32.mrb[16].mxu1 }
 0x324   : > { %v1912_v26 = vmul.f32 %v5794_v27, %v1906_v24  ;;  %v4645_v9 = vpop.f32.mrb[17].mxu1 }
 0x325   : > { %v1909_v29 = vpop.f32.mrb[18].mxu1 }
 0x326   : > { %v1913_v18 = vadd.f32 %v5801_v34, %v1912_v26  ;;  %v4646_v31 = vpop.f32.mrb[19].mxu1 }
 0x328   : > { %3908 = vst [vmem:[%s5805_s21 + $0x4] sm:$0xf] %v1913_v18 }
 0x343   : > { %v4475_v32 = vpop.f32.mrb[20].mxu1 }
 0x344   : > { %v4476_v33 = vpop.f32.mrb[21].mxu1 }
 0x345   : > { %v4477_v36 = vadd.f32 %v4476_v33, %v4475_v32  ;;  %v4478_v39 = vpop.f32.mrb[22].mxu1 }
 0x346   : > { %v4479_v40 = vpop.f32.mrb[23].mxu1 }
 0x347   : > { %v2271_v25 = vadd.f32 %v4477_v36, %v5912_v41  ;;  %v4961_v41 = vld [vmem:[%s6227_s1 + $0x48] sm:$0xff]  }
 0x349   : > { %v2453_v43 = vadd.f32 %v5914_v30, %v2271_v25  ;;  %v4962_v30 = vld [vmem:[%s6227_s1 + $0x8] sm:$0xff]  }
 0x363   : > { %v4519_v45 = vpop.f32.mrb[24].mxu1 }
 0x364   : > { %v4520_v46 = vpop.f32.mrb[25].mxu1 }
 0x365   : > { %v4521_v47 = vadd.f32 %v4520_v46, %v4519_v45  ;;  %v4522_v48 = vpop.f32.mrb[26].mxu1 }
 0x366   : > { %v4523_v49 = vpop.f32.mrb[27].mxu1 }
 0x367   : > { %v2638_v21 = vadd.f32 %v4521_v47, %v2453_v43 }
 0x369   : > { %v2639_v28 = vmul.f32 %v5552_v35, %v2638_v21  ;;  %v4965_v35 = vld [vmem:[%s6227_s1 + $0x50] sm:$0xff]  }
 0x36b   : > { %v2640_v50 = vadd.f32 %v5557_v38, %v2639_v28  ;;  %v4966_v38 = vld [vmem:[%s6227_s1 + $0x10] sm:$0xff]  }
 0x36d   : > { %v2641_v51 = vpack.c.bf16 %v2640_v50, %v2640_v50 }
 0x36f   : > { %4656 = vmatmul.mubr.msk.bf16.vlgmr.msra.gmra.mrb[28].mxu0 %vm1084_vm1, %v2641_v51 }
 0x370   : > { %4553 = vmatpush3.bf16.msra.mxu0 %v4956_v42  ;;  %3041 = vmatprep.mubr.bf16.mxu0 %v5959_v52  ;;  %v4970_v52 = vld [vmem:[%s6227_s1 + $0x18] sm:$0xff]  }
 0x371   : > { %4554 = vmatprep.subr.bf16.mxu0 %v4961_v41 }
 0x374   : > { %4555 = vmatpush3.bf16.msra.mxu0 %v4962_v30 }
 0x375   : > { %4556 = vmatprep.subr.bf16.mxu0 %v4965_v35 }
 0x378   : > { %4557 = vmatpush3.bf16.msra.mxu0 %v4966_v38 }
 0x379   : > { %4558 = vmatprep.subr.bf16.mxu0 %v4969_v55 }
 0x37c   : > { %4559 = vmatpush3.bf16.msra.mxu0 %v4970_v52  ;;  %v5011_v52 = vld [vmem:[%s6228_s2] ss:$0 sm:$0xff] }
 0x37d   : > { %4560 = vmatprep.subr.bf16.mxu0 %v4973_v56 }
 0x380   : > { %4561 = vmatpush3.bf16.msra.mxu0 %v4974_v57  ;;  %v5012_v57 = vld [vmem:[%s6229_s3] ss:$0 sm:$0xff] }
 0x381   : > { %4562 = vmatprep.subr.bf16.mxu0 %v4977_v58 }
 0x383   : > { %v4546_v24 = vpop.f32.mrb[28].mxu1 }
 0x384   : > { %4563 = vmatpush3.bf16.msra.mxu0 %v4978_v59  ;;  %v4547_v26 = vpop.f32.mrb[29].mxu1 }
 0x385   : > { %4564 = vmatprep.subr.bf16.mxu0 %v4981_v60  ;;  %v4548_v9 = vadd.f32 %v4547_v26, %v4546_v24  ;;  %v4549_v29 = vpop.f32.mrb[30].mxu1 }
 0x386   : > { %v4550_v18 = vpop.f32.mrb[31].mxu1 }
 0x388   : > { %4565 = vmatpush3.bf16.msra.mxu0 %v4982_v61 }
 0x389   : > { %4566 = vmatprep.subr.bf16.mxu0 %v4985_v63 }
 0x38c   : > { %4567 = vmatpush3.bf16.msra.mxu0 %v4986_v0 }
 0x38d   : > { %4596 = vmatprep.subr.bf16.mxu0 %v4989_v3 }
 0x38f   : > { %3042 = vmatmul.mubr.bf16.vlgmr.msra.gmra.mrb[32].mxu0 %v5964_v54  ;;  %v4997_v54 = vld [vmem:[%s6227_s1 + $0x1d8] sm:$0xff]  }
 0x390   : > { %4597 = vmatpush3.bf16.msra.mxu0 %v4992_v4  ;;  %3403 = vmatprep.mubr.bf16.mxu0 %v3272_v44 }
 0x391   : > { %4598 = vmatprep.subr.bf16.mxu0 %v4993_v5 }
 0x394   : > { %4599 = vmatpush3.bf16.msra.mxu0 %v4994_v6 }
 0x395   : > { %4600 = vmatprep.subr.bf16.mxu0 %v4995_v53 }
 0x398   : > { %4601 = vmatpush3.bf16.msra.mxu0 %v4996_v7 }
 0x399   : > { %4602 = vmatprep.subr.bf16.mxu0 %v4997_v54 }
 0x39c   : > { %4603 = vmatpush3.bf16.msra.mxu0 %v4998_v8 }
 0x39d   : > { %4604 = vmatprep.subr.bf16.mxu0 %v4999_v10 }
 0x3a0   : > { %4605 = vmatpush3.bf16.msra.mxu0 %v5000_v11 }
 0x3a1   : > { %4606 = vmatprep.subr.bf16.mxu0 %v5001_v12 }
 0x3a3   : > { %v4590_v31 = vpop.f32.mrb[32].mxu1 }
 0x3a4   : > { %4607 = vmatpush3.bf16.msra.mxu0 %v5002_v13  ;;  %v4591_v32 = vpop.f32.mrb[33].mxu1 }
 0x3a5   : > { %4608 = vmatprep.subr.bf16.mxu0 %v5003_v14  ;;  %v4592_v33 = vadd.f32 %v4591_v32, %v4590_v31  ;;  %v4593_v19 = vpop.f32.mrb[34].mxu1 }
 0x3a6   : > { %v4594_v36 = vpop.f32.mrb[35].mxu1 }
 0x3a8   : > { %4609 = vmatpush3.bf16.msra.mxu0 %v5004_v16 }
 0x3a9   : > { %4610 = vmatprep.subr.bf16.mxu0 %v5005_v17 }
 0x3ac   : > { %4611 = vmatpush3.bf16.msra.mxu0 %v5006_v22 }
 0x3af   : > { %3404 = vmatmul.mubr.bf16.vlgmr.msra.gmra.mrb[36].mxu0 %v3265_v23 }
 0x442   : > { %v2679_v39 = vpop.f32.mrb[28].mxu0 }
 0x443   : > { %v2685_v40 = vmul.f32 %v5794_v27, %v2679_v39  ;;  %v4657_v25 = vpop.f32.mrb[29].mxu0 }
 0x444   : > { %v2682_v43 = vpop.f32.mrb[30].mxu0 }
 0x445   : > { %v2686_v45 = vadd.f32 %v5801_v34, %v2685_v40  ;;  %v4658_v46 = vpop.f32.mrb[31].mxu0 }
 0x447   : > { %4076 = vst [vmem:[%s5805_s21 + $0x8] sm:$0xf] %v2686_v45 }
 0x462   : > { %v4568_v47 = vpop.f32.mrb[32].mxu0 }
 0x463   : > { %v4569_v48 = vpop.f32.mrb[33].mxu0 }
 0x464   : > { %v4570_v49 = vadd.f32 %v4569_v48, %v4568_v47  ;;  %v4571_v21 = vpop.f32.mrb[34].mxu0 }
 0x465   : > { %v4572_v28 = vpop.f32.mrb[35].mxu0 }
 0x466   : > { %v3044_v50 = vadd.f32 %v4570_v49, %v4548_v9 }
 0x468   : > { %v3226_v42 = vadd.f32 %v4592_v33, %v3044_v50 }
 0x482   : > { %v4612_v51 = vpop.f32.mrb[36].mxu0 }
 0x483   : > { %v4613_v41 = vpop.f32.mrb[37].mxu0 }
 0x484   : > { %v4614_v30 = vadd.f32 %v4613_v41, %v4612_v51  ;;  %v4615_v35 = vpop.f32.mrb[38].mxu0 }
 0x485   : > { %v4616_v38 = vpop.f32.mrb[39].mxu0 }
 0x486   : > { %v3411_v55 = vadd.f32 %v4614_v30, %v3226_v42 }
 0x488   : > { %v3412_v56 = vmul.f32 %v5011_v52, %v3411_v55 }
 0x48a   : > { %v3413_v58 = vadd.f32 %v5012_v57, %v3412_v56 }
 0x48c   : > { %v3414_v59 = vpack.c.bf16 %v3413_v58, %v3413_v58 }
 0x48e   : > { %4668 = vmatmul.mubr.msk.bf16.vlgmr.msra.gmra.mrb[36].mxu1 %vm1084_vm1, %v3414_v59 }
 0x561   : > { %v3452_v60 = vpop.f32.mrb[36].mxu1 }
 0x562   : > { %v3458_v61 = vmul.f32 %v5794_v27, %v3452_v60  ;;  %v4669_v62 = vpop.f32.mrb[37].mxu1 }
 0x563   : > { %v3455_v63 = vpop.f32.mrb[38].mxu1 }
 0x564   : > { %v3459_v0 = vadd.f32 %v5801_v34, %v3458_v61  ;;  %v4670_v1 = vpop.f32.mrb[39].mxu1 }
 0x566   : > { %4244 = vst [vmem:[%s5805_s21 + $0xc] sm:$0xf] %v3459_v0 }
 0x567   : > { %5026 = shalt.err (!%p5023_p5)
}
 0x568   : > { %s5027_s20 = scalar_lea.hbm %s6174_s19, 256  ;;  %s5031_s8 = scalar_lea.hbm %s6233_s7, 512 }
 0x569   : > { %p5028_p6 = scmp.ne.s32.totalorder %s6174_s19, %s5027_s20  ;;  %p5032_p10 = scmp.lt.u32.totalorder %s6174_s19, %s6233_s7 }
 0x56a   : > { %p5033_p11 = scmp.lt.u32.totalorder %s5031_s8, %s5027_s20  ;;  %p5035_p13 = scmp.lt.u32.totalorder %s5027_s20, %s6174_s19 }
 0x56b   : > { %p5029_p7 = pnand %p5028_p6, %p5178_p4 }
 0x56c   : > { %p5034_p12 = por %p5033_p11, %p5032_p10 }
 0x56d   : > { %p5030_p9 = pneg %p5029_p7 }
 0x56e   : > { %p5036_p0 = por %p5035_p13, %p5034_p12 }
 0x570   : > { %p5037_p1 = pnand %p5036_p0, %p5030_p9 }
 0x572   : > { %5040 = shalt.err (!%p5037_p1)
}
 0x573   : > { %s5096_s18 = smov 64   ;;  %s5097_s12 = smov 4  }
 0x574   : > { %4672 = dma.vmem_to_hbm [thread:$0]  (%p5178_p4), %s6169_s10, 256, %s6174_s19, %s6180_s27, %s5096_s18, %s5096_s18, %s5097_s12  }
 0x575 PF: > { %p4678_p2 = scmp.ge.s32.totalorder %s5091_s29, 2  ;;  %s3493_s22 = sand.u32 1, %s5071_s24  }
 0x576   : > { %s3494_s16 = scalar_lea.sflag [#allocation3], %s3493_s22 }
 0x577   : > { %p4675_p3 = pnand %p4678_p2, %p5185_p8 }
 0x579   : > { %5066 = dma.done.wait (!%p4675_p3), %s3494_s16, 256  }
 0x57a   : > { %5068 = vsyncadd (!%p4675_p3), %s3494_s16, 4294967040  ;;  %s20_s29 = sadd.s32 1, %s5091_s29   ;;  %s6236_s24 = smov %s5075_s25 }
 0x57b   : > { %p17_p5 = scmp.ge.s32.totalorder %s20_s29, 4   ;;  %s6237_s25 = smov %s5079_s26 }
 0x57c   : > { %s6238_s26 = smov %s5191_s14  ;;  %s6239_s27 = smov %s5087_s28 }
 0x57d   : > { %s6240_s28 = smov %s6242_s9  ;;  %19 = sbr.rel (!%p17_p5) target bundleno = 4 (0x4), region = 93 }
 0x584   :  { %3499 = vsyncpa [#allocation3], 1 }
 0x585   :  { %3501 = vsyncpa [#allocation3 + $0x1], 1 }

// kernel: spatial_path_forward.4
= control target key start
LH: loop header
LB: loop body
LE: loop exit
PB: predicated region body
PF: predicated region fallthrough
CT: control target
= control target key end

     0   :  { %s8993_s15 = smov 0   ;;  %s8995_s16 = smov 0   ;;  %s10771_s0 = inlined_call_operand.vmem [shape: bf16[2,1,9,9,256], index: 0, kind: input, shape index: {}]   ;;  %s10772_s1 = inlined_call_operand.vmem [shape: bf16[4,256,64], index: 1, kind: input, shape index: {}]   ;;  %s10773_s2 = inlined_call_operand.vmem [shape: f32[1,64], index: 2, kind: input, shape index: {}]   ;;  %s10774_s3 = inlined_call_operand.vmem [shape: f32[1,64], index: 3, kind: input, shape index: {}]   ;;  %s10775_s4 = inlined_call_operand.vmem [shape: bf16[2,8,8,64], index: 4, kind: output, shape index: {}]  }
   0x1   :  { %s8997_s17 = smov 0  }
   0x2 LB: > { %s26_s18 = sadd.s32 1, %s8962_s16  ;;  %p6267_p0 = scmp.ge.s32.totalorder %s8966_s17, 1  ;;  %s8966_s17 = sphi %s8997_s17, %s14_s17   ;;  %s8962_s16 = sphi %s8995_s16, %s10777_s16   ;;  %s8958_s15 = sphi %s8993_s15, %s10776_s15  }
   0x3   : > { %p28_p1 = scmp.ge.s32.totalorder %s26_s18, 2  ;;  %p182_p2 = scmp.lt.s32.totalorder %s8966_s17, 3 }
   0x5   : > { %s10779_s18 = smov (%p28_p1, %s26_s18), 0  ;;  %p183_p3 = pnand %p6267_p0, %p182_p2 }
   0x6   : > { %v8386_v0 = vld [vmem:[%s10772_s1 + $0xc0] sm:$0xff] (!%p183_p3)   ;;  %v8390_v4 = vld [vmem:[%s10772_s1 + $0xc8] sm:$0xff] (!%p183_p3)   ;;  %v8394_v8 = vld [vmem:[%s10772_s1 + $0xd0] sm:$0xff] (!%p183_p3)   ;;  %p216_p4 = scmp.lt.s32.totalorder (!%p183_p3), %s8958_s15, 1  ;;  %vm991_vm0 = vcmask (!%p183_p3), 519168  }
   0x7   : > { %186 = sbr.rel (%p183_p3) target bundleno = 747 (0x2eb), region = 36  ;;  %v8387_v1 = vld [vmem:[%s10772_s1 + $0x40] sm:$0xff] (!%p183_p3)   ;;  %7657 = vmatprep.subr.bf16.mxu0 (!%p183_p3), %v8386_v0  ;;  %v8391_v5 = vld [vmem:[%s10772_s1 + $0x48] sm:$0xff] (!%p183_p3)   ;;  %v8395_v9 = vld [vmem:[%s10772_s1 + $0x50] sm:$0xff] (!%p183_p3)  }
   0x8   : > { %v8388_v2 = vld [vmem:[%s10772_s1 + $0x80] sm:$0xff] (!%p183_p3)   ;;  %7679 = vmatprep.subr.bf16.mxu1 (!%p183_p3), %v8387_v1  ;;  %v8392_v6 = vld [vmem:[%s10772_s1 + $0x88] sm:$0xff] (!%p183_p3)   ;;  %v8396_v10 = vld [vmem:[%s10772_s1 + $0x90] sm:$0xff] (!%p183_p3)  }
   0x9   : > { %v8389_v3 = vld [vmem:[%s10772_s1] sm:$0xff] (!%p183_p3)   ;;  %7658 = vmatpush3.bf16.msra.mxu0 (!%p183_p3), %v8388_v2  ;;  %v8393_v7 = vld [vmem:[%s10772_s1 + $0x8] sm:$0xff] (!%p183_p3)   ;;  %v8397_v11 = vld [vmem:[%s10772_s1 + $0x10] sm:$0xff] (!%p183_p3)  }
   0xa   : > { %7680 = vmatpush3.bf16.msra.mxu1 (!%p183_p3), %v8389_v3  ;;  %7659 = vmatprep.subr.bf16.mxu0 (!%p183_p3), %v8390_v4  ;;  %v8398_v12 = vld [vmem:[%s10772_s1 + $0xd8] sm:$0xff] (!%p183_p3)   ;;  %v8402_v16 = vld [vmem:[%s10772_s1 + $0xe0] sm:$0xff] (!%p183_p3)   ;;  %v8406_v20 = vld [vmem:[%s10772_s1 + $0xe8] sm:$0xff] (!%p183_p3)  }
   0xb   : > { %7681 = vmatprep.subr.bf16.mxu1 (!%p183_p3), %v8391_v5  ;;  %v8399_v13 = vld [vmem:[%s10772_s1 + $0x58] sm:$0xff] (!%p183_p3)   ;;  %v8403_v17 = vld [vmem:[%s10772_s1 + $0x60] sm:$0xff] (!%p183_p3)   ;;  %v8407_v21 = vld [vmem:[%s10772_s1 + $0x68] sm:$0xff] (!%p183_p3)  }
   0xc   : > { %v8400_v14 = vld [vmem:[%s10772_s1 + $0x98] sm:$0xff] (!%p183_p3)   ;;  %v8404_v18 = vld [vmem:[%s10772_s1 + $0xa0] sm:$0xff] (!%p183_p3)   ;;  %v8408_v22 = vld [vmem:[%s10772_s1 + $0xa8] sm:$0xff] (!%p183_p3)  }
   0xd   : > { %7660 = vmatpush3.bf16.msra.mxu0 (!%p183_p3), %v8392_v6  ;;  %v8401_v15 = vld [vmem:[%s10772_s1 + $0x18] sm:$0xff] (!%p183_p3)   ;;  %v8405_v19 = vld [vmem:[%s10772_s1 + $0x20] sm:$0xff] (!%p183_p3)   ;;  %v8409_v23 = vld [vmem:[%s10772_s1 + $0x28] sm:$0xff] (!%p183_p3)  }
   0xe   : > { %7682 = vmatpush3.bf16.msra.mxu1 %v8393_v7  ;;  %7661 = vmatprep.subr.bf16.mxu0 %v8394_v8  ;;  %s10781_s15 = smov (!%p216_p4, %s8958_s15), 1  ;;  %v8410_v24 = vld [vmem:[%s10772_s1 + $0xf0] sm:$0xff]   ;;  %v8414_v28 = vld [vmem:[%s10772_s1 + $0xf8] sm:$0xff]   ;;  %v8422_v38 = vld [vmem:[%s10772_s1 + $0x140] sm:$0xff]  }
   0xf   : > { %7683 = vmatprep.subr.bf16.mxu1 %v8395_v9  ;;  %v8411_v25 = vld [vmem:[%s10772_s1 + $0x70] sm:$0xff]   ;;  %s8361_s27 = smul.u32 144, %s10781_s15  ;;  %v8415_v29 = vld [vmem:[%s10772_s1 + $0x78] sm:$0xff]   ;;  %v8423_v39 = vld [vmem:[%s10772_s1 + $0x1c0] sm:$0xff]   ;;  %s7656_s23 = sshll.u32 %s10781_s15, 5 }
  0x10   : > { %v8412_v26 = vld [vmem:[%s10772_s1 + $0xb0] sm:$0xff]   ;;  %v8416_v30 = vld [vmem:[%s10772_s1 + $0xb8] sm:$0xff]   ;;  %v8424_v46 = vld [vmem:[%s10772_s1 + $0x100] sm:$0xff]   ;;  %s9966_s5 = scalar_lea.vmem %s10775_s4, %s7656_s23 }
  0x11   : > { %7662 = vmatpush3.bf16.msra.mxu0 %v8396_v10  ;;  %v8413_v27 = vld [vmem:[%s10772_s1 + $0x30] sm:$0xff]   ;;  %s9111_s12 = scalar_lea.vmem %s10771_s0, %s8361_s27  ;;  %v8417_v31 = vld [vmem:[%s10772_s1 + $0x38] sm:$0xff]   ;;  %v8425_v47 = vld [vmem:[%s10772_s1 + $0x180] sm:$0xff]  }
  0x12   : > { %7684 = vmatpush3.bf16.msra.mxu1 %v8397_v11  ;;  %7663 = vmatprep.subr.bf16.mxu0 %v8398_v12  ;;  %v238_v32 = vld [vmem:[%s9111_s12] sm:$0xff]  ;;  %v239_v33 = vld [vmem:[%s9111_s12 + $0x8] sm:$0x11]  ;;  %v8431_v54 = vld [vmem:[%s10772_s1 + $0x1d0] sm:$0xff]  }
  0x13   : > { %7685 = vmatprep.subr.bf16.mxu1 %v8399_v13  ;;  %v6303_v34 = vcombine.low %v238_v32, %v239_v33  ;;  %v6304_v35 = vcombine.high %v238_v32, %v239_v33  ;;  %v6322_v36 = vcombine.high %v238_v32, %v238_v32  ;;  %v6321_v37 = vcombine.low %v238_v32, %v238_v32  ;;  %v8427_v50 = vld [vmem:[%s10772_s1 + $0x1c8] sm:$0xff]   ;;  %v8430_v55 = vld [vmem:[%s10772_s1 + $0x150] sm:$0xff]   ;;  %v8435_v58 = vld [vmem:[%s10772_s1 + $0x1d8] sm:$0xff]  }
  0x14   : > { %v8426_v51 = vld [vmem:[%s10772_s1 + $0x148] sm:$0xff]   ;;  %v8433_v56 = vld [vmem:[%s10772_s1 + $0x190] sm:$0xff]   ;;  %v8434_v59 = vld [vmem:[%s10772_s1 + $0x158] sm:$0xff]  }
  0x15   : > { %7664 = vmatpush3.bf16.msra.mxu0 %v8400_v14  ;;  %v321_v40 = vshrl.u32 %v6304_v35, 16  ;;  %v323_v41 = vshll.u32 %v6304_v35, 16  ;;  %597 = vmatprep.mubr.bf16.mxu1 %v6322_v36  ;;  %v314_v42 = vshrl.u32 %v6303_v34, 16  ;;  %v316_v43 = vshll.u32 %v6303_v34, 16  ;;  %v8429_v52 = vld [vmem:[%s10772_s1 + $0x188] sm:$0xff]   ;;  %v8432_v57 = vld [vmem:[%s10772_s1 + $0x110] sm:$0xff]  }
  0x16   : > { %7686 = vmatpush3.bf16.msra.mxu1 %v8401_v15  ;;  %7665 = vmatprep.subr.bf16.mxu0 %v8402_v16  ;;  %v8428_v53 = vld [vmem:[%s10772_s1 + $0x108] sm:$0xff]   ;;  %v8437_v60 = vld [vmem:[%s10772_s1 + $0x198] sm:$0xff]   ;;  %v8439_v62 = vld [vmem:[%s10772_s1 + $0x1e0] sm:$0xff]  }
  0x17   : > { %7687 = vmatprep.subr.bf16.mxu1 %v8403_v17  ;;  %v325_v44 = vrot.slane %v323_v41, 1  ;;  %v318_v45 = vrot.slane %v316_v43, 1  ;;  %v8436_v61 = vld [vmem:[%s10772_s1 + $0x118] sm:$0xff]   ;;  %v8438_v63 = vld [vmem:[%s10772_s1 + $0x160] sm:$0xff]   ;;  %v8443_v2 = vld [vmem:[%s10772_s1 + $0x1e8] sm:$0xff]  }
  0x18   : > { %v8441_v0 = vld [vmem:[%s10772_s1 + $0x1a0] sm:$0xff]   ;;  %v8442_v3 = vld [vmem:[%s10772_s1 + $0x168] sm:$0xff]   ;;  %v8447_v6 = vld [vmem:[%s10772_s1 + $0x1f0] sm:$0xff]  }
  0x19   : > { %7666 = vmatpush3.bf16.msra.mxu0 %v8404_v18  ;;  %v326_v48 = vor.u32 %v325_v44, %v321_v40  ;;  %v319_v49 = vor.u32 %v318_v45, %v314_v42  ;;  %v8440_v1 = vld [vmem:[%s10772_s1 + $0x120] sm:$0xff]   ;;  %v8445_v4 = vld [vmem:[%s10772_s1 + $0x1a8] sm:$0xff]   ;;  %v8446_v7 = vld [vmem:[%s10772_s1 + $0x170] sm:$0xff]  }
  0x1a   : > { %7688 = vmatpush3.bf16.msra.mxu1 %v8405_v19  ;;  %7667 = vmatprep.subr.bf16.mxu0 %v8406_v20  ;;  %v8444_v5 = vld [vmem:[%s10772_s1 + $0x128] sm:$0xff]   ;;  %v8449_v8 = vld [vmem:[%s10772_s1 + $0x1b0] sm:$0xff]   ;;  %v8451_v10 = vld [vmem:[%s10772_s1 + $0x1f8] sm:$0xff]  }
  0x1b   : > { %7689 = vmatprep.subr.bf16.mxu1 %v8407_v21  ;;  %457 = vmatprep.mubr.bf16.mxu0 %v326_v48  ;;  %v8448_v9 = vld [vmem:[%s10772_s1 + $0x130] sm:$0xff]   ;;  %v8450_v11 = vld [vmem:[%s10772_s1 + $0x178] sm:$0xff]   ;;  %v8458_v19 = vld [vmem:[%s10772_s1 + $0xc0] sm:$0xff]  }
  0x1c   : > { %v8452_v12 = vld [vmem:[%s10772_s1 + $0x138] sm:$0xff]   ;;  %v9218_v14 = vld [vmem:[%s9111_s12 + $0x10] sm:$0xff]  ;;  %v8459_v20 = vld [vmem:[%s10772_s1 + $0x40] sm:$0xff]  }
  0x1d   : > { %7668 = vmatpush3.bf16.msra.mxu0 %v8408_v22  ;;  %v8453_v13 = vld [vmem:[%s10772_s1 + $0x1b8] sm:$0xff]   ;;  %v6374_v16 = vcombine.high %v9218_v14, %v9218_v14  ;;  %v8463_v33 = vld [vmem:[%s10772_s1 + $0x48] sm:$0xff]   ;;  %v8466_v36 = vld [vmem:[%s10772_s1 + $0xd0] sm:$0xff]  }
  0x1e   : > { %7690 = vmatpush3.bf16.msra.mxu1 %v8409_v23  ;;  %7669 = vmatprep.subr.bf16.mxu0 %v8410_v24  ;;  %v6340_v15 = vld [vmem:[%s9111_s12 + $0x18] sm:$0x11]  ;;  %v8464_v34 = vld [vmem:[%s10772_s1 + $0x88] sm:$0xff]   ;;  %v8474_v44 = vld [vmem:[%s10772_s1 + $0xe0] sm:$0xff]  }
  0x1f   : > { %7691 = vmatprep.subr.bf16.mxu1 %v8411_v25  ;;  %v6423_v17 = vcombine.low %v9218_v14, %v6340_v15  ;;  %v6424_v18 = vcombine.high %v9218_v14, %v6340_v15  ;;  %v8460_v25 = vld [vmem:[%s10772_s1 + $0x80] sm:$0xff]   ;;  %v8465_v35 = vld [vmem:[%s10772_s1 + $0x8] sm:$0xff]   ;;  %v8470_v40 = vld [vmem:[%s10772_s1 + $0xd8] sm:$0xff]  }
  0x20   : > { %v8471_v41 = vld [vmem:[%s10772_s1 + $0x58] sm:$0xff]   ;;  %v8475_v45 = vld [vmem:[%s10772_s1 + $0x60] sm:$0xff]   ;;  %v8478_v48 = vld [vmem:[%s10772_s1 + $0xe8] sm:$0xff]  }
  0x21   : > { %7670 = vmatpush3.bf16.msra.mxu0 %v8412_v26  ;;  %v831_v21 = vshrl.u32 %v6424_v18, 16  ;;  %v833_v22 = vshll.u32 %v6424_v18, 16  ;;  %v824_v23 = vshrl.u32 %v6423_v17, 16  ;;  %v826_v24 = vshll.u32 %v6423_v17, 16  ;;  %v8472_v42 = vld [vmem:[%s10772_s1 + $0x98] sm:$0xff]   ;;  %v8501_v15 = vld [vmem:[%s10772_s1 + $0x1d0] sm:$0xff]  }
  0x22   : > { %7692 = vmatpush3.bf16.msra.mxu1 %v8413_v27  ;;  %7671 = vmatprep.subr.bf16.mxu0 %v8414_v28  ;;  %v9236_v27 = vcombine.low %v9218_v14, %v9218_v14  ;;  %v8473_v43 = vld [vmem:[%s10772_s1 + $0x18] sm:$0xff]   ;;  %v8502_v17 = vld [vmem:[%s10772_s1 + $0x110] sm:$0xff]  }
  0x23   : > { %7693 = vmatprep.subr.bf16.mxu1 %v8415_v29  ;;  %v835_v26 = vrot.slane %v833_v22, 1  ;;  %v828_v28 = vrot.slane %v826_v24, 1  ;;  %v8461_v29 = vld [vmem:[%s10772_s1] sm:$0xff]   ;;  %v8503_v18 = vld [vmem:[%s10772_s1 + $0x190] sm:$0xff]   ;;  %v8507_v22 = vld [vmem:[%s10772_s1 + $0x198] sm:$0xff]  }
  0x24   : > { %v8508_v24 = vld [vmem:[%s10772_s1 + $0x160] sm:$0xff]  }
  0x25   : > { %7672 = vmatpush3.bf16.msra.mxu0 %v8416_v30  ;;  %v8462_v30 = vld [vmem:[%s10772_s1 + $0xc8] sm:$0xff]   ;;  %v829_v32 = vor.u32 %v828_v28, %v824_v23  ;;  %v8509_v23 = vld [vmem:[%s10772_s1 + $0x1e0] sm:$0xff]  }
  0x26   : > { %7694 = vmatpush3.bf16.msra.mxu1 %v8417_v31  ;;  %7701 = vmatprep.subr.bf16.mxu0 %v8422_v38  ;;  %v836_v31 = vor.u32 %v835_v26, %v831_v21  ;;  %v8468_v38 = vld [vmem:[%s10772_s1 + $0x90] sm:$0xff]   ;;  %v8506_v21 = vld [vmem:[%s10772_s1 + $0x118] sm:$0xff]   ;;  %v8511_v26 = vld [vmem:[%s10772_s1 + $0x1a0] sm:$0xff]  }
  0x27   : > { %7723 = vmatprep.subr.bf16.mxu1 %v8423_v39  ;;  %v8469_v39 = vld [vmem:[%s10772_s1 + $0x10] sm:$0xff]   ;;  %v8512_v28 = vld [vmem:[%s10772_s1 + $0x168] sm:$0xff]  }
  0x28   : > { %458 = vmatmul.mubr.bf16.vlgmr.msra.gmra.mrb[0].mxu0 %v319_v49  ;;  %v8479_v49 = vld [vmem:[%s10772_s1 + $0x68] sm:$0xff]  }
  0x29   : > { %598 = vmatmul.mubr.bf16.vlgmr.msra.gmra.mrb[0].mxu1 %v6321_v37  ;;  %7702 = vmatpush3.bf16.msra.mxu0 %v8424_v46  ;;  %v8467_v37 = vld [vmem:[%s10772_s1 + $0x50] sm:$0xff]   ;;  %v8476_v46 = vld [vmem:[%s10772_s1 + $0xa0] sm:$0xff]  }
  0x2a   : > { %7724 = vmatpush3.bf16.msra.mxu1 %v8425_v47  ;;  %7703 = vmatprep.subr.bf16.mxu0 %v8426_v51  ;;  %v8477_v47 = vld [vmem:[%s10772_s1 + $0x20] sm:$0xff]   ;;  %v8481_v51 = vld [vmem:[%s10772_s1 + $0x28] sm:$0xff]  }
  0x2b   : > { %7725 = vmatprep.subr.bf16.mxu1 %v8427_v50  ;;  %776 = vmatprep.mubr.bf16.mxu0 %v6374_v16  ;;  %v8480_v50 = vld [vmem:[%s10772_s1 + $0xa8] sm:$0xff]  }
  0x2c   : > { %967 = vmatprep.mubr.bf16.mxu1 %v836_v31  ;;  %v8517_v31 = vld [vmem:[%s10772_s1 + $0x1f0] sm:$0xff]  }
  0x2d   : > { %7704 = vmatpush3.bf16.msra.mxu0 %v8428_v53  ;;  %v8483_v53 = vld [vmem:[%s10772_s1 + $0x70] sm:$0xff]  }
  0x2e   : > { %7726 = vmatpush3.bf16.msra.mxu1 %v8429_v52  ;;  %7705 = vmatprep.subr.bf16.mxu0 %v8430_v55  ;;  %v8482_v52 = vld [vmem:[%s10772_s1 + $0xf0] sm:$0xff]  }
  0x2f   : > { %7727 = vmatprep.subr.bf16.mxu1 %v8431_v54  ;;  %v8484_v54 = vld [vmem:[%s10772_s1 + $0xb0] sm:$0xff]  }
  0x30   : > { %v8485_v55 = vld [vmem:[%s10772_s1 + $0x30] sm:$0xff]  }
  0x31   : > { %7706 = vmatpush3.bf16.msra.mxu0 %v8432_v57  ;;  %v8487_v57 = vld [vmem:[%s10772_s1 + $0x78] sm:$0xff]  }
  0x32   : > { %7728 = vmatpush3.bf16.msra.mxu1 %v8433_v56  ;;  %7707 = vmatprep.subr.bf16.mxu0 %v8434_v59  ;;  %v8486_v56 = vld [vmem:[%s10772_s1 + $0xf8] sm:$0xff]  }
  0x33   : > { %7729 = vmatprep.subr.bf16.mxu1 %v8435_v58  ;;  %v8488_v58 = vld [vmem:[%s10772_s1 + $0xb8] sm:$0xff]  }
  0x34   : > { %v8489_v59 = vld [vmem:[%s10772_s1 + $0x38] sm:$0xff]  }
  0x35   : > { %7708 = vmatpush3.bf16.msra.mxu0 %v8436_v61 }
  0x36   : > { %7730 = vmatpush3.bf16.msra.mxu1 %v8437_v60  ;;  %7709 = vmatprep.subr.bf16.mxu0 %v8438_v63  ;;  %v6444_v60 = vld [vmem:[%s9111_s12 + $0x18] sm:$0x11]  ;;  %v8492_v63 = vld [vmem:[%s10772_s1 + $0x140] sm:$0xff]  }
  0x37   : > { %7731 = vmatprep.subr.bf16.mxu1 %v8439_v62  ;;  %v6477_v61 = vcombine.low %v9218_v14, %v6444_v60  ;;  %v6478_v62 = vcombine.high %v9218_v14, %v6444_v60  ;;  %v8499_v14 = vld [vmem:[%s10772_s1 + $0x188] sm:$0xff]  }
  0x38   : > { %v8535_v60 = vld [vmem:[%s10772_s1 + $0x8] sm:$0xff]  }
  0x39   : > { %7710 = vmatpush3.bf16.msra.mxu0 %v8440_v1  ;;  %v1075_v1 = vshrl.u32 %v6478_v62, 16 }
  0x3a   : > { %7732 = vmatpush3.bf16.msra.mxu1 %v8441_v0  ;;  %7711 = vmatprep.subr.bf16.mxu0 %v8442_v3  ;;  %v8493_v0 = vld [vmem:[%s10772_s1 + $0x1c0] sm:$0xff]   ;;  %v1068_v3 = vshrl.u32 %v6477_v61, 16 }
  0x3b   : > { %7733 = vmatprep.subr.bf16.mxu1 %v8443_v2  ;;  %v1077_v2 = vshll.u32 %v6478_v62, 16  ;;  %v8537_v62 = vld [vmem:[%s10772_s1 + $0x50] sm:$0xff]  }
  0x3d   : > { %7712 = vmatpush3.bf16.msra.mxu0 %v8444_v5  ;;  %v1079_v5 = vrot.slane %v1077_v2, 1  ;;  %v8541_v2 = vld [vmem:[%s10772_s1 + $0x58] sm:$0xff]  }
  0x3e   : > { %7734 = vmatpush3.bf16.msra.mxu1 %v8445_v4  ;;  %7713 = vmatprep.subr.bf16.mxu0 %v8446_v7  ;;  %v1070_v4 = vshll.u32 %v6477_v61, 16  ;;  %v8494_v7 = vld [vmem:[%s10772_s1 + $0x100] sm:$0xff]   ;;  %v8536_v61 = vld [vmem:[%s10772_s1 + $0xd0] sm:$0xff]  }
  0x3f   : > { %7735 = vmatprep.subr.bf16.mxu1 %v8447_v6 }
  0x40   : > { %v1072_v6 = vrot.slane %v1070_v4, 1  ;;  %v8543_v4 = vld [vmem:[%s10772_s1 + $0x18] sm:$0xff]  }
  0x41   : > { %7714 = vmatpush3.bf16.msra.mxu0 %v8448_v9  ;;  %v1080_v9 = vor.u32 %v1079_v5, %v1075_v1  ;;  %v8540_v1 = vld [vmem:[%s10772_s1 + $0xd8] sm:$0xff]   ;;  %v8544_v5 = vld [vmem:[%s10772_s1 + $0xe0] sm:$0xff]  }
  0x42   : > { %7736 = vmatpush3.bf16.msra.mxu1 %v8449_v8  ;;  %7715 = vmatprep.subr.bf16.mxu0 %v8450_v11  ;;  %v8495_v8 = vld [vmem:[%s10772_s1 + $0x180] sm:$0xff]   ;;  %v8497_v11 = vld [vmem:[%s10772_s1 + $0x1c8] sm:$0xff]  }
  0x43   : > { %7737 = vmatprep.subr.bf16.mxu1 %v8451_v10  ;;  %v1073_v10 = vor.u32 %v1072_v6, %v1068_v3  ;;  %v8542_v3 = vld [vmem:[%s10772_s1 + $0x98] sm:$0xff]   ;;  %v8545_v6 = vld [vmem:[%s10772_s1 + $0x60] sm:$0xff]  }
  0x45   : > { %7716 = vmatpush3.bf16.msra.mxu0 %v8452_v12  ;;  %v8496_v12 = vld [vmem:[%s10772_s1 + $0x148] sm:$0xff]  }
  0x46   : > { %7738 = vmatpush3.bf16.msra.mxu1 %v8453_v13  ;;  %7745 = vmatprep.subr.bf16.mxu0 %v8458_v19  ;;  %v8498_v13 = vld [vmem:[%s10772_s1 + $0x108] sm:$0xff]   ;;  %v8505_v19 = vld [vmem:[%s10772_s1 + $0x1d8] sm:$0xff]  }
  0x47   : > { %7767 = vmatprep.subr.bf16.mxu1 %v8459_v20  ;;  %v8504_v20 = vld [vmem:[%s10772_s1 + $0x158] sm:$0xff]  }
  0x48   : > { %777 = vmatmul.mubr.bf16.vlgmr.msra.gmra.mrb[4].mxu0 %v9236_v27 }
  0x49   : > { %968 = vmatmul.mubr.bf16.vlgmr.msra.gmra.mrb[4].mxu1 %v829_v32  ;;  %7746 = vmatpush3.bf16.msra.mxu0 %v8460_v25  ;;  %v8510_v25 = vld [vmem:[%s10772_s1 + $0x120] sm:$0xff]   ;;  %v8516_v32 = vld [vmem:[%s10772_s1 + $0x170] sm:$0xff]  }
  0x4a   : > { %7768 = vmatpush3.bf16.msra.mxu1 %v8461_v29  ;;  %7747 = vmatprep.subr.bf16.mxu0 %v8462_v30  ;;  %v8514_v29 = vld [vmem:[%s10772_s1 + $0x128] sm:$0xff]  }
  0x4b   : > { %7769 = vmatprep.subr.bf16.mxu1 %v8463_v33  ;;  %1351 = vmatprep.mubr.bf16.mxu1 %v6374_v16  ;;  %v8500_v16 = vld [vmem:[%s10772_s1 + $0x150] sm:$0xff]   ;;  %v8515_v30 = vld [vmem:[%s10772_s1 + $0x1a8] sm:$0xff]  }
  0x4c   : > { %1211 = vmatprep.mubr.bf16.mxu0 %v1080_v9  ;;  %v8518_v33 = vld [vmem:[%s10772_s1 + $0x130] sm:$0xff]   ;;  %v8548_v9 = vld [vmem:[%s10772_s1 + $0xe8] sm:$0xff]  }
  0x4d   : > { %7748 = vmatpush3.bf16.msra.mxu0 %v8464_v34  ;;  %v8519_v34 = vld [vmem:[%s10772_s1 + $0x1b0] sm:$0xff]  }
  0x4e   : > { %7770 = vmatpush3.bf16.msra.mxu1 %v8465_v35  ;;  %7749 = vmatprep.subr.bf16.mxu0 %v8466_v36  ;;  %v8521_v35 = vld [vmem:[%s10772_s1 + $0x1f8] sm:$0xff]  }
  0x4f   : > { %7771 = vmatprep.subr.bf16.mxu1 %v8467_v37  ;;  %v8520_v36 = vld [vmem:[%s10772_s1 + $0x178] sm:$0xff]  }
  0x50   : > { %v8522_v37 = vld [vmem:[%s10772_s1 + $0x138] sm:$0xff]  }
  0x51   : > { %7750 = vmatpush3.bf16.msra.mxu0 %v8468_v38  ;;  %v8523_v38 = vld [vmem:[%s10772_s1 + $0x1b8] sm:$0xff]  }
  0x52   : > { %7772 = vmatpush3.bf16.msra.mxu1 %v8469_v39  ;;  %7751 = vmatprep.subr.bf16.mxu0 %v8470_v40  ;;  %v9427_v39 = vld [vmem:[%s9111_s12 + $0x20] sm:$0xff] }
  0x53   : > { %7773 = vmatprep.subr.bf16.mxu1 %v8471_v41  ;;  %v6548_v40 = vcombine.high %v9427_v39, %v9427_v39  ;;  %v6514_v41 = vld [vmem:[%s9111_s12 + $0x28] sm:$0x11] }
  0x55   : > { %7752 = vmatpush3.bf16.msra.mxu0 %v8472_v42  ;;  %v6597_v42 = vcombine.low %v9427_v39, %v6514_v41 }
  0x56   : > { %7774 = vmatpush3.bf16.msra.mxu1 %v8473_v43  ;;  %7753 = vmatprep.subr.bf16.mxu0 %v8474_v44  ;;  %v6598_v43 = vcombine.high %v9427_v39, %v6514_v41  ;;  %v8528_v44 = vld [vmem:[%s10772_s1 + $0xc0] sm:$0xff]   ;;  %v8571_v41 = vld [vmem:[%s10772_s1 + $0x1d0] sm:$0xff]  }
  0x57   : > { %7775 = vmatprep.subr.bf16.mxu1 %v8475_v45  ;;  %v8529_v45 = vld [vmem:[%s10772_s1 + $0x40] sm:$0xff]  }
  0x59   : > { %7754 = vmatpush3.bf16.msra.mxu0 %v8476_v46  ;;  %v1583_v46 = vshrl.u32 %v6598_v43, 16 }
  0x5a   : > { %7776 = vmatpush3.bf16.msra.mxu1 %v8477_v47  ;;  %7755 = vmatprep.subr.bf16.mxu0 %v8478_v48  ;;  %v1585_v47 = vshll.u32 %v6598_v43, 16  ;;  %v1576_v48 = vshrl.u32 %v6597_v42, 16  ;;  %v8573_v43 = vld [vmem:[%s10772_s1 + $0x190] sm:$0xff]  }
  0x5b   : > { %7777 = vmatprep.subr.bf16.mxu1 %v8479_v49  ;;  %v1578_v49 = vshll.u32 %v6597_v42, 16  ;;  %v8572_v42 = vld [vmem:[%s10772_s1 + $0x110] sm:$0xff]  }
  0x5d   : > { %7756 = vmatpush3.bf16.msra.mxu0 %v8480_v50  ;;  %v8530_v50 = vld [vmem:[%s10772_s1 + $0x80] sm:$0xff]  }
  0x5e   : > { %7778 = vmatpush3.bf16.msra.mxu1 %v8481_v51  ;;  %7757 = vmatprep.subr.bf16.mxu0 %v8482_v52  ;;  %v9445_v51 = vcombine.low %v9427_v39, %v9427_v39  ;;  %v1587_v52 = vrot.slane %v1585_v47, 1  ;;  %v8577_v47 = vld [vmem:[%s10772_s1 + $0x198] sm:$0xff]  }
  0x5f   : > { %7779 = vmatprep.subr.bf16.mxu1 %v8483_v53  ;;  %v1580_v53 = vrot.slane %v1578_v49, 1  ;;  %v8579_v49 = vld [vmem:[%s10772_s1 + $0x1e0] sm:$0xff]  }
  0x61   : > { %7758 = vmatpush3.bf16.msra.mxu0 %v8484_v54  ;;  %v8531_v54 = vld [vmem:[%s10772_s1] sm:$0xff]  }
  0x62   : > { %7780 = vmatpush3.bf16.msra.mxu1 %v8485_v55  ;;  %7759 = vmatprep.subr.bf16.mxu0 %v8486_v56  ;;  %v8532_v55 = vld [vmem:[%s10772_s1 + $0xc8] sm:$0xff]   ;;  %v1588_v56 = vor.u32 %v1587_v52, %v1583_v46  ;;  %v8576_v46 = vld [vmem:[%s10772_s1 + $0x118] sm:$0xff]  }
  0x63   : > { %7781 = vmatprep.subr.bf16.mxu1 %v8487_v57  ;;  %v1581_v57 = vor.u32 %v1580_v53, %v1576_v48  ;;  %v8578_v48 = vld [vmem:[%s10772_s1 + $0x160] sm:$0xff]   ;;  %v8582_v52 = vld [vmem:[%s10772_s1 + $0x168] sm:$0xff]  }
  0x64   : > { %v8583_v53 = vld [vmem:[%s10772_s1 + $0x1e8] sm:$0xff]  }
  0x65   : > { %7760 = vmatpush3.bf16.msra.mxu0 %v8488_v58  ;;  %v8533_v58 = vld [vmem:[%s10772_s1 + $0x48] sm:$0xff]  }
  0x66   : > { %7782 = vmatpush3.bf16.msra.mxu1 %v8489_v59  ;;  %7789 = vmatprep.subr.bf16.mxu0 %v8492_v63  ;;  %v8534_v59 = vld [vmem:[%s10772_s1 + $0x88] sm:$0xff]   ;;  %v8538_v63 = vld [vmem:[%s10772_s1 + $0x90] sm:$0xff]  }
  0x67   : > { %7811 = vmatprep.subr.bf16.mxu1 %v8493_v0  ;;  %v8539_v0 = vld [vmem:[%s10772_s1 + $0x10] sm:$0xff]  }
  0x68   : > { %1212 = vmatmul.mubr.bf16.vlgmr.msra.gmra.mrb[8].mxu0 %v1073_v10  ;;  %v8549_v10 = vld [vmem:[%s10772_s1 + $0x68] sm:$0xff]  }
  0x69   : > { %1352 = vmatmul.mubr.bf16.vlgmr.msra.gmra.mrb[8].mxu1 %v9236_v27  ;;  %7790 = vmatpush3.bf16.msra.mxu0 %v8494_v7  ;;  %v8513_v27 = vld [vmem:[%s10772_s1 + $0x1e8] sm:$0xff]   ;;  %v8546_v7 = vld [vmem:[%s10772_s1 + $0xa0] sm:$0xff]  }
  0x6a   : > { %7812 = vmatpush3.bf16.msra.mxu1 %v8495_v8  ;;  %7791 = vmatprep.subr.bf16.mxu0 %v8496_v12  ;;  %v8547_v8 = vld [vmem:[%s10772_s1 + $0x20] sm:$0xff]   ;;  %v8551_v12 = vld [vmem:[%s10772_s1 + $0x28] sm:$0xff]  }
  0x6b   : > { %7813 = vmatprep.subr.bf16.mxu1 %v8497_v11  ;;  %1529 = vmatprep.mubr.bf16.mxu0 %v6548_v40  ;;  %v8550_v11 = vld [vmem:[%s10772_s1 + $0xa8] sm:$0xff]  }
  0x6c   : > { %1719 = vmatprep.mubr.bf16.mxu1 %v1588_v56  ;;  %v8586_v56 = vld [vmem:[%s10772_s1 + $0x170] sm:$0xff]  }
  0x6d   : > { %7792 = vmatpush3.bf16.msra.mxu0 %v8498_v13  ;;  %v8552_v13 = vld [vmem:[%s10772_s1 + $0xf0] sm:$0xff]  }
  0x6e   : > { %7814 = vmatpush3.bf16.msra.mxu1 %v8499_v14  ;;  %7793 = vmatprep.subr.bf16.mxu0 %v8500_v16  ;;  %v8553_v14 = vld [vmem:[%s10772_s1 + $0x70] sm:$0xff]  }
  0x6f   : > { %7815 = vmatprep.subr.bf16.mxu1 %v8501_v15  ;;  %v8554_v15 = vld [vmem:[%s10772_s1 + $0xb0] sm:$0xff]  }
  0x70   : > { %v8555_v16 = vld [vmem:[%s10772_s1 + $0x30] sm:$0xff]  }
  0x71   : > { %7794 = vmatpush3.bf16.msra.mxu0 %v8502_v17  ;;  %v8556_v17 = vld [vmem:[%s10772_s1 + $0xf8] sm:$0xff]  }
  0x72   : > { %7816 = vmatpush3.bf16.msra.mxu1 %v8503_v18  ;;  %7795 = vmatprep.subr.bf16.mxu0 %v8504_v20  ;;  %v8557_v18 = vld [vmem:[%s10772_s1 + $0x78] sm:$0xff]   ;;  %v6617_v20 = vld [vmem:[%s9111_s12 + $0x28] sm:$0x11] }
  0x73   : > { %7817 = vmatprep.subr.bf16.mxu1 %v8505_v19  ;;  %v8558_v19 = vld [vmem:[%s10772_s1 + $0xb8] sm:$0xff]  }
  0x75   : > { %7796 = vmatpush3.bf16.msra.mxu0 %v8506_v21  ;;  %v8559_v21 = vld [vmem:[%s10772_s1 + $0x38] sm:$0xff]  }
  0x76   : > { %7818 = vmatpush3.bf16.msra.mxu1 %v8507_v22  ;;  %7797 = vmatprep.subr.bf16.mxu0 %v8508_v24  ;;  %v6650_v22 = vcombine.low %v9427_v39, %v6617_v20  ;;  %v8562_v24 = vld [vmem:[%s10772_s1 + $0x140] sm:$0xff]  }
  0x77   : > { %7819 = vmatprep.subr.bf16.mxu1 %v8509_v23  ;;  %v6651_v23 = vcombine.high %v9427_v39, %v6617_v20  ;;  %v8569_v39 = vld [vmem:[%s10772_s1 + $0x188] sm:$0xff]  }
  0x78   : > { %v8604_v20 = vld [vmem:[%s10772_s1 + $0x88] sm:$0xff]  }
  0x79   : > { %7798 = vmatpush3.bf16.msra.mxu0 %v8510_v25  ;;  %v1815_v25 = vshrl.u32 %v6651_v23, 16 }
  0x7a   : > { %7820 = vmatpush3.bf16.msra.mxu1 %v8511_v26  ;;  %7799 = vmatprep.subr.bf16.mxu0 %v8512_v28  ;;  %v1817_v26 = vshll.u32 %v6651_v23, 16  ;;  %v1810_v28 = vshll.u32 %v6650_v22, 16  ;;  %v8607_v23 = vld [vmem:[%s10772_s1 + $0x50] sm:$0xff]  }
  0x7b   : > { %7821 = vmatprep.subr.bf16.mxu1 %v8513_v27  ;;  %v1808_v27 = vshrl.u32 %v6650_v22, 16  ;;  %v8606_v22 = vld [vmem:[%s10772_s1 + $0xd0] sm:$0xff]  }
  0x7d   : > { %7800 = vmatpush3.bf16.msra.mxu0 %v8514_v29  ;;  %v8563_v29 = vld [vmem:[%s10772_s1 + $0x1c0] sm:$0xff]  }
  0x7e   : > { %7822 = vmatpush3.bf16.msra.mxu1 %v8515_v30  ;;  %7801 = vmatprep.subr.bf16.mxu0 %v8516_v32  ;;  %v1819_v30 = vrot.slane %v1817_v26, 1  ;;  %v8564_v32 = vld [vmem:[%s10772_s1 + $0x100] sm:$0xff]   ;;  %v8610_v26 = vld [vmem:[%s10772_s1 + $0xd8] sm:$0xff]  }
  0x7f   : > { %7823 = vmatprep.subr.bf16.mxu1 %v8517_v31  ;;  %v1812_v31 = vrot.slane %v1810_v28, 1  ;;  %v8612_v28 = vld [vmem:[%s10772_s1 + $0x98] sm:$0xff]  }
  0x81   : > { %7802 = vmatpush3.bf16.msra.mxu0 %v8518_v33  ;;  %v8565_v33 = vld [vmem:[%s10772_s1 + $0x180] sm:$0xff]  }
  0x82   : > { %7824 = vmatpush3.bf16.msra.mxu1 %v8519_v34  ;;  %7803 = vmatprep.subr.bf16.mxu0 %v8520_v36  ;;  %v1820_v34 = vor.u32 %v1819_v30, %v1815_v25  ;;  %v8566_v36 = vld [vmem:[%s10772_s1 + $0x148] sm:$0xff]   ;;  %v8609_v25 = vld [vmem:[%s10772_s1 + $0x10] sm:$0xff]   ;;  %v8614_v30 = vld [vmem:[%s10772_s1 + $0xe0] sm:$0xff]  }
  0x83   : > { %7825 = vmatprep.subr.bf16.mxu1 %v8521_v35  ;;  %v1813_v35 = vor.u32 %v1812_v31, %v1808_v27  ;;  %v8611_v27 = vld [vmem:[%s10772_s1 + $0x58] sm:$0xff]   ;;  %v8615_v31 = vld [vmem:[%s10772_s1 + $0x60] sm:$0xff]  }
  0x85   : > { %7804 = vmatpush3.bf16.msra.mxu0 %v8522_v37  ;;  %v8567_v37 = vld [vmem:[%s10772_s1 + $0x1c8] sm:$0xff]  }
  0x86   : > { %7826 = vmatpush3.bf16.msra.mxu1 %v8523_v38  ;;  %7833 = vmatprep.subr.bf16.mxu0 %v8528_v44  ;;  %v8568_v38 = vld [vmem:[%s10772_s1 + $0x108] sm:$0xff]   ;;  %v8574_v44 = vld [vmem:[%s10772_s1 + $0x158] sm:$0xff]  }
  0x87   : > { %7855 = vmatprep.subr.bf16.mxu1 %v8529_v45  ;;  %v8575_v45 = vld [vmem:[%s10772_s1 + $0x1d8] sm:$0xff]  }
  0x88   : > { %1530 = vmatmul.mubr.bf16.vlgmr.msra.gmra.mrb[12].mxu0 %v9445_v51 }
  0x89   : > { %7834 = vmatpush3.bf16.msra.mxu0 %v8530_v50  ;;  %1720 = vmatmul.mubr.bf16.vlgmr.msra.gmra.mrb[12].mxu1 %v1581_v57  ;;  %v8580_v50 = vld [vmem:[%s10772_s1 + $0x120] sm:$0xff]   ;;  %v8587_v57 = vld [vmem:[%s10772_s1 + $0x1f0] sm:$0xff]  }
  0x8a   : > { %7835 = vmatprep.subr.bf16.mxu0 %v8532_v55  ;;  %7856 = vmatpush3.bf16.msra.mxu1 %v8531_v54  ;;  %v8584_v54 = vld [vmem:[%s10772_s1 + $0x128] sm:$0xff]  }
  0x8b   : > { %2091 = vmatprep.mubr.bf16.mxu1 %v6548_v40  ;;  %7857 = vmatprep.subr.bf16.mxu1 %v8533_v58  ;;  %v8570_v40 = vld [vmem:[%s10772_s1 + $0x150] sm:$0xff]   ;;  %v8585_v55 = vld [vmem:[%s10772_s1 + $0x1a8] sm:$0xff]  }
  0x8c   : > { %1951 = vmatprep.mubr.bf16.mxu0 %v1820_v34  ;;  %v8588_v58 = vld [vmem:[%s10772_s1 + $0x130] sm:$0xff]   ;;  %v8618_v34 = vld [vmem:[%s10772_s1 + $0xe8] sm:$0xff]  }
  0x8d   : > { %7836 = vmatpush3.bf16.msra.mxu0 %v8534_v59  ;;  %v8589_v59 = vld [vmem:[%s10772_s1 + $0x1b0] sm:$0xff]  }
  0x8e   : > { %7837 = vmatprep.subr.bf16.mxu0 %v8536_v61  ;;  %7858 = vmatpush3.bf16.msra.mxu1 %v8535_v60  ;;  %v8590_v60 = vld [vmem:[%s10772_s1 + $0x178] sm:$0xff]  }
  0x8f   : > { %7859 = vmatprep.subr.bf16.mxu1 %v8537_v62  ;;  %v8591_v61 = vld [vmem:[%s10772_s1 + $0x1f8] sm:$0xff]  }
  0x90   : > { %v8592_v62 = vld [vmem:[%s10772_s1 + $0x138] sm:$0xff]  }
  0x91   : > { %7838 = vmatpush3.bf16.msra.mxu0 %v8538_v63  ;;  %v8593_v63 = vld [vmem:[%s10772_s1 + $0x1b8] sm:$0xff]  }
  0x92   : > { %7839 = vmatprep.subr.bf16.mxu0 %v8540_v1  ;;  %7860 = vmatpush3.bf16.msra.mxu1 %v8539_v0  ;;  %v9636_v0 = vld [vmem:[%s9111_s12 + $0x30] sm:$0xff] }
  0x93   : > { %7861 = vmatprep.subr.bf16.mxu1 %v8541_v2  ;;  %v6721_v1 = vcombine.high %v9636_v0, %v9636_v0  ;;  %v6687_v2 = vld [vmem:[%s9111_s12 + $0x38] sm:$0x11] }
  0x95   : > { %7840 = vmatpush3.bf16.msra.mxu0 %v8542_v3  ;;  %v6770_v3 = vcombine.low %v9636_v0, %v6687_v2 }
  0x96   : > { %7841 = vmatprep.subr.bf16.mxu0 %v8544_v5  ;;  %7862 = vmatpush3.bf16.msra.mxu1 %v8543_v4  ;;  %v6771_v4 = vcombine.high %v9636_v0, %v6687_v2  ;;  %v8598_v5 = vld [vmem:[%s10772_s1 + $0xc0] sm:$0xff]   ;;  %v8641_v2 = vld [vmem:[%s10772_s1 + $0x1d0] sm:$0xff]  }
  0x97   : > { %7863 = vmatprep.subr.bf16.mxu1 %v8545_v6  ;;  %v8599_v6 = vld [vmem:[%s10772_s1 + $0x40] sm:$0xff]  }
  0x99   : > { %7842 = vmatpush3.bf16.msra.mxu0 %v8546_v7  ;;  %v2323_v7 = vshrl.u32 %v6771_v4, 16 }
  0x9a   : > { %7843 = vmatprep.subr.bf16.mxu0 %v8548_v9  ;;  %7864 = vmatpush3.bf16.msra.mxu1 %v8547_v8  ;;  %v2325_v8 = vshll.u32 %v6771_v4, 16  ;;  %v2316_v9 = vshrl.u32 %v6770_v3, 16  ;;  %v8643_v4 = vld [vmem:[%s10772_s1 + $0x190] sm:$0xff]  }
  0x9b   : > { %7865 = vmatprep.subr.bf16.mxu1 %v8549_v10  ;;  %v2318_v10 = vshll.u32 %v6770_v3, 16  ;;  %v8642_v3 = vld [vmem:[%s10772_s1 + $0x110] sm:$0xff]  }
  0x9d   : > { %7844 = vmatpush3.bf16.msra.mxu0 %v8550_v11  ;;  %v8600_v11 = vld [vmem:[%s10772_s1 + $0x80] sm:$0xff]  }
  0x9e   : > { %7845 = vmatprep.subr.bf16.mxu0 %v8552_v13  ;;  %7866 = vmatpush3.bf16.msra.mxu1 %v8551_v12  ;;  %v9654_v12 = vcombine.low %v9636_v0, %v9636_v0  ;;  %v2327_v13 = vrot.slane %v2325_v8, 1 }
  0x9f   : > { %7867 = vmatprep.subr.bf16.mxu1 %v8553_v14  ;;  %v2320_v14 = vrot.slane %v2318_v10, 1 }
  0xa1   : > { %7846 = vmatpush3.bf16.msra.mxu0 %v8554_v15  ;;  %v8601_v15 = vld [vmem:[%s10772_s1] sm:$0xff]  }
  0xa2   : > { %7847 = vmatprep.subr.bf16.mxu0 %v8556_v17  ;;  %7868 = vmatpush3.bf16.msra.mxu1 %v8555_v16  ;;  %v8602_v16 = vld [vmem:[%s10772_s1 + $0xc8] sm:$0xff]   ;;  %v2328_v17 = vor.u32 %v2327_v13, %v2323_v7  ;;  %v8646_v7 = vld [vmem:[%s10772_s1 + $0x118] sm:$0xff]  }
  0xa3   : > { %7869 = vmatprep.subr.bf16.mxu1 %v8557_v18  ;;  %v2321_v18 = vor.u32 %v2320_v14, %v2316_v9  ;;  %v8647_v9 = vld [vmem:[%s10772_s1 + $0x198] sm:$0xff]   ;;  %v8649_v14 = vld [vmem:[%s10772_s1 + $0x1e0] sm:$0xff]  }
  0xa5   : > { %7848 = vmatpush3.bf16.msra.mxu0 %v8558_v19  ;;  %v8603_v19 = vld [vmem:[%s10772_s1 + $0x48] sm:$0xff]  }
  0xa6   : > { %7877 = vmatprep.subr.bf16.mxu0 %v8562_v24  ;;  %7870 = vmatpush3.bf16.msra.mxu1 %v8559_v21  ;;  %v8605_v21 = vld [vmem:[%s10772_s1 + $0x8] sm:$0xff]   ;;  %v8608_v24 = vld [vmem:[%s10772_s1 + $0x90] sm:$0xff]  }
  0xa7   : > { %7899 = vmatprep.subr.bf16.mxu1 %v8563_v29  ;;  %v8613_v29 = vld [vmem:[%s10772_s1 + $0x18] sm:$0xff]  }
  0xa8   : > { %1952 = vmatmul.mubr.bf16.vlgmr.msra.gmra.mrb[16].mxu0 %v1813_v35  ;;  %v8619_v35 = vld [vmem:[%s10772_s1 + $0x68] sm:$0xff]  }
  0xa9   : > { %2092 = vmatmul.mubr.bf16.vlgmr.msra.gmra.mrb[16].mxu1 %v9445_v51  ;;  %7878 = vmatpush3.bf16.msra.mxu0 %v8564_v32  ;;  %v8581_v51 = vld [vmem:[%s10772_s1 + $0x1a0] sm:$0xff]  }
  0xaa   : > { %7900 = vmatpush3.bf16.msra.mxu1 %v8565_v33  ;;  %7879 = vmatprep.subr.bf16.mxu0 %v8566_v36  ;;  %v8616_v32 = vld [vmem:[%s10772_s1 + $0xa0] sm:$0xff]   ;;  %v8620_v36 = vld [vmem:[%s10772_s1 + $0xa8] sm:$0xff]  }
  0xab   : > { %7901 = vmatprep.subr.bf16.mxu1 %v8567_v37  ;;  %2269 = vmatprep.mubr.bf16.mxu0 %v6721_v1  ;;  %v8617_v33 = vld [vmem:[%s10772_s1 + $0x20] sm:$0xff]   ;;  %v8621_v37 = vld [vmem:[%s10772_s1 + $0x28] sm:$0xff]  }
  0xac   : > { %2459 = vmatprep.mubr.bf16.mxu1 %v2328_v17  ;;  %v8651_v17 = vld [vmem:[%s10772_s1 + $0x1a0] sm:$0xff]  }
  0xad   : > { %7880 = vmatpush3.bf16.msra.mxu0 %v8568_v38  ;;  %v8622_v38 = vld [vmem:[%s10772_s1 + $0xf0] sm:$0xff]  }
  0xae   : > { %7902 = vmatpush3.bf16.msra.mxu1 %v8569_v39  ;;  %7881 = vmatprep.subr.bf16.mxu0 %v8570_v40  ;;  %v8623_v39 = vld [vmem:[%s10772_s1 + $0x70] sm:$0xff]  }
  0xaf   : > { %7903 = vmatprep.subr.bf16.mxu1 %v8571_v41  ;;  %v8624_v40 = vld [vmem:[%s10772_s1 + $0xb0] sm:$0xff]  }
  0xb0   : > { %v8625_v41 = vld [vmem:[%s10772_s1 + $0x30] sm:$0xff]  }
  0xb1   : > { %7882 = vmatpush3.bf16.msra.mxu0 %v8572_v42  ;;  %v8626_v42 = vld [vmem:[%s10772_s1 + $0xf8] sm:$0xff]  }
  0xb2   : > { %7904 = vmatpush3.bf16.msra.mxu1 %v8573_v43  ;;  %7883 = vmatprep.subr.bf16.mxu0 %v8574_v44  ;;  %v8627_v43 = vld [vmem:[%s10772_s1 + $0x78] sm:$0xff]  }
  0xb3   : > { %7905 = vmatprep.subr.bf16.mxu1 %v8575_v45  ;;  %v8628_v44 = vld [vmem:[%s10772_s1 + $0xb8] sm:$0xff]  }
  0xb4   : > { %v6790_v45 = vld [vmem:[%s9111_s12 + $0x38] sm:$0x11] }
  0xb5   : > { %7884 = vmatpush3.bf16.msra.mxu0 %v8576_v46  ;;  %v8629_v46 = vld [vmem:[%s10772_s1 + $0x38] sm:$0xff]  }
  0xb6   : > { %7906 = vmatpush3.bf16.msra.mxu1 %v8577_v47  ;;  %7885 = vmatprep.subr.bf16.mxu0 %v8578_v48  ;;  %v6823_v47 = vcombine.low %v9636_v0, %v6790_v45  ;;  %v6824_v48 = vcombine.high %v9636_v0, %v6790_v45  ;;  %v8639_v0 = vld [vmem:[%s10772_s1 + $0x188] sm:$0xff]  }
  0xb7   : > { %7907 = vmatprep.subr.bf16.mxu1 %v8579_v49  ;;  %v8632_v49 = vld [vmem:[%s10772_s1 + $0x140] sm:$0xff]  }
  0xb9   : > { %7886 = vmatpush3.bf16.msra.mxu0 %v8580_v50  ;;  %v2555_v50 = vshrl.u32 %v6824_v48, 16 }
  0xba   : > { %7908 = vmatpush3.bf16.msra.mxu1 %v8581_v51  ;;  %7887 = vmatprep.subr.bf16.mxu0 %v8582_v52  ;;  %v2557_v51 = vshll.u32 %v6824_v48, 16  ;;  %v2548_v52 = vshrl.u32 %v6823_v47, 16 }
  0xbb   : > { %7909 = vmatprep.subr.bf16.mxu1 %v8583_v53  ;;  %v2550_v53 = vshll.u32 %v6823_v47, 16 }
  0xbd   : > { %7888 = vmatpush3.bf16.msra.mxu0 %v8584_v54  ;;  %v8633_v54 = vld [vmem:[%s10772_s1 + $0x1c0] sm:$0xff]  }
  0xbe   : > { %7910 = vmatpush3.bf16.msra.mxu1 %v8585_v55  ;;  %7889 = vmatprep.subr.bf16.mxu0 %v8586_v56  ;;  %v2559_v55 = vrot.slane %v2557_v51, 1  ;;  %v2552_v56 = vrot.slane %v2550_v53, 1  ;;  %v8672_v51 = vld [vmem:[%s10772_s1 + $0xc8] sm:$0xff]  }
  0xbf   : > { %7911 = vmatprep.subr.bf16.mxu1 %v8587_v57  ;;  %v8634_v57 = vld [vmem:[%s10772_s1 + $0x100] sm:$0xff]  }
  0xc1   : > { %7890 = vmatpush3.bf16.msra.mxu0 %v8588_v58  ;;  %v8635_v58 = vld [vmem:[%s10772_s1 + $0x180] sm:$0xff]  }
  0xc2   : > { %7912 = vmatpush3.bf16.msra.mxu1 %v8589_v59  ;;  %7891 = vmatprep.subr.bf16.mxu0 %v8590_v60  ;;  %v2560_v59 = vor.u32 %v2559_v55, %v2555_v50  ;;  %v2553_v60 = vor.u32 %v2552_v56, %v2548_v52  ;;  %v8670_v50 = vld [vmem:[%s10772_s1 + $0x80] sm:$0xff]   ;;  %v8673_v55 = vld [vmem:[%s10772_s1 + $0x48] sm:$0xff]  }
  0xc3   : > { %7913 = vmatprep.subr.bf16.mxu1 %v8591_v61  ;;  %v8636_v61 = vld [vmem:[%s10772_s1 + $0x148] sm:$0xff]  }
  0xc4   : > { %v8674_v56 = vld [vmem:[%s10772_s1 + $0x88] sm:$0xff]  }
  0xc5   : > { %7892 = vmatpush3.bf16.msra.mxu0 %v8592_v62  ;;  %v8637_v62 = vld [vmem:[%s10772_s1 + $0x1c8] sm:$0xff]  }
  0xc6   : > { %7914 = vmatpush3.bf16.msra.mxu1 %v8593_v63  ;;  %7921 = vmatprep.subr.bf16.mxu0 %v8598_v5  ;;  %v8638_v63 = vld [vmem:[%s10772_s1 + $0x108] sm:$0xff]   ;;  %v8644_v5 = vld [vmem:[%s10772_s1 + $0x158] sm:$0xff]  }
  0xc7   : > { %7943 = vmatprep.subr.bf16.mxu1 %v8599_v6  ;;  %v8645_v6 = vld [vmem:[%s10772_s1 + $0x1d8] sm:$0xff]  }
  0xc8   : > { %2270 = vmatmul.mubr.bf16.vlgmr.msra.gmra.mrb[20].mxu0 %v9654_v12 }
  0xc9   : > { %7922 = vmatpush3.bf16.msra.mxu0 %v8600_v11  ;;  %2460 = vmatmul.mubr.bf16.vlgmr.msra.gmra.mrb[20].mxu1 %v2321_v18  ;;  %v8648_v11 = vld [vmem:[%s10772_s1 + $0x160] sm:$0xff]  }
  0xca   : > { %7923 = vmatprep.subr.bf16.mxu0 %v8602_v16  ;;  %7944 = vmatpush3.bf16.msra.mxu1 %v8601_v15  ;;  %v8650_v16 = vld [vmem:[%s10772_s1 + $0x120] sm:$0xff]  }
  0xcb   : > { %2831 = vmatprep.mubr.bf16.mxu1 %v6721_v1  ;;  %7945 = vmatprep.subr.bf16.mxu1 %v8603_v19  ;;  %v8640_v1 = vld [vmem:[%s10772_s1 + $0x150] sm:$0xff]   ;;  %v8652_v19 = vld [vmem:[%s10772_s1 + $0x168] sm:$0xff]  }
  0xcc   : > { %2691 = vmatprep.mubr.bf16.mxu0 %v2560_v59  ;;  %v8677_v59 = vld [vmem:[%s10772_s1 + $0x50] sm:$0xff]  }
  0xcd   : > { %7924 = vmatpush3.bf16.msra.mxu0 %v8604_v20 }
  0xce   : > { %7925 = vmatprep.subr.bf16.mxu0 %v8606_v22  ;;  %7946 = vmatpush3.bf16.msra.mxu1 %v8605_v21  ;;  %v8653_v21 = vld [vmem:[%s10772_s1 + $0x1e8] sm:$0xff]  }
  0xcf   : > { %7947 = vmatprep.subr.bf16.mxu1 %v8607_v23 }
  0xd1   : > { %7926 = vmatpush3.bf16.msra.mxu0 %v8608_v24  ;;  %v8654_v24 = vld [vmem:[%s10772_s1 + $0x128] sm:$0xff]  }
  0xd2   : > { %7927 = vmatprep.subr.bf16.mxu0 %v8610_v26  ;;  %7948 = vmatpush3.bf16.msra.mxu1 %v8609_v25  ;;  %v8655_v25 = vld [vmem:[%s10772_s1 + $0x1a8] sm:$0xff]  }
  0xd3   : > { %7949 = vmatprep.subr.bf16.mxu1 %v8611_v27 }
  0xd5   : > { %7928 = vmatpush3.bf16.msra.mxu0 %v8612_v28  ;;  %v8656_v28 = vld [vmem:[%s10772_s1 + $0x170] sm:$0xff]  }
  0xd6   : > { %7929 = vmatprep.subr.bf16.mxu0 %v8614_v30  ;;  %7950 = vmatpush3.bf16.msra.mxu1 %v8613_v29  ;;  %v8657_v29 = vld [vmem:[%s10772_s1 + $0x1f0] sm:$0xff]  }
  0xd7   : > { %7951 = vmatprep.subr.bf16.mxu1 %v8615_v31  ;;  %v8658_v30 = vld [vmem:[%s10772_s1 + $0x130] sm:$0xff]  }
  0xd8   : > { %v8659_v31 = vld [vmem:[%s10772_s1 + $0x1b0] sm:$0xff]  }
  0xd9   : > { %7930 = vmatpush3.bf16.msra.mxu0 %v8616_v32  ;;  %v8660_v32 = vld [vmem:[%s10772_s1 + $0x178] sm:$0xff]  }
  0xda   : > { %7931 = vmatprep.subr.bf16.mxu0 %v8618_v34  ;;  %7952 = vmatpush3.bf16.msra.mxu1 %v8617_v33  ;;  %v8661_v33 = vld [vmem:[%s10772_s1 + $0x1f8] sm:$0xff]  }
  0xdb   : > { %7953 = vmatprep.subr.bf16.mxu1 %v8619_v35  ;;  %v8662_v34 = vld [vmem:[%s10772_s1 + $0x138] sm:$0xff]  }
  0xdc   : > { %v8663_v35 = vld [vmem:[%s10772_s1 + $0x1b8] sm:$0xff]  }
  0xdd   : > { %7932 = vmatpush3.bf16.msra.mxu0 %v8620_v36  ;;  %v9847_v36 = vld [vmem:[%s9111_s12 + $0x40] sm:$0xff] }
  0xde   : > { %7933 = vmatprep.subr.bf16.mxu0 %v8622_v38  ;;  %7954 = vmatpush3.bf16.msra.mxu1 %v8621_v37  ;;  %v6894_v37 = vcombine.high %v9847_v36, %v9847_v36  ;;  %v6860_v38 = vld [vmem:[%s9111_s12 + $0x48] sm:$0x11]  ;;  %v9862_v47 = vcombine.low %v9847_v36, %v9847_v36 }
  0xdf   : > { %7955 = vmatprep.subr.bf16.mxu1 %v8623_v39  ;;  %v6943_v39 = vcombine.low %v9847_v36, %v6860_v38 }
  0xe1   : > { %7934 = vmatpush3.bf16.msra.mxu0 %v8624_v40  ;;  %v6944_v40 = vcombine.high %v9847_v36, %v6860_v38  ;;  %v3056_v45 = vshrl.u32 %v6943_v39, 16 }
  0xe2   : > { %7935 = vmatprep.subr.bf16.mxu0 %v8626_v42  ;;  %7956 = vmatpush3.bf16.msra.mxu1 %v8625_v41  ;;  %v8668_v41 = vld [vmem:[%s10772_s1 + $0xc0] sm:$0xff]  }
  0xe3   : > { %7957 = vmatprep.subr.bf16.mxu1 %v8627_v43  ;;  %v8669_v42 = vld [vmem:[%s10772_s1 + $0x40] sm:$0xff]   ;;  %v3063_v43 = vshrl.u32 %v6944_v40, 16 }
  0xe5   : > { %7936 = vmatpush3.bf16.msra.mxu0 %v8628_v44  ;;  %v3065_v44 = vshll.u32 %v6944_v40, 16  ;;  %v8701_v40 = vld [vmem:[%s10772_s1 + $0x1c0] sm:$0xff]  }
  0xe6   : > { %7965 = vmatprep.subr.bf16.mxu0 %v8632_v49  ;;  %7958 = vmatpush3.bf16.msra.mxu1 %v8629_v46  ;;  %v3058_v46 = vshll.u32 %v6943_v39, 16  ;;  %v8700_v39 = vld [vmem:[%s10772_s1 + $0x140] sm:$0xff]  }
  0xe7   : > { %7987 = vmatprep.subr.bf16.mxu1 %v8633_v54  ;;  %v3067_v48 = vrot.slane %v3065_v44, 1  ;;  %v8671_v54 = vld [vmem:[%s10772_s1] sm:$0xff]  }
  0xe8   : > { %2692 = vmatmul.mubr.bf16.vlgmr.msra.gmra.mrb[24].mxu0 %v2553_v60  ;;  %v3060_v49 = vrot.slane %v3058_v46, 1  ;;  %v8678_v60 = vld [vmem:[%s10772_s1 + $0x90] sm:$0xff]  }
  0xe9   : > { %2832 = vmatmul.mubr.bf16.vlgmr.msra.gmra.mrb[24].mxu1 %v9654_v12  ;;  %7966 = vmatpush3.bf16.msra.mxu0 %v8634_v57  ;;  %v3068_v52 = vor.u32 %v3067_v48, %v3063_v43  ;;  %v8676_v57 = vld [vmem:[%s10772_s1 + $0xd0] sm:$0xff]   ;;  %v8705_v48 = vld [vmem:[%s10772_s1 + $0x1c8] sm:$0xff]  }
  0xea   : > { %7988 = vmatpush3.bf16.msra.mxu1 %v8635_v58  ;;  %7967 = vmatprep.subr.bf16.mxu0 %v8636_v61  ;;  %v3061_v53 = vor.u32 %v3060_v49, %v3056_v45  ;;  %v8675_v58 = vld [vmem:[%s10772_s1 + $0x8] sm:$0xff]   ;;  %v8680_v61 = vld [vmem:[%s10772_s1 + $0xd8] sm:$0xff]  }
  0xeb   : > { %7989 = vmatprep.subr.bf16.mxu1 %v8637_v62  ;;  %3009 = vmatprep.mubr.bf16.mxu0 %v6894_v37  ;;  %v8679_v62 = vld [vmem:[%s10772_s1 + $0x10] sm:$0xff]  }
  0xec   : > { %3199 = vmatprep.mubr.bf16.mxu1 %v3068_v52  ;;  %v8704_v52 = vld [vmem:[%s10772_s1 + $0x148] sm:$0xff]  }
  0xed   : > { %7968 = vmatpush3.bf16.msra.mxu0 %v8638_v63  ;;  %v8681_v63 = vld [vmem:[%s10772_s1 + $0x58] sm:$0xff]  }
  0xee   : > { %7990 = vmatpush3.bf16.msra.mxu1 %v8639_v0  ;;  %7969 = vmatprep.subr.bf16.mxu0 %v8640_v1  ;;  %v8682_v0 = vld [vmem:[%s10772_s1 + $0x98] sm:$0xff]   ;;  %v8684_v1 = vld [vmem:[%s10772_s1 + $0xe0] sm:$0xff]  }
  0xef   : > { %7991 = vmatprep.subr.bf16.mxu1 %v8641_v2  ;;  %v8683_v2 = vld [vmem:[%s10772_s1 + $0x18] sm:$0xff]  }
  0xf1   : > { %7970 = vmatpush3.bf16.msra.mxu0 %v8642_v3  ;;  %v8685_v3 = vld [vmem:[%s10772_s1 + $0x60] sm:$0xff]  }
  0xf2   : > { %7992 = vmatpush3.bf16.msra.mxu1 %v8643_v4  ;;  %7971 = vmatprep.subr.bf16.mxu0 %v8644_v5  ;;  %v8686_v4 = vld [vmem:[%s10772_s1 + $0xa0] sm:$0xff]  }
  0xf3   : > { %7993 = vmatprep.subr.bf16.mxu1 %v8645_v6  ;;  %v8688_v6 = vld [vmem:[%s10772_s1 + $0xe8] sm:$0xff]  }
  0xf5   : > { %7972 = vmatpush3.bf16.msra.mxu0 %v8646_v7 }
  0xf6   : > { %7994 = vmatpush3.bf16.msra.mxu1 %v8647_v9  ;;  %7973 = vmatprep.subr.bf16.mxu0 %v8648_v11  ;;  %v8687_v9 = vld [vmem:[%s10772_s1 + $0x20] sm:$0xff]  }
  0xf7   : > { %7995 = vmatprep.subr.bf16.mxu1 %v8649_v14  ;;  %v9928_v14 = vld [vmem:[%s10773_s2] ss:$0 sm:$0xff] }
  0xf9   : > { %7974 = vmatpush3.bf16.msra.mxu0 %v8650_v16 }
  0xfa   : > { %7996 = vmatpush3.bf16.msra.mxu1 %v8651_v17  ;;  %7975 = vmatprep.subr.bf16.mxu0 %v8652_v19  ;;  %v8690_v17 = vld [vmem:[%s10772_s1 + $0xa8] sm:$0xff]  }
  0xfb   : > { %v7673_v18 = vpop.f32.mrb[0].mxu0  ;;  %7997 = vmatprep.subr.bf16.mxu1 %v8653_v21  ;;  %v8691_v19 = vld [vmem:[%s10772_s1 + $0x28] sm:$0xff]  }
  0xfc   : > { %v7695_v8 = vpop.f32.mrb[0].mxu1  ;;  %v7674_v20 = vpop.f32.mrb[1].mxu0 }
  0xfd   : > { %v7696_v10 = vpop.f32.mrb[1].mxu1  ;;  %v7675_v22 = vadd.f32 %v7674_v20, %v7673_v18  ;;  %v7676_v23 = vpop.f32.mrb[2].mxu0  ;;  %7976 = vmatpush3.bf16.msra.mxu0 %v8654_v24 }
  0xfe   : > { %v7697_v12 = vadd.f32 %v7696_v10, %v7695_v8  ;;  %v7698_v13 = vpop.f32.mrb[2].mxu1  ;;  %v7677_v26 = vpop.f32.mrb[3].mxu0  ;;  %7998 = vmatpush3.bf16.msra.mxu1 %v8655_v25  ;;  %7977 = vmatprep.subr.bf16.mxu0 %v8656_v28  ;;  %v8692_v23 = vld [vmem:[%s10772_s1 + $0xf0] sm:$0xff]  }
  0xff   : > { %v7699_v15 = vpop.f32.mrb[3].mxu1  ;;  %7999 = vmatprep.subr.bf16.mxu1 %v8657_v29  ;;  %v8693_v25 = vld [vmem:[%s10772_s1 + $0x70] sm:$0xff]   ;;  %v8696_v29 = vld [vmem:[%s10772_s1 + $0xf8] sm:$0xff]  }
 0x100   : > { %v9820_v27 = vadd.f32 %v7697_v12, %v7675_v22  ;;  %v8689_v12 = vld [vmem:[%s10772_s1 + $0x68] sm:$0xff]   ;;  %v9940_v22 = vld [vmem:[%s10774_s3] ss:$0 sm:$0xff]  ;;  %v8694_v26 = vld [vmem:[%s10772_s1 + $0xb0] sm:$0xff]  }
 0x101   : > { %7978 = vmatpush3.bf16.msra.mxu0 %v8658_v30  ;;  %v8695_v28 = vld [vmem:[%s10772_s1 + $0x30] sm:$0xff]  }
 0x102   : > { %8000 = vmatpush3.bf16.msra.mxu1 %v8659_v31  ;;  %7979 = vmatprep.subr.bf16.mxu0 %v8660_v32  ;;  %v8697_v31 = vld [vmem:[%s10772_s1 + $0x78] sm:$0xff]  }
 0x103   : > { %8001 = vmatprep.subr.bf16.mxu1 %v8661_v33  ;;  %v8698_v32 = vld [vmem:[%s10772_s1 + $0xb8] sm:$0xff]  }
 0x105   : > { %7980 = vmatpush3.bf16.msra.mxu0 %v8662_v34  ;;  %v8699_v34 = vld [vmem:[%s10772_s1 + $0x38] sm:$0xff]  }
 0x106   : > { %8002 = vmatpush3.bf16.msra.mxu1 %v8663_v35  ;;  %8009 = vmatprep.subr.bf16.mxu0 %v8668_v41  ;;  %v6963_v35 = vld [vmem:[%s9111_s12 + $0x48] sm:$0x11] }
 0x107   : > { %8031 = vmatprep.subr.bf16.mxu1 %v8669_v42  ;;  %v6997_v38 = vcombine.high %v9847_v36, %v6963_v35 }
 0x108   : > { %3010 = vmatmul.mubr.bf16.vlgmr.msra.gmra.mrb[28].mxu0 %v9862_v47 }
 0x109   : > { %8010 = vmatpush3.bf16.msra.mxu0 %v8670_v50  ;;  %3200 = vmatmul.mubr.bf16.vlgmr.msra.gmra.mrb[28].mxu1 %v3061_v53  ;;  %v3295_v41 = vshrl.u32 %v6997_v38, 16  ;;  %v3297_v42 = vshll.u32 %v6997_v38, 16  ;;  %v8707_v53 = vld [vmem:[%s10772_s1 + $0x188] sm:$0xff]  }
 0x10a   : > { %8011 = vmatprep.subr.bf16.mxu0 %v8672_v51  ;;  %8032 = vmatpush3.bf16.msra.mxu1 %v8671_v54  ;;  %v8702_v51 = vld [vmem:[%s10772_s1 + $0x100] sm:$0xff]   ;;  %v8709_v54 = vld [vmem:[%s10772_s1 + $0x1d0] sm:$0xff]  }
 0x10b   : > { %3571 = vmatprep.mubr.bf16.mxu1 %v6894_v37  ;;  %8033 = vmatprep.subr.bf16.mxu1 %v8673_v55  ;;  %v6996_v37 = vcombine.low %v9847_v36, %v6963_v35  ;;  %v3299_v45 = vrot.slane %v3297_v42, 1  ;;  %v8703_v36 = vld [vmem:[%s10772_s1 + $0x180] sm:$0xff]   ;;  %v8708_v55 = vld [vmem:[%s10772_s1 + $0x150] sm:$0xff]  }
 0x10c   : > { %v8738_v42 = vld [vmem:[%s10772_s1 + $0x80] sm:$0xff]  }
 0x10d   : > { %8012 = vmatpush3.bf16.msra.mxu0 %v8674_v56  ;;  %v3288_v43 = vshrl.u32 %v6996_v37, 16  ;;  %v3290_v44 = vshll.u32 %v6996_v37, 16  ;;  %v3300_v49 = vor.u32 %v3299_v45, %v3295_v41  ;;  %v8711_v56 = vld [vmem:[%s10772_s1 + $0x190] sm:$0xff]  }
 0x10e   : > { %8013 = vmatprep.subr.bf16.mxu0 %v8676_v57  ;;  %8034 = vmatpush3.bf16.msra.mxu1 %v8675_v58  ;;  %v8713_v57 = vld [vmem:[%s10772_s1 + $0x1d8] sm:$0xff]   ;;  %v8710_v58 = vld [vmem:[%s10772_s1 + $0x110] sm:$0xff]  }
 0x10f   : > { %8035 = vmatprep.subr.bf16.mxu1 %v8677_v59  ;;  %v3292_v46 = vrot.slane %v3290_v44, 1  ;;  %3431 = vmatprep.mubr.bf16.mxu0 %v3300_v49  ;;  %v8712_v59 = vld [vmem:[%s10772_s1 + $0x158] sm:$0xff]   ;;  %v8743_v49 = vld [vmem:[%s10772_s1 + $0x8] sm:$0xff]  }
 0x111   : > { %8014 = vmatpush3.bf16.msra.mxu0 %v8678_v60  ;;  %v3293_v50 = vor.u32 %v3292_v46, %v3288_v43  ;;  %v8715_v60 = vld [vmem:[%s10772_s1 + $0x198] sm:$0xff]   ;;  %v8739_v43 = vld [vmem:[%s10772_s1] sm:$0xff]   ;;  %v8740_v46 = vld [vmem:[%s10772_s1 + $0xc8] sm:$0xff]  }
 0x112   : > { %8015 = vmatprep.subr.bf16.mxu0 %v8680_v61  ;;  %8036 = vmatpush3.bf16.msra.mxu1 %v8679_v62  ;;  %v8717_v61 = vld [vmem:[%s10772_s1 + $0x1e0] sm:$0xff]   ;;  %v8714_v62 = vld [vmem:[%s10772_s1 + $0x118] sm:$0xff]  }
 0x113   : > { %8037 = vmatprep.subr.bf16.mxu1 %v8681_v63  ;;  %v8716_v63 = vld [vmem:[%s10772_s1 + $0x160] sm:$0xff]  }
 0x115   : > { %8016 = vmatpush3.bf16.msra.mxu0 %v8682_v0 }
 0x116   : > { %8017 = vmatprep.subr.bf16.mxu0 %v8684_v1  ;;  %8038 = vmatpush3.bf16.msra.mxu1 %v8683_v2  ;;  %v8719_v1 = vld [vmem:[%s10772_s1 + $0x1a0] sm:$0xff]  }
 0x117   : > { %8039 = vmatprep.subr.bf16.mxu1 %v8685_v3 }
 0x119   : > { %8018 = vmatpush3.bf16.msra.mxu0 %v8686_v4  ;;  %v8721_v4 = vld [vmem:[%s10772_s1 + $0x1e8] sm:$0xff]  }
 0x11a   : > { %8019 = vmatprep.subr.bf16.mxu0 %v8688_v6  ;;  %8040 = vmatpush3.bf16.msra.mxu1 %v8687_v9 }
 0x11b   : > { %v7717_v5 = vpop.f32.mrb[4].mxu0  ;;  %8041 = vmatprep.subr.bf16.mxu1 %v8689_v12 }
 0x11c   : > { %v7739_v7 = vpop.f32.mrb[4].mxu1  ;;  %v7718_v8 = vpop.f32.mrb[5].mxu0 }
 0x11d   : > { %v7719_v10 = vadd.f32 %v7718_v8, %v7717_v5  ;;  %v7740_v11 = vpop.f32.mrb[5].mxu1  ;;  %v7720_v13 = vpop.f32.mrb[6].mxu0  ;;  %8020 = vmatpush3.bf16.msra.mxu0 %v8690_v17  ;;  %v8718_v8 = vld [vmem:[%s10772_s1 + $0x120] sm:$0xff]   ;;  %v8725_v17 = vld [vmem:[%s10772_s1 + $0x1f0] sm:$0xff]  }
 0x11e   : > { %v7741_v15 = vadd.f32 %v7740_v11, %v7739_v7  ;;  %v7742_v16 = vpop.f32.mrb[6].mxu1  ;;  %v7721_v20 = vpop.f32.mrb[7].mxu0  ;;  %8021 = vmatprep.subr.bf16.mxu0 %v8692_v23  ;;  %8042 = vmatpush3.bf16.msra.mxu1 %v8691_v19  ;;  %v8720_v11 = vld [vmem:[%s10772_s1 + $0x168] sm:$0xff]   ;;  %v8724_v19 = vld [vmem:[%s10772_s1 + $0x170] sm:$0xff]   ;;  %v8729_v23 = vld [vmem:[%s10772_s1 + $0x1f8] sm:$0xff]  }
 0x11f   : > { %v784_v18 = vadd.f32 %v7719_v10, %v9820_v27  ;;  %v7743_v21 = vpop.f32.mrb[7].mxu1  ;;  %8043 = vmatprep.subr.bf16.mxu1 %v8693_v25  ;;  %v8726_v20 = vld [vmem:[%s10772_s1 + $0x130] sm:$0xff]   ;;  %v8731_v25 = vld [vmem:[%s10772_s1 + $0x1b8] sm:$0xff]  }
 0x120   : > { %v8727_v21 = vld [vmem:[%s10772_s1 + $0x1b0] sm:$0xff]  }
 0x121   : > { %v975_v24 = vadd.f32 %v7741_v15, %v784_v18  ;;  %8022 = vmatpush3.bf16.msra.mxu0 %v8694_v26  ;;  %v8723_v15 = vld [vmem:[%s10772_s1 + $0x1a8] sm:$0xff]   ;;  %v8730_v26 = vld [vmem:[%s10772_s1 + $0x138] sm:$0xff]  }
 0x122   : > { %8023 = vmatprep.subr.bf16.mxu0 %v8696_v29  ;;  %8044 = vmatpush3.bf16.msra.mxu1 %v8695_v28  ;;  %v8722_v18 = vld [vmem:[%s10772_s1 + $0x128] sm:$0xff]   ;;  %v7033_v28 = vld [vmem:[%s9111_s12 + $0x58] sm:$0x11] }
 0x123   : > { %v982_v27 = vmul.f32 %v9928_v14, %v975_v24  ;;  %8045 = vmatprep.subr.bf16.mxu1 %v8697_v31  ;;  %v8728_v24 = vld [vmem:[%s10772_s1 + $0x178] sm:$0xff]  }
 0x125   : > { %v989_v30 = vadd.f32 %v9940_v22, %v982_v27  ;;  %8024 = vmatpush3.bf16.msra.mxu0 %v8698_v32  ;;  %v10079_v27 = vld [vmem:[%s9111_s12 + $0x50] sm:$0xff]  ;;  %v8736_v32 = vld [vmem:[%s10772_s1 + $0xc0] sm:$0xff]  }
 0x126   : > { %8053 = vmatprep.subr.bf16.mxu0 %v8700_v39  ;;  %8046 = vmatpush3.bf16.msra.mxu1 %v8699_v34  ;;  %v7067_v29 = vcombine.high %v10079_v27, %v10079_v27  ;;  %v7117_v31 = vcombine.high %v10079_v27, %v7033_v28 }
 0x127   : > { %v990_v33 = vpack.c.bf16 %v989_v30, %v989_v30  ;;  %8075 = vmatprep.subr.bf16.mxu1 %v8701_v40  ;;  %v7116_v30 = vcombine.low %v10079_v27, %v7033_v28  ;;  %v10094_v40 = vcombine.low %v10079_v27, %v10079_v27  ;;  %v8768_v28 = vld [vmem:[%s10772_s1 + $0x140] sm:$0xff]  }
 0x128   : > { %3432 = vmatmul.mubr.bf16.vlgmr.msra.gmra.mrb[32].mxu0 %v3293_v50  ;;  %v3803_v34 = vshrl.u32 %v7117_v31, 16  ;;  %v3805_v35 = vshll.u32 %v7117_v31, 16  ;;  %v8744_v50 = vld [vmem:[%s10772_s1 + $0xd0] sm:$0xff]  }
 0x129   : > { %992 = vst.msk [vmem:[%s9966_s5] sm:$0xf] %vm991_vm0, %v990_v33  ;;  %3572 = vmatmul.mubr.bf16.vlgmr.msra.gmra.mrb[32].mxu1 %v9862_v47  ;;  %8054 = vmatpush3.bf16.msra.mxu0 %v8702_v51  ;;  %v8706_v47 = vld [vmem:[%s10772_s1 + $0x108] sm:$0xff]   ;;  %v8737_v33 = vld [vmem:[%s10772_s1 + $0x40] sm:$0xff]   ;;  %v3796_v37 = vshrl.u32 %v7116_v30, 16  ;;  %v3798_v38 = vshll.u32 %v7116_v30, 16 }
 0x12a   : > { %8076 = vmatpush3.bf16.msra.mxu1 %v8703_v36  ;;  %8055 = vmatprep.subr.bf16.mxu0 %v8704_v52  ;;  %v3807_v39 = vrot.slane %v3805_v35, 1  ;;  %v8741_v36 = vld [vmem:[%s10772_s1 + $0x48] sm:$0xff]   ;;  %v8745_v51 = vld [vmem:[%s10772_s1 + $0x50] sm:$0xff]  }
 0x12b   : > { %8077 = vmatprep.subr.bf16.mxu1 %v8705_v48  ;;  %3749 = vmatprep.mubr.bf16.mxu0 %v7067_v29  ;;  %v3800_v41 = vrot.slane %v3798_v38, 1  ;;  %v8742_v48 = vld [vmem:[%s10772_s1 + $0x88] sm:$0xff]   ;;  %v8746_v52 = vld [vmem:[%s10772_s1 + $0x90] sm:$0xff]  }
 0x12c   : > { %v3808_v44 = vor.u32 %v3807_v39, %v3803_v34 }
 0x12d   : > { %8056 = vmatpush3.bf16.msra.mxu0 %v8706_v47  ;;  %v3801_v45 = vor.u32 %v3800_v41, %v3796_v37  ;;  %v8749_v47 = vld [vmem:[%s10772_s1 + $0x58] sm:$0xff]   ;;  %v8771_v37 = vld [vmem:[%s10772_s1 + $0x180] sm:$0xff]   ;;  %v8773_v41 = vld [vmem:[%s10772_s1 + $0x1c8] sm:$0xff]  }
 0x12e   : > { %8078 = vmatpush3.bf16.msra.mxu1 %v8707_v53  ;;  %8057 = vmatprep.subr.bf16.mxu0 %v8708_v55  ;;  %v8747_v53 = vld [vmem:[%s10772_s1 + $0x10] sm:$0xff]   ;;  %v8750_v55 = vld [vmem:[%s10772_s1 + $0x98] sm:$0xff]  }
 0x12f   : > { %8079 = vmatprep.subr.bf16.mxu1 %v8709_v54  ;;  %3939 = vmatprep.mubr.bf16.mxu1 %v3808_v44  ;;  %v8748_v54 = vld [vmem:[%s10772_s1 + $0xd8] sm:$0xff]   ;;  %v8775_v44 = vld [vmem:[%s10772_s1 + $0x188] sm:$0xff]  }
 0x131   : > { %8058 = vmatpush3.bf16.msra.mxu0 %v8710_v58  ;;  %v8753_v58 = vld [vmem:[%s10772_s1 + $0x60] sm:$0xff]  }
 0x132   : > { %8080 = vmatpush3.bf16.msra.mxu1 %v8711_v56  ;;  %8059 = vmatprep.subr.bf16.mxu0 %v8712_v59  ;;  %v8751_v56 = vld [vmem:[%s10772_s1 + $0x18] sm:$0xff]  }
 0x133   : > { %8081 = vmatprep.subr.bf16.mxu1 %v8713_v57  ;;  %v8752_v57 = vld [vmem:[%s10772_s1 + $0xe0] sm:$0xff]  }
 0x135   : > { %8060 = vmatpush3.bf16.msra.mxu0 %v8714_v62  ;;  %v8755_v62 = vld [vmem:[%s10772_s1 + $0x20] sm:$0xff]  }
 0x136   : > { %8082 = vmatpush3.bf16.msra.mxu1 %v8715_v60  ;;  %8061 = vmatprep.subr.bf16.mxu0 %v8716_v63  ;;  %v8754_v60 = vld [vmem:[%s10772_s1 + $0xa0] sm:$0xff]  }
 0x137   : > { %8083 = vmatprep.subr.bf16.mxu1 %v8717_v61 }
 0x139   : > { %8062 = vmatpush3.bf16.msra.mxu0 %v8718_v8  ;;  %v8758_v8 = vld [vmem:[%s10772_s1 + $0xa8] sm:$0xff]  }
 0x13a   : > { %8084 = vmatpush3.bf16.msra.mxu1 %v8719_v1  ;;  %8063 = vmatprep.subr.bf16.mxu0 %v8720_v11 }
 0x13b   : > { %v7761_v2 = vpop.f32.mrb[8].mxu0  ;;  %8085 = vmatprep.subr.bf16.mxu1 %v8721_v4 }
 0x13c   : > { %v7783_v0 = vpop.f32.mrb[8].mxu1  ;;  %v7762_v5 = vpop.f32.mrb[9].mxu0 }
 0x13d   : > { %v7784_v3 = vpop.f32.mrb[9].mxu1  ;;  %v7763_v9 = vadd.f32 %v7762_v5, %v7761_v2  ;;  %v7764_v10 = vpop.f32.mrb[10].mxu0  ;;  %8064 = vmatpush3.bf16.msra.mxu0 %v8722_v18  ;;  %v8756_v2 = vld [vmem:[%s10772_s1 + $0xe8] sm:$0xff]   ;;  %v8763_v18 = vld [vmem:[%s10772_s1 + $0x30] sm:$0xff]  }
 0x13e   : > { %v7785_v6 = vadd.f32 %v7784_v3, %v7783_v0  ;;  %v7786_v7 = vpop.f32.mrb[10].mxu1  ;;  %v7765_v12 = vpop.f32.mrb[11].mxu0  ;;  %8086 = vmatpush3.bf16.msra.mxu1 %v8723_v15  ;;  %8065 = vmatprep.subr.bf16.mxu0 %v8724_v19  ;;  %v8757_v3 = vld [vmem:[%s10772_s1 + $0x68] sm:$0xff]   ;;  %v8760_v15 = vld [vmem:[%s10772_s1 + $0xf0] sm:$0xff]  }
 0x13f   : > { %v7787_v16 = vpop.f32.mrb[11].mxu1  ;;  %8087 = vmatprep.subr.bf16.mxu1 %v8725_v17  ;;  %v8762_v17 = vld [vmem:[%s10772_s1 + $0xb0] sm:$0xff]  }
 0x140   : > { %v10046_v13 = vadd.f32 %v7785_v6, %v7763_v9  ;;  %v8759_v9 = vld [vmem:[%s10772_s1 + $0x28] sm:$0xff]  }
 0x141   : > { %8066 = vmatpush3.bf16.msra.mxu0 %v8726_v20  ;;  %v8764_v20 = vld [vmem:[%s10772_s1 + $0xf8] sm:$0xff]  }
 0x142   : > { %8088 = vmatpush3.bf16.msra.mxu1 %v8727_v21  ;;  %8067 = vmatprep.subr.bf16.mxu0 %v8728_v24  ;;  %v7136_v24 = vld [vmem:[%s9111_s12 + $0x58] sm:$0x11] }
 0x143   : > { %8089 = vmatprep.subr.bf16.mxu1 %v8729_v23  ;;  %v8766_v23 = vld [vmem:[%s10772_s1 + $0xb8] sm:$0xff]  }
 0x145   : > { %8068 = vmatpush3.bf16.msra.mxu0 %v8730_v26  ;;  %v7170_v26 = vcombine.high %v10079_v27, %v7136_v24 }
 0x146   : > { %8090 = vmatpush3.bf16.msra.mxu1 %v8731_v25  ;;  %8097 = vmatprep.subr.bf16.mxu0 %v8736_v32  ;;  %v7169_v25 = vcombine.low %v10079_v27, %v7136_v24  ;;  %v8770_v27 = vld [vmem:[%s10772_s1 + $0x100] sm:$0xff]  }
 0x147   : > { %8119 = vmatprep.subr.bf16.mxu1 %v8737_v33  ;;  %v4035_v30 = vshrl.u32 %v7170_v26, 16  ;;  %v4037_v31 = vshll.u32 %v7170_v26, 16  ;;  %v8806_v26 = vld [vmem:[%s10772_s1 + $0x80] sm:$0xff]  }
 0x148   : > { %3750 = vmatmul.mubr.bf16.vlgmr.msra.gmra.mrb[36].mxu0 %v10094_v40  ;;  %v4028_v32 = vshrl.u32 %v7169_v25, 16  ;;  %v4030_v33 = vshll.u32 %v7169_v25, 16 }
 0x149   : > { %3940 = vmatmul.mubr.bf16.vlgmr.msra.gmra.mrb[36].mxu1 %v3801_v45  ;;  %8098 = vmatpush3.bf16.msra.mxu0 %v8738_v42  ;;  %v4039_v34 = vrot.slane %v4037_v31, 1  ;;  %v8772_v42 = vld [vmem:[%s10772_s1 + $0x148] sm:$0xff]   ;;  %v8777_v45 = vld [vmem:[%s10772_s1 + $0x1d0] sm:$0xff]  }
 0x14a   : > { %8120 = vmatpush3.bf16.msra.mxu1 %v8739_v43  ;;  %8099 = vmatprep.subr.bf16.mxu0 %v8740_v46  ;;  %v4032_v35 = vrot.slane %v4030_v33, 1  ;;  %v8774_v43 = vld [vmem:[%s10772_s1 + $0x108] sm:$0xff]   ;;  %v8778_v46 = vld [vmem:[%s10772_s1 + $0x110] sm:$0xff]  }
 0x14b   : > { %8121 = vmatprep.subr.bf16.mxu1 %v8741_v36  ;;  %4311 = vmatprep.mubr.bf16.mxu1 %v7067_v29  ;;  %v8769_v29 = vld [vmem:[%s10772_s1 + $0x1c0] sm:$0xff]   ;;  %v4040_v38 = vor.u32 %v4039_v34, %v4035_v30  ;;  %v8779_v36 = vld [vmem:[%s10772_s1 + $0x190] sm:$0xff]   ;;  %v8808_v31 = vld [vmem:[%s10772_s1 + $0xc8] sm:$0xff]  }
 0x14c   : > { %v4033_v39 = vor.u32 %v4032_v35, %v4028_v32  ;;  %v8807_v30 = vld [vmem:[%s10772_s1] sm:$0xff]   ;;  %v8809_v34 = vld [vmem:[%s10772_s1 + $0x48] sm:$0xff]  }
 0x14d   : > { %8100 = vmatpush3.bf16.msra.mxu0 %v8742_v48  ;;  %4171 = vmatprep.mubr.bf16.mxu0 %v4040_v38  ;;  %v8781_v48 = vld [vmem:[%s10772_s1 + $0x1d8] sm:$0xff]   ;;  %v8810_v35 = vld [vmem:[%s10772_s1 + $0x88] sm:$0xff]   ;;  %v8813_v38 = vld [vmem:[%s10772_s1 + $0x50] sm:$0xff]  }
 0x14e   : > { %8122 = vmatpush3.bf16.msra.mxu1 %v8743_v49  ;;  %8101 = vmatprep.subr.bf16.mxu0 %v8744_v50  ;;  %v8780_v49 = vld [vmem:[%s10772_s1 + $0x158] sm:$0xff]  }
 0x14f   : > { %8123 = vmatprep.subr.bf16.mxu1 %v8745_v51  ;;  %v8782_v50 = vld [vmem:[%s10772_s1 + $0x118] sm:$0xff]  }
 0x150   : > { %v8783_v51 = vld [vmem:[%s10772_s1 + $0x198] sm:$0xff]  }
 0x151   : > { %8102 = vmatpush3.bf16.msra.mxu0 %v8746_v52  ;;  %v8785_v52 = vld [vmem:[%s10772_s1 + $0x1e0] sm:$0xff]  }
 0x152   : > { %8124 = vmatpush3.bf16.msra.mxu1 %v8747_v53  ;;  %8103 = vmatprep.subr.bf16.mxu0 %v8748_v54  ;;  %v8784_v53 = vld [vmem:[%s10772_s1 + $0x160] sm:$0xff]  }
 0x153   : > { %8125 = vmatprep.subr.bf16.mxu1 %v8749_v47  ;;  %v8786_v54 = vld [vmem:[%s10772_s1 + $0x120] sm:$0xff]  }
 0x154   : > { %v8787_v47 = vld [vmem:[%s10772_s1 + $0x1a0] sm:$0xff]  }
 0x155   : > { %8104 = vmatpush3.bf16.msra.mxu0 %v8750_v55 }
 0x156   : > { %8126 = vmatpush3.bf16.msra.mxu1 %v8751_v56  ;;  %8105 = vmatprep.subr.bf16.mxu0 %v8752_v57 }
 0x157   : > { %8127 = vmatprep.subr.bf16.mxu1 %v8753_v58 }
 0x159   : > { %8106 = vmatpush3.bf16.msra.mxu0 %v8754_v60 }
 0x15a   : > { %8128 = vmatpush3.bf16.msra.mxu1 %v8755_v62  ;;  %8107 = vmatprep.subr.bf16.mxu0 %v8756_v2  ;;  %v8790_v2 = vld [vmem:[%s10772_s1 + $0x128] sm:$0xff]  }
 0x15b   : > { %v7805_v59 = vpop.f32.mrb[12].mxu0  ;;  %8129 = vmatprep.subr.bf16.mxu1 %v8757_v3 }
 0x15c   : > { %v7806_v61 = vpop.f32.mrb[13].mxu0  ;;  %v7827_v63 = vpop.f32.mrb[12].mxu1 }
 0x15d   : > { %v7807_v0 = vadd.f32 %v7806_v61, %v7805_v59  ;;  %v7828_v1 = vpop.f32.mrb[13].mxu1  ;;  %v7808_v4 = vpop.f32.mrb[14].mxu0  ;;  %8108 = vmatpush3.bf16.msra.mxu0 %v8758_v8  ;;  %v8789_v61 = vld [vmem:[%s10772_s1 + $0x1e8] sm:$0xff]   ;;  %v8794_v8 = vld [vmem:[%s10772_s1 + $0x130] sm:$0xff]  }
 0x15e   : > { %v7829_v6 = vadd.f32 %v7828_v1, %v7827_v63  ;;  %v7830_v7 = vpop.f32.mrb[14].mxu1  ;;  %v7809_v10 = vpop.f32.mrb[15].mxu0  ;;  %8130 = vmatpush3.bf16.msra.mxu1 %v8759_v9  ;;  %8109 = vmatprep.subr.bf16.mxu0 %v8760_v15  ;;  %v8788_v63 = vld [vmem:[%s10772_s1 + $0x168] sm:$0xff]   ;;  %v8795_v9 = vld [vmem:[%s10772_s1 + $0x1b0] sm:$0xff]   ;;  %v8799_v15 = vld [vmem:[%s10772_s1 + $0x1b8] sm:$0xff]  }
 0x15f   : > { %v1537_v5 = vadd.f32 %v7807_v0, %v10046_v13  ;;  %v7831_v11 = vpop.f32.mrb[15].mxu1  ;;  %v8761_v13 = vld [vmem:[%s10772_s1 + $0x70] sm:$0xff]   ;;  %v8791_v4 = vld [vmem:[%s10772_s1 + $0x1a8] sm:$0xff]   ;;  %v8797_v10 = vld [vmem:[%s10772_s1 + $0x1f8] sm:$0xff]  }
 0x160   : > { %8131 = vmatprep.subr.bf16.mxu1 %v8761_v13  ;;  %v8792_v7 = vld [vmem:[%s10772_s1 + $0x170] sm:$0xff]   ;;  %v8796_v11 = vld [vmem:[%s10772_s1 + $0x178] sm:$0xff]   ;;  %v10295_v13 = vld [vmem:[%s9111_s12 + $0x60] sm:$0xff] }
 0x161   : > { %v1727_v12 = vadd.f32 %v7829_v6, %v1537_v5  ;;  %8110 = vmatpush3.bf16.msra.mxu0 %v8762_v17  ;;  %v8793_v6 = vld [vmem:[%s10772_s1 + $0x1f0] sm:$0xff]   ;;  %v7240_v17 = vcombine.high %v10295_v13, %v10295_v13  ;;  %v10310_v25 = vcombine.low %v10295_v13, %v10295_v13 }
 0x162   : > { %8132 = vmatpush3.bf16.msra.mxu1 %v8763_v18  ;;  %8111 = vmatprep.subr.bf16.mxu0 %v8764_v20  ;;  %v8804_v20 = vld [vmem:[%s10772_s1 + $0xc0] sm:$0xff]  }
 0x163   : > { %v1728_v16 = vmul.f32 %v9928_v14, %v1727_v12  ;;  %v8765_v14 = vld [vmem:[%s10772_s1 + $0x78] sm:$0xff]  }
 0x164   : > { %8133 = vmatprep.subr.bf16.mxu1 %v8765_v14  ;;  %v8798_v12 = vld [vmem:[%s10772_s1 + $0x138] sm:$0xff]   ;;  %v8805_v14 = vld [vmem:[%s10772_s1 + $0x40] sm:$0xff]  }
 0x165   : > { %v1729_v19 = vadd.f32 %v9940_v22, %v1728_v16  ;;  %v8767_v22 = vld [vmem:[%s10772_s1 + $0x38] sm:$0xff]   ;;  %8112 = vmatpush3.bf16.msra.mxu0 %v8766_v23  ;;  %v7206_v16 = vld [vmem:[%s9111_s12 + $0x68] sm:$0x11] }
 0x166   : > { %8134 = vmatpush3.bf16.msra.mxu1 %v8767_v22  ;;  %8141 = vmatprep.subr.bf16.mxu0 %v8768_v28  ;;  %v7289_v18 = vcombine.low %v10295_v13, %v7206_v16 }
 0x167   : > { %v1730_v21 = vpack.c.bf16 %v1729_v19, %v1729_v19  ;;  %8163 = vmatprep.subr.bf16.mxu1 %v8769_v29  ;;  %v7290_v19 = vcombine.high %v10295_v13, %v7206_v16 }
 0x168   : > { %4172 = vmatmul.mubr.bf16.vlgmr.msra.gmra.mrb[40].mxu0 %v4033_v39  ;;  %v4536_v22 = vshrl.u32 %v7289_v18, 16  ;;  %v4538_v24 = vshll.u32 %v7289_v18, 16  ;;  %v8814_v39 = vld [vmem:[%s10772_s1 + $0x90] sm:$0xff]   ;;  %v8836_v18 = vld [vmem:[%s10772_s1 + $0x140] sm:$0xff]  }
 0x169   : > { %6615 = vst.msk [vmem:[%s9966_s5 + $0x4] sm:$0xf] %vm991_vm0, %v1730_v21  ;;  %4312 = vmatmul.mubr.bf16.vlgmr.msra.gmra.mrb[40].mxu1 %v10094_v40  ;;  %8142 = vmatpush3.bf16.msra.mxu0 %v8770_v27  ;;  %v8776_v40 = vld [vmem:[%s10772_s1 + $0x150] sm:$0xff]   ;;  %v4543_v21 = vshrl.u32 %v7290_v19, 16  ;;  %v4545_v23 = vshll.u32 %v7290_v19, 16  ;;  %v8811_v27 = vld [vmem:[%s10772_s1 + $0x8] sm:$0xff]  }
 0x16a   : > { %8164 = vmatpush3.bf16.msra.mxu1 %v8771_v37  ;;  %8143 = vmatprep.subr.bf16.mxu0 %v8772_v42  ;;  %v4540_v29 = vrot.slane %v4538_v24, 1  ;;  %v8812_v37 = vld [vmem:[%s10772_s1 + $0xd0] sm:$0xff]   ;;  %v8816_v42 = vld [vmem:[%s10772_s1 + $0xd8] sm:$0xff]   ;;  %v8837_v19 = vld [vmem:[%s10772_s1 + $0x1c0] sm:$0xff]  }
 0x16b   : > { %8165 = vmatprep.subr.bf16.mxu1 %v8773_v41  ;;  %4489 = vmatprep.mubr.bf16.mxu0 %v7240_v17  ;;  %v4547_v28 = vrot.slane %v4545_v23, 1  ;;  %v8815_v41 = vld [vmem:[%s10772_s1 + $0x10] sm:$0xff]  }
 0x16c   : > { %v4541_v33 = vor.u32 %v4540_v29, %v4536_v22 }
 0x16d   : > { %8144 = vmatpush3.bf16.msra.mxu0 %v8774_v43  ;;  %v4548_v32 = vor.u32 %v4547_v28, %v4543_v21  ;;  %v8817_v43 = vld [vmem:[%s10772_s1 + $0x58] sm:$0xff]  }
 0x16e   : > { %8166 = vmatpush3.bf16.msra.mxu1 %v8775_v44  ;;  %8145 = vmatprep.subr.bf16.mxu0 %v8776_v40  ;;  %v8818_v44 = vld [vmem:[%s10772_s1 + $0x98] sm:$0xff]   ;;  %v8820_v40 = vld [vmem:[%s10772_s1 + $0xe0] sm:$0xff]  }
 0x16f   : > { %8167 = vmatprep.subr.bf16.mxu1 %v8777_v45  ;;  %4679 = vmatprep.mubr.bf16.mxu1 %v4548_v32  ;;  %v8819_v45 = vld [vmem:[%s10772_s1 + $0x18] sm:$0xff]   ;;  %v8842_v32 = vld [vmem:[%s10772_s1 + $0x108] sm:$0xff]  }
 0x171   : > { %8146 = vmatpush3.bf16.msra.mxu0 %v8778_v46  ;;  %v8821_v46 = vld [vmem:[%s10772_s1 + $0x60] sm:$0xff]  }
 0x172   : > { %8168 = vmatpush3.bf16.msra.mxu1 %v8779_v36  ;;  %8147 = vmatprep.subr.bf16.mxu0 %v8780_v49 }
 0x173   : > { %8169 = vmatprep.subr.bf16.mxu1 %v8781_v48  ;;  %v8822_v48 = vld [vmem:[%s10772_s1 + $0xa0] sm:$0xff]  }
 0x175   : > { %8148 = vmatpush3.bf16.msra.mxu0 %v8782_v50  ;;  %v8823_v50 = vld [vmem:[%s10772_s1 + $0x20] sm:$0xff]  }
 0x176   : > { %8170 = vmatpush3.bf16.msra.mxu1 %v8783_v51  ;;  %8149 = vmatprep.subr.bf16.mxu0 %v8784_v53 }
 0x177   : > { %8171 = vmatprep.subr.bf16.mxu1 %v8785_v52 }
 0x179   : > { %8150 = vmatpush3.bf16.msra.mxu0 %v8786_v54  ;;  %v8824_v54 = vld [vmem:[%s10772_s1 + $0xe8] sm:$0xff]  }
 0x17a   : > { %8172 = vmatpush3.bf16.msra.mxu1 %v8787_v47  ;;  %8151 = vmatprep.subr.bf16.mxu0 %v8788_v63 }
 0x17b   : > { %v7849_v55 = vpop.f32.mrb[16].mxu0  ;;  %8173 = vmatprep.subr.bf16.mxu1 %v8789_v61  ;;  %v8827_v61 = vld [vmem:[%s10772_s1 + $0x28] sm:$0xff]  }
 0x17c   : > { %v7871_v56 = vpop.f32.mrb[16].mxu1  ;;  %v7850_v57 = vpop.f32.mrb[17].mxu0 }
 0x17d   : > { %v7872_v58 = vpop.f32.mrb[17].mxu1  ;;  %v7851_v59 = vadd.f32 %v7850_v57, %v7849_v55  ;;  %v7852_v62 = vpop.f32.mrb[18].mxu0  ;;  %8152 = vmatpush3.bf16.msra.mxu0 %v8790_v2 }
 0x17e   : > { %v7873_v60 = vadd.f32 %v7872_v58, %v7871_v56  ;;  %v7874_v0 = vpop.f32.mrb[18].mxu1  ;;  %v7853_v3 = vpop.f32.mrb[19].mxu0  ;;  %8174 = vmatpush3.bf16.msra.mxu1 %v8791_v4  ;;  %8153 = vmatprep.subr.bf16.mxu0 %v8792_v7  ;;  %v8825_v56 = vld [vmem:[%s10772_s1 + $0x68] sm:$0xff]   ;;  %v8830_v4 = vld [vmem:[%s10772_s1 + $0xb0] sm:$0xff]  }
 0x17f   : > { %v7875_v5 = vpop.f32.mrb[19].mxu1  ;;  %8175 = vmatprep.subr.bf16.mxu1 %v8793_v6  ;;  %v8828_v0 = vld [vmem:[%s10772_s1 + $0xf0] sm:$0xff]  }
 0x180   : > { %v10262_v1 = vadd.f32 %v7873_v60, %v7851_v59  ;;  %v8826_v59 = vld [vmem:[%s10772_s1 + $0xa8] sm:$0xff]   ;;  %v8829_v3 = vld [vmem:[%s10772_s1 + $0x70] sm:$0xff]   ;;  %v10398_v5 = vld [vmem:[%s10774_s3] ss:$0 sm:$0xff] }
 0x181   : > { %8154 = vmatpush3.bf16.msra.mxu0 %v8794_v8  ;;  %v8831_v7 = vld [vmem:[%s10772_s1 + $0x30] sm:$0xff]   ;;  %v8832_v8 = vld [vmem:[%s10772_s1 + $0xf8] sm:$0xff]  }
 0x182   : > { %8176 = vmatpush3.bf16.msra.mxu1 %v8795_v9  ;;  %8155 = vmatprep.subr.bf16.mxu0 %v8796_v11  ;;  %v8834_v11 = vld [vmem:[%s10772_s1 + $0xb8] sm:$0xff]  }
 0x183   : > { %8177 = vmatprep.subr.bf16.mxu1 %v8797_v10  ;;  %v8833_v10 = vld [vmem:[%s10772_s1 + $0x78] sm:$0xff]  }
 0x185   : > { %8156 = vmatpush3.bf16.msra.mxu0 %v8798_v12  ;;  %v8835_v12 = vld [vmem:[%s10772_s1 + $0x38] sm:$0xff]  }
 0x186   : > { %8178 = vmatpush3.bf16.msra.mxu1 %v8799_v15  ;;  %8185 = vmatprep.subr.bf16.mxu0 %v8804_v20  ;;  %v7309_v15 = vld [vmem:[%s9111_s12 + $0x68] sm:$0x11] }
 0x187   : > { %8207 = vmatprep.subr.bf16.mxu1 %v8805_v14  ;;  %v7342_v16 = vcombine.low %v10295_v13, %v7309_v15 }
 0x188   : > { %4490 = vmatmul.mubr.bf16.vlgmr.msra.gmra.mrb[44].mxu0 %v10310_v25 }
 0x189   : > { %8186 = vmatpush3.bf16.msra.mxu0 %v8806_v26  ;;  %4680 = vmatmul.mubr.bf16.vlgmr.msra.gmra.mrb[44].mxu1 %v4541_v33  ;;  %v4768_v21 = vshrl.u32 %v7342_v16, 16  ;;  %v4770_v23 = vshll.u32 %v7342_v16, 16  ;;  %v8839_v26 = vld [vmem:[%s10772_s1 + $0x180] sm:$0xff]   ;;  %v8843_v33 = vld [vmem:[%s10772_s1 + $0x188] sm:$0xff]  }
 0x18a   : > { %8187 = vmatprep.subr.bf16.mxu0 %v8808_v31  ;;  %8208 = vmatpush3.bf16.msra.mxu1 %v8807_v30  ;;  %v8841_v30 = vld [vmem:[%s10772_s1 + $0x1c8] sm:$0xff]  }
 0x18b   : > { %5051 = vmatprep.mubr.bf16.mxu1 %v7240_v17  ;;  %8209 = vmatprep.subr.bf16.mxu1 %v8809_v34  ;;  %v7343_v17 = vcombine.high %v10295_v13, %v7309_v15  ;;  %v4772_v24 = vrot.slane %v4770_v23, 1  ;;  %v8838_v13 = vld [vmem:[%s10772_s1 + $0x100] sm:$0xff]   ;;  %v8840_v31 = vld [vmem:[%s10772_s1 + $0x148] sm:$0xff]   ;;  %v8845_v34 = vld [vmem:[%s10772_s1 + $0x1d0] sm:$0xff]  }
 0x18d   : > { %8188 = vmatpush3.bf16.msra.mxu0 %v8810_v35  ;;  %v4775_v20 = vshrl.u32 %v7343_v17, 16  ;;  %v4777_v14 = vshll.u32 %v7343_v17, 16  ;;  %v4773_v29 = vor.u32 %v4772_v24, %v4768_v21  ;;  %v8846_v35 = vld [vmem:[%s10772_s1 + $0x110] sm:$0xff]   ;;  %v8876_v21 = vld [vmem:[%s10772_s1 + $0xc8] sm:$0xff]   ;;  %v8875_v24 = vld [vmem:[%s10772_s1] sm:$0xff]  }
 0x18e   : > { %8189 = vmatprep.subr.bf16.mxu0 %v8812_v37  ;;  %8210 = vmatpush3.bf16.msra.mxu1 %v8811_v27  ;;  %v8847_v27 = vld [vmem:[%s10772_s1 + $0x190] sm:$0xff]   ;;  %v8849_v37 = vld [vmem:[%s10772_s1 + $0x1d8] sm:$0xff]  }
 0x18f   : > { %8211 = vmatprep.subr.bf16.mxu1 %v8813_v38  ;;  %v4779_v22 = vrot.slane %v4777_v14, 1  ;;  %v8848_v38 = vld [vmem:[%s10772_s1 + $0x158] sm:$0xff]   ;;  %v8874_v14 = vld [vmem:[%s10772_s1 + $0x80] sm:$0xff]  }
 0x191   : > { %8190 = vmatpush3.bf16.msra.mxu0 %v8814_v39  ;;  %v4780_v28 = vor.u32 %v4779_v22, %v4775_v20  ;;  %v8850_v39 = vld [vmem:[%s10772_s1 + $0x118] sm:$0xff]  }
 0x192   : > { %8191 = vmatprep.subr.bf16.mxu0 %v8816_v42  ;;  %8212 = vmatpush3.bf16.msra.mxu1 %v8815_v41  ;;  %v8851_v41 = vld [vmem:[%s10772_s1 + $0x198] sm:$0xff]   ;;  %v8853_v42 = vld [vmem:[%s10772_s1 + $0x1e0] sm:$0xff]  }
 0x193   : > { %8213 = vmatprep.subr.bf16.mxu1 %v8817_v43  ;;  %4911 = vmatprep.mubr.bf16.mxu0 %v4780_v28  ;;  %v8852_v43 = vld [vmem:[%s10772_s1 + $0x160] sm:$0xff]   ;;  %v8880_v28 = vld [vmem:[%s10772_s1 + $0xd0] sm:$0xff]  }
 0x195   : > { %8192 = vmatpush3.bf16.msra.mxu0 %v8818_v44 }
 0x196   : > { %8193 = vmatprep.subr.bf16.mxu0 %v8820_v40  ;;  %8214 = vmatpush3.bf16.msra.mxu1 %v8819_v45  ;;  %v8854_v45 = vld [vmem:[%s10772_s1 + $0x120] sm:$0xff]  }
 0x197   : > { %8215 = vmatprep.subr.bf16.mxu1 %v8821_v46  ;;  %v8855_v40 = vld [vmem:[%s10772_s1 + $0x1a0] sm:$0xff]  }
 0x199   : > { %8194 = vmatpush3.bf16.msra.mxu0 %v8822_v48 }
 0x19a   : > { %8195 = vmatprep.subr.bf16.mxu0 %v8824_v54  ;;  %8216 = vmatpush3.bf16.msra.mxu1 %v8823_v50  ;;  %v8857_v50 = vld [vmem:[%s10772_s1 + $0x1e8] sm:$0xff]  }
 0x19b   : > { %v7893_v36 = vpop.f32.mrb[20].mxu0  ;;  %8217 = vmatprep.subr.bf16.mxu1 %v8825_v56  ;;  %v8856_v54 = vld [vmem:[%s10772_s1 + $0x168] sm:$0xff]  }
 0x19c   : > { %v7894_v49 = vpop.f32.mrb[21].mxu0  ;;  %v7915_v51 = vpop.f32.mrb[20].mxu1  ;;  %v8858_v56 = vld [vmem:[%s10772_s1 + $0x128] sm:$0xff]  }
 0x19d   : > { %v7895_v52 = vadd.f32 %v7894_v49, %v7893_v36  ;;  %v7916_v53 = vpop.f32.mrb[21].mxu1  ;;  %v7896_v57 = vpop.f32.mrb[22].mxu0  ;;  %8196 = vmatpush3.bf16.msra.mxu0 %v8826_v59  ;;  %v8861_v59 = vld [vmem:[%s10772_s1 + $0x1f0] sm:$0xff]  }
 0x19e   : > { %v7917_v55 = vadd.f32 %v7916_v53, %v7915_v51  ;;  %v7918_v58 = vpop.f32.mrb[22].mxu1  ;;  %v7897_v62 = vpop.f32.mrb[23].mxu0  ;;  %8197 = vmatprep.subr.bf16.mxu0 %v8828_v0  ;;  %8218 = vmatpush3.bf16.msra.mxu1 %v8827_v61  ;;  %v8862_v61 = vld [vmem:[%s10772_s1 + $0x130] sm:$0xff]   ;;  %v8864_v0 = vld [vmem:[%s10772_s1 + $0x178] sm:$0xff]  }
 0x19f   : > { %v2277_v47 = vadd.f32 %v7895_v52, %v10262_v1  ;;  %v7919_v63 = vpop.f32.mrb[23].mxu1  ;;  %v10386_v1 = vld [vmem:[%s10773_s2] ss:$0 sm:$0xff]  ;;  %8219 = vmatprep.subr.bf16.mxu1 %v8829_v3  ;;  %v8859_v58 = vld [vmem:[%s10772_s1 + $0x1a8] sm:$0xff]   ;;  %v8863_v62 = vld [vmem:[%s10772_s1 + $0x1b0] sm:$0xff]  }
 0x1a0   : > { %v8865_v63 = vld [vmem:[%s10772_s1 + $0x1f8] sm:$0xff]  }
 0x1a1   : > { %v2467_v60 = vadd.f32 %v7917_v55, %v2277_v47  ;;  %8198 = vmatpush3.bf16.msra.mxu0 %v8830_v4  ;;  %v8867_v3 = vld [vmem:[%s10772_s1 + $0x1b8] sm:$0xff]   ;;  %v10521_v4 = vld [vmem:[%s9111_s12 + $0x70] sm:$0xff] }
 0x1a2   : > { %8199 = vmatprep.subr.bf16.mxu0 %v8832_v8  ;;  %8220 = vmatpush3.bf16.msra.mxu1 %v8831_v7  ;;  %v7379_v7 = vld [vmem:[%s9111_s12 + $0x78] sm:$0x11] }
 0x1a3   : > { %v2468_v2 = vmul.f32 %v10386_v1, %v2467_v60  ;;  %8221 = vmatprep.subr.bf16.mxu1 %v8833_v10  ;;  %v8860_v60 = vld [vmem:[%s10772_s1 + $0x170] sm:$0xff]   ;;  %v7462_v8 = vcombine.low %v10521_v4, %v7379_v7  ;;  %v8872_v10 = vld [vmem:[%s10772_s1 + $0xc0] sm:$0xff]  }
 0x1a5   : > { %v2469_v6 = vadd.f32 %v10398_v5, %v2468_v2  ;;  %8200 = vmatpush3.bf16.msra.mxu0 %v8834_v11  ;;  %v8866_v2 = vld [vmem:[%s10772_s1 + $0x138] sm:$0xff]   ;;  %v8873_v11 = vld [vmem:[%s10772_s1 + $0x40] sm:$0xff]   ;;  %v5276_v16 = vshrl.u32 %v7462_v8, 16  ;;  %v5278_v17 = vshll.u32 %v7462_v8, 16 }
 0x1a6   : > { %8229 = vmatprep.subr.bf16.mxu0 %v8836_v18  ;;  %8222 = vmatpush3.bf16.msra.mxu1 %v8835_v12  ;;  %v10536_v18 = vcombine.low %v10521_v4, %v10521_v4 }
 0x1a7   : > { %v2470_v9 = vpack.c.bf16 %v2469_v6, %v2469_v6  ;;  %8251 = vmatprep.subr.bf16.mxu1 %v8837_v19  ;;  %v7413_v6 = vcombine.high %v10521_v4, %v10521_v4  ;;  %v5280_v20 = vrot.slane %v5278_v17, 1 }
 0x1a8   : > { %4912 = vmatmul.mubr.bf16.vlgmr.msra.gmra.mrb[48].mxu0 %v4773_v29  ;;  %v8879_v29 = vld [vmem:[%s10772_s1 + $0x8] sm:$0xff]  }
 0x1a9   : > { %6788 = vst.msk [vmem:[%s9966_s5 + $0x8] sm:$0xf] %vm991_vm0, %v2470_v9  ;;  %5052 = vmatmul.mubr.bf16.vlgmr.msra.gmra.mrb[48].mxu1 %v10310_v25  ;;  %8230 = vmatpush3.bf16.msra.mxu0 %v8838_v13  ;;  %v8844_v25 = vld [vmem:[%s10772_s1 + $0x150] sm:$0xff]   ;;  %v7463_v9 = vcombine.high %v10521_v4, %v7379_v7  ;;  %v5281_v22 = vor.u32 %v5280_v20, %v5276_v16  ;;  %v8877_v13 = vld [vmem:[%s10772_s1 + $0x48] sm:$0xff]   ;;  %v8907_v16 = vld [vmem:[%s10772_s1 + $0x180] sm:$0xff]  }
 0x1aa   : > { %8252 = vmatpush3.bf16.msra.mxu1 %v8839_v26  ;;  %8231 = vmatprep.subr.bf16.mxu0 %v8840_v31  ;;  %v8878_v26 = vld [vmem:[%s10772_s1 + $0x88] sm:$0xff]   ;;  %v8882_v31 = vld [vmem:[%s10772_s1 + $0x90] sm:$0xff]  }
 0x1ab   : > { %8253 = vmatprep.subr.bf16.mxu1 %v8841_v30  ;;  %5229 = vmatprep.mubr.bf16.mxu0 %v7413_v6  ;;  %v5283_v12 = vshrl.u32 %v7463_v9, 16  ;;  %v5285_v15 = vshll.u32 %v7463_v9, 16  ;;  %v8881_v30 = vld [vmem:[%s10772_s1 + $0x50] sm:$0xff]   ;;  %v8908_v20 = vld [vmem:[%s10772_s1 + $0x148] sm:$0xff]  }
 0x1ad   : > { %8232 = vmatpush3.bf16.msra.mxu0 %v8842_v32  ;;  %v5287_v19 = vrot.slane %v5285_v15, 1  ;;  %v8884_v32 = vld [vmem:[%s10772_s1 + $0xd8] sm:$0xff]  }
 0x1ae   : > { %8254 = vmatpush3.bf16.msra.mxu1 %v8843_v33  ;;  %8233 = vmatprep.subr.bf16.mxu0 %v8844_v25  ;;  %v8883_v33 = vld [vmem:[%s10772_s1 + $0x10] sm:$0xff]   ;;  %v8886_v25 = vld [vmem:[%s10772_s1 + $0x98] sm:$0xff]  }
 0x1af   : > { %8255 = vmatprep.subr.bf16.mxu1 %v8845_v34  ;;  %v5288_v23 = vor.u32 %v5287_v19, %v5283_v12  ;;  %v8885_v34 = vld [vmem:[%s10772_s1 + $0x58] sm:$0xff]  }
 0x1b1   : > { %8234 = vmatpush3.bf16.msra.mxu0 %v8846_v35  ;;  %5419 = vmatprep.mubr.bf16.mxu1 %v5288_v23  ;;  %v8888_v35 = vld [vmem:[%s10772_s1 + $0xe0] sm:$0xff]   ;;  %v8911_v23 = vld [vmem:[%s10772_s1 + $0x188] sm:$0xff]  }
 0x1b2   : > { %8256 = vmatpush3.bf16.msra.mxu1 %v8847_v27  ;;  %8235 = vmatprep.subr.bf16.mxu0 %v8848_v38 }
 0x1b3   : > { %8257 = vmatprep.subr.bf16.mxu1 %v8849_v37  ;;  %v8887_v37 = vld [vmem:[%s10772_s1 + $0x18] sm:$0xff]  }
 0x1b5   : > { %8236 = vmatpush3.bf16.msra.mxu0 %v8850_v39  ;;  %v8889_v39 = vld [vmem:[%s10772_s1 + $0x60] sm:$0xff]  }
 0x1b6   : > { %8258 = vmatpush3.bf16.msra.mxu1 %v8851_v41  ;;  %8237 = vmatprep.subr.bf16.mxu0 %v8852_v43  ;;  %v8890_v43 = vld [vmem:[%s10772_s1 + $0xa0] sm:$0xff]  }
 0x1b7   : > { %8259 = vmatprep.subr.bf16.mxu1 %v8853_v42 }
 0x1b9   : > { %8238 = vmatpush3.bf16.msra.mxu0 %v8854_v45  ;;  %v8891_v45 = vld [vmem:[%s10772_s1 + $0x20] sm:$0xff]  }
 0x1ba   : > { %8260 = vmatpush3.bf16.msra.mxu1 %v8855_v40  ;;  %8239 = vmatprep.subr.bf16.mxu0 %v8856_v54 }
 0x1bb   : > { %v7937_v44 = vpop.f32.mrb[24].mxu0  ;;  %8261 = vmatprep.subr.bf16.mxu1 %v8857_v50 }
 0x1bc   : > { %v7959_v46 = vpop.f32.mrb[24].mxu1  ;;  %v7938_v36 = vpop.f32.mrb[25].mxu0 }
 0x1bd   : > { %v7939_v48 = vadd.f32 %v7938_v36, %v7937_v44  ;;  %v7960_v49 = vpop.f32.mrb[25].mxu1  ;;  %v7940_v52 = vpop.f32.mrb[26].mxu0  ;;  %8240 = vmatpush3.bf16.msra.mxu0 %v8858_v56  ;;  %v8892_v36 = vld [vmem:[%s10772_s1 + $0xe8] sm:$0xff]   ;;  %v8896_v56 = vld [vmem:[%s10772_s1 + $0xf0] sm:$0xff]  }
 0x1be   : > { %v7961_v51 = vadd.f32 %v7960_v49, %v7959_v46  ;;  %v7962_v53 = vpop.f32.mrb[26].mxu1  ;;  %v7941_v47 = vpop.f32.mrb[27].mxu0  ;;  %8262 = vmatpush3.bf16.msra.mxu1 %v8859_v58  ;;  %8241 = vmatprep.subr.bf16.mxu0 %v8860_v60  ;;  %v8894_v52 = vld [vmem:[%s10772_s1 + $0xa8] sm:$0xff]  }
 0x1bf   : > { %v7963_v57 = vpop.f32.mrb[27].mxu1  ;;  %8263 = vmatprep.subr.bf16.mxu1 %v8861_v59  ;;  %v8895_v47 = vld [vmem:[%s10772_s1 + $0x28] sm:$0xff]   ;;  %v8898_v59 = vld [vmem:[%s10772_s1 + $0xb0] sm:$0xff]  }
 0x1c0   : > { %v10488_v55 = vadd.f32 %v7961_v51, %v7939_v48  ;;  %v8893_v51 = vld [vmem:[%s10772_s1 + $0x68] sm:$0xff]   ;;  %v8897_v57 = vld [vmem:[%s10772_s1 + $0x70] sm:$0xff]  }
 0x1c1   : > { %8242 = vmatpush3.bf16.msra.mxu0 %v8862_v61  ;;  %v8900_v61 = vld [vmem:[%s10772_s1 + $0xf8] sm:$0xff]  }
 0x1c2   : > { %8264 = vmatpush3.bf16.msra.mxu1 %v8863_v62  ;;  %8243 = vmatprep.subr.bf16.mxu0 %v8864_v0  ;;  %v8902_v62 = vld [vmem:[%s10772_s1 + $0xb8] sm:$0xff]  }
 0x1c3   : > { %8265 = vmatprep.subr.bf16.mxu1 %v8865_v63  ;;  %v7482_v63 = vld [vmem:[%s9111_s12 + $0x78] sm:$0x11] }
 0x1c4   : > { %v8903_v0 = vld [vmem:[%s10772_s1 + $0x38] sm:$0xff]  }
 0x1c5   : > { %8244 = vmatpush3.bf16.msra.mxu0 %v8866_v2  ;;  %v7515_v2 = vcombine.low %v10521_v4, %v7482_v63 }
 0x1c6   : > { %8266 = vmatpush3.bf16.msra.mxu1 %v8867_v3  ;;  %8273 = vmatprep.subr.bf16.mxu0 %v8872_v10  ;;  %v7516_v3 = vcombine.high %v10521_v4, %v7482_v63  ;;  %v8906_v4 = vld [vmem:[%s10772_s1 + $0x100] sm:$0xff]  }
 0x1c7   : > { %8295 = vmatprep.subr.bf16.mxu1 %v8873_v11  ;;  %v5508_v9 = vshrl.u32 %v7515_v2, 16  ;;  %v5510_v10 = vshll.u32 %v7515_v2, 16  ;;  %v8905_v11 = vld [vmem:[%s10772_s1 + $0x1c0] sm:$0xff]  }
 0x1c8   : > { %5230 = vmatmul.mubr.bf16.vlgmr.msra.gmra.mrb[52].mxu0 %v10536_v18  ;;  %v5515_v7 = vshrl.u32 %v7516_v3, 16  ;;  %v5517_v8 = vshll.u32 %v7516_v3, 16 }
 0x1c9   : > { %8274 = vmatpush3.bf16.msra.mxu0 %v8874_v14  ;;  %5420 = vmatmul.mubr.bf16.vlgmr.msra.gmra.mrb[52].mxu1 %v5281_v22  ;;  %v5512_v15 = vrot.slane %v5510_v10, 1  ;;  %v8909_v14 = vld [vmem:[%s10772_s1 + $0x1c8] sm:$0xff]   ;;  %v8912_v22 = vld [vmem:[%s10772_s1 + $0x150] sm:$0xff]  }
 0x1ca   : > { %8275 = vmatprep.subr.bf16.mxu0 %v8876_v21  ;;  %8296 = vmatpush3.bf16.msra.mxu1 %v8875_v24  ;;  %v5519_v12 = vrot.slane %v5517_v8, 1  ;;  %v8910_v21 = vld [vmem:[%s10772_s1 + $0x108] sm:$0xff]   ;;  %v8913_v24 = vld [vmem:[%s10772_s1 + $0x1d0] sm:$0xff]  }
 0x1cb   : > { %5791 = vmatprep.mubr.bf16.mxu1 %v7413_v6  ;;  %8297 = vmatprep.subr.bf16.mxu1 %v8877_v13  ;;  %v8904_v6 = vld [vmem:[%s10772_s1 + $0x140] sm:$0xff]   ;;  %v5513_v19 = vor.u32 %v5512_v15, %v5508_v9  ;;  %v8915_v13 = vld [vmem:[%s10772_s1 + $0x190] sm:$0xff]  }
 0x1cc   : > { %v5520_v17 = vor.u32 %v5519_v12, %v5515_v7 }
 0x1cd   : > { %8276 = vmatpush3.bf16.msra.mxu0 %v8878_v26  ;;  %v8916_v26 = vld [vmem:[%s10772_s1 + $0x158] sm:$0xff]  }
 0x1ce   : > { %8277 = vmatprep.subr.bf16.mxu0 %v8880_v28  ;;  %8298 = vmatpush3.bf16.msra.mxu1 %v8879_v29  ;;  %v8917_v28 = vld [vmem:[%s10772_s1 + $0x1d8] sm:$0xff]  }
 0x1cf   : > { %8299 = vmatprep.subr.bf16.mxu1 %v8881_v30  ;;  %5651 = vmatprep.mubr.bf16.mxu0 %v5520_v17  ;;  %v8918_v29 = vld [vmem:[%s10772_s1 + $0x118] sm:$0xff]  }
 0x1d0   : > { %v8919_v30 = vld [vmem:[%s10772_s1 + $0x198] sm:$0xff]  }
 0x1d1   : > { %8278 = vmatpush3.bf16.msra.mxu0 %v8882_v31  ;;  %v8920_v31 = vld [vmem:[%s10772_s1 + $0x160] sm:$0xff]  }
 0x1d2   : > { %8279 = vmatprep.subr.bf16.mxu0 %v8884_v32  ;;  %8300 = vmatpush3.bf16.msra.mxu1 %v8883_v33  ;;  %v8921_v32 = vld [vmem:[%s10772_s1 + $0x1e0] sm:$0xff]  }
 0x1d3   : > { %8301 = vmatprep.subr.bf16.mxu1 %v8885_v34 }
 0x1d5   : > { %8280 = vmatpush3.bf16.msra.mxu0 %v8886_v25  ;;  %v8922_v25 = vld [vmem:[%s10772_s1 + $0x120] sm:$0xff]  }
 0x1d6   : > { %8281 = vmatprep.subr.bf16.mxu0 %v8888_v35  ;;  %8302 = vmatpush3.bf16.msra.mxu1 %v8887_v37  ;;  %v8923_v37 = vld [vmem:[%s10772_s1 + $0x1a0] sm:$0xff]  }
 0x1d7   : > { %8303 = vmatprep.subr.bf16.mxu1 %v8889_v39  ;;  %v8924_v39 = vld [vmem:[%s10772_s1 + $0x168] sm:$0xff]  }
 0x1d9   : > { %8282 = vmatpush3.bf16.msra.mxu0 %v8890_v43  ;;  %v8925_v43 = vld [vmem:[%s10772_s1 + $0x1e8] sm:$0xff]  }
 0x1da   : > { %8283 = vmatprep.subr.bf16.mxu0 %v8892_v36  ;;  %8304 = vmatpush3.bf16.msra.mxu1 %v8891_v45  ;;  %v8926_v45 = vld [vmem:[%s10772_s1 + $0x128] sm:$0xff]  }
 0x1db   : > { %v7981_v27 = vpop.f32.mrb[28].mxu0  ;;  %8305 = vmatprep.subr.bf16.mxu1 %v8893_v51  ;;  %v8930_v51 = vld [vmem:[%s10772_s1 + $0x130] sm:$0xff]  }
 0x1dc   : > { %v7982_v38 = vpop.f32.mrb[29].mxu0  ;;  %v8003_v41 = vpop.f32.mrb[28].mxu1 }
 0x1dd   : > { %v7983_v42 = vadd.f32 %v7982_v38, %v7981_v27  ;;  %v8004_v44 = vpop.f32.mrb[29].mxu1  ;;  %v7984_v48 = vpop.f32.mrb[30].mxu0  ;;  %8284 = vmatpush3.bf16.msra.mxu0 %v8894_v52  ;;  %v8931_v52 = vld [vmem:[%s10772_s1 + $0x1b0] sm:$0xff]  }
 0x1de   : > { %v8005_v46 = vadd.f32 %v8004_v44, %v8003_v41  ;;  %v8006_v49 = vpop.f32.mrb[30].mxu1  ;;  %v7985_v53 = vpop.f32.mrb[31].mxu0  ;;  %8285 = vmatprep.subr.bf16.mxu0 %v8896_v56  ;;  %8306 = vmatpush3.bf16.msra.mxu1 %v8895_v47  ;;  %v8927_v48 = vld [vmem:[%s10772_s1 + $0x1a8] sm:$0xff]   ;;  %v7551_v47 = vld [vmem:[%s9111_s12 + $0x80] sm:$0xff]  ;;  %v8934_v56 = vld [vmem:[%s10772_s1 + $0x138] sm:$0xff]  }
 0x1df   : > { %v3017_v40 = vadd.f32 %v7983_v42, %v10488_v55  ;;  %v8007_v54 = vpop.f32.mrb[31].mxu1  ;;  %8307 = vmatprep.subr.bf16.mxu1 %v8897_v57  ;;  %v8928_v49 = vld [vmem:[%s10772_s1 + $0x170] sm:$0xff]   ;;  %v8932_v53 = vld [vmem:[%s10772_s1 + $0x178] sm:$0xff]   ;;  %v7585_v63 = vcombine.low %v7551_v47, %v7551_v47 }
 0x1e0   : > { %v8933_v54 = vld [vmem:[%s10772_s1 + $0x1f8] sm:$0xff]  }
 0x1e1   : > { %v3207_v50 = vadd.f32 %v8005_v46, %v3017_v40  ;;  %8286 = vmatpush3.bf16.msra.mxu0 %v8898_v59  ;;  %v8935_v57 = vld [vmem:[%s10772_s1 + $0x1b8] sm:$0xff]  }
 0x1e2   : > { %8287 = vmatprep.subr.bf16.mxu0 %v8900_v61 }
 0x1e3   : > { %v3208_v55 = vmul.f32 %v10386_v1, %v3207_v50  ;;  %v8899_v1 = vld [vmem:[%s10772_s1 + $0x30] sm:$0xff]  }
 0x1e4   : > { %8308 = vmatpush3.bf16.msra.mxu1 %v8899_v1  ;;  %v8929_v50 = vld [vmem:[%s10772_s1 + $0x1f0] sm:$0xff]  }
 0x1e5   : > { %v3209_v58 = vadd.f32 %v10398_v5, %v3208_v55  ;;  %v8901_v5 = vld [vmem:[%s10772_s1 + $0x78] sm:$0xff]   ;;  %8288 = vmatpush3.bf16.msra.mxu0 %v8902_v62  ;;  %v7552_v55 = vld [vmem:[%s9111_s12 + $0x88] sm:$0x11] }
 0x1e6   : > { %8309 = vmatprep.subr.bf16.mxu1 %v8901_v5  ;;  %8317 = vmatprep.subr.bf16.mxu0 %v8904_v6  ;;  %v7635_v59 = vcombine.low %v7551_v47, %v7552_v55  ;;  %v7636_v1 = vcombine.high %v7551_v47, %v7552_v55 }
 0x1e7   : > { %v3210_v60 = vpack.c.bf16 %v3209_v58, %v3209_v58  ;;  %v7586_v58 = vcombine.high %v7551_v47, %v7551_v47 }
 0x1e8   : > { %8310 = vmatpush3.bf16.msra.mxu1 %v8903_v0  ;;  %5652 = vmatmul.mubr.bf16.vlgmr.msra.gmra.mrb[56].mxu0 %v5513_v19  ;;  %v6025_v61 = vshll.u32 %v7636_v1, 16  ;;  %v6016_v5 = vshrl.u32 %v7635_v59, 16  ;;  %v6018_v62 = vshll.u32 %v7635_v59, 16 }
 0x1e9   : > { %6961 = vst.msk [vmem:[%s9966_s5 + $0xc] sm:$0xf] %vm991_vm0, %v3210_v60  ;;  %8339 = vmatprep.subr.bf16.mxu1 %v8905_v11  ;;  %8318 = vmatpush3.bf16.msra.mxu0 %v8906_v4  ;;  %v6023_v60 = vshrl.u32 %v7636_v1, 16 }
 0x1ea   : > { %8319 = vmatprep.subr.bf16.mxu0 %v8908_v20  ;;  %5969 = vmatprep.mubr.bf16.mxu0 %v7586_v58  ;;  %v6027_v0 = vrot.slane %v6025_v61, 1  ;;  %v6020_v2 = vrot.slane %v6018_v62, 1 }
 0x1eb   : > { %5792 = vmatmul.mubr.bf16.vlgmr.msra.gmra.mrb[56].mxu1 %v10536_v18  ;;  %v8914_v18 = vld [vmem:[%s10772_s1 + $0x110] sm:$0xff]  }
 0x1ec   : > { %8340 = vmatpush3.bf16.msra.mxu1 %v8907_v16  ;;  %v6028_v3 = vor.u32 %v6027_v0, %v6023_v60  ;;  %v6021_v6 = vor.u32 %v6020_v2, %v6016_v5 }
 0x1ed   : > { %8341 = vmatprep.subr.bf16.mxu1 %v8909_v14  ;;  %8320 = vmatpush3.bf16.msra.mxu0 %v8910_v21  ;;  %v10739_v14 = vld [vmem:[%s10773_s2] ss:$0 sm:$0xff] }
 0x1ee   : > { %8321 = vmatprep.subr.bf16.mxu0 %v8912_v22  ;;  %6159 = vmatprep.mubr.bf16.mxu1 %v6028_v3 }
 0x1f0   : > { %8342 = vmatpush3.bf16.msra.mxu1 %v8911_v23  ;;  %v10745_v23 = vld [vmem:[%s10774_s3] ss:$0 sm:$0xff] }
 0x1f1   : > { %8343 = vmatprep.subr.bf16.mxu1 %v8913_v24  ;;  %8322 = vmatpush3.bf16.msra.mxu0 %v8914_v18 }
 0x1f2   : > { %8323 = vmatprep.subr.bf16.mxu0 %v8916_v26 }
 0x1f4   : > { %8344 = vmatpush3.bf16.msra.mxu1 %v8915_v13 }
 0x1f5   : > { %8345 = vmatprep.subr.bf16.mxu1 %v8917_v28  ;;  %8324 = vmatpush3.bf16.msra.mxu0 %v8918_v29 }
 0x1f6   : > { %8325 = vmatprep.subr.bf16.mxu0 %v8920_v31 }
 0x1f8   : > { %8346 = vmatpush3.bf16.msra.mxu1 %v8919_v30 }
 0x1f9   : > { %8347 = vmatprep.subr.bf16.mxu1 %v8921_v32  ;;  %8326 = vmatpush3.bf16.msra.mxu0 %v8922_v25 }
 0x1fa   : > { %8327 = vmatprep.subr.bf16.mxu0 %v8924_v39 }
 0x1fb   : > { %v8025_v35 = vpop.f32.mrb[32].mxu0 }
 0x1fc   : > { %v8047_v33 = vpop.f32.mrb[32].mxu1  ;;  %v8026_v38 = vpop.f32.mrb[33].mxu0  ;;  %8348 = vmatpush3.bf16.msra.mxu1 %v8923_v37 }
 0x1fd   : > { %v8048_v34 = vpop.f32.mrb[33].mxu1  ;;  %v8027_v42 = vadd.f32 %v8026_v38, %v8025_v35  ;;  %v8028_v44 = vpop.f32.mrb[34].mxu0  ;;  %8349 = vmatprep.subr.bf16.mxu1 %v8925_v43  ;;  %8328 = vmatpush3.bf16.msra.mxu0 %v8926_v45 }
 0x1fe   : > { %v8049_v27 = vadd.f32 %v8048_v34, %v8047_v33  ;;  %v8050_v41 = vpop.f32.mrb[34].mxu1  ;;  %v8029_v40 = vpop.f32.mrb[35].mxu0  ;;  %8329 = vmatprep.subr.bf16.mxu0 %v8928_v49 }
 0x1ff   : > { %v8051_v46 = vpop.f32.mrb[35].mxu1 }
 0x200   : > { %v3574_v36 = vadd.f32 %v8049_v27, %v8027_v42  ;;  %8350 = vmatpush3.bf16.msra.mxu1 %v8927_v48 }
 0x201   : > { %8351 = vmatprep.subr.bf16.mxu1 %v8929_v50  ;;  %8330 = vmatpush3.bf16.msra.mxu0 %v8930_v51 }
 0x202   : > { %8331 = vmatprep.subr.bf16.mxu0 %v8932_v53 }
 0x204   : > { %8352 = vmatpush3.bf16.msra.mxu1 %v8931_v52 }
 0x205   : > { %8353 = vmatprep.subr.bf16.mxu1 %v8933_v54  ;;  %8332 = vmatpush3.bf16.msra.mxu0 %v8934_v56 }
 0x208   : > { %8354 = vmatpush3.bf16.msra.mxu1 %v8935_v57  ;;  %5970 = vmatmul.mubr.bf16.vlgmr.msra.gmra.mrb[60].mxu0 %v7585_v63 }
 0x20b   : > { %6160 = vmatmul.mubr.bf16.vlgmr.msra.gmra.mrb[60].mxu1 %v6021_v6 }
 0x21b   : > { %v8069_v7 = vpop.f32.mrb[36].mxu0 }
 0x21c   : > { %v8091_v8 = vpop.f32.mrb[36].mxu1  ;;  %v8070_v9 = vpop.f32.mrb[37].mxu0 }
 0x21d   : > { %v8071_v10 = vadd.f32 %v8070_v9, %v8069_v7  ;;  %v8092_v11 = vpop.f32.mrb[37].mxu1  ;;  %v8072_v12 = vpop.f32.mrb[38].mxu0 }
 0x21e   : > { %v8093_v15 = vadd.f32 %v8092_v11, %v8091_v8  ;;  %v8094_v4 = vpop.f32.mrb[38].mxu1  ;;  %v8073_v16 = vpop.f32.mrb[39].mxu0 }
 0x21f   : > { %v3757_v17 = vadd.f32 %v8071_v10, %v3574_v36  ;;  %v8095_v19 = vpop.f32.mrb[39].mxu1 }
 0x221   : > { %v3947_v20 = vadd.f32 %v8093_v15, %v3757_v17 }
 0x223   : > { %v3948_v21 = vmul.f32 %v10739_v14, %v3947_v20 }
 0x225   : > { %v3949_v22 = vadd.f32 %v10745_v23, %v3948_v21 }
 0x227   : > { %v3950_v24 = vpack.c.bf16 %v3949_v22, %v3949_v22 }
 0x229   : > { %7134 = vst.msk [vmem:[%s9966_s5 + $0x10] sm:$0xf] %vm991_vm0, %v3950_v24 }
 0x23b   : > { %v8113_v13 = vpop.f32.mrb[40].mxu0 }
 0x23c   : > { %v8135_v18 = vpop.f32.mrb[40].mxu1  ;;  %v8114_v28 = vpop.f32.mrb[41].mxu0 }
 0x23d   : > { %v8136_v26 = vpop.f32.mrb[41].mxu1  ;;  %v8115_v31 = vadd.f32 %v8114_v28, %v8113_v13  ;;  %v8116_v32 = vpop.f32.mrb[42].mxu0 }
 0x23e   : > { %v8137_v29 = vadd.f32 %v8136_v26, %v8135_v18  ;;  %v8138_v30 = vpop.f32.mrb[42].mxu1  ;;  %v8117_v34 = vpop.f32.mrb[43].mxu0 }
 0x23f   : > { %v8139_v33 = vpop.f32.mrb[43].mxu1 }
 0x240   : > { %v4314_v25 = vadd.f32 %v8137_v29, %v8115_v31 }
 0x25b   : > { %v8157_v35 = vpop.f32.mrb[44].mxu0 }
 0x25c   : > { %v8158_v27 = vpop.f32.mrb[45].mxu0  ;;  %v8179_v37 = vpop.f32.mrb[44].mxu1 }
 0x25d   : > { %v8159_v38 = vadd.f32 %v8158_v27, %v8157_v35  ;;  %v8160_v39 = vpop.f32.mrb[46].mxu0  ;;  %v8180_v41 = vpop.f32.mrb[45].mxu1 }
 0x25e   : > { %v8161_v42 = vpop.f32.mrb[47].mxu0  ;;  %v8181_v44 = vadd.f32 %v8180_v41, %v8179_v37  ;;  %v8182_v45 = vpop.f32.mrb[46].mxu1 }
 0x25f   : > { %v4497_v43 = vadd.f32 %v8159_v38, %v4314_v25  ;;  %v8183_v40 = vpop.f32.mrb[47].mxu1 }
 0x261   : > { %v4687_v46 = vadd.f32 %v8181_v44, %v4497_v43 }
 0x263   : > { %v4688_v36 = vmul.f32 %v10739_v14, %v4687_v46 }
 0x265   : > { %v4689_v48 = vadd.f32 %v10745_v23, %v4688_v36 }
 0x267   : > { %v4690_v49 = vpack.c.bf16 %v4689_v48, %v4689_v48 }
 0x269   : > { %7307 = vst.msk [vmem:[%s9966_s5 + $0x14] sm:$0xf] %vm991_vm0, %v4690_v49 }
 0x27b   : > { %v8201_v51 = vpop.f32.mrb[48].mxu0 }
 0x27c   : > { %v8223_v50 = vpop.f32.mrb[48].mxu1  ;;  %v8202_v53 = vpop.f32.mrb[49].mxu0 }
 0x27d   : > { %v8224_v52 = vpop.f32.mrb[49].mxu1  ;;  %v8203_v55 = vadd.f32 %v8202_v53, %v8201_v51  ;;  %v8204_v56 = vpop.f32.mrb[50].mxu0 }
 0x27e   : > { %v8225_v54 = vadd.f32 %v8224_v52, %v8223_v50  ;;  %v8226_v47 = vpop.f32.mrb[50].mxu1  ;;  %v8205_v58 = vpop.f32.mrb[51].mxu0 }
 0x27f   : > { %v8227_v57 = vpop.f32.mrb[51].mxu1 }
 0x280   : > { %v5054_v59 = vadd.f32 %v8225_v54, %v8203_v55 }
 0x29b   : > { %v8245_v1 = vpop.f32.mrb[52].mxu0 }
 0x29c   : > { %v8246_v60 = vpop.f32.mrb[53].mxu0  ;;  %v8267_v61 = vpop.f32.mrb[52].mxu1 }
 0x29d   : > { %v8247_v5 = vadd.f32 %v8246_v60, %v8245_v1  ;;  %v8248_v62 = vpop.f32.mrb[54].mxu0  ;;  %v8268_v63 = vpop.f32.mrb[53].mxu1 }
 0x29e   : > { %v8249_v0 = vpop.f32.mrb[55].mxu0  ;;  %v8269_v3 = vadd.f32 %v8268_v63, %v8267_v61  ;;  %v8270_v6 = vpop.f32.mrb[54].mxu1 }
 0x29f   : > { %v5237_v2 = vadd.f32 %v8247_v5, %v5054_v59  ;;  %v8271_v7 = vpop.f32.mrb[55].mxu1 }
 0x2a1   : > { %v5427_v8 = vadd.f32 %v8269_v3, %v5237_v2 }
 0x2a3   : > { %v5428_v9 = vmul.f32 %v10739_v14, %v5427_v8 }
 0x2a5   : > { %v5429_v10 = vadd.f32 %v10745_v23, %v5428_v9 }
 0x2a7   : > { %v5430_v11 = vpack.c.bf16 %v5429_v10, %v5429_v10 }
 0x2a9   : > { %7480 = vst.msk [vmem:[%s9966_s5 + $0x18] sm:$0xf] %vm991_vm0, %v5430_v11 }
 0x2bb   : > { %v8289_v12 = vpop.f32.mrb[56].mxu0 }
 0x2bc   : > { %v8290_v4 = vpop.f32.mrb[57].mxu0 }
 0x2bd   : > { %v8291_v17 = vadd.f32 %v8290_v4, %v8289_v12  ;;  %v8292_v20 = vpop.f32.mrb[58].mxu0 }
 0x2be   : > { %v8311_v15 = vpop.f32.mrb[56].mxu1  ;;  %v8293_v22 = vpop.f32.mrb[59].mxu0 }
 0x2bf   : > { %v8312_v16 = vpop.f32.mrb[57].mxu1 }
 0x2c0   : > { %v8313_v19 = vadd.f32 %v8312_v16, %v8311_v15  ;;  %v8314_v21 = vpop.f32.mrb[58].mxu1 }
 0x2c1   : > { %v8315_v24 = vpop.f32.mrb[59].mxu1 }
 0x2c2   : > { %v5794_v18 = vadd.f32 %v8313_v19, %v8291_v17 }
 0x2db   : > { %v8333_v13 = vpop.f32.mrb[60].mxu0 }
 0x2dc   : > { %v8334_v26 = vpop.f32.mrb[61].mxu0 }
 0x2dd   : > { %v8335_v29 = vadd.f32 %v8334_v26, %v8333_v13  ;;  %v8336_v30 = vpop.f32.mrb[62].mxu0 }
 0x2de   : > { %v8355_v28 = vpop.f32.mrb[60].mxu1  ;;  %v8337_v32 = vpop.f32.mrb[63].mxu0 }
 0x2df   : > { %v8356_v31 = vpop.f32.mrb[61].mxu1  ;;  %v5977_v33 = vadd.f32 %v8335_v29, %v5794_v18 }
 0x2e0   : > { %v8357_v34 = vadd.f32 %v8356_v31, %v8355_v28  ;;  %v8358_v25 = vpop.f32.mrb[62].mxu1 }
 0x2e1   : > { %v8359_v35 = vpop.f32.mrb[63].mxu1 }
 0x2e2   : > { %v6167_v27 = vadd.f32 %v8357_v34, %v5977_v33 }
 0x2e4   : > { %v6168_v37 = vmul.f32 %v10739_v14, %v6167_v27 }
 0x2e6   : > { %v6169_v38 = vadd.f32 %v10745_v23, %v6168_v37 }
 0x2e8   : > { %v6170_v39 = vpack.c.bf16 %v6169_v38, %v6169_v38 }
 0x2ea   : > { %7653 = vst.msk [vmem:[%s9966_s5 + $0x1c] sm:$0xf] %vm991_vm0, %v6170_v39 }
 0x2eb PF: > { %s14_s17 = sadd.s32 1, %s8966_s17   ;;  %s10776_s15 = smov %s8962_s16 }
 0x2ec   : > { %p11_p5 = scmp.ge.s32.totalorder %s14_s17, 4   ;;  %s10777_s16 = smov %s10779_s18 }
 0x2ee   :  { %13 = sbr.rel (!%p11_p5) target bundleno = 2 (0x2), region = 84 }

</bundles_post_ra>
